<compile_context>
chip_gen: v5e
topology: v5e:2x2
jax: 0.10.0
libtpu: 0.0.40
codegen_flags: <defaults>
</compile_context>

<pallas_src>
import functools

import jax
import jax.numpy as jnp
from jax import lax
from jax.experimental import pallas as pl
from jax.experimental.pallas import tpu as pltpu


# ----------------------------- fused Pallas kernel --------------------------

def _bottleneck_kernel(x_ref, w1_ref, w2_ref, w3_ref,
                       g1_ref, b1_ref, g2_ref, b2_ref, g3_ref, b3_ref,
                       o_ref, xpad_ref, *, N, D, H, W, cg, eps):
    """Fused Bottleneck forward on one (N, C, D*H*W) block resident in VMEM."""
    S = D * H * W
    planes = w1_ref.shape[1]
    f32 = jnp.float32

    def bn_scale_shift(ys, g_ref, b_ref, axis):
        # Training-mode BatchNorm: biased batch variance over all N*S samples,
        # folded into a per-channel scale/shift (stats reduced in-kernel).
        cnt = len(ys) * ys[0].shape[axis]
        s = ss = None
        for yn in ys:
            sn = jnp.sum(yn, axis=axis, keepdims=True)
            qn = jnp.sum(yn * yn, axis=axis, keepdims=True)
            s = sn if s is None else s + sn
            ss = qn if ss is None else ss + qn
        mean = s * (1.0 / cnt)
        var = jnp.maximum(ss * (1.0 / cnt) - mean * mean, 0.0)
        scale = g_ref[...] * lax.rsqrt(var + eps)
        shift = b_ref[...] - mean * scale
        return scale, shift

    # ---- conv1: 1x1x1 == channel contraction; consumes NCDHW directly ------
    # x[n] is (Cin, S); contract over Cin (transposed-LHS matmul, MXU native).
    # bf16 operands, f32 accumulate (no HIGHEST multi-pass emulation).
    w1b = w1_ref[...].astype(jnp.bfloat16)                     # (Cin, planes)
    y1 = [lax.dot_general(x_ref[n].astype(jnp.bfloat16), w1b,
                          dimension_numbers=(((0,), (0,)), ((), ())),
                          preferred_element_type=f32)          # (S, planes)
          for n in range(N)]
    sc1, sh1 = bn_scale_shift(y1, g1_ref, b1_ref, axis=0)      # (1, planes)
    a1 = [jnp.maximum(yn * sc1 + sh1, 0.0) for yn in y1]

    # ---- conv2: 3x3x3, stride=1, padding=1, groups=32 -----------------------
    # Zero-padded activations live in VMEM scratch; cg == 1 (planes=32 case)
    # is depthwise -> pure VPU multiply-accumulate, no MXU / dense zero blocks.
    xpad_ref[...] = jnp.zeros_like(xpad_ref)
    for n in range(N):
        xpad_ref[n, 1:D + 1, 1:H + 1, 1:W + 1, :] = a1[n].reshape(D, H, W, planes)

    w2 = w2_ref[...]
    y2 = []
    for n in range(N):
        acc = jnp.zeros((D, H, W, planes), f32)
        for kd in range(3):
            for kh in range(3):
                for kw in range(3):
                    t = kd * 9 + kh * 3 + kw
                    patch = xpad_ref[n, kd:kd + D, kh:kh + H, kw:kw + W, :]
                    if cg == 1:
                        acc = acc + patch * w2[t].reshape(1, 1, 1, planes)
                    else:
                        g = planes // cg
                        acc = acc + jnp.einsum(
                            'dhwgi,gio->dhwgo',
                            patch.reshape(D, H, W, g, cg), w2[t],
                            preferred_element_type=f32).reshape(D, H, W, planes)
        y2.append(acc.reshape(S, planes))
    sc2, sh2 = bn_scale_shift(y2, g2_ref, b2_ref, axis=0)
    a2 = [jnp.maximum(yn * sc2 + sh2, 0.0) for yn in y2]

    # ---- conv3: 1x1x1 emitted channels-first + bn3 + residual + relu -------
    w3b = w3_ref[...].astype(jnp.bfloat16)                     # (C4, planes)
    y3 = [lax.dot_general(w3b, a2[n].astype(jnp.bfloat16),
                          dimension_numbers=(((1,), (1,)), ((), ())),
                          preferred_element_type=f32)          # (C4, S)
          for n in range(N)]
    sc3, sh3 = bn_scale_shift(y3, g3_ref, b3_ref, axis=1)      # (C4, 1)
    for n in range(N):
        out_cf = y3[n] * sc3 + sh3 + x_ref[n]                  # residual (f32)
        o_ref[n] = jnp.maximum(out_cf, 0.0).astype(o_ref.dtype)


# ----------------------------- wrapper ---------------------------------------

def bottleneck_forward(x_ncdhw, p, *, eps=1e-5):
    """Fused Pallas forward.  Input / output are PyTorch NCDHW."""
    N, Cin, D, H, W = x_ncdhw.shape
    S = D * H * W
    w1 = p["w1_k"]                    # (Cin, planes)
    w2 = p["w2_k"]                    # (27, planes) [cg==1] or (27, G, cg, cg)
    w3 = p["w3_k"]                    # (planes*4, planes)
    planes = w1.shape[1]
    C4 = w3.shape[0]
    cg = planes // 32
    assert Cin == C4, "downsample=None requires inplanes == planes * expansion"

    x3 = x_ncdhw.reshape(N, Cin, S)   # free reshape, stays channels-first
    g1 = p["g1"].reshape(1, planes); b1 = p["b1"].reshape(1, planes)
    g2 = p["g2"].reshape(1, planes); b2 = p["b2"].reshape(1, planes)
    g3 = p["g3"].reshape(C4, 1);     b3 = p["b3"].reshape(C4, 1)

    kernel = functools.partial(_bottleneck_kernel,
                               N=N, D=D, H=H, W=W, cg=cg, eps=eps)

    def spec(a):
        nd = a.ndim
        return pl.BlockSpec(a.shape, lambda i, _n=nd: (0,) * _n)

    out3 = pl.pallas_call(
        kernel,
        out_shape=jax.ShapeDtypeStruct((N, C4, S), x_ncdhw.dtype),
        grid=(1,),
        in_specs=[spec(a) for a in (x3, w1, w2, w3, g1, b1, g2, b2, g3, b3)],
        out_specs=pl.BlockSpec((N, C4, S), lambda i: (0, 0, 0)),
        scratch_shapes=[pltpu.VMEM((N, D + 2, H + 2, W + 2, planes), jnp.float32)],
        compiler_params=pltpu.CompilerParams(dimension_semantics=("arbitrary",)),
    )(x3, w1, w2, w3, g1, b1, g2, b2, g3, b3)

    return out3.reshape(N, C4, D, H, W)


# ----------------------------- parameters ------------------------------------

def init_params(key, inplanes, planes, dtype=jnp.float32):
    groups = 32
    assert planes % groups == 0
    cg = planes // groups
    k = jax.random.split(key, 9)
    # PyTorch conv weights: OIDHW = (out, in/groups, kd, kh, kw)
    w1 = 0.1 * jax.random.normal(k[0], (planes, inplanes, 1, 1, 1), dtype)
    w2 = 0.1 * jax.random.normal(k[1], (planes, cg, 3, 3, 3), dtype)
    w3 = 0.1 * jax.random.normal(k[2], (planes * 4, planes, 1, 1, 1), dtype)
    g1 = 1.0 + 0.1 * jax.random.normal(k[3], (planes,), dtype)
    b1 = 0.1 * jax.random.normal(k[4], (planes,), dtype)
    g2 = 1.0 + 0.1 * jax.random.normal(k[5], (planes,), dtype)
    b2 = 0.1 * jax.random.normal(k[6], (planes,), dtype)
    g3 = 1.0 + 0.1 * jax.random.normal(k[7], (planes * 4,), dtype)
    b3 = 0.1 * jax.random.normal(k[8], (planes * 4,), dtype)

    # Kernel-layout weights.
    w1_k = jnp.transpose(w1[:, :, 0, 0, 0], (1, 0))            # (Cin, planes)
    w3_k = w3[:, :, 0, 0, 0]                                   # (planes*4, planes)
    if cg == 1:   # depthwise: one scalar weight per (tap, channel)
        w2_k = jnp.transpose(w2[:, 0].reshape(planes, 27), (1, 0))        # (27, C)
    else:         # (tap, group, c_in_group, c_out_group)
        w2_k = jnp.transpose(w2.reshape(groups, cg, cg, 27), (3, 0, 2, 1))

    return dict(w1=w1, w2=w2, w3=w3, w1_k=w1_k, w2_k=w2_k, w3_k=w3_k,
                g1=g1, b1=b1, g2=g2, b2=b2, g3=g3, b3=b3)


# ----------------------------- pure-JAX reference ----------------------------

def reference_forward(x_ncdhw, p, eps=1e-5):
    """XLA reference.  The 1x1x1 convs use the same bf16-operand / f32-accumulate
    policy as the kernel's MXU matmuls; the grouped 3x3x3 conv is full f32."""
    x = jnp.transpose(x_ncdhw, (0, 2, 3, 4, 1))                # NDHWC
    dn = ("NDHWC", "DHWIO", "NDHWC")

    def conv(inp, w_pt, groups=1, padding="VALID", bf16=False):
        w = jnp.transpose(w_pt, (2, 3, 4, 1, 0))               # OIDHW -> DHWIO
        if bf16:
            inp, w = inp.astype(jnp.bfloat16), w.astype(jnp.bfloat16)
        return lax.conv_general_dilated(
            inp, w, (1, 1, 1), padding, dimension_numbers=dn,
            feature_group_count=groups,
            preferred_element_type=jnp.float32,
            precision=lax.Precision.HIGHEST)

    def bn(y, g, b):
        mean = jnp.mean(y, axis=(0, 1, 2, 3))
        var = jnp.mean(jnp.square(y - mean), axis=(0, 1, 2, 3))   # biased var
        return (y - mean) * lax.rsqrt(var + eps) * g + b

    out = jax.nn.relu(bn(conv(x, p["w1"], bf16=True), p["g1"], p["b1"]))
    out = jax.nn.relu(bn(conv(out, p["w2"], groups=32, padding="SAME"),
                         p["g2"], p["b2"]))
    out = bn(conv(out, p["w3"], bf16=True), p["g3"], p["b3"])
    out = jax.nn.relu(out + x)
    return jnp.transpose(out, (0, 4, 1, 2, 3))


# ----------------------------- main -------------------------------------------

if __name__ == "__main__":
    inplanes, planes = 128, 32        # downsample=None => inplanes == planes * 4
    N, D, H, W = 2, 4, 4, 4
    key = jax.random.PRNGKey(0)
    kx, kp = jax.random.split(key)
    x = jax.random.normal(kx, (N, inplanes, D, H, W), jnp.float32)   # NCDHW
    params = init_params(kp, inplanes, planes)

    out = jax.block_until_ready(jax.jit(bottleneck_forward)(x, params))
    ref = jax.block_until_ready(reference_forward(x, params))

    assert out.shape == (N, planes * 4, D, H, W), out.shape
    err = float(jnp.max(jnp.abs(out - ref)))
    assert err < 5e-3, f"mismatch vs reference: max abs err = {err}"
    print("KERNEL_OK")
</pallas_src>

<mosaic_0001>
module attributes {stable_mosaic.version = 11 : i64} {
  func.func @_bottleneck_kernel(%arg0: i32, %arg1: memref<2x128x64xf32, #tpu.memory_space<vmem>>, %arg2: memref<128x32xf32, #tpu.memory_space<vmem>>, %arg3: memref<27x32xf32, #tpu.memory_space<vmem>>, %arg4: memref<128x32xf32, #tpu.memory_space<vmem>>, %arg5: memref<1x32xf32, #tpu.memory_space<vmem>>, %arg6: memref<1x32xf32, #tpu.memory_space<vmem>>, %arg7: memref<1x32xf32, #tpu.memory_space<vmem>>, %arg8: memref<1x32xf32, #tpu.memory_space<vmem>>, %arg9: memref<128x1xf32, #tpu.memory_space<vmem>>, %arg10: memref<128x1xf32, #tpu.memory_space<vmem>>, %arg11: memref<2x128x64xf32, #tpu.memory_space<vmem>>, %arg12: memref<2x6x6x6x32xf32, #tpu.memory_space<vmem>>) attributes {dimension_semantics = [#tpu.dimension_semantics<arbitrary>], iteration_bounds = array<i64: 1>, scalar_prefetch = 0 : i64, scratch_operands = 1 : i64, tpu.core_type = #tpu.core_type<tc>, window_params = [{pipeline_mode = #tpu.pipeline_mode<synchronous>, transform_indices = @transform_0, window_bounds = array<i64: 2, 128, 64>}, {pipeline_mode = #tpu.pipeline_mode<synchronous>, transform_indices = @transform_1, window_bounds = array<i64: 128, 32>}, {pipeline_mode = #tpu.pipeline_mode<synchronous>, transform_indices = @transform_2, window_bounds = array<i64: 27, 32>}, {pipeline_mode = #tpu.pipeline_mode<synchronous>, transform_indices = @transform_3, window_bounds = array<i64: 128, 32>}, {pipeline_mode = #tpu.pipeline_mode<synchronous>, transform_indices = @transform_4, window_bounds = array<i64: 1, 32>}, {pipeline_mode = #tpu.pipeline_mode<synchronous>, transform_indices = @transform_5, window_bounds = array<i64: 1, 32>}, {pipeline_mode = #tpu.pipeline_mode<synchronous>, transform_indices = @transform_6, window_bounds = array<i64: 1, 32>}, {pipeline_mode = #tpu.pipeline_mode<synchronous>, transform_indices = @transform_7, window_bounds = array<i64: 1, 32>}, {pipeline_mode = #tpu.pipeline_mode<synchronous>, transform_indices = @transform_8, window_bounds = array<i64: 128, 1>}, {pipeline_mode = #tpu.pipeline_mode<synchronous>, transform_indices = @transform_9, window_bounds = array<i64: 128, 1>}, {pipeline_mode = #tpu.pipeline_mode<synchronous>, transform_indices = @transform_10, window_bounds = array<i64: 2, 128, 64>}]} {
    %c0 = arith.constant 0 : index
    %c0_0 = arith.constant 0 : index
    %0 = vector.load %arg2[%c0, %c0_0] : memref<128x32xf32, #tpu.memory_space<vmem>>, vector<128x32xf32>
    %1 = arith.truncf %0 : vector<128x32xf32> to vector<128x32xbf16>
    %c0_1 = arith.constant 0 : index
    %c0_2 = arith.constant 0 : index
    %c0_3 = arith.constant 0 : index
    %2 = vector.load %arg1[%c0_1, %c0_2, %c0_3] : memref<2x128x64xf32, #tpu.memory_space<vmem>>, vector<1x128x64xf32>
    %3 = vector.shape_cast %2 : vector<1x128x64xf32> to vector<128x64xf32>
    %4 = arith.truncf %3 : vector<128x64xf32> to vector<128x64xbf16>
    %cst = arith.constant dense<0.000000e+00> : vector<64x32xf32>
    %5 = tpu.matmul %4, %1, %cst {dimension_numbers = #tpu.dot_dimension_numbers<[0], [0], [1], [1], [0, 1, 1, 1], [], []>} : vector<128x64xbf16>, vector<128x32xbf16>, vector<64x32xf32> -> vector<64x32xf32>
    %c1 = arith.constant 1 : index
    %c0_4 = arith.constant 0 : index
    %c0_5 = arith.constant 0 : index
    %6 = vector.load %arg1[%c1, %c0_4, %c0_5] : memref<2x128x64xf32, #tpu.memory_space<vmem>>, vector<1x128x64xf32>
    %7 = vector.shape_cast %6 : vector<1x128x64xf32> to vector<128x64xf32>
    %8 = arith.truncf %7 : vector<128x64xf32> to vector<128x64xbf16>
    %cst_6 = arith.constant dense<0.000000e+00> : vector<64x32xf32>
    %9 = tpu.matmul %8, %1, %cst_6 {dimension_numbers = #tpu.dot_dimension_numbers<[0], [0], [1], [1], [0, 1, 1, 1], [], []>} : vector<128x64xbf16>, vector<128x32xbf16>, vector<64x32xf32> -> vector<64x32xf32>
    %cst_7 = arith.constant dense<0.000000e+00> : vector<32xf32>
    %10 = vector.multi_reduction <add>, %5, %cst_7 [0] : vector<64x32xf32> to vector<32xf32>
    %11 = vector.shape_cast %10 : vector<32xf32> to vector<1x32xf32>
    %12 = arith.mulf %5, %5 : vector<64x32xf32>
    %cst_8 = arith.constant dense<0.000000e+00> : vector<32xf32>
    %13 = vector.multi_reduction <add>, %12, %cst_8 [0] : vector<64x32xf32> to vector<32xf32>
    %14 = vector.shape_cast %13 : vector<32xf32> to vector<1x32xf32>
    %cst_9 = arith.constant dense<0.000000e+00> : vector<32xf32>
    %15 = vector.multi_reduction <add>, %9, %cst_9 [0] : vector<64x32xf32> to vector<32xf32>
    %16 = vector.shape_cast %15 : vector<32xf32> to vector<1x32xf32>
    %17 = arith.mulf %9, %9 : vector<64x32xf32>
    %cst_10 = arith.constant dense<0.000000e+00> : vector<32xf32>
    %18 = vector.multi_reduction <add>, %17, %cst_10 [0] : vector<64x32xf32> to vector<32xf32>
    %19 = vector.shape_cast %18 : vector<32xf32> to vector<1x32xf32>
    %20 = arith.addf %11, %16 : vector<1x32xf32>
    %21 = arith.addf %14, %19 : vector<1x32xf32>
    %cst_11 = arith.constant 7.812500e-03 : f32
    %22 = vector.broadcast %cst_11 : f32 to vector<1x32xf32>
    %23 = arith.mulf %20, %22 : vector<1x32xf32>
    %cst_12 = arith.constant 7.812500e-03 : f32
    %24 = vector.broadcast %cst_12 : f32 to vector<1x32xf32>
    %25 = arith.mulf %21, %24 : vector<1x32xf32>
    %26 = arith.mulf %23, %23 : vector<1x32xf32>
    %27 = arith.subf %25, %26 : vector<1x32xf32>
    %cst_13 = arith.constant 0.000000e+00 : f32
    %28 = vector.broadcast %cst_13 : f32 to vector<1x32xf32>
    %29 = arith.maximumf %27, %28 : vector<1x32xf32>
    %c0_14 = arith.constant 0 : index
    %c0_15 = arith.constant 0 : index
    %30 = vector.load %arg5[%c0_14, %c0_15] : memref<1x32xf32, #tpu.memory_space<vmem>>, vector<1x32xf32>
    %cst_16 = arith.constant 9.99999974E-6 : f32
    %31 = vector.broadcast %cst_16 : f32 to vector<1x32xf32>
    %32 = arith.addf %29, %31 : vector<1x32xf32>
    %33 = math.rsqrt %32 : vector<1x32xf32>
    %34 = arith.mulf %30, %33 : vector<1x32xf32>
    %c0_17 = arith.constant 0 : index
    %c0_18 = arith.constant 0 : index
    %35 = vector.load %arg6[%c0_17, %c0_18] : memref<1x32xf32, #tpu.memory_space<vmem>>, vector<1x32xf32>
    %36 = arith.mulf %23, %34 : vector<1x32xf32>
    %37 = arith.subf %35, %36 : vector<1x32xf32>
    %38 = vector.broadcast %34 : vector<1x32xf32> to vector<64x32xf32>
    %39 = arith.mulf %5, %38 : vector<64x32xf32>
    %40 = vector.broadcast %37 : vector<1x32xf32> to vector<64x32xf32>
    %41 = arith.addf %39, %40 : vector<64x32xf32>
    %cst_19 = arith.constant 0.000000e+00 : f32
    %42 = vector.broadcast %cst_19 : f32 to vector<64x32xf32>
    %43 = arith.maximumf %41, %42 : vector<64x32xf32>
    %44 = vector.broadcast %34 : vector<1x32xf32> to vector<64x32xf32>
    %45 = arith.mulf %9, %44 : vector<64x32xf32>
    %46 = vector.broadcast %37 : vector<1x32xf32> to vector<64x32xf32>
    %47 = arith.addf %45, %46 : vector<64x32xf32>
    %cst_20 = arith.constant 0.000000e+00 : f32
    %48 = vector.broadcast %cst_20 : f32 to vector<64x32xf32>
    %49 = arith.maximumf %47, %48 : vector<64x32xf32>
    %cst_21 = arith.constant 0.000000e+00 : f32
    %50 = vector.broadcast %cst_21 : f32 to vector<2x6x6x6x32xf32>
    %c0_22 = arith.constant 0 : index
    %c0_23 = arith.constant 0 : index
    %c0_24 = arith.constant 0 : index
    %c0_25 = arith.constant 0 : index
    %c0_26 = arith.constant 0 : index
    %51 = vector.load %arg12[%c0_22, %c0_23, %c0_24, %c0_25, %c0_26] : memref<2x6x6x6x32xf32, #tpu.memory_space<vmem>>, vector<2x6x6x6x32xf32>
    tpu.vector_store %arg12[%c0_22, %c0_23, %c0_24, %c0_25, %c0_26], %50 {strides = array<i32>} : memref<2x6x6x6x32xf32, #tpu.memory_space<vmem>>, vector<2x6x6x6x32xf32>,
    %52 = vector.shape_cast %43 : vector<64x32xf32> to vector<4x4x4x32xf32>
    %c0_27 = arith.constant 0 : index
    %c1_28 = arith.constant 1 : index
    %c1_29 = arith.constant 1 : index
    %c1_30 = arith.constant 1 : index
    %c0_31 = arith.constant 0 : index
    %53 = vector.load %arg12[%c0_27, %c1_28, %c1_29, %c1_30, %c0_31] : memref<2x6x6x6x32xf32, #tpu.memory_space<vmem>>, vector<1x4x4x4x32xf32>
    %54 = vector.shape_cast %53 : vector<1x4x4x4x32xf32> to vector<4x4x4x32xf32>
    %55 = vector.shape_cast %52 : vector<4x4x4x32xf32> to vector<1x4x4x4x32xf32>
    tpu.vector_store %arg12[%c0_27, %c1_28, %c1_29, %c1_30, %c0_31], %55 {strides = array<i32>} : memref<2x6x6x6x32xf32, #tpu.memory_space<vmem>>, vector<1x4x4x4x32xf32>,
    %56 = vector.shape_cast %49 : vector<64x32xf32> to vector<4x4x4x32xf32>
    %c1_32 = arith.constant 1 : index
    %c1_33 = arith.constant 1 : index
    %c1_34 = arith.constant 1 : index
    %c1_35 = arith.constant 1 : index
    %c0_36 = arith.constant 0 : index
    %57 = vector.load %arg12[%c1_32, %c1_33, %c1_34, %c1_35, %c0_36] : memref<2x6x6x6x32xf32, #tpu.memory_space<vmem>>, vector<1x4x4x4x32xf32>
    %58 = vector.shape_cast %57 : vector<1x4x4x4x32xf32> to vector<4x4x4x32xf32>
    %59 = vector.shape_cast %56 : vector<4x4x4x32xf32> to vector<1x4x4x4x32xf32>
    tpu.vector_store %arg12[%c1_32, %c1_33, %c1_34, %c1_35, %c0_36], %59 {strides = array<i32>} : memref<2x6x6x6x32xf32, #tpu.memory_space<vmem>>, vector<1x4x4x4x32xf32>,
    %c0_37 = arith.constant 0 : index
    %c0_38 = arith.constant 0 : index
    %60 = vector.load %arg3[%c0_37, %c0_38] : memref<27x32xf32, #tpu.memory_space<vmem>>, vector<27x32xf32>
    %cst_39 = arith.constant 0.000000e+00 : f32
    %61 = vector.broadcast %cst_39 : f32 to vector<4x4x4x32xf32>
    %c0_40 = arith.constant 0 : index
    %c0_41 = arith.constant 0 : index
    %c0_42 = arith.constant 0 : index
    %c0_43 = arith.constant 0 : index
    %c0_44 = arith.constant 0 : index
    %62 = vector.load %arg12[%c0_40, %c0_41, %c0_42, %c0_43, %c0_44] : memref<2x6x6x6x32xf32, #tpu.memory_space<vmem>>, vector<1x4x4x4x32xf32>
    %63 = vector.shape_cast %62 : vector<1x4x4x4x32xf32> to vector<4x4x4x32xf32>
    %64 = vector.extract_strided_slice %60 {offsets = [0, 0], sizes = [1, 32], strides = [1, 1]} : vector<27x32xf32> to vector<1x32xf32>
    %65 = vector.shape_cast %64 : vector<1x32xf32> to vector<32xf32>
    %66 = vector.shape_cast %65 : vector<32xf32> to vector<1x1x1x32xf32>
    %67 = vector.broadcast %66 : vector<1x1x1x32xf32> to vector<4x4x4x32xf32>
    %68 = arith.mulf %63, %67 : vector<4x4x4x32xf32>
    %69 = arith.addf %61, %68 : vector<4x4x4x32xf32>
    %c0_45 = arith.constant 0 : index
    %c0_46 = arith.constant 0 : index
    %c0_47 = arith.constant 0 : index
    %c1_48 = arith.constant 1 : index
    %c0_49 = arith.constant 0 : index
    %70 = vector.load %arg12[%c0_45, %c0_46, %c0_47, %c1_48, %c0_49] : memref<2x6x6x6x32xf32, #tpu.memory_space<vmem>>, vector<1x4x4x4x32xf32>
    %71 = vector.shape_cast %70 : vector<1x4x4x4x32xf32> to vector<4x4x4x32xf32>
    %72 = vector.extract_strided_slice %60 {offsets = [1, 0], sizes = [1, 32], strides = [1, 1]} : vector<27x32xf32> to vector<1x32xf32>
    %73 = vector.shape_cast %72 : vector<1x32xf32> to vector<32xf32>
    %74 = vector.shape_cast %73 : vector<32xf32> to vector<1x1x1x32xf32>
    %75 = vector.broadcast %74 : vector<1x1x1x32xf32> to vector<4x4x4x32xf32>
    %76 = arith.mulf %71, %75 : vector<4x4x4x32xf32>
    %77 = arith.addf %69, %76 : vector<4x4x4x32xf32>
    %c0_50 = arith.constant 0 : index
    %c0_51 = arith.constant 0 : index
    %c0_52 = arith.constant 0 : index
    %c2 = arith.constant 2 : index
    %c0_53 = arith.constant 0 : index
    %78 = vector.load %arg12[%c0_50, %c0_51, %c0_52, %c2, %c0_53] : memref<2x6x6x6x32xf32, #tpu.memory_space<vmem>>, vector<1x4x4x4x32xf32>
    %79 = vector.shape_cast %78 : vector<1x4x4x4x32xf32> to vector<4x4x4x32xf32>
    %80 = vector.extract_strided_slice %60 {offsets = [2, 0], sizes = [1, 32], strides = [1, 1]} : vector<27x32xf32> to vector<1x32xf32>
    %81 = vector.shape_cast %80 : vector<1x32xf32> to vector<32xf32>
    %82 = vector.shape_cast %81 : vector<32xf32> to vector<1x1x1x32xf32>
    %83 = vector.broadcast %82 : vector<1x1x1x32xf32> to vector<4x4x4x32xf32>
    %84 = arith.mulf %79, %83 : vector<4x4x4x32xf32>
    %85 = arith.addf %77, %84 : vector<4x4x4x32xf32>
    %c0_54 = arith.constant 0 : index
    %c0_55 = arith.constant 0 : index
    %c1_56 = arith.constant 1 : index
    %c0_57 = arith.constant 0 : index
    %c0_58 = arith.constant 0 : index
    %86 = vector.load %arg12[%c0_54, %c0_55, %c1_56, %c0_57, %c0_58] : memref<2x6x6x6x32xf32, #tpu.memory_space<vmem>>, vector<1x4x4x4x32xf32>
    %87 = vector.shape_cast %86 : vector<1x4x4x4x32xf32> to vector<4x4x4x32xf32>
    %88 = vector.extract_strided_slice %60 {offsets = [3, 0], sizes = [1, 32], strides = [1, 1]} : vector<27x32xf32> to vector<1x32xf32>
    %89 = vector.shape_cast %88 : vector<1x32xf32> to vector<32xf32>
    %90 = vector.shape_cast %89 : vector<32xf32> to vector<1x1x1x32xf32>
    %91 = vector.broadcast %90 : vector<1x1x1x32xf32> to vector<4x4x4x32xf32>
    %92 = arith.mulf %87, %91 : vector<4x4x4x32xf32>
    %93 = arith.addf %85, %92 : vector<4x4x4x32xf32>
    %c0_59 = arith.constant 0 : index
    %c0_60 = arith.constant 0 : index
    %c1_61 = arith.constant 1 : index
    %c1_62 = arith.constant 1 : index
    %c0_63 = arith.constant 0 : index
    %94 = vector.load %arg12[%c0_59, %c0_60, %c1_61, %c1_62, %c0_63] : memref<2x6x6x6x32xf32, #tpu.memory_space<vmem>>, vector<1x4x4x4x32xf32>
    %95 = vector.shape_cast %94 : vector<1x4x4x4x32xf32> to vector<4x4x4x32xf32>
    %96 = vector.extract_strided_slice %60 {offsets = [4, 0], sizes = [1, 32], strides = [1, 1]} : vector<27x32xf32> to vector<1x32xf32>
    %97 = vector.shape_cast %96 : vector<1x32xf32> to vector<32xf32>
    %98 = vector.shape_cast %97 : vector<32xf32> to vector<1x1x1x32xf32>
    %99 = vector.broadcast %98 : vector<1x1x1x32xf32> to vector<4x4x4x32xf32>
    %100 = arith.mulf %95, %99 : vector<4x4x4x32xf32>
    %101 = arith.addf %93, %100 : vector<4x4x4x32xf32>
    %c0_64 = arith.constant 0 : index
    %c0_65 = arith.constant 0 : index
    %c1_66 = arith.constant 1 : index
    %c2_67 = arith.constant 2 : index
    %c0_68 = arith.constant 0 : index
    %102 = vector.load %arg12[%c0_64, %c0_65, %c1_66, %c2_67, %c0_68] : memref<2x6x6x6x32xf32, #tpu.memory_space<vmem>>, vector<1x4x4x4x32xf32>
    %103 = vector.shape_cast %102 : vector<1x4x4x4x32xf32> to vector<4x4x4x32xf32>
    %104 = vector.extract_strided_slice %60 {offsets = [5, 0], sizes = [1, 32], strides = [1, 1]} : vector<27x32xf32> to vector<1x32xf32>
    %105 = vector.shape_cast %104 : vector<1x32xf32> to vector<32xf32>
    %106 = vector.shape_cast %105 : vector<32xf32> to vector<1x1x1x32xf32>
    %107 = vector.broadcast %106 : vector<1x1x1x32xf32> to vector<4x4x4x32xf32>
    %108 = arith.mulf %103, %107 : vector<4x4x4x32xf32>
    %109 = arith.addf %101, %108 : vector<4x4x4x32xf32>
    %c0_69 = arith.constant 0 : index
    %c0_70 = arith.constant 0 : index
    %c2_71 = arith.constant 2 : index
    %c0_72 = arith.constant 0 : index
    %c0_73 = arith.constant 0 : index
    %110 = vector.load %arg12[%c0_69, %c0_70, %c2_71, %c0_72, %c0_73] : memref<2x6x6x6x32xf32, #tpu.memory_space<vmem>>, vector<1x4x4x4x32xf32>
    %111 = vector.shape_cast %110 : vector<1x4x4x4x32xf32> to vector<4x4x4x32xf32>
    %112 = vector.extract_strided_slice %60 {offsets = [6, 0], sizes = [1, 32], strides = [1, 1]} : vector<27x32xf32> to vector<1x32xf32>
    %113 = vector.shape_cast %112 : vector<1x32xf32> to vector<32xf32>
    %114 = vector.shape_cast %113 : vector<32xf32> to vector<1x1x1x32xf32>
    %115 = vector.broadcast %114 : vector<1x1x1x32xf32> to vector<4x4x4x32xf32>
    %116 = arith.mulf %111, %115 : vector<4x4x4x32xf32>
    %117 = arith.addf %109, %116 : vector<4x4x4x32xf32>
    %c0_74 = arith.constant 0 : index
    %c0_75 = arith.constant 0 : index
    %c2_76 = arith.constant 2 : index
    %c1_77 = arith.constant 1 : index
    %c0_78 = arith.constant 0 : index
    %118 = vector.load %arg12[%c0_74, %c0_75, %c2_76, %c1_77, %c0_78] : memref<2x6x6x6x32xf32, #tpu.memory_space<vmem>>, vector<1x4x4x4x32xf32>
    %119 = vector.shape_cast %118 : vector<1x4x4x4x32xf32> to vector<4x4x4x32xf32>
    %120 = vector.extract_strided_slice %60 {offsets = [7, 0], sizes = [1, 32], strides = [1, 1]} : vector<27x32xf32> to vector<1x32xf32>
    %121 = vector.shape_cast %120 : vector<1x32xf32> to vector<32xf32>
    %122 = vector.shape_cast %121 : vector<32xf32> to vector<1x1x1x32xf32>
    %123 = vector.broadcast %122 : vector<1x1x1x32xf32> to vector<4x4x4x32xf32>
    %124 = arith.mulf %119, %123 : vector<4x4x4x32xf32>
    %125 = arith.addf %117, %124 : vector<4x4x4x32xf32>
    %c0_79 = arith.constant 0 : index
    %c0_80 = arith.constant 0 : index
    %c2_81 = arith.constant 2 : index
    %c2_82 = arith.constant 2 : index
    %c0_83 = arith.constant 0 : index
    %126 = vector.load %arg12[%c0_79, %c0_80, %c2_81, %c2_82, %c0_83] : memref<2x6x6x6x32xf32, #tpu.memory_space<vmem>>, vector<1x4x4x4x32xf32>
    %127 = vector.shape_cast %126 : vector<1x4x4x4x32xf32> to vector<4x4x4x32xf32>
    %128 = vector.extract_strided_slice %60 {offsets = [8, 0], sizes = [1, 32], strides = [1, 1]} : vector<27x32xf32> to vector<1x32xf32>
    %129 = vector.shape_cast %128 : vector<1x32xf32> to vector<32xf32>
    %130 = vector.shape_cast %129 : vector<32xf32> to vector<1x1x1x32xf32>
    %131 = vector.broadcast %130 : vector<1x1x1x32xf32> to vector<4x4x4x32xf32>
    %132 = arith.mulf %127, %131 : vector<4x4x4x32xf32>
    %133 = arith.addf %125, %132 : vector<4x4x4x32xf32>
    %c0_84 = arith.constant 0 : index
    %c1_85 = arith.constant 1 : index
    %c0_86 = arith.constant 0 : index
    %c0_87 = arith.constant 0 : index
    %c0_88 = arith.constant 0 : index
    %134 = vector.load %arg12[%c0_84, %c1_85, %c0_86, %c0_87, %c0_88] : memref<2x6x6x6x32xf32, #tpu.memory_space<vmem>>, vector<1x4x4x4x32xf32>
    %135 = vector.shape_cast %134 : vector<1x4x4x4x32xf32> to vector<4x4x4x32xf32>
    %136 = vector.extract_strided_slice %60 {offsets = [9, 0], sizes = [1, 32], strides = [1, 1]} : vector<27x32xf32> to vector<1x32xf32>
    %137 = vector.shape_cast %136 : vector<1x32xf32> to vector<32xf32>
    %138 = vector.shape_cast %137 : vector<32xf32> to vector<1x1x1x32xf32>
    %139 = vector.broadcast %138 : vector<1x1x1x32xf32> to vector<4x4x4x32xf32>
    %140 = arith.mulf %135, %139 : vector<4x4x4x32xf32>
    %141 = arith.addf %133, %140 : vector<4x4x4x32xf32>
    %c0_89 = arith.constant 0 : index
    %c1_90 = arith.constant 1 : index
    %c0_91 = arith.constant 0 : index
    %c1_92 = arith.constant 1 : index
    %c0_93 = arith.constant 0 : index
    %142 = vector.load %arg12[%c0_89, %c1_90, %c0_91, %c1_92, %c0_93] : memref<2x6x6x6x32xf32, #tpu.memory_space<vmem>>, vector<1x4x4x4x32xf32>
    %143 = vector.shape_cast %142 : vector<1x4x4x4x32xf32> to vector<4x4x4x32xf32>
    %144 = vector.extract_strided_slice %60 {offsets = [10, 0], sizes = [1, 32], strides = [1, 1]} : vector<27x32xf32> to vector<1x32xf32>
    %145 = vector.shape_cast %144 : vector<1x32xf32> to vector<32xf32>
    %146 = vector.shape_cast %145 : vector<32xf32> to vector<1x1x1x32xf32>
    %147 = vector.broadcast %146 : vector<1x1x1x32xf32> to vector<4x4x4x32xf32>
    %148 = arith.mulf %143, %147 : vector<4x4x4x32xf32>
    %149 = arith.addf %141, %148 : vector<4x4x4x32xf32>
    %c0_94 = arith.constant 0 : index
    %c1_95 = arith.constant 1 : index
    %c0_96 = arith.constant 0 : index
    %c2_97 = arith.constant 2 : index
    %c0_98 = arith.constant 0 : index
    %150 = vector.load %arg12[%c0_94, %c1_95, %c0_96, %c2_97, %c0_98] : memref<2x6x6x6x32xf32, #tpu.memory_space<vmem>>, vector<1x4x4x4x32xf32>
    %151 = vector.shape_cast %150 : vector<1x4x4x4x32xf32> to vector<4x4x4x32xf32>
    %152 = vector.extract_strided_slice %60 {offsets = [11, 0], sizes = [1, 32], strides = [1, 1]} : vector<27x32xf32> to vector<1x32xf32>
    %153 = vector.shape_cast %152 : vector<1x32xf32> to vector<32xf32>
    %154 = vector.shape_cast %153 : vector<32xf32> to vector<1x1x1x32xf32>
    %155 = vector.broadcast %154 : vector<1x1x1x32xf32> to vector<4x4x4x32xf32>
    %156 = arith.mulf %151, %155 : vector<4x4x4x32xf32>
    %157 = arith.addf %149, %156 : vector<4x4x4x32xf32>
    %c0_99 = arith.constant 0 : index
    %c1_100 = arith.constant 1 : index
    %c1_101 = arith.constant 1 : index
    %c0_102 = arith.constant 0 : index
    %c0_103 = arith.constant 0 : index
    %158 = vector.load %arg12[%c0_99, %c1_100, %c1_101, %c0_102, %c0_103] : memref<2x6x6x6x32xf32, #tpu.memory_space<vmem>>, vector<1x4x4x4x32xf32>
    %159 = vector.shape_cast %158 : vector<1x4x4x4x32xf32> to vector<4x4x4x32xf32>
    %160 = vector.extract_strided_slice %60 {offsets = [12, 0], sizes = [1, 32], strides = [1, 1]} : vector<27x32xf32> to vector<1x32xf32>
    %161 = vector.shape_cast %160 : vector<1x32xf32> to vector<32xf32>
    %162 = vector.shape_cast %161 : vector<32xf32> to vector<1x1x1x32xf32>
    %163 = vector.broadcast %162 : vector<1x1x1x32xf32> to vector<4x4x4x32xf32>
    %164 = arith.mulf %159, %163 : vector<4x4x4x32xf32>
    %165 = arith.addf %157, %164 : vector<4x4x4x32xf32>
    %c0_104 = arith.constant 0 : index
    %c1_105 = arith.constant 1 : index
    %c1_106 = arith.constant 1 : index
    %c1_107 = arith.constant 1 : index
    %c0_108 = arith.constant 0 : index
    %166 = vector.load %arg12[%c0_104, %c1_105, %c1_106, %c1_107, %c0_108] : memref<2x6x6x6x32xf32, #tpu.memory_space<vmem>>, vector<1x4x4x4x32xf32>
    %167 = vector.shape_cast %166 : vector<1x4x4x4x32xf32> to vector<4x4x4x32xf32>
    %168 = vector.extract_strided_slice %60 {offsets = [13, 0], sizes = [1, 32], strides = [1, 1]} : vector<27x32xf32> to vector<1x32xf32>
    %169 = vector.shape_cast %168 : vector<1x32xf32> to vector<32xf32>
    %170 = vector.shape_cast %169 : vector<32xf32> to vector<1x1x1x32xf32>
    %171 = vector.broadcast %170 : vector<1x1x1x32xf32> to vector<4x4x4x32xf32>
    %172 = arith.mulf %167, %171 : vector<4x4x4x32xf32>
    %173 = arith.addf %165, %172 : vector<4x4x4x32xf32>
    %c0_109 = arith.constant 0 : index
    %c1_110 = arith.constant 1 : index
    %c1_111 = arith.constant 1 : index
    %c2_112 = arith.constant 2 : index
    %c0_113 = arith.constant 0 : index
    %174 = vector.load %arg12[%c0_109, %c1_110, %c1_111, %c2_112, %c0_113] : memref<2x6x6x6x32xf32, #tpu.memory_space<vmem>>, vector<1x4x4x4x32xf32>
    %175 = vector.shape_cast %174 : vector<1x4x4x4x32xf32> to vector<4x4x4x32xf32>
    %176 = vector.extract_strided_slice %60 {offsets = [14, 0], sizes = [1, 32], strides = [1, 1]} : vector<27x32xf32> to vector<1x32xf32>
    %177 = vector.shape_cast %176 : vector<1x32xf32> to vector<32xf32>
    %178 = vector.shape_cast %177 : vector<32xf32> to vector<1x1x1x32xf32>
    %179 = vector.broadcast %178 : vector<1x1x1x32xf32> to vector<4x4x4x32xf32>
    %180 = arith.mulf %175, %179 : vector<4x4x4x32xf32>
    %181 = arith.addf %173, %180 : vector<4x4x4x32xf32>
    %c0_114 = arith.constant 0 : index
    %c1_115 = arith.constant 1 : index
    %c2_116 = arith.constant 2 : index
    %c0_117 = arith.constant 0 : index
    %c0_118 = arith.constant 0 : index
    %182 = vector.load %arg12[%c0_114, %c1_115, %c2_116, %c0_117, %c0_118] : memref<2x6x6x6x32xf32, #tpu.memory_space<vmem>>, vector<1x4x4x4x32xf32>
    %183 = vector.shape_cast %182 : vector<1x4x4x4x32xf32> to vector<4x4x4x32xf32>
    %184 = vector.extract_strided_slice %60 {offsets = [15, 0], sizes = [1, 32], strides = [1, 1]} : vector<27x32xf32> to vector<1x32xf32>
    %185 = vector.shape_cast %184 : vector<1x32xf32> to vector<32xf32>
    %186 = vector.shape_cast %185 : vector<32xf32> to vector<1x1x1x32xf32>
    %187 = vector.broadcast %186 : vector<1x1x1x32xf32> to vector<4x4x4x32xf32>
    %188 = arith.mulf %183, %187 : vector<4x4x4x32xf32>
    %189 = arith.addf %181, %188 : vector<4x4x4x32xf32>
    %c0_119 = arith.constant 0 : index
    %c1_120 = arith.constant 1 : index
    %c2_121 = arith.constant 2 : index
    %c1_122 = arith.constant 1 : index
    %c0_123 = arith.constant 0 : index
    %190 = vector.load %arg12[%c0_119, %c1_120, %c2_121, %c1_122, %c0_123] : memref<2x6x6x6x32xf32, #tpu.memory_space<vmem>>, vector<1x4x4x4x32xf32>
    %191 = vector.shape_cast %190 : vector<1x4x4x4x32xf32> to vector<4x4x4x32xf32>
    %192 = vector.extract_strided_slice %60 {offsets = [16, 0], sizes = [1, 32], strides = [1, 1]} : vector<27x32xf32> to vector<1x32xf32>
    %193 = vector.shape_cast %192 : vector<1x32xf32> to vector<32xf32>
    %194 = vector.shape_cast %193 : vector<32xf32> to vector<1x1x1x32xf32>
    %195 = vector.broadcast %194 : vector<1x1x1x32xf32> to vector<4x4x4x32xf32>
    %196 = arith.mulf %191, %195 : vector<4x4x4x32xf32>
    %197 = arith.addf %189, %196 : vector<4x4x4x32xf32>
    %c0_124 = arith.constant 0 : index
    %c1_125 = arith.constant 1 : index
    %c2_126 = arith.constant 2 : index
    %c2_127 = arith.constant 2 : index
    %c0_128 = arith.constant 0 : index
    %198 = vector.load %arg12[%c0_124, %c1_125, %c2_126, %c2_127, %c0_128] : memref<2x6x6x6x32xf32, #tpu.memory_space<vmem>>, vector<1x4x4x4x32xf32>
    %199 = vector.shape_cast %198 : vector<1x4x4x4x32xf32> to vector<4x4x4x32xf32>
    %200 = vector.extract_strided_slice %60 {offsets = [17, 0], sizes = [1, 32], strides = [1, 1]} : vector<27x32xf32> to vector<1x32xf32>
    %201 = vector.shape_cast %200 : vector<1x32xf32> to vector<32xf32>
    %202 = vector.shape_cast %201 : vector<32xf32> to vector<1x1x1x32xf32>
    %203 = vector.broadcast %202 : vector<1x1x1x32xf32> to vector<4x4x4x32xf32>
    %204 = arith.mulf %199, %203 : vector<4x4x4x32xf32>
    %205 = arith.addf %197, %204 : vector<4x4x4x32xf32>
    %c0_129 = arith.constant 0 : index
    %c2_130 = arith.constant 2 : index
    %c0_131 = arith.constant 0 : index
    %c0_132 = arith.constant 0 : index
    %c0_133 = arith.constant 0 : index
    %206 = vector.load %arg12[%c0_129, %c2_130, %c0_131, %c0_132, %c0_133] : memref<2x6x6x6x32xf32, #tpu.memory_space<vmem>>, vector<1x4x4x4x32xf32>
    %207 = vector.shape_cast %206 : vector<1x4x4x4x32xf32> to vector<4x4x4x32xf32>
    %208 = vector.extract_strided_slice %60 {offsets = [18, 0], sizes = [1, 32], strides = [1, 1]} : vector<27x32xf32> to vector<1x32xf32>
    %209 = vector.shape_cast %208 : vector<1x32xf32> to vector<32xf32>
    %210 = vector.shape_cast %209 : vector<32xf32> to vector<1x1x1x32xf32>
    %211 = vector.broadcast %210 : vector<1x1x1x32xf32> to vector<4x4x4x32xf32>
    %212 = arith.mulf %207, %211 : vector<4x4x4x32xf32>
    %213 = arith.addf %205, %212 : vector<4x4x4x32xf32>
    %c0_134 = arith.constant 0 : index
    %c2_135 = arith.constant 2 : index
    %c0_136 = arith.constant 0 : index
    %c1_137 = arith.constant 1 : index
    %c0_138 = arith.constant 0 : index
    %214 = vector.load %arg12[%c0_134, %c2_135, %c0_136, %c1_137, %c0_138] : memref<2x6x6x6x32xf32, #tpu.memory_space<vmem>>, vector<1x4x4x4x32xf32>
    %215 = vector.shape_cast %214 : vector<1x4x4x4x32xf32> to vector<4x4x4x32xf32>
    %216 = vector.extract_strided_slice %60 {offsets = [19, 0], sizes = [1, 32], strides = [1, 1]} : vector<27x32xf32> to vector<1x32xf32>
    %217 = vector.shape_cast %216 : vector<1x32xf32> to vector<32xf32>
    %218 = vector.shape_cast %217 : vector<32xf32> to vector<1x1x1x32xf32>
    %219 = vector.broadcast %218 : vector<1x1x1x32xf32> to vector<4x4x4x32xf32>
    %220 = arith.mulf %215, %219 : vector<4x4x4x32xf32>
    %221 = arith.addf %213, %220 : vector<4x4x4x32xf32>
    %c0_139 = arith.constant 0 : index
    %c2_140 = arith.constant 2 : index
    %c0_141 = arith.constant 0 : index
    %c2_142 = arith.constant 2 : index
    %c0_143 = arith.constant 0 : index
    %222 = vector.load %arg12[%c0_139, %c2_140, %c0_141, %c2_142, %c0_143] : memref<2x6x6x6x32xf32, #tpu.memory_space<vmem>>, vector<1x4x4x4x32xf32>
    %223 = vector.shape_cast %222 : vector<1x4x4x4x32xf32> to vector<4x4x4x32xf32>
    %224 = vector.extract_strided_slice %60 {offsets = [20, 0], sizes = [1, 32], strides = [1, 1]} : vector<27x32xf32> to vector<1x32xf32>
    %225 = vector.shape_cast %224 : vector<1x32xf32> to vector<32xf32>
    %226 = vector.shape_cast %225 : vector<32xf32> to vector<1x1x1x32xf32>
    %227 = vector.broadcast %226 : vector<1x1x1x32xf32> to vector<4x4x4x32xf32>
    %228 = arith.mulf %223, %227 : vector<4x4x4x32xf32>
    %229 = arith.addf %221, %228 : vector<4x4x4x32xf32>
    %c0_144 = arith.constant 0 : index
    %c2_145 = arith.constant 2 : index
    %c1_146 = arith.constant 1 : index
    %c0_147 = arith.constant 0 : index
    %c0_148 = arith.constant 0 : index
    %230 = vector.load %arg12[%c0_144, %c2_145, %c1_146, %c0_147, %c0_148] : memref<2x6x6x6x32xf32, #tpu.memory_space<vmem>>, vector<1x4x4x4x32xf32>
    %231 = vector.shape_cast %230 : vector<1x4x4x4x32xf32> to vector<4x4x4x32xf32>
    %232 = vector.extract_strided_slice %60 {offsets = [21, 0], sizes = [1, 32], strides = [1, 1]} : vector<27x32xf32> to vector<1x32xf32>
    %233 = vector.shape_cast %232 : vector<1x32xf32> to vector<32xf32>
    %234 = vector.shape_cast %233 : vector<32xf32> to vector<1x1x1x32xf32>
    %235 = vector.broadcast %234 : vector<1x1x1x32xf32> to vector<4x4x4x32xf32>
    %236 = arith.mulf %231, %235 : vector<4x4x4x32xf32>
    %237 = arith.addf %229, %236 : vector<4x4x4x32xf32>
    %c0_149 = arith.constant 0 : index
    %c2_150 = arith.constant 2 : index
    %c1_151 = arith.constant 1 : index
    %c1_152 = arith.constant 1 : index
    %c0_153 = arith.constant 0 : index
    %238 = vector.load %arg12[%c0_149, %c2_150, %c1_151, %c1_152, %c0_153] : memref<2x6x6x6x32xf32, #tpu.memory_space<vmem>>, vector<1x4x4x4x32xf32>
    %239 = vector.shape_cast %238 : vector<1x4x4x4x32xf32> to vector<4x4x4x32xf32>
    %240 = vector.extract_strided_slice %60 {offsets = [22, 0], sizes = [1, 32], strides = [1, 1]} : vector<27x32xf32> to vector<1x32xf32>
    %241 = vector.shape_cast %240 : vector<1x32xf32> to vector<32xf32>
    %242 = vector.shape_cast %241 : vector<32xf32> to vector<1x1x1x32xf32>
    %243 = vector.broadcast %242 : vector<1x1x1x32xf32> to vector<4x4x4x32xf32>
    %244 = arith.mulf %239, %243 : vector<4x4x4x32xf32>
    %245 = arith.addf %237, %244 : vector<4x4x4x32xf32>
    %c0_154 = arith.constant 0 : index
    %c2_155 = arith.constant 2 : index
    %c1_156 = arith.constant 1 : index
    %c2_157 = arith.constant 2 : index
    %c0_158 = arith.constant 0 : index
    %246 = vector.load %arg12[%c0_154, %c2_155, %c1_156, %c2_157, %c0_158] : memref<2x6x6x6x32xf32, #tpu.memory_space<vmem>>, vector<1x4x4x4x32xf32>
    %247 = vector.shape_cast %246 : vector<1x4x4x4x32xf32> to vector<4x4x4x32xf32>
    %248 = vector.extract_strided_slice %60 {offsets = [23, 0], sizes = [1, 32], strides = [1, 1]} : vector<27x32xf32> to vector<1x32xf32>
    %249 = vector.shape_cast %248 : vector<1x32xf32> to vector<32xf32>
    %250 = vector.shape_cast %249 : vector<32xf32> to vector<1x1x1x32xf32>
    %251 = vector.broadcast %250 : vector<1x1x1x32xf32> to vector<4x4x4x32xf32>
    %252 = arith.mulf %247, %251 : vector<4x4x4x32xf32>
    %253 = arith.addf %245, %252 : vector<4x4x4x32xf32>
    %c0_159 = arith.constant 0 : index
    %c2_160 = arith.constant 2 : index
    %c2_161 = arith.constant 2 : index
    %c0_162 = arith.constant 0 : index
    %c0_163 = arith.constant 0 : index
    %254 = vector.load %arg12[%c0_159, %c2_160, %c2_161, %c0_162, %c0_163] : memref<2x6x6x6x32xf32, #tpu.memory_space<vmem>>, vector<1x4x4x4x32xf32>
    %255 = vector.shape_cast %254 : vector<1x4x4x4x32xf32> to vector<4x4x4x32xf32>
    %256 = vector.extract_strided_slice %60 {offsets = [24, 0], sizes = [1, 32], strides = [1, 1]} : vector<27x32xf32> to vector<1x32xf32>
    %257 = vector.shape_cast %256 : vector<1x32xf32> to vector<32xf32>
    %258 = vector.shape_cast %257 : vector<32xf32> to vector<1x1x1x32xf32>
    %259 = vector.broadcast %258 : vector<1x1x1x32xf32> to vector<4x4x4x32xf32>
    %260 = arith.mulf %255, %259 : vector<4x4x4x32xf32>
    %261 = arith.addf %253, %260 : vector<4x4x4x32xf32>
    %c0_164 = arith.constant 0 : index
    %c2_165 = arith.constant 2 : index
    %c2_166 = arith.constant 2 : index
    %c1_167 = arith.constant 1 : index
    %c0_168 = arith.constant 0 : index
    %262 = vector.load %arg12[%c0_164, %c2_165, %c2_166, %c1_167, %c0_168] : memref<2x6x6x6x32xf32, #tpu.memory_space<vmem>>, vector<1x4x4x4x32xf32>
    %263 = vector.shape_cast %262 : vector<1x4x4x4x32xf32> to vector<4x4x4x32xf32>
    %264 = vector.extract_strided_slice %60 {offsets = [25, 0], sizes = [1, 32], strides = [1, 1]} : vector<27x32xf32> to vector<1x32xf32>
    %265 = vector.shape_cast %264 : vector<1x32xf32> to vector<32xf32>
    %266 = vector.shape_cast %265 : vector<32xf32> to vector<1x1x1x32xf32>
    %267 = vector.broadcast %266 : vector<1x1x1x32xf32> to vector<4x4x4x32xf32>
    %268 = arith.mulf %263, %267 : vector<4x4x4x32xf32>
    %269 = arith.addf %261, %268 : vector<4x4x4x32xf32>
    %c0_169 = arith.constant 0 : index
    %c2_170 = arith.constant 2 : index
    %c2_171 = arith.constant 2 : index
    %c2_172 = arith.constant 2 : index
    %c0_173 = arith.constant 0 : index
    %270 = vector.load %arg12[%c0_169, %c2_170, %c2_171, %c2_172, %c0_173] : memref<2x6x6x6x32xf32, #tpu.memory_space<vmem>>, vector<1x4x4x4x32xf32>
    %271 = vector.shape_cast %270 : vector<1x4x4x4x32xf32> to vector<4x4x4x32xf32>
    %272 = vector.extract_strided_slice %60 {offsets = [26, 0], sizes = [1, 32], strides = [1, 1]} : vector<27x32xf32> to vector<1x32xf32>
    %273 = vector.shape_cast %272 : vector<1x32xf32> to vector<32xf32>
    %274 = vector.shape_cast %273 : vector<32xf32> to vector<1x1x1x32xf32>
    %275 = vector.broadcast %274 : vector<1x1x1x32xf32> to vector<4x4x4x32xf32>
    %276 = arith.mulf %271, %275 : vector<4x4x4x32xf32>
    %277 = arith.addf %269, %276 : vector<4x4x4x32xf32>
    %278 = vector.shape_cast %277 : vector<4x4x4x32xf32> to vector<64x32xf32>
    %cst_174 = arith.constant 0.000000e+00 : f32
    %279 = vector.broadcast %cst_174 : f32 to vector<4x4x4x32xf32>
    %c1_175 = arith.constant 1 : index
    %c0_176 = arith.constant 0 : index
    %c0_177 = arith.constant 0 : index
    %c0_178 = arith.constant 0 : index
    %c0_179 = arith.constant 0 : index
    %280 = vector.load %arg12[%c1_175, %c0_176, %c0_177, %c0_178, %c0_179] : memref<2x6x6x6x32xf32, #tpu.memory_space<vmem>>, vector<1x4x4x4x32xf32>
    %281 = vector.shape_cast %280 : vector<1x4x4x4x32xf32> to vector<4x4x4x32xf32>
    %282 = vector.extract_strided_slice %60 {offsets = [0, 0], sizes = [1, 32], strides = [1, 1]} : vector<27x32xf32> to vector<1x32xf32>
    %283 = vector.shape_cast %282 : vector<1x32xf32> to vector<32xf32>
    %284 = vector.shape_cast %283 : vector<32xf32> to vector<1x1x1x32xf32>
    %285 = vector.broadcast %284 : vector<1x1x1x32xf32> to vector<4x4x4x32xf32>
    %286 = arith.mulf %281, %285 : vector<4x4x4x32xf32>
    %287 = arith.addf %279, %286 : vector<4x4x4x32xf32>
    %c1_180 = arith.constant 1 : index
    %c0_181 = arith.constant 0 : index
    %c0_182 = arith.constant 0 : index
    %c1_183 = arith.constant 1 : index
    %c0_184 = arith.constant 0 : index
    %288 = vector.load %arg12[%c1_180, %c0_181, %c0_182, %c1_183, %c0_184] : memref<2x6x6x6x32xf32, #tpu.memory_space<vmem>>, vector<1x4x4x4x32xf32>
    %289 = vector.shape_cast %288 : vector<1x4x4x4x32xf32> to vector<4x4x4x32xf32>
    %290 = vector.extract_strided_slice %60 {offsets = [1, 0], sizes = [1, 32], strides = [1, 1]} : vector<27x32xf32> to vector<1x32xf32>
    %291 = vector.shape_cast %290 : vector<1x32xf32> to vector<32xf32>
    %292 = vector.shape_cast %291 : vector<32xf32> to vector<1x1x1x32xf32>
    %293 = vector.broadcast %292 : vector<1x1x1x32xf32> to vector<4x4x4x32xf32>
    %294 = arith.mulf %289, %293 : vector<4x4x4x32xf32>
    %295 = arith.addf %287, %294 : vector<4x4x4x32xf32>
    %c1_185 = arith.constant 1 : index
    %c0_186 = arith.constant 0 : index
    %c0_187 = arith.constant 0 : index
    %c2_188 = arith.constant 2 : index
    %c0_189 = arith.constant 0 : index
    %296 = vector.load %arg12[%c1_185, %c0_186, %c0_187, %c2_188, %c0_189] : memref<2x6x6x6x32xf32, #tpu.memory_space<vmem>>, vector<1x4x4x4x32xf32>
    %297 = vector.shape_cast %296 : vector<1x4x4x4x32xf32> to vector<4x4x4x32xf32>
    %298 = vector.extract_strided_slice %60 {offsets = [2, 0], sizes = [1, 32], strides = [1, 1]} : vector<27x32xf32> to vector<1x32xf32>
    %299 = vector.shape_cast %298 : vector<1x32xf32> to vector<32xf32>
    %300 = vector.shape_cast %299 : vector<32xf32> to vector<1x1x1x32xf32>
    %301 = vector.broadcast %300 : vector<1x1x1x32xf32> to vector<4x4x4x32xf32>
    %302 = arith.mulf %297, %301 : vector<4x4x4x32xf32>
    %303 = arith.addf %295, %302 : vector<4x4x4x32xf32>
    %c1_190 = arith.constant 1 : index
    %c0_191 = arith.constant 0 : index
    %c1_192 = arith.constant 1 : index
    %c0_193 = arith.constant 0 : index
    %c0_194 = arith.constant 0 : index
    %304 = vector.load %arg12[%c1_190, %c0_191, %c1_192, %c0_193, %c0_194] : memref<2x6x6x6x32xf32, #tpu.memory_space<vmem>>, vector<1x4x4x4x32xf32>
    %305 = vector.shape_cast %304 : vector<1x4x4x4x32xf32> to vector<4x4x4x32xf32>
    %306 = vector.extract_strided_slice %60 {offsets = [3, 0], sizes = [1, 32], strides = [1, 1]} : vector<27x32xf32> to vector<1x32xf32>
    %307 = vector.shape_cast %306 : vector<1x32xf32> to vector<32xf32>
    %308 = vector.shape_cast %307 : vector<32xf32> to vector<1x1x1x32xf32>
    %309 = vector.broadcast %308 : vector<1x1x1x32xf32> to vector<4x4x4x32xf32>
    %310 = arith.mulf %305, %309 : vector<4x4x4x32xf32>
    %311 = arith.addf %303, %310 : vector<4x4x4x32xf32>
    %c1_195 = arith.constant 1 : index
    %c0_196 = arith.constant 0 : index
    %c1_197 = arith.constant 1 : index
    %c1_198 = arith.constant 1 : index
    %c0_199 = arith.constant 0 : index
    %312 = vector.load %arg12[%c1_195, %c0_196, %c1_197, %c1_198, %c0_199] : memref<2x6x6x6x32xf32, #tpu.memory_space<vmem>>, vector<1x4x4x4x32xf32>
    %313 = vector.shape_cast %312 : vector<1x4x4x4x32xf32> to vector<4x4x4x32xf32>
    %314 = vector.extract_strided_slice %60 {offsets = [4, 0], sizes = [1, 32], strides = [1, 1]} : vector<27x32xf32> to vector<1x32xf32>
    %315 = vector.shape_cast %314 : vector<1x32xf32> to vector<32xf32>
    %316 = vector.shape_cast %315 : vector<32xf32> to vector<1x1x1x32xf32>
    %317 = vector.broadcast %316 : vector<1x1x1x32xf32> to vector<4x4x4x32xf32>
    %318 = arith.mulf %313, %317 : vector<4x4x4x32xf32>
    %319 = arith.addf %311, %318 : vector<4x4x4x32xf32>
    %c1_200 = arith.constant 1 : index
    %c0_201 = arith.constant 0 : index
    %c1_202 = arith.constant 1 : index
    %c2_203 = arith.constant 2 : index
    %c0_204 = arith.constant 0 : index
    %320 = vector.load %arg12[%c1_200, %c0_201, %c1_202, %c2_203, %c0_204] : memref<2x6x6x6x32xf32, #tpu.memory_space<vmem>>, vector<1x4x4x4x32xf32>
    %321 = vector.shape_cast %320 : vector<1x4x4x4x32xf32> to vector<4x4x4x32xf32>
    %322 = vector.extract_strided_slice %60 {offsets = [5, 0], sizes = [1, 32], strides = [1, 1]} : vector<27x32xf32> to vector<1x32xf32>
    %323 = vector.shape_cast %322 : vector<1x32xf32> to vector<32xf32>
    %324 = vector.shape_cast %323 : vector<32xf32> to vector<1x1x1x32xf32>
    %325 = vector.broadcast %324 : vector<1x1x1x32xf32> to vector<4x4x4x32xf32>
    %326 = arith.mulf %321, %325 : vector<4x4x4x32xf32>
    %327 = arith.addf %319, %326 : vector<4x4x4x32xf32>
    %c1_205 = arith.constant 1 : index
    %c0_206 = arith.constant 0 : index
    %c2_207 = arith.constant 2 : index
    %c0_208 = arith.constant 0 : index
    %c0_209 = arith.constant 0 : index
    %328 = vector.load %arg12[%c1_205, %c0_206, %c2_207, %c0_208, %c0_209] : memref<2x6x6x6x32xf32, #tpu.memory_space<vmem>>, vector<1x4x4x4x32xf32>
    %329 = vector.shape_cast %328 : vector<1x4x4x4x32xf32> to vector<4x4x4x32xf32>
    %330 = vector.extract_strided_slice %60 {offsets = [6, 0], sizes = [1, 32], strides = [1, 1]} : vector<27x32xf32> to vector<1x32xf32>
    %331 = vector.shape_cast %330 : vector<1x32xf32> to vector<32xf32>
    %332 = vector.shape_cast %331 : vector<32xf32> to vector<1x1x1x32xf32>
    %333 = vector.broadcast %332 : vector<1x1x1x32xf32> to vector<4x4x4x32xf32>
    %334 = arith.mulf %329, %333 : vector<4x4x4x32xf32>
    %335 = arith.addf %327, %334 : vector<4x4x4x32xf32>
    %c1_210 = arith.constant 1 : index
    %c0_211 = arith.constant 0 : index
    %c2_212 = arith.constant 2 : index
    %c1_213 = arith.constant 1 : index
    %c0_214 = arith.constant 0 : index
    %336 = vector.load %arg12[%c1_210, %c0_211, %c2_212, %c1_213, %c0_214] : memref<2x6x6x6x32xf32, #tpu.memory_space<vmem>>, vector<1x4x4x4x32xf32>
    %337 = vector.shape_cast %336 : vector<1x4x4x4x32xf32> to vector<4x4x4x32xf32>
    %338 = vector.extract_strided_slice %60 {offsets = [7, 0], sizes = [1, 32], strides = [1, 1]} : vector<27x32xf32> to vector<1x32xf32>
    %339 = vector.shape_cast %338 : vector<1x32xf32> to vector<32xf32>
    %340 = vector.shape_cast %339 : vector<32xf32> to vector<1x1x1x32xf32>
    %341 = vector.broadcast %340 : vector<1x1x1x32xf32> to vector<4x4x4x32xf32>
    %342 = arith.mulf %337, %341 : vector<4x4x4x32xf32>
    %343 = arith.addf %335, %342 : vector<4x4x4x32xf32>
    %c1_215 = arith.constant 1 : index
    %c0_216 = arith.constant 0 : index
    %c2_217 = arith.constant 2 : index
    %c2_218 = arith.constant 2 : index
    %c0_219 = arith.constant 0 : index
    %344 = vector.load %arg12[%c1_215, %c0_216, %c2_217, %c2_218, %c0_219] : memref<2x6x6x6x32xf32, #tpu.memory_space<vmem>>, vector<1x4x4x4x32xf32>
    %345 = vector.shape_cast %344 : vector<1x4x4x4x32xf32> to vector<4x4x4x32xf32>
    %346 = vector.extract_strided_slice %60 {offsets = [8, 0], sizes = [1, 32], strides = [1, 1]} : vector<27x32xf32> to vector<1x32xf32>
    %347 = vector.shape_cast %346 : vector<1x32xf32> to vector<32xf32>
    %348 = vector.shape_cast %347 : vector<32xf32> to vector<1x1x1x32xf32>
    %349 = vector.broadcast %348 : vector<1x1x1x32xf32> to vector<4x4x4x32xf32>
    %350 = arith.mulf %345, %349 : vector<4x4x4x32xf32>
    %351 = arith.addf %343, %350 : vector<4x4x4x32xf32>
    %c1_220 = arith.constant 1 : index
    %c1_221 = arith.constant 1 : index
    %c0_222 = arith.constant 0 : index
    %c0_223 = arith.constant 0 : index
    %c0_224 = arith.constant 0 : index
    %352 = vector.load %arg12[%c1_220, %c1_221, %c0_222, %c0_223, %c0_224] : memref<2x6x6x6x32xf32, #tpu.memory_space<vmem>>, vector<1x4x4x4x32xf32>
    %353 = vector.shape_cast %352 : vector<1x4x4x4x32xf32> to vector<4x4x4x32xf32>
    %354 = vector.extract_strided_slice %60 {offsets = [9, 0], sizes = [1, 32], strides = [1, 1]} : vector<27x32xf32> to vector<1x32xf32>
    %355 = vector.shape_cast %354 : vector<1x32xf32> to vector<32xf32>
    %356 = vector.shape_cast %355 : vector<32xf32> to vector<1x1x1x32xf32>
    %357 = vector.broadcast %356 : vector<1x1x1x32xf32> to vector<4x4x4x32xf32>
    %358 = arith.mulf %353, %357 : vector<4x4x4x32xf32>
    %359 = arith.addf %351, %358 : vector<4x4x4x32xf32>
    %c1_225 = arith.constant 1 : index
    %c1_226 = arith.constant 1 : index
    %c0_227 = arith.constant 0 : index
    %c1_228 = arith.constant 1 : index
    %c0_229 = arith.constant 0 : index
    %360 = vector.load %arg12[%c1_225, %c1_226, %c0_227, %c1_228, %c0_229] : memref<2x6x6x6x32xf32, #tpu.memory_space<vmem>>, vector<1x4x4x4x32xf32>
    %361 = vector.shape_cast %360 : vector<1x4x4x4x32xf32> to vector<4x4x4x32xf32>
    %362 = vector.extract_strided_slice %60 {offsets = [10, 0], sizes = [1, 32], strides = [1, 1]} : vector<27x32xf32> to vector<1x32xf32>
    %363 = vector.shape_cast %362 : vector<1x32xf32> to vector<32xf32>
    %364 = vector.shape_cast %363 : vector<32xf32> to vector<1x1x1x32xf32>
    %365 = vector.broadcast %364 : vector<1x1x1x32xf32> to vector<4x4x4x32xf32>
    %366 = arith.mulf %361, %365 : vector<4x4x4x32xf32>
    %367 = arith.addf %359, %366 : vector<4x4x4x32xf32>
    %c1_230 = arith.constant 1 : index
    %c1_231 = arith.constant 1 : index
    %c0_232 = arith.constant 0 : index
    %c2_233 = arith.constant 2 : index
    %c0_234 = arith.constant 0 : index
    %368 = vector.load %arg12[%c1_230, %c1_231, %c0_232, %c2_233, %c0_234] : memref<2x6x6x6x32xf32, #tpu.memory_space<vmem>>, vector<1x4x4x4x32xf32>
    %369 = vector.shape_cast %368 : vector<1x4x4x4x32xf32> to vector<4x4x4x32xf32>
    %370 = vector.extract_strided_slice %60 {offsets = [11, 0], sizes = [1, 32], strides = [1, 1]} : vector<27x32xf32> to vector<1x32xf32>
    %371 = vector.shape_cast %370 : vector<1x32xf32> to vector<32xf32>
    %372 = vector.shape_cast %371 : vector<32xf32> to vector<1x1x1x32xf32>
    %373 = vector.broadcast %372 : vector<1x1x1x32xf32> to vector<4x4x4x32xf32>
    %374 = arith.mulf %369, %373 : vector<4x4x4x32xf32>
    %375 = arith.addf %367, %374 : vector<4x4x4x32xf32>
    %c1_235 = arith.constant 1 : index
    %c1_236 = arith.constant 1 : index
    %c1_237 = arith.constant 1 : index
    %c0_238 = arith.constant 0 : index
    %c0_239 = arith.constant 0 : index
    %376 = vector.load %arg12[%c1_235, %c1_236, %c1_237, %c0_238, %c0_239] : memref<2x6x6x6x32xf32, #tpu.memory_space<vmem>>, vector<1x4x4x4x32xf32>
    %377 = vector.shape_cast %376 : vector<1x4x4x4x32xf32> to vector<4x4x4x32xf32>
    %378 = vector.extract_strided_slice %60 {offsets = [12, 0], sizes = [1, 32], strides = [1, 1]} : vector<27x32xf32> to vector<1x32xf32>
    %379 = vector.shape_cast %378 : vector<1x32xf32> to vector<32xf32>
    %380 = vector.shape_cast %379 : vector<32xf32> to vector<1x1x1x32xf32>
    %381 = vector.broadcast %380 : vector<1x1x1x32xf32> to vector<4x4x4x32xf32>
    %382 = arith.mulf %377, %381 : vector<4x4x4x32xf32>
    %383 = arith.addf %375, %382 : vector<4x4x4x32xf32>
    %c1_240 = arith.constant 1 : index
    %c1_241 = arith.constant 1 : index
    %c1_242 = arith.constant 1 : index
    %c1_243 = arith.constant 1 : index
    %c0_244 = arith.constant 0 : index
    %384 = vector.load %arg12[%c1_240, %c1_241, %c1_242, %c1_243, %c0_244] : memref<2x6x6x6x32xf32, #tpu.memory_space<vmem>>, vector<1x4x4x4x32xf32>
    %385 = vector.shape_cast %384 : vector<1x4x4x4x32xf32> to vector<4x4x4x32xf32>
    %386 = vector.extract_strided_slice %60 {offsets = [13, 0], sizes = [1, 32], strides = [1, 1]} : vector<27x32xf32> to vector<1x32xf32>
    %387 = vector.shape_cast %386 : vector<1x32xf32> to vector<32xf32>
    %388 = vector.shape_cast %387 : vector<32xf32> to vector<1x1x1x32xf32>
    %389 = vector.broadcast %388 : vector<1x1x1x32xf32> to vector<4x4x4x32xf32>
    %390 = arith.mulf %385, %389 : vector<4x4x4x32xf32>
    %391 = arith.addf %383, %390 : vector<4x4x4x32xf32>
    %c1_245 = arith.constant 1 : index
    %c1_246 = arith.constant 1 : index
    %c1_247 = arith.constant 1 : index
    %c2_248 = arith.constant 2 : index
    %c0_249 = arith.constant 0 : index
    %392 = vector.load %arg12[%c1_245, %c1_246, %c1_247, %c2_248, %c0_249] : memref<2x6x6x6x32xf32, #tpu.memory_space<vmem>>, vector<1x4x4x4x32xf32>
    %393 = vector.shape_cast %392 : vector<1x4x4x4x32xf32> to vector<4x4x4x32xf32>
    %394 = vector.extract_strided_slice %60 {offsets = [14, 0], sizes = [1, 32], strides = [1, 1]} : vector<27x32xf32> to vector<1x32xf32>
    %395 = vector.shape_cast %394 : vector<1x32xf32> to vector<32xf32>
    %396 = vector.shape_cast %395 : vector<32xf32> to vector<1x1x1x32xf32>
    %397 = vector.broadcast %396 : vector<1x1x1x32xf32> to vector<4x4x4x32xf32>
    %398 = arith.mulf %393, %397 : vector<4x4x4x32xf32>
    %399 = arith.addf %391, %398 : vector<4x4x4x32xf32>
    %c1_250 = arith.constant 1 : index
    %c1_251 = arith.constant 1 : index
    %c2_252 = arith.constant 2 : index
    %c0_253 = arith.constant 0 : index
    %c0_254 = arith.constant 0 : index
    %400 = vector.load %arg12[%c1_250, %c1_251, %c2_252, %c0_253, %c0_254] : memref<2x6x6x6x32xf32, #tpu.memory_space<vmem>>, vector<1x4x4x4x32xf32>
    %401 = vector.shape_cast %400 : vector<1x4x4x4x32xf32> to vector<4x4x4x32xf32>
    %402 = vector.extract_strided_slice %60 {offsets = [15, 0], sizes = [1, 32], strides = [1, 1]} : vector<27x32xf32> to vector<1x32xf32>
    %403 = vector.shape_cast %402 : vector<1x32xf32> to vector<32xf32>
    %404 = vector.shape_cast %403 : vector<32xf32> to vector<1x1x1x32xf32>
    %405 = vector.broadcast %404 : vector<1x1x1x32xf32> to vector<4x4x4x32xf32>
    %406 = arith.mulf %401, %405 : vector<4x4x4x32xf32>
    %407 = arith.addf %399, %406 : vector<4x4x4x32xf32>
    %c1_255 = arith.constant 1 : index
    %c1_256 = arith.constant 1 : index
    %c2_257 = arith.constant 2 : index
    %c1_258 = arith.constant 1 : index
    %c0_259 = arith.constant 0 : index
    %408 = vector.load %arg12[%c1_255, %c1_256, %c2_257, %c1_258, %c0_259] : memref<2x6x6x6x32xf32, #tpu.memory_space<vmem>>, vector<1x4x4x4x32xf32>
    %409 = vector.shape_cast %408 : vector<1x4x4x4x32xf32> to vector<4x4x4x32xf32>
    %410 = vector.extract_strided_slice %60 {offsets = [16, 0], sizes = [1, 32], strides = [1, 1]} : vector<27x32xf32> to vector<1x32xf32>
    %411 = vector.shape_cast %410 : vector<1x32xf32> to vector<32xf32>
    %412 = vector.shape_cast %411 : vector<32xf32> to vector<1x1x1x32xf32>
    %413 = vector.broadcast %412 : vector<1x1x1x32xf32> to vector<4x4x4x32xf32>
    %414 = arith.mulf %409, %413 : vector<4x4x4x32xf32>
    %415 = arith.addf %407, %414 : vector<4x4x4x32xf32>
    %c1_260 = arith.constant 1 : index
    %c1_261 = arith.constant 1 : index
    %c2_262 = arith.constant 2 : index
    %c2_263 = arith.constant 2 : index
    %c0_264 = arith.constant 0 : index
    %416 = vector.load %arg12[%c1_260, %c1_261, %c2_262, %c2_263, %c0_264] : memref<2x6x6x6x32xf32, #tpu.memory_space<vmem>>, vector<1x4x4x4x32xf32>
    %417 = vector.shape_cast %416 : vector<1x4x4x4x32xf32> to vector<4x4x4x32xf32>
    %418 = vector.extract_strided_slice %60 {offsets = [17, 0], sizes = [1, 32], strides = [1, 1]} : vector<27x32xf32> to vector<1x32xf32>
    %419 = vector.shape_cast %418 : vector<1x32xf32> to vector<32xf32>
    %420 = vector.shape_cast %419 : vector<32xf32> to vector<1x1x1x32xf32>
    %421 = vector.broadcast %420 : vector<1x1x1x32xf32> to vector<4x4x4x32xf32>
    %422 = arith.mulf %417, %421 : vector<4x4x4x32xf32>
    %423 = arith.addf %415, %422 : vector<4x4x4x32xf32>
    %c1_265 = arith.constant 1 : index
    %c2_266 = arith.constant 2 : index
    %c0_267 = arith.constant 0 : index
    %c0_268 = arith.constant 0 : index
    %c0_269 = arith.constant 0 : index
    %424 = vector.load %arg12[%c1_265, %c2_266, %c0_267, %c0_268, %c0_269] : memref<2x6x6x6x32xf32, #tpu.memory_space<vmem>>, vector<1x4x4x4x32xf32>
    %425 = vector.shape_cast %424 : vector<1x4x4x4x32xf32> to vector<4x4x4x32xf32>
    %426 = vector.extract_strided_slice %60 {offsets = [18, 0], sizes = [1, 32], strides = [1, 1]} : vector<27x32xf32> to vector<1x32xf32>
    %427 = vector.shape_cast %426 : vector<1x32xf32> to vector<32xf32>
    %428 = vector.shape_cast %427 : vector<32xf32> to vector<1x1x1x32xf32>
    %429 = vector.broadcast %428 : vector<1x1x1x32xf32> to vector<4x4x4x32xf32>
    %430 = arith.mulf %425, %429 : vector<4x4x4x32xf32>
    %431 = arith.addf %423, %430 : vector<4x4x4x32xf32>
    %c1_270 = arith.constant 1 : index
    %c2_271 = arith.constant 2 : index
    %c0_272 = arith.constant 0 : index
    %c1_273 = arith.constant 1 : index
    %c0_274 = arith.constant 0 : index
    %432 = vector.load %arg12[%c1_270, %c2_271, %c0_272, %c1_273, %c0_274] : memref<2x6x6x6x32xf32, #tpu.memory_space<vmem>>, vector<1x4x4x4x32xf32>
    %433 = vector.shape_cast %432 : vector<1x4x4x4x32xf32> to vector<4x4x4x32xf32>
    %434 = vector.extract_strided_slice %60 {offsets = [19, 0], sizes = [1, 32], strides = [1, 1]} : vector<27x32xf32> to vector<1x32xf32>
    %435 = vector.shape_cast %434 : vector<1x32xf32> to vector<32xf32>
    %436 = vector.shape_cast %435 : vector<32xf32> to vector<1x1x1x32xf32>
    %437 = vector.broadcast %436 : vector<1x1x1x32xf32> to vector<4x4x4x32xf32>
    %438 = arith.mulf %433, %437 : vector<4x4x4x32xf32>
    %439 = arith.addf %431, %438 : vector<4x4x4x32xf32>
    %c1_275 = arith.constant 1 : index
    %c2_276 = arith.constant 2 : index
    %c0_277 = arith.constant 0 : index
    %c2_278 = arith.constant 2 : index
    %c0_279 = arith.constant 0 : index
    %440 = vector.load %arg12[%c1_275, %c2_276, %c0_277, %c2_278, %c0_279] : memref<2x6x6x6x32xf32, #tpu.memory_space<vmem>>, vector<1x4x4x4x32xf32>
    %441 = vector.shape_cast %440 : vector<1x4x4x4x32xf32> to vector<4x4x4x32xf32>
    %442 = vector.extract_strided_slice %60 {offsets = [20, 0], sizes = [1, 32], strides = [1, 1]} : vector<27x32xf32> to vector<1x32xf32>
    %443 = vector.shape_cast %442 : vector<1x32xf32> to vector<32xf32>
    %444 = vector.shape_cast %443 : vector<32xf32> to vector<1x1x1x32xf32>
    %445 = vector.broadcast %444 : vector<1x1x1x32xf32> to vector<4x4x4x32xf32>
    %446 = arith.mulf %441, %445 : vector<4x4x4x32xf32>
    %447 = arith.addf %439, %446 : vector<4x4x4x32xf32>
    %c1_280 = arith.constant 1 : index
    %c2_281 = arith.constant 2 : index
    %c1_282 = arith.constant 1 : index
    %c0_283 = arith.constant 0 : index
    %c0_284 = arith.constant 0 : index
    %448 = vector.load %arg12[%c1_280, %c2_281, %c1_282, %c0_283, %c0_284] : memref<2x6x6x6x32xf32, #tpu.memory_space<vmem>>, vector<1x4x4x4x32xf32>
    %449 = vector.shape_cast %448 : vector<1x4x4x4x32xf32> to vector<4x4x4x32xf32>
    %450 = vector.extract_strided_slice %60 {offsets = [21, 0], sizes = [1, 32], strides = [1, 1]} : vector<27x32xf32> to vector<1x32xf32>
    %451 = vector.shape_cast %450 : vector<1x32xf32> to vector<32xf32>
    %452 = vector.shape_cast %451 : vector<32xf32> to vector<1x1x1x32xf32>
    %453 = vector.broadcast %452 : vector<1x1x1x32xf32> to vector<4x4x4x32xf32>
    %454 = arith.mulf %449, %453 : vector<4x4x4x32xf32>
    %455 = arith.addf %447, %454 : vector<4x4x4x32xf32>
    %c1_285 = arith.constant 1 : index
    %c2_286 = arith.constant 2 : index
    %c1_287 = arith.constant 1 : index
    %c1_288 = arith.constant 1 : index
    %c0_289 = arith.constant 0 : index
    %456 = vector.load %arg12[%c1_285, %c2_286, %c1_287, %c1_288, %c0_289] : memref<2x6x6x6x32xf32, #tpu.memory_space<vmem>>, vector<1x4x4x4x32xf32>
    %457 = vector.shape_cast %456 : vector<1x4x4x4x32xf32> to vector<4x4x4x32xf32>
    %458 = vector.extract_strided_slice %60 {offsets = [22, 0], sizes = [1, 32], strides = [1, 1]} : vector<27x32xf32> to vector<1x32xf32>
    %459 = vector.shape_cast %458 : vector<1x32xf32> to vector<32xf32>
    %460 = vector.shape_cast %459 : vector<32xf32> to vector<1x1x1x32xf32>
    %461 = vector.broadcast %460 : vector<1x1x1x32xf32> to vector<4x4x4x32xf32>
    %462 = arith.mulf %457, %461 : vector<4x4x4x32xf32>
    %463 = arith.addf %455, %462 : vector<4x4x4x32xf32>
    %c1_290 = arith.constant 1 : index
    %c2_291 = arith.constant 2 : index
    %c1_292 = arith.constant 1 : index
    %c2_293 = arith.constant 2 : index
    %c0_294 = arith.constant 0 : index
    %464 = vector.load %arg12[%c1_290, %c2_291, %c1_292, %c2_293, %c0_294] : memref<2x6x6x6x32xf32, #tpu.memory_space<vmem>>, vector<1x4x4x4x32xf32>
    %465 = vector.shape_cast %464 : vector<1x4x4x4x32xf32> to vector<4x4x4x32xf32>
    %466 = vector.extract_strided_slice %60 {offsets = [23, 0], sizes = [1, 32], strides = [1, 1]} : vector<27x32xf32> to vector<1x32xf32>
    %467 = vector.shape_cast %466 : vector<1x32xf32> to vector<32xf32>
    %468 = vector.shape_cast %467 : vector<32xf32> to vector<1x1x1x32xf32>
    %469 = vector.broadcast %468 : vector<1x1x1x32xf32> to vector<4x4x4x32xf32>
    %470 = arith.mulf %465, %469 : vector<4x4x4x32xf32>
    %471 = arith.addf %463, %470 : vector<4x4x4x32xf32>
    %c1_295 = arith.constant 1 : index
    %c2_296 = arith.constant 2 : index
    %c2_297 = arith.constant 2 : index
    %c0_298 = arith.constant 0 : index
    %c0_299 = arith.constant 0 : index
    %472 = vector.load %arg12[%c1_295, %c2_296, %c2_297, %c0_298, %c0_299] : memref<2x6x6x6x32xf32, #tpu.memory_space<vmem>>, vector<1x4x4x4x32xf32>
    %473 = vector.shape_cast %472 : vector<1x4x4x4x32xf32> to vector<4x4x4x32xf32>
    %474 = vector.extract_strided_slice %60 {offsets = [24, 0], sizes = [1, 32], strides = [1, 1]} : vector<27x32xf32> to vector<1x32xf32>
    %475 = vector.shape_cast %474 : vector<1x32xf32> to vector<32xf32>
    %476 = vector.shape_cast %475 : vector<32xf32> to vector<1x1x1x32xf32>
    %477 = vector.broadcast %476 : vector<1x1x1x32xf32> to vector<4x4x4x32xf32>
    %478 = arith.mulf %473, %477 : vector<4x4x4x32xf32>
    %479 = arith.addf %471, %478 : vector<4x4x4x32xf32>
    %c1_300 = arith.constant 1 : index
    %c2_301 = arith.constant 2 : index
    %c2_302 = arith.constant 2 : index
    %c1_303 = arith.constant 1 : index
    %c0_304 = arith.constant 0 : index
    %480 = vector.load %arg12[%c1_300, %c2_301, %c2_302, %c1_303, %c0_304] : memref<2x6x6x6x32xf32, #tpu.memory_space<vmem>>, vector<1x4x4x4x32xf32>
    %481 = vector.shape_cast %480 : vector<1x4x4x4x32xf32> to vector<4x4x4x32xf32>
    %482 = vector.extract_strided_slice %60 {offsets = [25, 0], sizes = [1, 32], strides = [1, 1]} : vector<27x32xf32> to vector<1x32xf32>
    %483 = vector.shape_cast %482 : vector<1x32xf32> to vector<32xf32>
    %484 = vector.shape_cast %483 : vector<32xf32> to vector<1x1x1x32xf32>
    %485 = vector.broadcast %484 : vector<1x1x1x32xf32> to vector<4x4x4x32xf32>
    %486 = arith.mulf %481, %485 : vector<4x4x4x32xf32>
    %487 = arith.addf %479, %486 : vector<4x4x4x32xf32>
    %c1_305 = arith.constant 1 : index
    %c2_306 = arith.constant 2 : index
    %c2_307 = arith.constant 2 : index
    %c2_308 = arith.constant 2 : index
    %c0_309 = arith.constant 0 : index
    %488 = vector.load %arg12[%c1_305, %c2_306, %c2_307, %c2_308, %c0_309] : memref<2x6x6x6x32xf32, #tpu.memory_space<vmem>>, vector<1x4x4x4x32xf32>
    %489 = vector.shape_cast %488 : vector<1x4x4x4x32xf32> to vector<4x4x4x32xf32>
    %490 = vector.extract_strided_slice %60 {offsets = [26, 0], sizes = [1, 32], strides = [1, 1]} : vector<27x32xf32> to vector<1x32xf32>
    %491 = vector.shape_cast %490 : vector<1x32xf32> to vector<32xf32>
    %492 = vector.shape_cast %491 : vector<32xf32> to vector<1x1x1x32xf32>
    %493 = vector.broadcast %492 : vector<1x1x1x32xf32> to vector<4x4x4x32xf32>
    %494 = arith.mulf %489, %493 : vector<4x4x4x32xf32>
    %495 = arith.addf %487, %494 : vector<4x4x4x32xf32>
    %496 = vector.shape_cast %495 : vector<4x4x4x32xf32> to vector<64x32xf32>
    %cst_310 = arith.constant dense<0.000000e+00> : vector<32xf32>
    %497 = vector.multi_reduction <add>, %278, %cst_310 [0] : vector<64x32xf32> to vector<32xf32>
    %498 = vector.shape_cast %497 : vector<32xf32> to vector<1x32xf32>
    %499 = arith.mulf %278, %278 : vector<64x32xf32>
    %cst_311 = arith.constant dense<0.000000e+00> : vector<32xf32>
    %500 = vector.multi_reduction <add>, %499, %cst_311 [0] : vector<64x32xf32> to vector<32xf32>
    %501 = vector.shape_cast %500 : vector<32xf32> to vector<1x32xf32>
    %cst_312 = arith.constant dense<0.000000e+00> : vector<32xf32>
    %502 = vector.multi_reduction <add>, %496, %cst_312 [0] : vector<64x32xf32> to vector<32xf32>
    %503 = vector.shape_cast %502 : vector<32xf32> to vector<1x32xf32>
    %504 = arith.mulf %496, %496 : vector<64x32xf32>
    %cst_313 = arith.constant dense<0.000000e+00> : vector<32xf32>
    %505 = vector.multi_reduction <add>, %504, %cst_313 [0] : vector<64x32xf32> to vector<32xf32>
    %506 = vector.shape_cast %505 : vector<32xf32> to vector<1x32xf32>
    %507 = arith.addf %498, %503 : vector<1x32xf32>
    %508 = arith.addf %501, %506 : vector<1x32xf32>
    %cst_314 = arith.constant 7.812500e-03 : f32
    %509 = vector.broadcast %cst_314 : f32 to vector<1x32xf32>
    %510 = arith.mulf %507, %509 : vector<1x32xf32>
    %cst_315 = arith.constant 7.812500e-03 : f32
    %511 = vector.broadcast %cst_315 : f32 to vector<1x32xf32>
    %512 = arith.mulf %508, %511 : vector<1x32xf32>
    %513 = arith.mulf %510, %510 : vector<1x32xf32>
    %514 = arith.subf %512, %513 : vector<1x32xf32>
    %cst_316 = arith.constant 0.000000e+00 : f32
    %515 = vector.broadcast %cst_316 : f32 to vector<1x32xf32>
    %516 = arith.maximumf %514, %515 : vector<1x32xf32>
    %c0_317 = arith.constant 0 : index
    %c0_318 = arith.constant 0 : index
    %517 = vector.load %arg7[%c0_317, %c0_318] : memref<1x32xf32, #tpu.memory_space<vmem>>, vector<1x32xf32>
    %cst_319 = arith.constant 9.99999974E-6 : f32
    %518 = vector.broadcast %cst_319 : f32 to vector<1x32xf32>
    %519 = arith.addf %516, %518 : vector<1x32xf32>
    %520 = math.rsqrt %519 : vector<1x32xf32>
    %521 = arith.mulf %517, %520 : vector<1x32xf32>
    %c0_320 = arith.constant 0 : index
    %c0_321 = arith.constant 0 : index
    %522 = vector.load %arg8[%c0_320, %c0_321] : memref<1x32xf32, #tpu.memory_space<vmem>>, vector<1x32xf32>
    %523 = arith.mulf %510, %521 : vector<1x32xf32>
    %524 = arith.subf %522, %523 : vector<1x32xf32>
    %525 = vector.broadcast %521 : vector<1x32xf32> to vector<64x32xf32>
    %526 = arith.mulf %278, %525 : vector<64x32xf32>
    %527 = vector.broadcast %524 : vector<1x32xf32> to vector<64x32xf32>
    %528 = arith.addf %526, %527 : vector<64x32xf32>
    %cst_322 = arith.constant 0.000000e+00 : f32
    %529 = vector.broadcast %cst_322 : f32 to vector<64x32xf32>
    %530 = arith.maximumf %528, %529 : vector<64x32xf32>
    %531 = vector.broadcast %521 : vector<1x32xf32> to vector<64x32xf32>
    %532 = arith.mulf %496, %531 : vector<64x32xf32>
    %533 = vector.broadcast %524 : vector<1x32xf32> to vector<64x32xf32>
    %534 = arith.addf %532, %533 : vector<64x32xf32>
    %cst_323 = arith.constant 0.000000e+00 : f32
    %535 = vector.broadcast %cst_323 : f32 to vector<64x32xf32>
    %536 = arith.maximumf %534, %535 : vector<64x32xf32>
    %c0_324 = arith.constant 0 : index
    %c0_325 = arith.constant 0 : index
    %537 = vector.load %arg4[%c0_324, %c0_325] : memref<128x32xf32, #tpu.memory_space<vmem>>, vector<128x32xf32>
    %538 = arith.truncf %537 : vector<128x32xf32> to vector<128x32xbf16>
    %539 = arith.truncf %530 : vector<64x32xf32> to vector<64x32xbf16>
    %cst_326 = arith.constant dense<0.000000e+00> : vector<128x64xf32>
    %540 = tpu.matmul %538, %539, %cst_326 {dimension_numbers = #tpu.dot_dimension_numbers<[1], [1], [0], [0], [0, 0, 1, 0], [], []>} : vector<128x32xbf16>, vector<64x32xbf16>, vector<128x64xf32> -> vector<128x64xf32>
    %541 = arith.truncf %536 : vector<64x32xf32> to vector<64x32xbf16>
    %cst_327 = arith.constant dense<0.000000e+00> : vector<128x64xf32>
    %542 = tpu.matmul %538, %541, %cst_327 {dimension_numbers = #tpu.dot_dimension_numbers<[1], [1], [0], [0], [0, 0, 1, 0], [], []>} : vector<128x32xbf16>, vector<64x32xbf16>, vector<128x64xf32> -> vector<128x64xf32>
    %cst_328 = arith.constant dense<0.000000e+00> : vector<128xf32>
    %543 = vector.multi_reduction <add>, %540, %cst_328 [1] : vector<128x64xf32> to vector<128xf32>
    %544 = vector.shape_cast %543 : vector<128xf32> to vector<128x1xf32>
    %545 = arith.mulf %540, %540 : vector<128x64xf32>
    %cst_329 = arith.constant dense<0.000000e+00> : vector<128xf32>
    %546 = vector.multi_reduction <add>, %545, %cst_329 [1] : vector<128x64xf32> to vector<128xf32>
    %547 = vector.shape_cast %546 : vector<128xf32> to vector<128x1xf32>
    %cst_330 = arith.constant dense<0.000000e+00> : vector<128xf32>
    %548 = vector.multi_reduction <add>, %542, %cst_330 [1] : vector<128x64xf32> to vector<128xf32>
    %549 = vector.shape_cast %548 : vector<128xf32> to vector<128x1xf32>
    %550 = arith.mulf %542, %542 : vector<128x64xf32>
    %cst_331 = arith.constant dense<0.000000e+00> : vector<128xf32>
    %551 = vector.multi_reduction <add>, %550, %cst_331 [1] : vector<128x64xf32> to vector<128xf32>
    %552 = vector.shape_cast %551 : vector<128xf32> to vector<128x1xf32>
    %553 = arith.addf %544, %549 : vector<128x1xf32>
    %554 = arith.addf %547, %552 : vector<128x1xf32>
    %cst_332 = arith.constant 7.812500e-03 : f32
    %555 = vector.broadcast %cst_332 : f32 to vector<128x1xf32>
    %556 = arith.mulf %553, %555 : vector<128x1xf32>
    %cst_333 = arith.constant 7.812500e-03 : f32
    %557 = vector.broadcast %cst_333 : f32 to vector<128x1xf32>
    %558 = arith.mulf %554, %557 : vector<128x1xf32>
    %559 = arith.mulf %556, %556 : vector<128x1xf32>
    %560 = arith.subf %558, %559 : vector<128x1xf32>
    %cst_334 = arith.constant 0.000000e+00 : f32
    %561 = vector.broadcast %cst_334 : f32 to vector<128x1xf32>
    %562 = arith.maximumf %560, %561 : vector<128x1xf32>
    %c0_335 = arith.constant 0 : index
    %c0_336 = arith.constant 0 : index
    %563 = vector.load %arg9[%c0_335, %c0_336] : memref<128x1xf32, #tpu.memory_space<vmem>>, vector<128x1xf32>
    %cst_337 = arith.constant 9.99999974E-6 : f32
    %564 = vector.broadcast %cst_337 : f32 to vector<128x1xf32>
    %565 = arith.addf %562, %564 : vector<128x1xf32>
    %566 = math.rsqrt %565 : vector<128x1xf32>
    %567 = arith.mulf %563, %566 : vector<128x1xf32>
    %c0_338 = arith.constant 0 : index
    %c0_339 = arith.constant 0 : index
    %568 = vector.load %arg10[%c0_338, %c0_339] : memref<128x1xf32, #tpu.memory_space<vmem>>, vector<128x1xf32>
    %569 = arith.mulf %556, %567 : vector<128x1xf32>
    %570 = arith.subf %568, %569 : vector<128x1xf32>
    %571 = vector.broadcast %567 : vector<128x1xf32> to vector<128x64xf32>
    %572 = arith.mulf %540, %571 : vector<128x64xf32>
    %573 = vector.broadcast %570 : vector<128x1xf32> to vector<128x64xf32>
    %574 = arith.addf %572, %573 : vector<128x64xf32>
    %c0_340 = arith.constant 0 : index
    %c0_341 = arith.constant 0 : index
    %c0_342 = arith.constant 0 : index
    %575 = vector.load %arg1[%c0_340, %c0_341, %c0_342] : memref<2x128x64xf32, #tpu.memory_space<vmem>>, vector<1x128x64xf32>
    %576 = vector.shape_cast %575 : vector<1x128x64xf32> to vector<128x64xf32>
    %577 = arith.addf %574, %576 : vector<128x64xf32>
    %cst_343 = arith.constant 0.000000e+00 : f32
    %578 = vector.broadcast %cst_343 : f32 to vector<128x64xf32>
    %579 = arith.maximumf %577, %578 : vector<128x64xf32>
    %c0_344 = arith.constant 0 : index
    %c0_345 = arith.constant 0 : index
    %c0_346 = arith.constant 0 : index
    %580 = vector.load %arg11[%c0_344, %c0_345, %c0_346] : memref<2x128x64xf32, #tpu.memory_space<vmem>>, vector<1x128x64xf32>
    %581 = vector.shape_cast %580 : vector<1x128x64xf32> to vector<128x64xf32>
    %582 = vector.shape_cast %579 : vector<128x64xf32> to vector<1x128x64xf32>
    tpu.vector_store %arg11[%c0_344, %c0_345, %c0_346], %582 {strides = array<i32>} : memref<2x128x64xf32, #tpu.memory_space<vmem>>, vector<1x128x64xf32>,
    %583 = vector.broadcast %567 : vector<128x1xf32> to vector<128x64xf32>
    %584 = arith.mulf %542, %583 : vector<128x64xf32>
    %585 = vector.broadcast %570 : vector<128x1xf32> to vector<128x64xf32>
    %586 = arith.addf %584, %585 : vector<128x64xf32>
    %c1_347 = arith.constant 1 : index
    %c0_348 = arith.constant 0 : index
    %c0_349 = arith.constant 0 : index
    %587 = vector.load %arg1[%c1_347, %c0_348, %c0_349] : memref<2x128x64xf32, #tpu.memory_space<vmem>>, vector<1x128x64xf32>
    %588 = vector.shape_cast %587 : vector<1x128x64xf32> to vector<128x64xf32>
    %589 = arith.addf %586, %588 : vector<128x64xf32>
    %cst_350 = arith.constant 0.000000e+00 : f32
    %590 = vector.broadcast %cst_350 : f32 to vector<128x64xf32>
    %591 = arith.maximumf %589, %590 : vector<128x64xf32>
    %c1_351 = arith.constant 1 : index
    %c0_352 = arith.constant 0 : index
    %c0_353 = arith.constant 0 : index
    %592 = vector.load %arg11[%c1_351, %c0_352, %c0_353] : memref<2x128x64xf32, #tpu.memory_space<vmem>>, vector<1x128x64xf32>
    %593 = vector.shape_cast %592 : vector<1x128x64xf32> to vector<128x64xf32>
    %594 = vector.shape_cast %591 : vector<128x64xf32> to vector<1x128x64xf32>
    tpu.vector_store %arg11[%c1_351, %c0_352, %c0_353], %594 {strides = array<i32>} : memref<2x128x64xf32, #tpu.memory_space<vmem>>, vector<1x128x64xf32>,
    return
  }
  func.func @transform_0(%arg0: i32) -> (i32, i32, i32) {
    %c0_i32 = arith.constant 0 : i32
    %c0_i32_0 = arith.constant 0 : i32
    %c0_i32_1 = arith.constant 0 : i32
    %c0_i32_2 = arith.constant 0 : i32
    return %c0_i32, %c0_i32_0, %c0_i32_1 : i32, i32, i32
  }
  func.func @transform_1(%arg0: i32) -> (i32, i32) {
    %c0_i32 = arith.constant 0 : i32
    %c0_i32_0 = arith.constant 0 : i32
    %c0_i32_1 = arith.constant 0 : i32
    return %c0_i32, %c0_i32_0 : i32, i32
  }
  func.func @transform_2(%arg0: i32) -> (i32, i32) {
    %c0_i32 = arith.constant 0 : i32
    %c0_i32_0 = arith.constant 0 : i32
    %c0_i32_1 = arith.constant 0 : i32
    return %c0_i32, %c0_i32_0 : i32, i32
  }
  func.func @transform_3(%arg0: i32) -> (i32, i32) {
    %c0_i32 = arith.constant 0 : i32
    %c0_i32_0 = arith.constant 0 : i32
    %c0_i32_1 = arith.constant 0 : i32
    return %c0_i32, %c0_i32_0 : i32, i32
  }
  func.func @transform_4(%arg0: i32) -> (i32, i32) {
    %c0_i32 = arith.constant 0 : i32
    %c0_i32_0 = arith.constant 0 : i32
    %c0_i32_1 = arith.constant 0 : i32
    return %c0_i32, %c0_i32_0 : i32, i32
  }
  func.func @transform_5(%arg0: i32) -> (i32, i32) {
    %c0_i32 = arith.constant 0 : i32
    %c0_i32_0 = arith.constant 0 : i32
    %c0_i32_1 = arith.constant 0 : i32
    return %c0_i32, %c0_i32_0 : i32, i32
  }
  func.func @transform_6(%arg0: i32) -> (i32, i32) {
    %c0_i32 = arith.constant 0 : i32
    %c0_i32_0 = arith.constant 0 : i32
    %c0_i32_1 = arith.constant 0 : i32
    return %c0_i32, %c0_i32_0 : i32, i32
  }
  func.func @transform_7(%arg0: i32) -> (i32, i32) {
    %c0_i32 = arith.constant 0 : i32
    %c0_i32_0 = arith.constant 0 : i32
    %c0_i32_1 = arith.constant 0 : i32
    return %c0_i32, %c0_i32_0 : i32, i32
  }
  func.func @transform_8(%arg0: i32) -> (i32, i32) {
    %c0_i32 = arith.constant 0 : i32
    %c0_i32_0 = arith.constant 0 : i32
    %c0_i32_1 = arith.constant 0 : i32
    return %c0_i32, %c0_i32_0 : i32, i32
  }
  func.func @transform_9(%arg0: i32) -> (i32, i32) {
    %c0_i32 = arith.constant 0 : i32
    %c0_i32_0 = arith.constant 0 : i32
    %c0_i32_1 = arith.constant 0 : i32
    return %c0_i32, %c0_i32_0 : i32, i32
  }
  func.func @transform_10(%arg0: i32) -> (i32, i32, i32) {
    %c0_i32 = arith.constant 0 : i32
    %c0_i32_0 = arith.constant 0 : i32
    %c0_i32_1 = arith.constant 0 : i32
    %c0_i32_2 = arith.constant 0 : i32
    return %c0_i32, %c0_i32_0, %c0_i32_1 : i32, i32, i32
  }
}

</mosaic_0001>

<bundles_post_ra>
// kernel: bottleneck_forward.1
= control target key start
LH: loop header
LB: loop body
LE: loop exit
PB: predicated region body
PF: predicated region fallthrough
CT: control target
= control target key end

     0   :  { %vm199_vm0 = vcmask 261120   ;;  %vm377_vm1 = vcmask 259072   ;;  %vm475_vm5 = vcmask 257024   ;;  %vm3924_vm9 = vcmask 523264   ;;  %s7926_s0 = inlined_call_operand.vmem [shape: f32[2,128,64], index: 0, kind: input, shape index: {}]   ;;  %s7927_s1 = inlined_call_operand.vmem [shape: f32[128,32], index: 1, kind: input, shape index: {}]   ;;  %s7928_s4 = inlined_call_operand.vmem [shape: f32[1,32], index: 4, kind: input, shape index: {}]   ;;  %s7929_s5 = inlined_call_operand.vmem [shape: f32[1,32], index: 5, kind: input, shape index: {}]   ;;  %s7930_s2 = inlined_call_operand.vmem [shape: f32[27,32], index: 2, kind: input, shape index: {}]   ;;  %s7931_s6 = inlined_call_operand.vmem [shape: f32[1,32], index: 6, kind: input, shape index: {}]   ;;  %s7932_s7 = inlined_call_operand.vmem [shape: f32[1,32], index: 7, kind: input, shape index: {}]   ;;  %s7933_s3 = inlined_call_operand.vmem [shape: f32[128,32], index: 3, kind: input, shape index: {}]   ;;  %s7934_s8 = inlined_call_operand.vmem [shape: f32[128,1], index: 8, kind: input, shape index: {}]   ;;  %s7935_s9 = inlined_call_operand.vmem [shape: f32[128,1], index: 9, kind: input, shape index: {}]   ;;  %s7936_s10 = inlined_call_operand.vmem [shape: f32[2,128,64], index: 10, kind: output, shape index: {}]  }
   0x1   :  { %v60_v0 = vld [vmem:[%s7926_s0] sm:$0xff]  ;;  %v61_v1 = vld [vmem:[%s7926_s0 + $0x8] sm:$0xff]  ;;  %v62_v6 = vld [vmem:[%s7926_s0 + $0x10] sm:$0xff] }
   0x2   :  { %v4874_v2 = vld [vmem:[%s7926_s0 + $0x80] sm:$0xff]  ;;  %v76_v3 = vpack.c.bf16 %v61_v1, %v60_v0  ;;  %v4875_v4 = vld [vmem:[%s7926_s0 + $0x88] sm:$0xff]  ;;  %v63_v7 = vld [vmem:[%s7926_s0 + $0x18] sm:$0xff] }
   0x3   :  { %v146_v5 = vpack.c.bf16 %v4875_v4, %v4874_v2  ;;  %v4876_v8 = vld [vmem:[%s7926_s0 + $0x90] sm:$0xff]  ;;  %v4877_v9 = vld [vmem:[%s7926_s0 + $0x98] sm:$0xff]  ;;  %v77_v10 = vpack.c.bf16 %v63_v7, %v62_v6  ;;  %v64_v12 = vld [vmem:[%s7926_s0 + $0x20] sm:$0xff] }
   0x4   :  { %v147_v11 = vpack.c.bf16 %v4877_v9, %v4876_v8  ;;  %v65_v13 = vld [vmem:[%s7926_s0 + $0x28] sm:$0xff]  ;;  %v4878_v14 = vld [vmem:[%s7926_s0 + $0xa0] sm:$0xff]  ;;  %v66_v18 = vld [vmem:[%s7926_s0 + $0x30] sm:$0xff] }
   0x5   :  { %4954 = vxpose.binary.xlu0.c.b16.start [1/16] (narrow) %v146_v5, %v76_v3, 64  ;;  %v4879_v15 = vld [vmem:[%s7926_s0 + $0xa8] sm:$0xff]  ;;  %v78_v16 = vpack.c.bf16 %v65_v13, %v64_v12  ;;  %v67_v19 = vld [vmem:[%s7926_s0 + $0x38] sm:$0xff]  ;;  %v4880_v20 = vld [vmem:[%s7926_s0 + $0xb0] sm:$0xff] }
   0x6   :  { %v148_v17 = vpack.c.bf16 %v4879_v15, %v4878_v14  ;;  %v4881_v21 = vld [vmem:[%s7926_s0 + $0xb8] sm:$0xff]  ;;  %v79_v22 = vpack.c.bf16 %v67_v19, %v66_v18  ;;  %v68_v24 = vld [vmem:[%s7926_s0 + $0x40] sm:$0xff]  ;;  %v69_v25 = vld [vmem:[%s7926_s0 + $0x48] sm:$0xff] }
   0x7   :  { %v149_v23 = vpack.c.bf16 %v4881_v21, %v4880_v20  ;;  %v4882_v26 = vld [vmem:[%s7926_s0 + $0xc0] sm:$0xff]  ;;  %v4883_v27 = vld [vmem:[%s7926_s0 + $0xc8] sm:$0xff]  ;;  %v80_v28 = vpack.c.bf16 %v69_v25, %v68_v24  ;;  %v70_v30 = vld [vmem:[%s7926_s0 + $0x50] sm:$0xff] }
   0x8   :  { %v150_v29 = vpack.c.bf16 %v4883_v27, %v4882_v26  ;;  %v71_v31 = vld [vmem:[%s7926_s0 + $0x58] sm:$0xff]  ;;  %v4884_v32 = vld [vmem:[%s7926_s0 + $0xd0] sm:$0xff]  ;;  %v48_v38 = vld [vmem:[%s7927_s1 + $0x60] sm:$0xff] }
   0x9   :  { %v4885_v33 = vld [vmem:[%s7926_s0 + $0xd8] sm:$0xff]  ;;  %v81_v34 = vpack.c.bf16 %v71_v31, %v70_v30  ;;  %v50_v36 = vld [vmem:[%s7927_s1 + $0x70] sm:$0xff]  ;;  %v49_v40 = vld [vmem:[%s7927_s1 + $0x68] sm:$0xff] }
   0xa   :  { %v151_v35 = vpack.c.bf16 %v4885_v33, %v4884_v32  ;;  %v51_v37 = vld [vmem:[%s7927_s1 + $0x78] sm:$0xff]  ;;  %v58_v41 = vpack.c.bf16 %v49_v40, %v48_v38  ;;  %v46_v42 = vld [vmem:[%s7927_s1 + $0x50] sm:$0xff]  ;;  %v72_v45 = vld [vmem:[%s7926_s0 + $0x60] sm:$0xff] }
   0xb   :  { %v59_v39 = vpack.c.bf16 %v51_v37, %v50_v36  ;;  %v47_v43 = vld [vmem:[%s7927_s1 + $0x58] sm:$0xff]  ;;  %v44_v46 = vld [vmem:[%s7927_s1 + $0x40] sm:$0xff]  ;;  %v45_v47 = vld [vmem:[%s7927_s1 + $0x48] sm:$0xff] }
   0xc   :  { %v57_v44 = vpack.c.bf16 %v47_v43, %v46_v42  ;;  %v73_v48 = vld [vmem:[%s7926_s0 + $0x68] sm:$0xff]  ;;  %v4886_v49 = vld [vmem:[%s7926_s0 + $0xe0] sm:$0xff]  ;;  %v56_v51 = vpack.c.bf16 %v45_v47, %v44_v46  ;;  %v42_v54 = vld [vmem:[%s7927_s1 + $0x30] sm:$0xff] }
   0xd   :  { %100 = vmatpush.bf16.msra.mxu0 %v59_v39  ;;  %170 = vmatpush.bf16.msra.mxu1 %v59_v39  ;;  %v4887_v50 = vld [vmem:[%s7926_s0 + $0xe8] sm:$0xff]  ;;  %v82_v52 = vpack.c.bf16 %v73_v48, %v72_v45  ;;  %v43_v55 = vld [vmem:[%s7927_s1 + $0x38] sm:$0xff]  ;;  %v40_v57 = vld [vmem:[%s7927_s1 + $0x20] sm:$0xff] }
   0xe   :  { %v152_v53 = vpack.c.bf16 %v4887_v50, %v4886_v49  ;;  %v55_v56 = vpack.c.bf16 %v43_v55, %v42_v54  ;;  %v41_v58 = vld [vmem:[%s7927_s1 + $0x28] sm:$0xff]  ;;  %v38_v60 = vld [vmem:[%s7927_s1 + $0x10] sm:$0xff]  ;;  %v39_v61 = vld [vmem:[%s7927_s1 + $0x18] sm:$0xff] }
   0xf   :  { %v54_v59 = vpack.c.bf16 %v41_v58, %v40_v57  ;;  %v53_v62 = vpack.c.bf16 %v39_v61, %v38_v60  ;;  %v74_v63 = vld [vmem:[%s7926_s0 + $0x70] sm:$0xff]  ;;  %v36_v0 = vld [vmem:[%s7927_s1] sm:$0xff]  ;;  %v37_v1 = vld [vmem:[%s7927_s1 + $0x8] sm:$0xff] }
  0x10   :  { %v75_v2 = vld [vmem:[%s7926_s0 + $0x78] sm:$0xff]  ;;  %v4888_v3 = vld [vmem:[%s7926_s0 + $0xf0] sm:$0xff]  ;;  %v52_v5 = vpack.c.bf16 %v37_v1, %v36_v0 }
  0x11   :  { %101 = vmatpush.bf16.msra.mxu0 %v58_v41  ;;  %171 = vmatpush.bf16.msra.mxu1 %v58_v41  ;;  %v4889_v4 = vld [vmem:[%s7926_s0 + $0xf8] sm:$0xff]  ;;  %v83_v6 = vpack.c.bf16 %v75_v2, %v74_v63 }
  0x12   :  { %v153_v7 = vpack.c.bf16 %v4889_v4, %v4888_v3 }
  0x15   :  { %4955 = vxpose.binary.xlu0.c.b16.cont [2/16] (narrow) %v147_v11, %v77_v10, 64 }
  0x16   :  { %102 = vmatpush.bf16.msra.mxu0 %v57_v44  ;;  %172 = vmatpush.bf16.msra.mxu1 %v57_v44 }
  0x1a   :  { %103 = vmatpush.bf16.msra.mxu0 %v56_v51  ;;  %173 = vmatpush.bf16.msra.mxu1 %v56_v51 }
  0x1e   :  { %104 = vmatpush.bf16.msra.mxu0 %v55_v56  ;;  %174 = vmatpush.bf16.msra.mxu1 %v55_v56 }
  0x22   :  { %105 = vmatpush.bf16.msra.mxu0 %v54_v59  ;;  %175 = vmatpush.bf16.msra.mxu1 %v54_v59 }
  0x25   :  { %4956 = vxpose.binary.xlu0.c.b16.cont [3/16] (narrow) %v148_v17, %v78_v16, 64 }
  0x26   :  { %106 = vmatpush.bf16.msra.mxu0 %v53_v62  ;;  %176 = vmatpush.bf16.msra.mxu1 %v53_v62 }
  0x2a   :  { %107 = vmatpush.bf16.msra.mxu0 %v52_v5  ;;  %177 = vmatpush.bf16.msra.mxu1 %v52_v5 }
  0x35   :  { %4957 = vxpose.binary.xlu0.c.b16.cont [4/16] (narrow) %v149_v23, %v79_v22, 64 }
  0x45   :  { %4958 = vxpose.binary.xlu0.c.b16.cont [5/16] (narrow) %v150_v29, %v80_v28, 64 }
  0x55   :  { %4959 = vxpose.binary.xlu0.c.b16.cont [6/16] (narrow) %v151_v35, %v81_v34, 64 }
  0x65   :  { %4960 = vxpose.binary.xlu0.c.b16.cont [7/16] (narrow) %v152_v53, %v82_v52, 64 }
  0x75   :  { %4961 = vxpose.binary.xlu0.c.b16.end [8/16] (narrow) %v153_v7, %v83_v6, 64 }
  0xb1   :  { %v4962_v8 = vpop.trf.xlu0 }
  0xb2   :  { %108 = vmatmul.bf16.vlgmr.msra.gmra.mxu0 %v4962_v8 }
  0xb9   :  { %v4963_v9 = vpop.trf.xlu0 }
  0xba   :  { %178 = vmatmul.bf16.vlgmr.msra.gmra.mxu1 %v4963_v9 }
  0xc1   :  { %v4964_v10 = vpop.trf.xlu0 }
  0xc2   :  { %113 = vmatmul.bf16.gmra.mxu0 %v4964_v10 }
  0xc9   :  { %v4965_v11 = vpop.trf.xlu0 }
  0xca   :  { %183 = vmatmul.bf16.gmra.mxu1 %v4965_v11 }
  0xd1   :  { %v4966_v12 = vpop.trf.xlu0 }
  0xd2   :  { %118 = vmatmul.bf16.gmra.mxu0 %v4966_v12 }
  0xd9   :  { %v4967_v13 = vpop.trf.xlu0 }
  0xda   :  { %188 = vmatmul.bf16.gmra.mxu1 %v4967_v13 }
  0xe1   :  { %v4968_v14 = vpop.trf.xlu0 }
  0xe2   :  { %123 = vmatmul.bf16.gmra.mxu0 %v4968_v14 }
  0xe9   :  { %v4969_v15 = vpop.trf.xlu0 }
  0xea   :  { %193 = vmatmul.bf16.gmra.mxu1 %v4969_v15 }
 0x12f   :  { %v5210_v16 = vpop.f32.mrf.mxu0 }
 0x130   :  { %v221_v28 = vmul.f32 %v5210_v16, %v5210_v16  ;;  %v200_v31 = vsel %vm199_vm0, %v5210_v16, 0.0 }
 0x132   :  { %v229_v37 = vsel %vm199_vm0, %v221_v28, 0.0 }
 0x137   :  { %v5212_v17 = vpop.f32.mrf.mxu0  ;;  %v5214_v18 = vpop.f32.mrf.mxu1 }
 0x138   :  { %v222_v27 = vmul.f32 %v5212_v17, %v5212_v17  ;;  %v201_v29 = vsel %vm199_vm0, %v5212_v17, 0.0  ;;  %v271_v45 = vmul.f32 %v5214_v18, %v5214_v18  ;;  %v250_v57 = vsel %vm199_vm0, %v5214_v18, 0.0 }
 0x139   :  { %v202_v35 = vadd.f32 %v201_v29, %v200_v31 }
 0x13a   :  { %v230_v32 = vsel %vm199_vm0, %v222_v27, 0.0  ;;  %v279_v61 = vsel %vm199_vm0, %v271_v45, 0.0 }
 0x13b   :  { %v231_v41 = vadd.f32 %v230_v32, %v229_v37 }
 0x13f   :  { %v5216_v19 = vpop.f32.mrf.mxu0  ;;  %v5218_v20 = vpop.f32.mrf.mxu1 }
 0x140   :  { %v223_v30 = vmul.f32 %v5216_v19, %v5216_v19  ;;  %v203_v33 = vsel %vm199_vm0, %v5216_v19, 0.0  ;;  %v272_v36 = vmul.f32 %v5218_v20, %v5218_v20  ;;  %v251_v50 = vsel %vm199_vm0, %v5218_v20, 0.0 }
 0x141   :  { %v204_v42 = vadd.f32 %v203_v33, %v202_v35  ;;  %v252_v1 = vadd.f32 %v251_v50, %v250_v57 }
 0x142   :  { %v232_v38 = vsel %vm199_vm0, %v223_v30, 0.0  ;;  %v280_v51 = vsel %vm199_vm0, %v272_v36, 0.0 }
 0x143   :  { %v233_v49 = vadd.f32 %v232_v38, %v231_v41  ;;  %v281_v2 = vadd.f32 %v280_v51, %v279_v61 }
 0x147   :  { %v5220_v21 = vpop.f32.mrf.mxu0  ;;  %v5222_v22 = vpop.f32.mrf.mxu1 }
 0x148   :  { %v224_v34 = vmul.f32 %v5220_v21, %v5220_v21  ;;  %v205_v39 = vsel %vm199_vm0, %v5220_v21, 0.0  ;;  %v273_v53 = vmul.f32 %v5222_v22, %v5222_v22  ;;  %v253_v62 = vsel %vm199_vm0, %v5222_v22, 0.0 }
 0x149   :  { %v206_v52 = vadd.f32 %v205_v39, %v204_v42  ;;  %v254_v9 = vadd.f32 %v253_v62, %v252_v1 }
 0x14a   :  { %v234_v46 = vsel %vm199_vm0, %v224_v34, 0.0  ;;  %v282_v5 = vsel %vm199_vm0, %v273_v53, 0.0 }
 0x14b   :  { %v235_v58 = vadd.f32 %v234_v46, %v233_v49  ;;  %v283_v30 = vadd.f32 %v282_v5, %v281_v2 }
 0x14f   :  { %v5224_v23 = vpop.f32.mrf.mxu0  ;;  %v5226_v24 = vpop.f32.mrf.mxu1 }
 0x150   :  { %v225_v40 = vmul.f32 %v5224_v23, %v5224_v23  ;;  %v207_v47 = vsel %vm199_vm0, %v5224_v23, 0.0  ;;  %v274_v60 = vmul.f32 %v5226_v24, %v5226_v24  ;;  %v255_v6 = vsel %vm199_vm0, %v5226_v24, 0.0 }
 0x151   :  { %v208_v59 = vadd.f32 %v207_v47, %v206_v52  ;;  %v256_v31 = vadd.f32 %v255_v6, %v254_v9 }
 0x152   :  { %v236_v54 = vsel %vm199_vm0, %v225_v40, 0.0  ;;  %v284_v10 = vsel %vm199_vm0, %v274_v60, 0.0 }
 0x153   :  { %v237_v3 = vadd.f32 %v236_v54, %v235_v58  ;;  %v285_v38 = vadd.f32 %v284_v10, %v283_v30 }
 0x157   :  { %v5228_v25 = vpop.f32.mrf.mxu0  ;;  %v5230_v26 = vpop.f32.mrf.mxu1 }
 0x158   :  { %v226_v48 = vmul.f32 %v5228_v25, %v5228_v25  ;;  %v209_v55 = vsel %vm199_vm0, %v5228_v25, 0.0  ;;  %v275_v7 = vmul.f32 %v5230_v26, %v5230_v26  ;;  %v257_v15 = vsel %vm199_vm0, %v5230_v26, 0.0 }
 0x159   :  { %v210_v4 = vadd.f32 %v209_v55, %v208_v59  ;;  %v258_v39 = vadd.f32 %v257_v15, %v256_v31 }
 0x15a   :  { %v238_v63 = vsel %vm199_vm0, %v226_v48, 0.0  ;;  %v286_v34 = vsel %vm199_vm0, %v275_v7, 0.0 }
 0x15b   :  { %v239_v11 = vadd.f32 %v238_v63, %v237_v3  ;;  %v287_v46 = vadd.f32 %v286_v34, %v285_v38 }
 0x15f   :  { %v5255_v43 = vpop.f32.mrf.mxu0  ;;  %v5257_v44 = vpop.f32.mrf.mxu1 }
 0x160   :  { %v227_v56 = vmul.f32 %v5255_v43, %v5255_v43  ;;  %v211_v0 = vsel %vm199_vm0, %v5255_v43, 0.0  ;;  %v276_v27 = vmul.f32 %v5257_v44, %v5257_v44  ;;  %v259_v35 = vsel %vm199_vm0, %v5257_v44, 0.0 }
 0x161   :  { %v212_v12 = vadd.f32 %v211_v0, %v210_v4  ;;  %v260_v47 = vadd.f32 %v259_v35, %v258_v39 }
 0x162   :  { %v240_v8 = vsel %vm199_vm0, %v227_v56, 0.0  ;;  %v288_v42 = vsel %vm199_vm0, %v276_v27, 0.0 }
 0x163   :  { %v241_v32 = vadd.f32 %v240_v8, %v239_v11  ;;  %v289_v51 = vadd.f32 %v288_v42, %v287_v46 }
 0x167   :  { %v5293_v13 = vpop.f32.mrf.mxu0  ;;  %v5295_v14 = vpop.f32.mrf.mxu1 }
 0x168   :  { %v213_v28 = vsel %vm199_vm0, %v5293_v13, 0.0  ;;  %v228_v29 = vmul.f32 %v5293_v13, %v5293_v13  ;;  %v277_v37 = vmul.f32 %v5295_v14, %v5295_v14  ;;  %v261_v45 = vsel %vm199_vm0, %v5295_v14, 0.0 }
 0x169   :  { %v214_v33 = vadd.f32 %v213_v28, %v212_v12  ;;  %v262_v53 = vadd.f32 %v261_v45, %v260_v47  ;;  %v5009_v12 = vmov 0.0   ;;  %v307_v47 = vld [vmem:[%s7928_s4] sm:$0x1] }
 0x16a   :  { %v242_v36 = vsel %vm199_vm0, %v228_v29, 0.0  ;;  %v290_v50 = vsel %vm199_vm0, %v277_v37, 0.0  ;;  %378 = vst.msk [vmem:[#allocation2] sm:$0x3f] %vm377_vm1, %v5009_v12 }
 0x16b   :  { %v215_v40 = vrot.slane %v214_v33, 4  ;;  %v243_v41 = vadd.f32 %v242_v36, %v241_v32  ;;  %v291_v58 = vadd.f32 %v290_v50, %v289_v51  ;;  %379 = vst.msk [vmem:[#allocation2 + $0x8] sm:$0x3f] %vm377_vm1, %v5009_v12  ;;  %v320_v51 = vld [vmem:[%s7929_s5] sm:$0x1] }
 0x16c   :  { %380 = vst.msk [vmem:[#allocation2 + $0x10] sm:$0x3f] %vm377_vm1, %v5009_v12 }
 0x16d   :  { %v216_v48 = vadd.f32 %v215_v40, %v214_v33  ;;  %v244_v49 = vrot.slane %v243_v41, 4  ;;  %381 = vst.msk [vmem:[#allocation2 + $0x18] sm:$0x3f] %vm377_vm1, %v5009_v12 }
 0x16e   :  { %382 = vst.msk [vmem:[#allocation2 + $0x20] sm:$0x3f] %vm377_vm1, %v5009_v12 }
 0x16f   :  { %v245_v52 = vadd.f32 %v244_v49, %v243_v41  ;;  %v5315_v54 = vpop.f32.mrf.mxu1  ;;  %v217_v57 = vrot.slane %v216_v48, 2  ;;  %383 = vst.msk [vmem:[#allocation2 + $0x28] sm:$0x3f] %vm377_vm1, %v5009_v12 }
 0x170   :  { %v263_v55 = vsel %vm199_vm0, %v5315_v54, 0.0  ;;  %v278_v56 = vmul.f32 %v5315_v54, %v5315_v54  ;;  %384 = vst.msk [vmem:[#allocation2 + $0x30] sm:$0x3f] %vm377_vm1, %v5009_v12 }
 0x171   :  { %v264_v59 = vadd.f32 %v263_v55, %v262_v53  ;;  %v246_v61 = vrot.slane %v245_v52, 2  ;;  %v218_v0 = vadd.f32 %v217_v57, %v216_v48  ;;  %385 = vst.msk [vmem:[#allocation2 + $0x38] sm:$0x3f] %vm377_vm1, %v5009_v12 }
 0x172   :  { %v292_v60 = vsel %vm199_vm0, %v278_v56, 0.0  ;;  %386 = vst.msk [vmem:[#allocation2 + $0x40] sm:$0x3f] %vm377_vm1, %v5009_v12 }
 0x173   :  { %v265_v62 = vrot.slane %v264_v59, 4  ;;  %v293_v63 = vadd.f32 %v292_v60, %v291_v58  ;;  %v247_v3 = vadd.f32 %v246_v61, %v245_v52  ;;  %v219_v6 = vrot.slane %v218_v0, 1  ;;  %387 = vst.msk [vmem:[#allocation2 + $0x48] sm:$0x3f] %vm377_vm1, %v5009_v12 }
 0x174   :  { %388 = vst.msk [vmem:[#allocation2 + $0x50] sm:$0x3f] %vm377_vm1, %v5009_v12 }
 0x175   :  { %v266_v1 = vadd.f32 %v265_v62, %v264_v59  ;;  %v294_v2 = vrot.slane %v293_v63, 4  ;;  %v248_v9 = vrot.slane %v247_v3, 1  ;;  %v220_v15 = vadd.f32 %v219_v6, %v218_v0  ;;  %389 = vst.msk [vmem:[#allocation2 + $0x58] sm:$0x3f] %vm377_vm1, %v5009_v12 }
 0x176   :  { %390 = vst.msk [vmem:[#allocation2 + $0x60] sm:$0x3f] %vm377_vm1, %v5009_v12 }
 0x177   :  { %v267_v4 = vrot.slane %v266_v1, 2  ;;  %v295_v5 = vadd.f32 %v294_v2, %v293_v63  ;;  %v249_v29 = vadd.f32 %v248_v9, %v247_v3  ;;  %391 = vst.msk [vmem:[#allocation2 + $0x68] sm:$0x3f] %vm377_vm1, %v5009_v12 }
 0x178   :  { %392 = vst.msk [vmem:[#allocation2 + $0x70] sm:$0x3f] %vm377_vm1, %v5009_v12 }
 0x179   :  { %v268_v7 = vadd.f32 %v267_v4, %v266_v1  ;;  %v296_v8 = vrot.slane %v295_v5, 2  ;;  %393 = vst.msk [vmem:[#allocation2 + $0x78] sm:$0x3f] %vm377_vm1, %v5009_v12 }
 0x17a   :  { %394 = vst.msk [vmem:[#allocation2 + $0x80] sm:$0x3f] %vm377_vm1, %v5009_v12 }
 0x17b   :  { %v269_v10 = vrot.slane %v268_v7, 1  ;;  %v297_v11 = vadd.f32 %v296_v8, %v295_v5  ;;  %395 = vst.msk [vmem:[#allocation2 + $0x88] sm:$0x3f] %vm377_vm1, %v5009_v12 }
 0x17c   :  { %396 = vst.msk [vmem:[#allocation2 + $0x90] sm:$0x3f] %vm377_vm1, %v5009_v12 }
 0x17d   :  { %v270_v27 = vadd.f32 %v269_v10, %v268_v7  ;;  %v298_v28 = vrot.slane %v297_v11, 1  ;;  %397 = vst.msk [vmem:[#allocation2 + $0x98] sm:$0x3f] %vm377_vm1, %v5009_v12 }
 0x17e   :  { %398 = vst.msk [vmem:[#allocation2 + $0xa0] sm:$0x3f] %vm377_vm1, %v5009_v12 }
 0x17f   :  { %v299_v30 = vadd.f32 %v298_v28, %v297_v11  ;;  %v300_v31 = vadd.f32 %v270_v27, %v220_v15  ;;  %399 = vst.msk [vmem:[#allocation2 + $0xa8] sm:$0x3f] %vm377_vm1, %v5009_v12 }
 0x180   :  { %400 = vst.msk [vmem:[#allocation2 + $0xb0] sm:$0x3f] %vm377_vm1, %v5009_v12 }
 0x181   :  { %v301_v32 = vadd.f32 %v299_v30, %v249_v29  ;;  %v5334_v33 = vmul.f32 0.0078125, %v300_v31  ;;  %401 = vst.msk [vmem:[#allocation2 + $0xb8] sm:$0x3f] %vm377_vm1, %v5009_v12 }
 0x182   :  { %402 = vst.msk [vmem:[#allocation2 + $0xc0] sm:$0x3f] %vm377_vm1, %v5009_v12 }
 0x183   :  { %v303_v34 = vmul.f32 0.0078125, %v301_v32  ;;  %v304_v35 = vmul.f32 %v5334_v33, %v5334_v33  ;;  %403 = vst.msk [vmem:[#allocation2 + $0xc8] sm:$0x3f] %vm377_vm1, %v5009_v12 }
 0x184   :  { %404 = vst.msk [vmem:[#allocation2 + $0xd0] sm:$0x3f] %vm377_vm1, %v5009_v12 }
 0x185   :  { %v305_v36 = vsub.f32 %v303_v34, %v304_v35  ;;  %405 = vst.msk [vmem:[#allocation2 + $0xd8] sm:$0x3f] %vm377_vm1, %v5009_v12 }
 0x186   :  { %406 = vst.msk [vmem:[#allocation2 + $0xe0] sm:$0x3f] %vm377_vm1, %v5009_v12 }
 0x187   :  { %v306_v37 = vmax.f32 %v305_v36, 0.0  ;;  %407 = vst.msk [vmem:[#allocation2 + $0xe8] sm:$0x3f] %vm377_vm1, %v5009_v12 }
 0x188   :  { %408 = vst.msk [vmem:[#allocation2 + $0xf0] sm:$0x3f] %vm377_vm1, %v5009_v12 }
 0x189   :  { %v308_v38 = vadd.f32 1e-05, %v306_v37  ;;  %409 = vst.msk [vmem:[#allocation2 + $0xf8] sm:$0x3f] %vm377_vm1, %v5009_v12  ;;  %v5543_v37 = vld [vmem:[%s7930_s2] sm:$0xff] }
 0x18a   :  { %410 = vst.msk [vmem:[#allocation2 + $0x100] sm:$0x3f] %vm377_vm1, %v5009_v12 }
 0x18b   :  { %4973 = vrsqrt.f32 %v308_v38  ;;  %411 = vst.msk [vmem:[#allocation2 + $0x108] sm:$0x3f] %vm377_vm1, %v5009_v12  ;;  %vm315_vm3 = vweird.f32 %v308_v38 }
 0x18c   :  { %412 = vst.msk [vmem:[#allocation2 + $0x110] sm:$0x3f] %vm377_vm1, %v5009_v12 }
 0x18d   :  { %413 = vst.msk [vmem:[#allocation2 + $0x118] sm:$0x3f] %vm377_vm1, %v5009_v12 }
 0x18e   :  { %414 = vst.msk [vmem:[#allocation2 + $0x120] sm:$0x3f] %vm377_vm1, %v5009_v12 }
 0x18f   :  { %415 = vst.msk [vmem:[#allocation2 + $0x128] sm:$0x3f] %vm377_vm1, %v5009_v12 }
 0x190   :  { %416 = vst.msk [vmem:[#allocation2 + $0x130] sm:$0x3f] %vm377_vm1, %v5009_v12 }
 0x191   :  { %v4974_v39 = vpop.eup %4973  ;;  %417 = vst.msk [vmem:[#allocation2 + $0x138] sm:$0x3f] %vm377_vm1, %v5009_v12 }
 0x192   :  { %v310_v40 = vmul.f32 %v4974_v39, %v308_v38  ;;  %vm316_vm2 = vweird.f32 %v4974_v39  ;;  %418 = vst.msk [vmem:[#allocation2 + $0x140] sm:$0x3f] %vm377_vm1, %v5009_v12 }
 0x193   :  { %vm317_vm4 = vmor %vm315_vm3, %vm316_vm2  ;;  %419 = vst.msk [vmem:[#allocation2 + $0x148] sm:$0x3f] %vm377_vm1, %v5009_v12 }
 0x194   :  { %v311_v41 = vmul.f32 %v4974_v39, %v310_v40  ;;  %420 = vst.msk [vmem:[#allocation2 + $0x150] sm:$0x3f] %vm377_vm1, %v5009_v12 }
 0x195   :  { %421 = vst.msk [vmem:[#allocation2 + $0x158] sm:$0x3f] %vm377_vm1, %v5009_v12 }
 0x196   :  { %v312_v42 = vmul.f32 0.5, %v311_v41  ;;  %422 = vst.msk [vmem:[#allocation2 + $0x160] sm:$0x3f] %vm377_vm1, %v5009_v12 }
 0x197   :  { %423 = vst.msk [vmem:[#allocation2 + $0x168] sm:$0x3f] %vm377_vm1, %v5009_v12 }
 0x198   :  { %v313_v45 = vsub.f32 1.5, %v312_v42  ;;  %424 = vst.msk [vmem:[#allocation2 + $0x170] sm:$0x3f] %vm377_vm1, %v5009_v12 }
 0x199   :  { %425 = vst.msk [vmem:[#allocation2 + $0x178] sm:$0x3f] %vm377_vm1, %v5009_v12 }
 0x19a   :  { %v314_v46 = vmul.f32 %v4974_v39, %v313_v45  ;;  %426 = vst.msk [vmem:[#allocation2 + $0x180] sm:$0x3f] %vm377_vm1, %v5009_v12 }
 0x19b   :  { %427 = vst.msk [vmem:[#allocation2 + $0x188] sm:$0x3f] %vm377_vm1, %v5009_v12 }
 0x19c   :  { %v318_v48 = vsel %vm317_vm4, %v4974_v39, %v314_v46  ;;  %428 = vst.msk [vmem:[#allocation2 + $0x190] sm:$0x3f] %vm377_vm1, %v5009_v12 }
 0x19d   :  { %v319_v49 = vmul.f32 %v318_v48, %v307_v47  ;;  %429 = vst.msk [vmem:[#allocation2 + $0x198] sm:$0x3f] %vm377_vm1, %v5009_v12  ;;  %v5559_v48 = vperm.slane %v5543_v37, 1 }
 0x19e   :  { %430 = vst.msk [vmem:[#allocation2 + $0x1a0] sm:$0x3f] %vm377_vm1, %v5009_v12 }
 0x19f   :  { %v321_v50 = vmul.f32 %v319_v49, %v5334_v33  ;;  %431 = vst.msk [vmem:[#allocation2 + $0x1a8] sm:$0x3f] %vm377_vm1, %v5009_v12  ;;  %v5443_v53 = vperm.slane %v319_v49, 0  ;;  %v537_v49 = vld [vmem:[#allocation2] sm:$0xf] }
 0x1a0   :  { %432 = vst.msk [vmem:[#allocation2 + $0x1b0] sm:$0x3f] %vm377_vm1, %v5009_v12 }
 0x1a1   :  { %v322_v52 = vsub.f32 %v320_v51, %v321_v50  ;;  %433 = vst.msk [vmem:[#allocation2 + $0x1b8] sm:$0x3f] %vm377_vm1, %v5009_v12  ;;  %v326_v56 = vmul.f32 %v5443_v53, %v5210_v16  ;;  %v327_v57 = vmul.f32 %v5443_v53, %v5212_v17  ;;  %v328_v16 = vmul.f32 %v5443_v53, %v5216_v19  ;;  %v586_v50 = vld [vmem:[#allocation2 + $0x1] sm:$0xf] }
 0x1a2   :  { %434 = vst.msk [vmem:[#allocation2 + $0x1c0] sm:$0x3f] %vm377_vm1, %v5009_v12  ;;  %v329_v17 = vmul.f32 %v5443_v53, %v5220_v21  ;;  %v330_v19 = vmul.f32 %v5443_v53, %v5224_v23  ;;  %v331_v21 = vmul.f32 %v5443_v53, %v5228_v25  ;;  %v332_v2 = vmul.f32 %v5443_v53, %v5255_v43 }
 0x1a3   :  { %v5449_v55 = vperm.slane %v322_v52, 0  ;;  %435 = vst.msk [vmem:[#allocation2 + $0x1c8] sm:$0x3f] %vm377_vm1, %v5009_v12  ;;  %v333_v5 = vmul.f32 %v5443_v53, %v5293_v13  ;;  %v353_v43 = vmul.f32 %v5443_v53, %v5214_v18  ;;  %v354_v11 = vmul.f32 %v5443_v53, %v5218_v20  ;;  %v538_v52 = vld [vmem:[#allocation2 + $0x8] sm:$0xf] }
 0x1a4   :  { %436 = vst.msk [vmem:[#allocation2 + $0x1d0] sm:$0x3f] %vm377_vm1, %v5009_v12  ;;  %v355_v18 = vmul.f32 %v5443_v53, %v5222_v22  ;;  %v356_v29 = vmul.f32 %v5443_v53, %v5226_v24  ;;  %v357_v20 = vmul.f32 %v5443_v53, %v5230_v26  ;;  %v358_v30 = vmul.f32 %v5443_v53, %v5257_v44 }
 0x1a5   :  { %437 = vst.msk [vmem:[#allocation2 + $0x1d8] sm:$0x3f] %vm377_vm1, %v5009_v12  ;;  %v337_v58 = vadd.f32 %v5449_v55, %v326_v56  ;;  %v338_v59 = vadd.f32 %v5449_v55, %v327_v57  ;;  %v339_v60 = vadd.f32 %v5449_v55, %v328_v16  ;;  %v340_v62 = vadd.f32 %v5449_v55, %v329_v17 }
 0x1a6   :  { %438 = vst.msk [vmem:[#allocation2 + $0x1e0] sm:$0x3f] %vm377_vm1, %v5009_v12  ;;  %v341_v0 = vadd.f32 %v5449_v55, %v330_v19  ;;  %v342_v3 = vadd.f32 %v5449_v55, %v331_v21  ;;  %v343_v6 = vadd.f32 %v5449_v55, %v332_v2  ;;  %v344_v9 = vadd.f32 %v5449_v55, %v333_v5  ;;  %v588_v21 = vld [vmem:[#allocation2 + $0x11] sm:$0xf]  ;;  %v638_v5 = vld [vmem:[#allocation2 + $0x1a] sm:$0xf] }
 0x1a7   :  { %439 = vst.msk [vmem:[#allocation2 + $0x1e8] sm:$0x3f] %vm377_vm1, %v5009_v12  ;;  %v345_v61 = vmax.f32 %v337_v58, 0.0  ;;  %v346_v63 = vmax.f32 %v338_v59, 0.0  ;;  %v347_v1 = vmax.f32 %v339_v60, 0.0  ;;  %v348_v4 = vmax.f32 %v340_v62, 0.0 }
 0x1a8   :  { %440 = vst.msk [vmem:[#allocation2 + $0x1f0] sm:$0x3f] %vm377_vm1, %v5009_v12  ;;  %v349_v7 = vmax.f32 %v341_v0, 0.0  ;;  %v350_v10 = vmax.f32 %v342_v3, 0.0  ;;  %v351_v13 = vmax.f32 %v343_v6, 0.0  ;;  %v361_v15 = vadd.f32 %v353_v43, %v5449_v55 }
 0x1a9   :  { %441 = vst.msk [vmem:[#allocation2 + $0x1f8] sm:$0x3f] %vm377_vm1, %v5009_v12  ;;  %v458_v23 = vrot.slane %v345_v61, 4  ;;  %v459_v25 = vrot.slane %v346_v63, 4  ;;  %v460_v8 = vrot.slane %v347_v1, 4  ;;  %v362_v27 = vadd.f32 %v354_v11, %v5449_v55 }
 0x1aa   :  { %442 = vst.msk [vmem:[#allocation2 + $0x200] sm:$0x3f] %vm377_vm1, %v5009_v12  ;;  %v462_v28 = vrot.slane %v349_v7, 4  ;;  %v352_v31 = vmax.f32 %v344_v9, 0.0  ;;  %v463_v32 = vrot.slane %v350_v10, 4  ;;  %v363_v33 = vadd.f32 %v355_v18, %v5449_v55 }
 0x1ab   :  { %443 = vst.msk [vmem:[#allocation2 + $0x208] sm:$0x3f] %vm377_vm1, %v5009_v12  ;;  %v364_v34 = vadd.f32 %v356_v29, %v5449_v55  ;;  %v5530_v22 = vadd.f32 %v357_v20, %v5449_v55  ;;  %v5533_v24 = vadd.f32 %v358_v30, %v5449_v55  ;;  %v359_v26 = vmul.f32 %v5443_v53, %v5295_v14  ;;  %v540_v59 = vld [vmem:[#allocation2 + $0x18] sm:$0xf]  ;;  %v636_v0 = vld [vmem:[#allocation2 + $0xa] sm:$0xf] }
 0x1ac   :  { %444 = vst.msk [vmem:[#allocation2 + $0x210] sm:$0x3f] %vm377_vm1, %v5009_v12  ;;  %v369_v44 = vmax.f32 %v361_v15, 0.0  ;;  %v370_v35 = vmax.f32 %v362_v27, 0.0  ;;  %v464_v36 = vrot.slane %v351_v13, 4  ;;  %v360_v38 = vmul.f32 %v5443_v53, %v5315_v54 }
 0x1ad   :  { %445 = vst.msk [vmem:[#allocation2 + $0x218] sm:$0x3f] %vm377_vm1, %v5009_v12  ;;  %v5548_v39 = vadd.f32 %v359_v26, %v5449_v55  ;;  %v465_v40 = vrot.slane %v352_v31, 4  ;;  %v371_v14 = vmax.f32 %v363_v33, 0.0  ;;  %v372_v41 = vmax.f32 %v364_v34, 0.0 }
 0x1ae   :  { %446 = vst.msk [vmem:[#allocation2 + $0x220] sm:$0x3f] %vm377_vm1, %v5009_v12  ;;  %v373_v42 = vmax.f32 %v5530_v22, 0.0  ;;  %v374_v45 = vmax.f32 %v5533_v24, 0.0  ;;  %v500_v46 = vrot.slane %v369_v44, 4  ;;  %v501_v47 = vrot.slane %v370_v35, 4 }
 0x1af   :  { %447 = vst.msk [vmem:[#allocation2 + $0x228] sm:$0x3f] %vm377_vm1, %v5009_v12  ;;  %v5556_v54 = vperm.slane %v5543_v37, 0  ;;  %v5563_v51 = vadd.f32 %v360_v38, %v5449_v55  ;;  %v587_v53 = vld [vmem:[#allocation2 + $0x9] sm:$0xf]  ;;  %v375_v56 = vmax.f32 %v5548_v39, 0.0  ;;  %v603_v60 = vmul.f32 %v5559_v48, %v586_v50 }
 0x1b0   :  { %448 = vst.msk [vmem:[#allocation2 + $0x230] sm:$0x3f] %vm377_vm1, %v5009_v12  ;;  %v502_v57 = vrot.slane %v371_v14, 4  ;;  %v503_v58 = vrot.slane %v372_v41, 4  ;;  %v5569_v16 = vperm.slane %v5543_v37, 2  ;;  %v604_v62 = vmul.f32 %v5559_v48, %v587_v53 }
 0x1b1   :  { %449 = vst.msk [vmem:[#allocation2 + $0x238] sm:$0x3f] %vm377_vm1, %v5009_v12  ;;  %v461_v12 = vrot.slane %v348_v4, 4  ;;  %v554_v17 = vmul.f32 %v5556_v54, %v537_v49  ;;  %v589_v55 = vld [vmem:[#allocation2 + $0x19] sm:$0xf]  ;;  %v555_v19 = vmul.f32 %v5556_v54, %v538_v52  ;;  %v557_v2 = vmul.f32 %v5556_v54, %v540_v59 }
 0x1b2   :  { %476 = vst.msk [vmem:[#allocation2 + $0x39] sm:$0xf] %vm475_vm5, %v345_v61  ;;  %v539_v61 = vld [vmem:[#allocation2 + $0x10] sm:$0xf]  ;;  %v606_v3 = vmul.f32 %v5559_v48, %v589_v55  ;;  %v605_v43 = vmul.f32 %v5559_v48, %v588_v21  ;;  %v685_v11 = vld [vmem:[#allocation2 + $0x8] sm:$0xf] }
 0x1b3   :  { %477 = vst.msk [vmem:[#allocation2 + $0x41] sm:$0xf] %vm475_vm5, %v458_v23  ;;  %v504_v23 = vrot.slane %v373_v42, 4  ;;  %v620_v9 = vadd.f32 %v604_v62, %v555_v19  ;;  %v506_v15 = vrot.slane %v375_v56, 4  ;;  %v688_v20 = vld [vmem:[#allocation2 + $0x20] sm:$0xf] }
 0x1b4   :  { %478 = vst.msk [vmem:[#allocation2 + $0x49] sm:$0xf] %vm475_vm5, %v346_v63  ;;  %v635_v63 = vld [vmem:[#allocation2 + $0x2] sm:$0xf]  ;;  %v622_v27 = vadd.f32 %v606_v3, %v557_v2  ;;  %v734_v24 = vld [vmem:[#allocation2 + $0x9] sm:$0xf] }
 0x1b5   :  { %479 = vst.msk [vmem:[#allocation2 + $0x51] sm:$0xf] %vm475_vm5, %v459_v25  ;;  %v619_v25 = vadd.f32 %v603_v60, %v554_v17  ;;  %v652_v6 = vmul.f32 %v5569_v16, %v635_v63  ;;  %v687_v26 = vld [vmem:[#allocation2 + $0x18] sm:$0xf]  ;;  %v737_v39 = vld [vmem:[#allocation2 + $0x21] sm:$0xf] }
 0x1b6   :  { %480 = vst.msk [vmem:[#allocation2 + $0x69] sm:$0xf] %vm475_vm5, %v347_v1  ;;  %v376_v1 = vmax.f32 %v5563_v51, 0.0  ;;  %v5612_v49 = vperm.slane %v5543_v37, 5  ;;  %v541_v50 = vld [vmem:[#allocation2 + $0x30] sm:$0xf] }
 0x1b7   :  { %481 = vst.msk [vmem:[#allocation2 + $0x71] sm:$0xf] %vm475_vm5, %v460_v8  ;;  %v556_v8 = vmul.f32 %v5556_v54, %v539_v61  ;;  %v668_v29 = vadd.f32 %v652_v6, %v619_v25  ;;  %v590_v51 = vld [vmem:[#allocation2 + $0x31] sm:$0xf]  ;;  %v786_v59 = vld [vmem:[#allocation2 + $0x22] sm:$0xf] }
 0x1b8   :  { %482 = vst.msk [vmem:[#allocation2 + $0x79] sm:$0xf] %vm475_vm5, %v348_v4  ;;  %v505_v4 = vrot.slane %v374_v45, 4  ;;  %v507_v18 = vrot.slane %v376_v1, 4  ;;  %v549_v55 = vld [vmem:[#allocation2 + $0x90] sm:$0xf]  ;;  %v607_v2 = vmul.f32 %v5559_v48, %v590_v51 }
 0x1b9   :  { %483 = vst.msk [vmem:[#allocation2 + $0x81] sm:$0xf] %vm475_vm5, %v461_v12  ;;  %v637_v12 = vld [vmem:[#allocation2 + $0x12] sm:$0xf]  ;;  %v542_v17 = vld [vmem:[#allocation2 + $0x38] sm:$0xf] }
 0x1ba   :  { %484 = vst.msk [vmem:[#allocation2 + $0x99] sm:$0xf] %vm475_vm5, %v349_v7  ;;  %v5585_v7 = vperm.slane %v5543_v37, 3  ;;  %v654_v33 = vmul.f32 %v5569_v16, %v637_v12  ;;  %v598_v60 = vld [vmem:[#allocation2 + $0x91] sm:$0xf] }
 0x1bb   :  { %485 = vst.msk [vmem:[#allocation2 + $0xa1] sm:$0xf] %vm475_vm5, %v462_v28  ;;  %v655_v28 = vmul.f32 %v5569_v16, %v638_v5  ;;  %v543_v21 = vld [vmem:[#allocation2 + $0x40] sm:$0xf]  ;;  %v639_v6 = vld [vmem:[#allocation2 + $0x32] sm:$0xf] }
 0x1bc   :  { %486 = vst.msk [vmem:[#allocation2 + $0xa9] sm:$0xf] %vm475_vm5, %v350_v10  ;;  %v653_v10 = vmul.f32 %v5569_v16, %v636_v0  ;;  %v702_v30 = vmul.f32 %v5585_v7, %v685_v11  ;;  %v558_v0 = vmul.f32 %v5556_v54, %v541_v50  ;;  %v643_v11 = vld [vmem:[#allocation2 + $0x62] sm:$0xf]  ;;  %v647_v12 = vld [vmem:[#allocation2 + $0x92] sm:$0xf] }
 0x1bd   :  { %487 = vst.msk [vmem:[#allocation2 + $0xb1] sm:$0xf] %vm475_vm5, %v463_v32  ;;  %v621_v32 = vadd.f32 %v605_v43, %v556_v8  ;;  %v803_v43 = vmul.f32 %v5612_v49, %v786_v59  ;;  %v664_v51 = vmul.f32 %v5569_v16, %v647_v12 }
 0x1be   :  { %488 = vst.msk [vmem:[#allocation2 + $0xc9] sm:$0xf] %vm475_vm5, %v351_v13  ;;  %v686_v13 = vld [vmem:[#allocation2 + $0x10] sm:$0xf]  ;;  %v669_v34 = vadd.f32 %v653_v10, %v620_v9  ;;  %v718_v38 = vadd.f32 %v702_v30, %v668_v29  ;;  %v566_v9 = vmul.f32 %v5556_v54, %v549_v55  ;;  %v615_v10 = vmul.f32 %v5559_v48, %v598_v60  ;;  %v640_v30 = vld [vmem:[#allocation2 + $0x3a] sm:$0xf] }
 0x1bf   :  { %489 = vst.msk [vmem:[#allocation2 + $0xd1] sm:$0xf] %vm475_vm5, %v464_v36  ;;  %v703_v22 = vmul.f32 %v5585_v7, %v686_v13  ;;  %v705_v36 = vmul.f32 %v5585_v7, %v688_v20  ;;  %v785_v13 = vld [vmem:[#allocation2 + $0x1a] sm:$0xf]  ;;  %v657_v55 = vmul.f32 %v5569_v16, %v640_v30 }
 0x1c0   :  { %490 = vst.msk [vmem:[#allocation2 + $0xd9] sm:$0xf] %vm475_vm5, %v352_v31  ;;  %v5597_v31 = vperm.slane %v5543_v37, 4  ;;  %v631_v50 = vadd.f32 %v615_v10, %v566_v9 }
 0x1c1   :  { %491 = vst.msk [vmem:[#allocation2 + $0xe1] sm:$0xf] %vm475_vm5, %v465_v40 }
 0x1c2   :  { %517 = vst.msk [vmem:[#allocation2 + $0x159] sm:$0xf] %vm475_vm5, %v369_v44  ;;  %v735_v44 = vld [vmem:[#allocation2 + $0x11] sm:$0xf]  ;;  %v751_v40 = vmul.f32 %v5597_v31, %v734_v24  ;;  %v754_v53 = vmul.f32 %v5597_v31, %v737_v39 }
 0x1c3   :  { %518 = vst.msk [vmem:[#allocation2 + $0x161] sm:$0xf] %vm475_vm5, %v500_v46  ;;  %v752_v46 = vmul.f32 %v5597_v31, %v735_v44 }
 0x1c4   :  { %519 = vst.msk [vmem:[#allocation2 + $0x169] sm:$0xf] %vm475_vm5, %v370_v35  ;;  %v671_v35 = vadd.f32 %v655_v28, %v622_v27  ;;  %v767_v62 = vadd.f32 %v751_v40, %v718_v38  ;;  %v559_v27 = vmul.f32 %v5556_v54, %v542_v17  ;;  %v560_v28 = vmul.f32 %v5556_v54, %v543_v21  ;;  %v597_v38 = vld [vmem:[#allocation2 + $0x79] sm:$0xf] }
 0x1c5   :  { %520 = vst.msk [vmem:[#allocation2 + $0x171] sm:$0xf] %vm475_vm5, %v501_v47  ;;  %v783_v47 = vld [vmem:[#allocation2 + $0xa] sm:$0xf]  ;;  %v656_v40 = vmul.f32 %v5569_v16, %v639_v6 }
 0x1c6   :  { %521 = vst.msk [vmem:[#allocation2 + $0x189] sm:$0xf] %vm475_vm5, %v371_v14  ;;  %v670_v14 = vadd.f32 %v654_v33, %v621_v32  ;;  %v721_v52 = vadd.f32 %v705_v36, %v671_v35  ;;  %v800_v3 = vmul.f32 %v5612_v49, %v783_v47  ;;  %v546_v32 = vld [vmem:[#allocation2 + $0x68] sm:$0xf]  ;;  %v547_v33 = vld [vmem:[#allocation2 + $0x70] sm:$0xf] }
 0x1c7   :  { %522 = vst.msk [vmem:[#allocation2 + $0x191] sm:$0xf] %vm475_vm5, %v502_v57  ;;  %v545_v57 = vld [vmem:[#allocation2 + $0x60] sm:$0xf]  ;;  %v548_v35 = vld [vmem:[#allocation2 + $0x78] sm:$0xf]  ;;  %v563_v60 = vmul.f32 %v5556_v54, %v546_v32 }
 0x1c8   :  { %523 = vst.msk [vmem:[#allocation2 + $0x199] sm:$0xf] %vm475_vm5, %v372_v41  ;;  %v704_v41 = vmul.f32 %v5585_v7, %v687_v26  ;;  %v562_v25 = vmul.f32 %v5556_v54, %v545_v57  ;;  %v770_v8 = vadd.f32 %v754_v53, %v721_v52  ;;  %v5629_v26 = vadd.f32 %v800_v3, %v767_v62  ;;  %v596_v36 = vld [vmem:[#allocation2 + $0x71] sm:$0xf]  ;;  %v599_v47 = vld [vmem:[#allocation2 + $0x99] sm:$0xf] }
 0x1c9   :  { %524 = vst.msk [vmem:[#allocation2 + $0x1a1] sm:$0xf] %vm475_vm5, %v503_v58  ;;  %v594_v58 = vld [vmem:[#allocation2 + $0x61] sm:$0xf]  ;;  %v802_v52 = vmul.f32 %v5612_v49, %v785_v13  ;;  %v552_v53 = vld [vmem:[#allocation2 + $0xa8] sm:$0xf]  ;;  %v613_v62 = vmul.f32 %v5559_v48, %v596_v36  ;;  %v565_v21 = vmul.f32 %v5556_v54, %v548_v35 }
 0x1ca   :  { %525 = vst.msk [vmem:[#allocation2 + $0x1b9] sm:$0xf] %vm475_vm5, %v373_v42  ;;  %v719_v42 = vadd.f32 %v703_v22, %v669_v34  ;;  %v720_v61 = vadd.f32 %v704_v41, %v670_v14  ;;  %v611_v5 = vmul.f32 %v5559_v48, %v594_v58  ;;  %v595_v34 = vld [vmem:[#allocation2 + $0x69] sm:$0xf]  ;;  %v623_v22 = vadd.f32 %v607_v2, %v558_v0 }
 0x1cb   :  { %526 = vst.msk [vmem:[#allocation2 + $0x1c1] sm:$0xf] %vm475_vm5, %v504_v23  ;;  %v592_v23 = vld [vmem:[#allocation2 + $0x41] sm:$0xf]  ;;  %v660_v14 = vmul.f32 %v5569_v16, %v643_v11  ;;  %v5635_v41 = vadd.f32 %v803_v43, %v770_v8  ;;  %v601_v57 = vld [vmem:[#allocation2 + $0xa9] sm:$0xf]  ;;  %v569_v3 = vmul.f32 %v5556_v54, %v552_v53  ;;  %v5655_v11 = vadd.f32 %v664_v51, %v631_v50 }
 0x1cc   :  { %527 = vst.msk [vmem:[#allocation2 + $0x1c9] sm:$0xf] %vm475_vm5, %v374_v45  ;;  %v736_v45 = vld [vmem:[#allocation2 + $0x19] sm:$0xf]  ;;  %v768_v63 = vadd.f32 %v752_v46, %v719_v42  ;;  %v609_v20 = vmul.f32 %v5559_v48, %v592_v23  ;;  %v627_v39 = vadd.f32 %v611_v5, %v562_v25  ;;  %v616_v23 = vmul.f32 %v5559_v48, %v599_v47  ;;  %v642_v5 = vld [vmem:[#allocation2 + $0x4a] sm:$0xf] }
 0x1cd   :  { %528 = vst.msk [vmem:[#allocation2 + $0x1d1] sm:$0xf] %vm475_vm5, %v505_v4  ;;  %v753_v19 = vmul.f32 %v5597_v31, %v736_v45  ;;  %v550_v42 = vld [vmem:[#allocation2 + $0x98] sm:$0xf]  ;;  %v551_v45 = vld [vmem:[#allocation2 + $0xa0] sm:$0xf]  ;;  %v618_v25 = vmul.f32 %v5559_v48, %v601_v57  ;;  %v672_v9 = vadd.f32 %v656_v40, %v623_v22  ;;  %v659_v22 = vmul.f32 %v5569_v16, %v642_v5 }
 0x1ce   :  { %529 = vst.msk [vmem:[#allocation2 + $0x1e9] sm:$0xf] %vm475_vm5, %v375_v56  ;;  %v784_v56 = vld [vmem:[#allocation2 + $0x12] sm:$0xf]  ;;  %v625_v17 = vadd.f32 %v609_v20, %v560_v28  ;;  %v567_v0 = vmul.f32 %v5556_v54, %v550_v42  ;;  %v568_v2 = vmul.f32 %v5556_v54, %v551_v45  ;;  %v644_v6 = vld [vmem:[#allocation2 + $0x6a] sm:$0xf]  ;;  %v676_v10 = vadd.f32 %v660_v14, %v627_v39 }
 0x1cf   :  { %530 = vst.msk [vmem:[#allocation2 + $0x1f1] sm:$0xf] %vm475_vm5, %v506_v15  ;;  %v801_v4 = vmul.f32 %v5612_v49, %v784_v56  ;;  %v544_v15 = vld [vmem:[#allocation2 + $0x48] sm:$0xf]  ;;  %v769_v24 = vadd.f32 %v753_v19, %v720_v61  ;;  %v600_v56 = vld [vmem:[#allocation2 + $0xa1] sm:$0xf]  ;;  %v564_v61 = vmul.f32 %v5556_v54, %v547_v33  ;;  %v612_v19 = vmul.f32 %v5559_v48, %v595_v34 }
 0x1d0   :  { %531 = vst.msk [vmem:[#allocation2 + $0x1f9] sm:$0xf] %vm475_vm5, %v376_v1  ;;  %v591_v1 = vld [vmem:[#allocation2 + $0x39] sm:$0xf]  ;;  %v561_v46 = vmul.f32 %v5556_v54, %v544_v15  ;;  %v645_v8 = vld [vmem:[#allocation2 + $0x72] sm:$0xf]  ;;  %v632_v32 = vadd.f32 %v616_v23, %v567_v0  ;;  %v661_v39 = vmul.f32 %v5569_v16, %v644_v6 }
 0x1d1   :  { %532 = vst.msk [vmem:[#allocation2 + $0x201] sm:$0xf] %vm475_vm5, %v507_v18  ;;  %v593_v18 = vld [vmem:[#allocation2 + $0x49] sm:$0xf]  ;;  %v608_v29 = vmul.f32 %v5559_v48, %v591_v1  ;;  %v5631_v44 = vadd.f32 %v801_v4, %v768_v63  ;;  %v641_v63 = vld [vmem:[#allocation2 + $0x42] sm:$0xf]  ;;  %v614_v1 = vmul.f32 %v5559_v48, %v597_v38  ;;  %v617_v4 = vmul.f32 %v5559_v48, %v600_v56 }
 0x1d2   :  { %v610_v58 = vmul.f32 %v5559_v48, %v593_v18  ;;  %v658_v43 = vmul.f32 %v5569_v16, %v641_v63  ;;  %v628_v13 = vadd.f32 %v612_v19, %v563_v60  ;;  %v646_v15 = vld [vmem:[#allocation2 + $0x7a] sm:$0xf]  ;;  %v629_v20 = vadd.f32 %v613_v62, %v564_v61  ;;  %v649_v33 = vld [vmem:[#allocation2 + $0xa2] sm:$0xf]  ;;  %v650_v34 = vld [vmem:[#allocation2 + $0xaa] sm:$0xf] }
 0x1d3   :  { %v624_v59 = vadd.f32 %v608_v29, %v559_v27  ;;  %v648_v27 = vld [vmem:[#allocation2 + $0x9a] sm:$0xf]  ;;  %v5657_v29 = vadd.f32 %v802_v52, %v769_v24  ;;  %v630_v30 = vadd.f32 %v614_v1, %v565_v21  ;;  %v633_v36 = vadd.f32 %v617_v4, %v568_v2  ;;  %v693_v40 = vld [vmem:[#allocation2 + $0x68] sm:$0xf]  ;;  %v690_v45 = vld [vmem:[#allocation2 + $0x40] sm:$0xf] }
 0x1d4   :  { %v626_v12 = vadd.f32 %v610_v58, %v561_v46  ;;  %v689_v18 = vld [vmem:[#allocation2 + $0x38] sm:$0xf]  ;;  %v674_v35 = vadd.f32 %v658_v43, %v625_v17  ;;  %v634_v38 = vadd.f32 %v618_v25, %v569_v3  ;;  %v662_v14 = vmul.f32 %v5569_v16, %v645_v8  ;;  %v691_v46 = vld [vmem:[#allocation2 + $0x48] sm:$0xf]  ;;  %v692_v56 = vld [vmem:[#allocation2 + $0x50] sm:$0xf] }
 0x1d5   :  { %v673_v28 = vadd.f32 %v657_v55, %v624_v59  ;;  %v663_v42 = vmul.f32 %v5569_v16, %v646_v15  ;;  %v665_v24 = vmul.f32 %v5569_v16, %v648_v27  ;;  %v706_v47 = vmul.f32 %v5585_v7, %v689_v18  ;;  %v694_v57 = vld [vmem:[#allocation2 + $0x70] sm:$0xf]  ;;  %v697_v58 = vld [vmem:[#allocation2 + $0x98] sm:$0xf]  ;;  %v696_v61 = vld [vmem:[#allocation2 + $0x80] sm:$0xf] }
 0x1d6   :  { %v666_v50 = vmul.f32 %v5569_v16, %v649_v33  ;;  %v667_v51 = vmul.f32 %v5569_v16, %v650_v34  ;;  %v675_v52 = vadd.f32 %v659_v22, %v626_v12  ;;  %v677_v53 = vadd.f32 %v661_v39, %v628_v13  ;;  %v695_v60 = vld [vmem:[#allocation2 + $0x78] sm:$0xf]  ;;  %v698_v21 = vld [vmem:[#allocation2 + $0xa0] sm:$0xf]  ;;  %v699_v0 = vld [vmem:[#allocation2 + $0xa8] sm:$0xf] }
 0x1d7   :  { %v678_v59 = vadd.f32 %v662_v14, %v629_v20  ;;  %v679_v17 = vadd.f32 %v663_v42, %v630_v30  ;;  %v681_v55 = vadd.f32 %v665_v24, %v632_v32  ;;  %v710_v19 = vmul.f32 %v5585_v7, %v693_v40  ;;  %v700_v2 = vld [vmem:[#allocation2 + $0xb0] sm:$0xf]  ;;  %v738_v13 = vld [vmem:[#allocation2 + $0x39] sm:$0xf]  ;;  %v739_v30 = vld [vmem:[#allocation2 + $0x41] sm:$0xf] }
 0x1d8   :  { %v682_v62 = vadd.f32 %v666_v50, %v633_v36  ;;  %v683_v63 = vadd.f32 %v667_v51, %v634_v38  ;;  %v707_v1 = vmul.f32 %v5585_v7, %v690_v45  ;;  %v708_v23 = vmul.f32 %v5585_v7, %v691_v46  ;;  %v740_v32 = vld [vmem:[#allocation2 + $0x49] sm:$0xf]  ;;  %v741_v33 = vld [vmem:[#allocation2 + $0x51] sm:$0xf]  ;;  %v744_v40 = vld [vmem:[#allocation2 + $0x79] sm:$0xf] }
 0x1d9   :  { %v709_v3 = vmul.f32 %v5585_v7, %v692_v56  ;;  %v711_v4 = vmul.f32 %v5585_v7, %v694_v57  ;;  %v714_v25 = vmul.f32 %v5585_v7, %v697_v58  ;;  %v722_v5 = vadd.f32 %v706_v47, %v672_v9  ;;  %v742_v22 = vld [vmem:[#allocation2 + $0x69] sm:$0xf]  ;;  %v743_v39 = vld [vmem:[#allocation2 + $0x71] sm:$0xf]  ;;  %v745_v42 = vld [vmem:[#allocation2 + $0x81] sm:$0xf] }
 0x1da   :  { %v712_v6 = vmul.f32 %v5585_v7, %v695_v60  ;;  %v713_v8 = vmul.f32 %v5585_v7, %v696_v61  ;;  %v723_v43 = vadd.f32 %v707_v1, %v673_v28  ;;  %v724_v12 = vadd.f32 %v708_v23, %v674_v35  ;;  %v746_v24 = vld [vmem:[#allocation2 + $0x99] sm:$0xf]  ;;  %v747_v46 = vld [vmem:[#allocation2 + $0xa1] sm:$0xf]  ;;  %v748_v47 = vld [vmem:[#allocation2 + $0xa9] sm:$0xf] }
 0x1db   :  { %v715_v15 = vmul.f32 %v5585_v7, %v698_v21  ;;  %v716_v27 = vmul.f32 %v5585_v7, %v699_v0  ;;  %v725_v18 = vadd.f32 %v709_v3, %v675_v52  ;;  %v726_v20 = vadd.f32 %v710_v19, %v676_v10  ;;  %v787_v61 = vld [vmem:[#allocation2 + $0x3a] sm:$0xf]  ;;  %v788_v19 = vld [vmem:[#allocation2 + $0x42] sm:$0xf]  ;;  %v789_v1 = vld [vmem:[#allocation2 + $0x4a] sm:$0xf] }
 0x1dc   :  { %v717_v34 = vmul.f32 %v5585_v7, %v700_v2  ;;  %v727_v36 = vadd.f32 %v711_v4, %v677_v53  ;;  %v728_v9 = vadd.f32 %v712_v6, %v678_v59  ;;  %v729_v38 = vadd.f32 %v713_v8, %v679_v17  ;;  %v749_v53 = vld [vmem:[#allocation2 + $0xb1] sm:$0xf]  ;;  %v791_v2 = vld [vmem:[#allocation2 + $0x6a] sm:$0xf]  ;;  %v793_v8 = vld [vmem:[#allocation2 + $0x7a] sm:$0xf] }
 0x1dd   :  { %v730_v28 = vadd.f32 %v714_v25, %v5655_v11  ;;  %v731_v35 = vadd.f32 %v715_v15, %v681_v55  ;;  %v732_v14 = vadd.f32 %v716_v27, %v682_v62  ;;  %v755_v45 = vmul.f32 %v5597_v31, %v738_v13  ;;  %v790_v23 = vld [vmem:[#allocation2 + $0x52] sm:$0xf]  ;;  %v795_v27 = vld [vmem:[#allocation2 + $0x9a] sm:$0xf] }
 0x1de   :  { %v733_v10 = vadd.f32 %v717_v34, %v683_v63  ;;  %v756_v50 = vmul.f32 %v5597_v31, %v739_v30  ;;  %v757_v51 = vmul.f32 %v5597_v31, %v740_v32  ;;  %v758_v52 = vmul.f32 %v5597_v31, %v741_v33  ;;  %v792_v6 = vld [vmem:[#allocation2 + $0x72] sm:$0xf]  ;;  %v796_v30 = vld [vmem:[#allocation2 + $0xa2] sm:$0xf]  ;;  %v797_v32 = vld [vmem:[#allocation2 + $0xaa] sm:$0xf] }
 0x1df   :  { %v759_v56 = vmul.f32 %v5597_v31, %v742_v22  ;;  %v760_v11 = vmul.f32 %v5597_v31, %v743_v39  ;;  %v761_v57 = vmul.f32 %v5597_v31, %v744_v40  ;;  %v771_v58 = vadd.f32 %v755_v45, %v722_v5  ;;  %v798_v33 = vld [vmem:[#allocation2 + $0xb2] sm:$0xf]  ;;  %v835_v45 = vld [vmem:[#allocation2 + $0x20] sm:$0xf] }
 0x1e0   :  { %v762_v59 = vmul.f32 %v5597_v31, %v745_v42  ;;  %v763_v17 = vmul.f32 %v5597_v31, %v746_v24  ;;  %v772_v55 = vadd.f32 %v756_v50, %v723_v43  ;;  %v773_v60 = vadd.f32 %v757_v51, %v724_v12  ;;  %v794_v43 = vld [vmem:[#allocation2 + $0x82] sm:$0xf]  ;;  %v834_v24 = vld [vmem:[#allocation2 + $0x18] sm:$0xf] }
 0x1e1   :  { %v764_v62 = vmul.f32 %v5597_v31, %v747_v46  ;;  %v765_v63 = vmul.f32 %v5597_v31, %v748_v47  ;;  %v774_v21 = vadd.f32 %v758_v52, %v725_v18  ;;  %v775_v0 = vadd.f32 %v759_v56, %v726_v20  ;;  %v836_v52 = vld [vmem:[#allocation2 + $0x28] sm:$0xf] }
 0x1e2   :  { %v766_v3 = vmul.f32 %v5597_v31, %v749_v53  ;;  %v776_v4 = vadd.f32 %v760_v11, %v727_v36  ;;  %v777_v25 = vadd.f32 %v761_v57, %v728_v9  ;;  %v778_v5 = vadd.f32 %v762_v59, %v729_v38  ;;  %v837_v53 = vld [vmem:[#allocation2 + $0x40] sm:$0xf]  ;;  %v838_v56 = vld [vmem:[#allocation2 + $0x48] sm:$0xf] }
 0x1e3   :  { %v779_v12 = vadd.f32 %v763_v17, %v730_v28  ;;  %v780_v13 = vadd.f32 %v764_v62, %v731_v35  ;;  %v781_v15 = vadd.f32 %v765_v63, %v732_v14  ;;  %v804_v18 = vmul.f32 %v5612_v49, %v787_v61  ;;  %v833_v28 = vld [vmem:[#allocation2 + $0x10] sm:$0xf] }
 0x1e4   :  { %v782_v20 = vadd.f32 %v766_v3, %v733_v10  ;;  %v805_v34 = vmul.f32 %v5612_v49, %v788_v19  ;;  %v806_v22 = vmul.f32 %v5612_v49, %v789_v1  ;;  %v807_v36 = vmul.f32 %v5612_v49, %v790_v23  ;;  %v839_v61 = vld [vmem:[#allocation2 + $0x50] sm:$0xf]  ;;  %v840_v19 = vld [vmem:[#allocation2 + $0x58] sm:$0xf] }
 0x1e5   :  { %v808_v9 = vmul.f32 %v5612_v49, %v791_v2  ;;  %v809_v38 = vmul.f32 %v5612_v49, %v792_v6  ;;  %v810_v39 = vmul.f32 %v5612_v49, %v793_v8  ;;  %v811_v40 = vmul.f32 %v5612_v49, %v794_v43  ;;  %v841_v62 = vld [vmem:[#allocation2 + $0x70] sm:$0xf]  ;;  %v842_v3 = vld [vmem:[#allocation2 + $0x78] sm:$0xf]  ;;  %v843_v6 = vld [vmem:[#allocation2 + $0x80] sm:$0xf] }
 0x1e6   :  { %v812_v35 = vmul.f32 %v5612_v49, %v795_v27  ;;  %v813_v14 = vmul.f32 %v5612_v49, %v796_v30  ;;  %v814_v42 = vmul.f32 %v5612_v49, %v797_v32  ;;  %v5703_v10 = vperm.slane %v5543_v37, 6  ;;  %v844_v8 = vld [vmem:[#allocation2 + $0x88] sm:$0xf] }
 0x1e7   :  { %v815_v46 = vmul.f32 %v5612_v49, %v798_v33  ;;  %v820_v47 = vadd.f32 %v804_v18, %v771_v58  ;;  %v821_v50 = vadd.f32 %v805_v34, %v772_v55  ;;  %v822_v51 = vadd.f32 %v806_v22, %v773_v60  ;;  %v845_v55 = vld [vmem:[#allocation2 + $0xa0] sm:$0xf]  ;;  %v846_v60 = vld [vmem:[#allocation2 + $0xa8] sm:$0xf] }
 0x1e8   :  { %v823_v11 = vadd.f32 %v807_v36, %v774_v21  ;;  %v824_v57 = vadd.f32 %v808_v9, %v775_v0  ;;  %v825_v59 = vadd.f32 %v809_v38, %v776_v4  ;;  %v826_v17 = vadd.f32 %v810_v39, %v777_v25  ;;  %v847_v4 = vld [vmem:[#allocation2 + $0xb0] sm:$0xf]  ;;  %v848_v25 = vld [vmem:[#allocation2 + $0xb8] sm:$0xf] }
 0x1e9   :  { %v827_v63 = vadd.f32 %v811_v40, %v778_v5  ;;  %v828_v1 = vadd.f32 %v812_v35, %v779_v12  ;;  %v829_v23 = vadd.f32 %v813_v14, %v780_v13  ;;  %v830_v2 = vadd.f32 %v814_v42, %v781_v15  ;;  %v882_v39 = vld [vmem:[#allocation2 + $0x11] sm:$0xf]  ;;  %v883_v40 = vld [vmem:[#allocation2 + $0x19] sm:$0xf] }
 0x1ea   :  { %v831_v58 = vadd.f32 %v815_v46, %v782_v20  ;;  %v850_v43 = vmul.f32 %v5703_v10, %v833_v28  ;;  %v851_v21 = vmul.f32 %v5703_v10, %v834_v24  ;;  %v5709_v0 = vperm.slane %v5543_v37, 7  ;;  %v884_v24 = vld [vmem:[#allocation2 + $0x21] sm:$0xf] }
 0x1eb   :  { %v852_v5 = vmul.f32 %v5703_v10, %v835_v45  ;;  %v853_v12 = vmul.f32 %v5703_v10, %v836_v52  ;;  %v854_v13 = vmul.f32 %v5703_v10, %v837_v53  ;;  %v855_v15 = vmul.f32 %v5703_v10, %v838_v56  ;;  %v885_v45 = vld [vmem:[#allocation2 + $0x29] sm:$0xf]  ;;  %v886_v46 = vld [vmem:[#allocation2 + $0x41] sm:$0xf] }
 0x1ec   :  { %8003 = vst [vmem:[#allocation3_spill] sm:$0xff] %v5709_v0  ;;  %v856_v27 = vmul.f32 %v5703_v10, %v839_v61  ;;  %v857_v30 = vmul.f32 %v5703_v10, %v840_v19  ;;  %v858_v32 = vmul.f32 %v5703_v10, %v841_v62  ;;  %v859_v18 = vmul.f32 %v5703_v10, %v842_v3  ;;  %v887_v19 = vld [vmem:[#allocation2 + $0x49] sm:$0xf]  ;;  %v888_v62 = vld [vmem:[#allocation2 + $0x51] sm:$0xf] }
 0x1ed   :  { %v860_v37 = vmul.f32 %v5703_v10, %v843_v6  ;;  %v861_v20 = vmul.f32 %v5703_v10, %v844_v8  ;;  %v862_v33 = vmul.f32 %v5703_v10, %v845_v55  ;;  %v863_v34 = vmul.f32 %v5703_v10, %v846_v60  ;;  %v890_v55 = vld [vmem:[#allocation2 + $0x71] sm:$0xf]  ;;  %v892_v60 = vld [vmem:[#allocation2 + $0x81] sm:$0xf] }
 0x1ee   :  { %v864_v22 = vmul.f32 %v5703_v10, %v847_v4  ;;  %v865_v36 = vmul.f32 %v5703_v10, %v848_v25  ;;  %v866_v9 = vadd.f32 %v850_v43, %v5629_v26  ;;  %v867_v38 = vadd.f32 %v851_v21, %v5631_v44  ;;  %v889_v26 = vld [vmem:[#allocation2 + $0x59] sm:$0xf]  ;;  %v894_v43 = vld [vmem:[#allocation2 + $0xa1] sm:$0xf]  ;;  %v895_v21 = vld [vmem:[#allocation2 + $0xa9] sm:$0xf] }
 0x1ef   :  { %v868_v28 = vadd.f32 %v852_v5, %v5657_v29  ;;  %v869_v35 = vadd.f32 %v853_v12, %v5635_v41  ;;  %v870_v14 = vadd.f32 %v854_v13, %v820_v47  ;;  %v871_v42 = vadd.f32 %v855_v15, %v821_v50  ;;  %v891_v29 = vld [vmem:[#allocation2 + $0x79] sm:$0xf]  ;;  %v893_v50 = vld [vmem:[#allocation2 + $0x89] sm:$0xf] }
 0x1f0   :  { %v872_v52 = vadd.f32 %v856_v27, %v822_v51  ;;  %v873_v53 = vadd.f32 %v857_v30, %v823_v11  ;;  %v874_v56 = vadd.f32 %v858_v32, %v824_v57  ;;  %v875_v61 = vadd.f32 %v859_v18, %v825_v59  ;;  %v896_v57 = vld [vmem:[#allocation2 + $0xb1] sm:$0xf]  ;;  %v897_v59 = vld [vmem:[#allocation2 + $0xb9] sm:$0xf] }
 0x1f1   :  { %v876_v3 = vadd.f32 %v860_v37, %v826_v17  ;;  %v877_v44 = vadd.f32 %v861_v20, %v827_v63  ;;  %v878_v6 = vadd.f32 %v862_v33, %v828_v1  ;;  %v879_v8 = vadd.f32 %v863_v34, %v829_v23  ;;  %v5738_v23 = vld [vmem:[%s7930_s2 + $0x8] sm:$0xff]  ;;  %v931_v20 = vld [vmem:[#allocation2 + $0x12] sm:$0xf]  ;;  %v932_v33 = vld [vmem:[#allocation2 + $0x1a] sm:$0xf] }
 0x1f2   :  { %v880_v41 = vadd.f32 %v864_v22, %v830_v2  ;;  %v881_v47 = vadd.f32 %v865_v36, %v831_v58  ;;  %v899_v51 = vmul.f32 %v5709_v0, %v882_v39  ;;  %v900_v11 = vmul.f32 %v5709_v0, %v883_v40  ;;  %v933_v34 = vld [vmem:[#allocation2 + $0x22] sm:$0xf]  ;;  %v934_v40 = vld [vmem:[#allocation2 + $0x2a] sm:$0xf] }
 0x1f3   :  { %v901_v4 = vmul.f32 %v5709_v0, %v884_v24  ;;  %v902_v17 = vmul.f32 %v5709_v0, %v885_v45  ;;  %v903_v63 = vmul.f32 %v5709_v0, %v886_v46  ;;  %v904_v1 = vmul.f32 %v5709_v0, %v887_v19  ;;  %v935_v24 = vld [vmem:[#allocation2 + $0x42] sm:$0xf] }
 0x1f4   :  { %v905_v2 = vmul.f32 %v5709_v0, %v888_v62  ;;  %v906_v58 = vmul.f32 %v5709_v0, %v889_v26  ;;  %v907_v25 = vmul.f32 %v5709_v0, %v890_v55  ;;  %v908_v5 = vmul.f32 %v5709_v0, %v891_v29  ;;  %v936_v55 = vld [vmem:[#allocation2 + $0x4a] sm:$0xf]  ;;  %v937_v29 = vld [vmem:[#allocation2 + $0x52] sm:$0xf] }
 0x1f5   :  { %v909_v12 = vmul.f32 %v5709_v0, %v892_v60  ;;  %v910_v13 = vmul.f32 %v5709_v0, %v893_v50  ;;  %v911_v15 = vmul.f32 %v5709_v0, %v894_v43  ;;  %v912_v27 = vmul.f32 %v5709_v0, %v895_v21  ;;  %v938_v60 = vld [vmem:[#allocation2 + $0x5a] sm:$0xf]  ;;  %v939_v21 = vld [vmem:[#allocation2 + $0x72] sm:$0xf] }
 0x1f6   :  { %v913_v30 = vmul.f32 %v5709_v0, %v896_v57  ;;  %v914_v32 = vmul.f32 %v5709_v0, %v897_v59  ;;  %v915_v18 = vadd.f32 %v899_v51, %v866_v9  ;;  %v916_v37 = vadd.f32 %v900_v11, %v867_v38  ;;  %v942_v57 = vld [vmem:[#allocation2 + $0x8a] sm:$0xf]  ;;  %v943_v59 = vld [vmem:[#allocation2 + $0xa2] sm:$0xf] }
 0x1f7   :  { %v917_v22 = vadd.f32 %v901_v4, %v868_v28  ;;  %v918_v36 = vadd.f32 %v902_v17, %v869_v35  ;;  %v919_v39 = vadd.f32 %v903_v63, %v870_v14  ;;  %v5751_v45 = vperm.slane %v5738_v23, 0  ;;  %v940_v28 = vld [vmem:[#allocation2 + $0x7a] sm:$0xf]  ;;  %v941_v35 = vld [vmem:[#allocation2 + $0x82] sm:$0xf] }
 0x1f8   :  { %v920_v46 = vadd.f32 %v904_v1, %v871_v42  ;;  %v921_v19 = vadd.f32 %v905_v2, %v872_v52  ;;  %v922_v62 = vadd.f32 %v906_v58, %v873_v53  ;;  %v923_v26 = vadd.f32 %v907_v25, %v874_v56  ;;  %v944_v52 = vld [vmem:[#allocation2 + $0xaa] sm:$0xf]  ;;  %v945_v53 = vld [vmem:[#allocation2 + $0xb2] sm:$0xf]  ;;  %v946_v56 = vld [vmem:[#allocation2 + $0xba] sm:$0xf] }
 0x1f9   :  { %8004 = vst [vmem:[#allocation4_spill] sm:$0xff] %v5751_v45  ;;  %v924_v9 = vadd.f32 %v908_v5, %v875_v61  ;;  %v925_v38 = vadd.f32 %v909_v12, %v876_v3  ;;  %v926_v50 = vadd.f32 %v910_v13, %v877_v44  ;;  %v927_v43 = vadd.f32 %v911_v15, %v878_v6  ;;  %v981_v13 = vld [vmem:[#allocation2 + $0x30] sm:$0xf] }
 0x1fa   :  { %v928_v14 = vadd.f32 %v912_v27, %v879_v8  ;;  %v929_v51 = vadd.f32 %v913_v30, %v880_v41  ;;  %v930_v11 = vadd.f32 %v914_v32, %v881_v47  ;;  %v5754_v42 = vperm.slane %v5738_v23, 1 }
 0x1fb   :  { %v948_v4 = vmul.f32 %v5751_v45, %v931_v20  ;;  %v949_v61 = vmul.f32 %v5751_v45, %v932_v33  ;;  %v950_v3 = vmul.f32 %v5751_v45, %v933_v34  ;;  %v951_v44 = vmul.f32 %v5751_v45, %v934_v40  ;;  %v982_v20 = vld [vmem:[#allocation2 + $0x38] sm:$0xf]  ;;  %v983_v33 = vld [vmem:[#allocation2 + $0x40] sm:$0xf]  ;;  %v984_v34 = vld [vmem:[#allocation2 + $0x48] sm:$0xf] }
 0x1fc   :  { %8005 = vst [vmem:[#allocation5_spill] sm:$0xff] %v5754_v42  ;;  %v952_v6 = vmul.f32 %v5751_v45, %v935_v24  ;;  %v953_v8 = vmul.f32 %v5751_v45, %v936_v55  ;;  %v954_v41 = vmul.f32 %v5751_v45, %v937_v29  ;;  %v955_v47 = vmul.f32 %v5751_v45, %v938_v60  ;;  %v985_v60 = vld [vmem:[#allocation2 + $0x60] sm:$0xf] }
 0x1fd   :  { %v956_v17 = vmul.f32 %v5751_v45, %v939_v21  ;;  %v957_v63 = vmul.f32 %v5751_v45, %v940_v28  ;;  %v958_v1 = vmul.f32 %v5751_v45, %v941_v35  ;;  %v959_v2 = vmul.f32 %v5751_v45, %v942_v57  ;;  %v986_v21 = vld [vmem:[#allocation2 + $0x68] sm:$0xf]  ;;  %v987_v28 = vld [vmem:[#allocation2 + $0x70] sm:$0xf] }
 0x1fe   :  { %v960_v58 = vmul.f32 %v5751_v45, %v943_v59  ;;  %v961_v25 = vmul.f32 %v5751_v45, %v944_v52  ;;  %v962_v5 = vmul.f32 %v5751_v45, %v945_v53  ;;  %v963_v12 = vmul.f32 %v5751_v45, %v946_v56  ;;  %v988_v53 = vld [vmem:[#allocation2 + $0x78] sm:$0xf]  ;;  %v989_v56 = vld [vmem:[#allocation2 + $0x90] sm:$0xf] }
 0x1ff   :  { %v964_v15 = vadd.f32 %v948_v4, %v915_v18  ;;  %v965_v27 = vadd.f32 %v949_v61, %v916_v37  ;;  %v966_v30 = vadd.f32 %v950_v3, %v917_v22  ;;  %v967_v32 = vadd.f32 %v951_v44, %v918_v36  ;;  %v990_v18 = vld [vmem:[#allocation2 + $0x98] sm:$0xf]  ;;  %v991_v61 = vld [vmem:[#allocation2 + $0xa0] sm:$0xf]  ;;  %v992_v3 = vld [vmem:[#allocation2 + $0xa8] sm:$0xf] }
 0x200   :  { %v968_v40 = vadd.f32 %v952_v6, %v919_v39  ;;  %v969_v24 = vadd.f32 %v953_v8, %v920_v46  ;;  %v970_v55 = vadd.f32 %v954_v41, %v921_v19  ;;  %v971_v29 = vadd.f32 %v955_v47, %v922_v62  ;;  %v993_v39 = vld [vmem:[#allocation2 + $0xc0] sm:$0xf]  ;;  %v994_v46 = vld [vmem:[#allocation2 + $0xc8] sm:$0xf]  ;;  %v995_v19 = vld [vmem:[#allocation2 + $0xd0] sm:$0xf] }
 0x201   :  { %v972_v35 = vadd.f32 %v956_v17, %v923_v26  ;;  %v973_v57 = vadd.f32 %v957_v63, %v924_v9  ;;  %v974_v59 = vadd.f32 %v958_v1, %v925_v38  ;;  %v975_v52 = vadd.f32 %v959_v2, %v926_v50  ;;  %v996_v62 = vld [vmem:[#allocation2 + $0xd8] sm:$0xf] }
 0x202   :  { %v976_v37 = vadd.f32 %v960_v58, %v927_v43  ;;  %v977_v22 = vadd.f32 %v961_v25, %v928_v14  ;;  %v978_v36 = vadd.f32 %v962_v5, %v929_v51  ;;  %v979_v4 = vadd.f32 %v963_v12, %v930_v11  ;;  %v1030_v12 = vld [vmem:[#allocation2 + $0x31] sm:$0xf] }
 0x203   :  { %v998_v44 = vmul.f32 %v5754_v42, %v981_v13  ;;  %v999_v26 = vmul.f32 %v5754_v42, %v982_v20  ;;  %v1000_v9 = vmul.f32 %v5754_v42, %v983_v33  ;;  %v1001_v38 = vmul.f32 %v5754_v42, %v984_v34  ;;  %v1031_v13 = vld [vmem:[#allocation2 + $0x39] sm:$0xf]  ;;  %v1032_v20 = vld [vmem:[#allocation2 + $0x41] sm:$0xf]  ;;  %v1033_v33 = vld [vmem:[#allocation2 + $0x49] sm:$0xf] }
 0x204   :  { %v1002_v50 = vmul.f32 %v5754_v42, %v985_v60  ;;  %v1003_v43 = vmul.f32 %v5754_v42, %v986_v21  ;;  %v1004_v14 = vmul.f32 %v5754_v42, %v987_v28  ;;  %v1005_v51 = vmul.f32 %v5754_v42, %v988_v53  ;;  %v1034_v28 = vld [vmem:[#allocation2 + $0x61] sm:$0xf]  ;;  %v1035_v53 = vld [vmem:[#allocation2 + $0x69] sm:$0xf] }
 0x205   :  { %v1006_v11 = vmul.f32 %v5754_v42, %v989_v56  ;;  %v1007_v6 = vmul.f32 %v5754_v42, %v990_v18  ;;  %v1008_v8 = vmul.f32 %v5754_v42, %v991_v61  ;;  %v1009_v41 = vmul.f32 %v5754_v42, %v992_v3 }
 0x206   :  { %v1010_v47 = vmul.f32 %v5754_v42, %v993_v39  ;;  %v1011_v17 = vmul.f32 %v5754_v42, %v994_v46  ;;  %v1012_v63 = vmul.f32 %v5754_v42, %v995_v19  ;;  %v1013_v1 = vmul.f32 %v5754_v42, %v996_v62  ;;  %v1085_v42 = vld [vmem:[#allocation2 + $0x72] sm:$0xf] }
 0x207   :  { %v1014_v2 = vadd.f32 %v998_v44, %v964_v15  ;;  %v1015_v58 = vadd.f32 %v999_v26, %v965_v27  ;;  %v1016_v25 = vadd.f32 %v1000_v9, %v966_v30  ;;  %v1017_v5 = vadd.f32 %v1001_v38, %v967_v32  ;;  %v1036_v15 = vld [vmem:[#allocation2 + $0x71] sm:$0xf]  ;;  %v1037_v27 = vld [vmem:[#allocation2 + $0x79] sm:$0xf]  ;;  %v1042_v26 = vld [vmem:[#allocation2 + $0xc1] sm:$0xf] }
 0x208   :  { %v1018_v34 = vadd.f32 %v1002_v50, %v968_v40  ;;  %v1019_v60 = vadd.f32 %v1003_v43, %v969_v24  ;;  %v1020_v21 = vadd.f32 %v1004_v14, %v970_v55  ;;  %v5789_v56 = vperm.slane %v5738_v23, 2  ;;  %v1038_v30 = vld [vmem:[#allocation2 + $0x91] sm:$0xf]  ;;  %v1039_v44 = vld [vmem:[#allocation2 + $0x99] sm:$0xf] }
 0x209   :  { %v1021_v18 = vadd.f32 %v1005_v51, %v971_v29  ;;  %v1022_v61 = vadd.f32 %v1006_v11, %v972_v35  ;;  %v1023_v3 = vadd.f32 %v1007_v6, %v973_v57  ;;  %v1024_v39 = vadd.f32 %v1008_v8, %v974_v59  ;;  %v1040_v40 = vld [vmem:[#allocation2 + $0xa1] sm:$0xf]  ;;  %v1041_v24 = vld [vmem:[#allocation2 + $0xa9] sm:$0xf]  ;;  %v1044_v59 = vld [vmem:[#allocation2 + $0xd1] sm:$0xf] }
 0x20a   :  { %8006 = vst [vmem:[#allocation6_spill] sm:$0xff] %v5789_v56  ;;  %v1025_v32 = vadd.f32 %v1009_v41, %v975_v52  ;;  %v1026_v46 = vadd.f32 %v1010_v47, %v976_v37  ;;  %v1027_v19 = vadd.f32 %v1011_v17, %v977_v22  ;;  %v1028_v62 = vadd.f32 %v1012_v63, %v978_v36  ;;  %v1043_v57 = vld [vmem:[#allocation2 + $0xc9] sm:$0xf]  ;;  %v1045_v52 = vld [vmem:[#allocation2 + $0xd9] sm:$0xf] }
 0x20b   :  { %v1029_v55 = vadd.f32 %v1013_v1, %v979_v4  ;;  %v5792_v9 = vperm.slane %v5738_v23, 3  ;;  %v5795_v29 = vperm.slane %v5738_v23, 4  ;;  %v5798_v35 = vperm.slane %v5738_v23, 5  ;;  %v1079_v1 = vld [vmem:[#allocation2 + $0x32] sm:$0xf] }
 0x20c   :  { %v1047_v37 = vmul.f32 %v5789_v56, %v1030_v12  ;;  %v1048_v22 = vmul.f32 %v5789_v56, %v1031_v13  ;;  %v1049_v36 = vmul.f32 %v5789_v56, %v1032_v20  ;;  %v1050_v4 = vmul.f32 %v5789_v56, %v1033_v33 }
 0x20d   :  { %8007 = vst [vmem:[#allocation7_spill] sm:$0xff] %v5792_v9  ;;  %v1051_v38 = vmul.f32 %v5789_v56, %v1034_v28  ;;  %v1052_v50 = vmul.f32 %v5789_v56, %v1035_v53  ;;  %v1053_v43 = vmul.f32 %v5789_v56, %v1036_v15  ;;  %v1054_v14 = vmul.f32 %v5789_v56, %v1037_v27  ;;  %v1080_v28 = vld [vmem:[#allocation2 + $0x3a] sm:$0xf]  ;;  %v1081_v53 = vld [vmem:[#allocation2 + $0x42] sm:$0xf] }
 0x20e   :  { %8008 = vst [vmem:[#allocation8_spill] sm:$0xff] %v5795_v29  ;;  %v1055_v51 = vmul.f32 %v5789_v56, %v1038_v30  ;;  %v1056_v11 = vmul.f32 %v5789_v56, %v1039_v44  ;;  %v1057_v6 = vmul.f32 %v5789_v56, %v1040_v40  ;;  %v1058_v8 = vmul.f32 %v5789_v56, %v1041_v24  ;;  %v1082_v15 = vld [vmem:[#allocation2 + $0x4a] sm:$0xf]  ;;  %v1083_v24 = vld [vmem:[#allocation2 + $0x62] sm:$0xf] }
 0x20f   :  { %8009 = vst [vmem:[#allocation9_spill] sm:$0xff] %v5798_v35  ;;  %v1059_v41 = vmul.f32 %v5789_v56, %v1042_v26  ;;  %v1060_v47 = vmul.f32 %v5789_v56, %v1043_v57  ;;  %v1061_v17 = vmul.f32 %v5789_v56, %v1044_v59  ;;  %v1062_v63 = vmul.f32 %v5789_v56, %v1045_v52  ;;  %v1084_v26 = vld [vmem:[#allocation2 + $0x6a] sm:$0xf]  ;;  %v1086_v52 = vld [vmem:[#allocation2 + $0x7a] sm:$0xf] }
 0x210   :  { %v1063_v12 = vadd.f32 %v1047_v37, %v1014_v2  ;;  %v1064_v13 = vadd.f32 %v1048_v22, %v1015_v58  ;;  %v1065_v20 = vadd.f32 %v1049_v36, %v1016_v25  ;;  %v1066_v33 = vadd.f32 %v1050_v4, %v1017_v5  ;;  %v1087_v56 = vld [vmem:[#allocation2 + $0x92] sm:$0xf]  ;;  %v1088_v2 = vld [vmem:[#allocation2 + $0x9a] sm:$0xf]  ;;  %v1089_v22 = vld [vmem:[#allocation2 + $0xa2] sm:$0xf] }
 0x211   :  { %v1067_v27 = vadd.f32 %v1051_v38, %v1018_v34  ;;  %v1068_v30 = vadd.f32 %v1052_v50, %v1019_v60  ;;  %v1069_v44 = vadd.f32 %v1053_v43, %v1020_v21  ;;  %v1070_v40 = vadd.f32 %v1054_v14, %v1021_v18  ;;  %v1090_v36 = vld [vmem:[#allocation2 + $0xaa] sm:$0xf]  ;;  %v1091_v34 = vld [vmem:[#allocation2 + $0xc2] sm:$0xf]  ;;  %v1093_v21 = vld [vmem:[#allocation2 + $0xd2] sm:$0xf] }
 0x212   :  { %v1071_v57 = vadd.f32 %v1055_v51, %v1022_v61  ;;  %v1072_v45 = vadd.f32 %v1056_v11, %v1023_v3  ;;  %v1073_v59 = vadd.f32 %v1057_v6, %v1024_v39  ;;  %v1074_v0 = vadd.f32 %v1058_v8, %v1025_v32  ;;  %v1092_v60 = vld [vmem:[#allocation2 + $0xca] sm:$0xf]  ;;  %v1094_v18 = vld [vmem:[#allocation2 + $0xda] sm:$0xf] }
 0x213   :  { %v1075_v58 = vadd.f32 %v1059_v41, %v1026_v46  ;;  %v1076_v25 = vadd.f32 %v1060_v47, %v1027_v19  ;;  %v1077_v5 = vadd.f32 %v1061_v17, %v1028_v62  ;;  %v1078_v37 = vadd.f32 %v1062_v63, %v1029_v55  ;;  %v1128_v8 = vld [vmem:[#allocation2 + $0x38] sm:$0xf]  ;;  %v1130_v63 = vld [vmem:[#allocation2 + $0x48] sm:$0xf] }
 0x214   :  { %v1096_v4 = vmul.f32 %v5792_v9, %v1079_v1  ;;  %v1097_v61 = vmul.f32 %v5792_v9, %v1080_v28  ;;  %v1098_v3 = vmul.f32 %v5792_v9, %v1081_v53  ;;  %v1099_v39 = vmul.f32 %v5792_v9, %v1082_v15  ;;  %v1131_v1 = vld [vmem:[#allocation2 + $0x50] sm:$0xf] }
 0x215   :  { %v1100_v32 = vmul.f32 %v5792_v9, %v1083_v24  ;;  %v1101_v46 = vmul.f32 %v5792_v9, %v1084_v26  ;;  %v1102_v19 = vmul.f32 %v5792_v9, %v1085_v42  ;;  %v1103_v62 = vmul.f32 %v5792_v9, %v1086_v52  ;;  %v1132_v26 = vld [vmem:[#allocation2 + $0x68] sm:$0xf]  ;;  %v1133_v52 = vld [vmem:[#allocation2 + $0x70] sm:$0xf] }
 0x216   :  { %v1104_v55 = vmul.f32 %v5792_v9, %v1087_v56  ;;  %v1105_v38 = vmul.f32 %v5792_v9, %v1088_v2  ;;  %v1106_v50 = vmul.f32 %v5792_v9, %v1089_v22  ;;  %v1107_v43 = vmul.f32 %v5792_v9, %v1090_v36  ;;  %v1129_v56 = vld [vmem:[#allocation2 + $0x40] sm:$0xf]  ;;  %v1134_v2 = vld [vmem:[#allocation2 + $0x78] sm:$0xf] }
 0x217   :  { %v1108_v14 = vmul.f32 %v5792_v9, %v1091_v34  ;;  %v1109_v51 = vmul.f32 %v5792_v9, %v1092_v60  ;;  %v1110_v11 = vmul.f32 %v5792_v9, %v1093_v21  ;;  %v1111_v6 = vmul.f32 %v5792_v9, %v1094_v18  ;;  %v1135_v21 = vld [vmem:[#allocation2 + $0x80] sm:$0xf]  ;;  %v1136_v18 = vld [vmem:[#allocation2 + $0x98] sm:$0xf] }
 0x218   :  { %v1112_v42 = vadd.f32 %v1096_v4, %v1063_v12  ;;  %v1113_v41 = vadd.f32 %v1097_v61, %v1064_v13  ;;  %v1114_v47 = vadd.f32 %v1098_v3, %v1065_v20  ;;  %v1115_v17 = vadd.f32 %v1099_v39, %v1066_v33  ;;  %v1137_v12 = vld [vmem:[#allocation2 + $0xa0] sm:$0xf]  ;;  %v1138_v61 = vld [vmem:[#allocation2 + $0xa8] sm:$0xf]  ;;  %v1139_v3 = vld [vmem:[#allocation2 + $0xb0] sm:$0xf] }
 0x219   :  { %v1116_v28 = vadd.f32 %v1100_v32, %v1067_v27  ;;  %v1117_v53 = vadd.f32 %v1101_v46, %v1068_v30  ;;  %v1118_v15 = vadd.f32 %v1102_v19, %v1069_v44  ;;  %v1119_v24 = vadd.f32 %v1103_v62, %v1070_v40  ;;  %v1140_v27 = vld [vmem:[#allocation2 + $0xc8] sm:$0xf]  ;;  %v1141_v30 = vld [vmem:[#allocation2 + $0xd0] sm:$0xf]  ;;  %v1142_v44 = vld [vmem:[#allocation2 + $0xd8] sm:$0xf] }
 0x21a   :  { %v1120_v22 = vadd.f32 %v1104_v55, %v1071_v57  ;;  %v1121_v36 = vadd.f32 %v1105_v38, %v1072_v45  ;;  %v1122_v34 = vadd.f32 %v1106_v50, %v1073_v59  ;;  %v1123_v60 = vadd.f32 %v1107_v43, %v1074_v0  ;;  %v1143_v40 = vld [vmem:[#allocation2 + $0xe0] sm:$0xf]  ;;  %v1177_v43 = vld [vmem:[#allocation2 + $0x39] sm:$0xf] }
 0x21b   :  { %v1124_v13 = vadd.f32 %v1108_v14, %v1075_v58  ;;  %v1125_v20 = vadd.f32 %v1109_v51, %v1076_v25  ;;  %v1126_v33 = vadd.f32 %v1110_v11, %v1077_v5  ;;  %v1127_v4 = vadd.f32 %v1111_v6, %v1078_v37 }
 0x21c   :  { %v1145_v39 = vmul.f32 %v5795_v29, %v1128_v8  ;;  %v1146_v57 = vmul.f32 %v5795_v29, %v1129_v56  ;;  %v1147_v45 = vmul.f32 %v5795_v29, %v1130_v63  ;;  %v1148_v0 = vmul.f32 %v5795_v29, %v1131_v1  ;;  %v1178_v8 = vld [vmem:[#allocation2 + $0x41] sm:$0xf]  ;;  %v1179_v56 = vld [vmem:[#allocation2 + $0x49] sm:$0xf]  ;;  %v1180_v63 = vld [vmem:[#allocation2 + $0x51] sm:$0xf] }
 0x21d   :  { %v1149_v59 = vmul.f32 %v5795_v29, %v1132_v26  ;;  %v1150_v58 = vmul.f32 %v5795_v29, %v1133_v52  ;;  %v1151_v25 = vmul.f32 %v5795_v29, %v1134_v2  ;;  %v1152_v5 = vmul.f32 %v5795_v29, %v1135_v21  ;;  %v1181_v21 = vld [vmem:[#allocation2 + $0x69] sm:$0xf] }
 0x21e   :  { %v1153_v37 = vmul.f32 %v5795_v29, %v1136_v18  ;;  %v1154_v32 = vmul.f32 %v5795_v29, %v1137_v12  ;;  %v1155_v46 = vmul.f32 %v5795_v29, %v1138_v61  ;;  %v1156_v19 = vmul.f32 %v5795_v29, %v1139_v3  ;;  %v1182_v18 = vld [vmem:[#allocation2 + $0x71] sm:$0xf]  ;;  %v1183_v12 = vld [vmem:[#allocation2 + $0x79] sm:$0xf] }
 0x21f   :  { %v1157_v62 = vmul.f32 %v5795_v29, %v1140_v27  ;;  %v1158_v55 = vmul.f32 %v5795_v29, %v1141_v30  ;;  %v1159_v38 = vmul.f32 %v5795_v29, %v1142_v44  ;;  %v1160_v50 = vmul.f32 %v5795_v29, %v1143_v40  ;;  %v1184_v44 = vld [vmem:[#allocation2 + $0x81] sm:$0xf]  ;;  %v1185_v40 = vld [vmem:[#allocation2 + $0x99] sm:$0xf] }
 0x220   :  { %v1161_v14 = vadd.f32 %v1145_v39, %v1112_v42  ;;  %v1162_v51 = vadd.f32 %v1146_v57, %v1113_v41  ;;  %v1163_v11 = vadd.f32 %v1147_v45, %v1114_v47  ;;  %v1164_v6 = vadd.f32 %v1148_v0, %v1115_v17  ;;  %v1186_v42 = vld [vmem:[#allocation2 + $0xa1] sm:$0xf]  ;;  %v1187_v57 = vld [vmem:[#allocation2 + $0xa9] sm:$0xf]  ;;  %v1188_v45 = vld [vmem:[#allocation2 + $0xb1] sm:$0xf] }
 0x221   :  { %v1165_v1 = vadd.f32 %v1149_v59, %v1116_v28  ;;  %v1166_v26 = vadd.f32 %v1150_v58, %v1117_v53  ;;  %v1167_v52 = vadd.f32 %v1151_v25, %v1118_v15  ;;  %v1168_v2 = vadd.f32 %v1152_v5, %v1119_v24  ;;  %v1189_v28 = vld [vmem:[#allocation2 + $0xc9] sm:$0xf]  ;;  %v1190_v53 = vld [vmem:[#allocation2 + $0xd1] sm:$0xf]  ;;  %v1191_v15 = vld [vmem:[#allocation2 + $0xd9] sm:$0xf] }
 0x222   :  { %v1169_v61 = vadd.f32 %v1153_v37, %v1120_v22  ;;  %v1170_v3 = vadd.f32 %v1154_v32, %v1121_v36  ;;  %v1171_v27 = vadd.f32 %v1155_v46, %v1122_v34  ;;  %v1172_v30 = vadd.f32 %v1156_v19, %v1123_v60  ;;  %v1192_v24 = vld [vmem:[#allocation2 + $0xe1] sm:$0xf] }
 0x223   :  { %v1173_v41 = vadd.f32 %v1157_v62, %v1124_v13  ;;  %v1174_v47 = vadd.f32 %v1158_v55, %v1125_v20  ;;  %v1175_v17 = vadd.f32 %v1159_v38, %v1126_v33  ;;  %v1176_v39 = vadd.f32 %v1160_v50, %v1127_v4  ;;  %v1226_v50 = vld [vmem:[#allocation2 + $0x3a] sm:$0xf] }
 0x224   :  { %v1194_v0 = vmul.f32 %v5798_v35, %v1177_v43  ;;  %v1195_v22 = vmul.f32 %v5798_v35, %v1178_v8  ;;  %v1196_v36 = vmul.f32 %v5798_v35, %v1179_v56  ;;  %v1197_v34 = vmul.f32 %v5798_v35, %v1180_v63  ;;  %v1227_v43 = vld [vmem:[#allocation2 + $0x42] sm:$0xf]  ;;  %v1228_v8 = vld [vmem:[#allocation2 + $0x4a] sm:$0xf]  ;;  %v1229_v56 = vld [vmem:[#allocation2 + $0x52] sm:$0xf] }
 0x225   :  { %v1198_v60 = vmul.f32 %v5798_v35, %v1181_v21  ;;  %v1199_v13 = vmul.f32 %v5798_v35, %v1182_v18  ;;  %v1200_v20 = vmul.f32 %v5798_v35, %v1183_v12  ;;  %v1201_v33 = vmul.f32 %v5798_v35, %v1184_v44  ;;  %v5867_v63 = vld [vmem:[%s7930_s2 + $0x10] sm:$0xff] }
 0x226   :  { %v1202_v4 = vmul.f32 %v5798_v35, %v1185_v40  ;;  %v1203_v59 = vmul.f32 %v5798_v35, %v1186_v42  ;;  %v1204_v58 = vmul.f32 %v5798_v35, %v1187_v57  ;;  %v1205_v25 = vmul.f32 %v5798_v35, %v1188_v45  ;;  %v1230_v44 = vld [vmem:[#allocation2 + $0x6a] sm:$0xf]  ;;  %v1231_v40 = vld [vmem:[#allocation2 + $0x72] sm:$0xf]  ;;  %v1232_v57 = vld [vmem:[#allocation2 + $0x7a] sm:$0xf] }
 0x227   :  { %v1206_v5 = vmul.f32 %v5798_v35, %v1189_v28  ;;  %v1207_v37 = vmul.f32 %v5798_v35, %v1190_v53  ;;  %v1208_v32 = vmul.f32 %v5798_v35, %v1191_v15  ;;  %v1209_v46 = vmul.f32 %v5798_v35, %v1192_v24  ;;  %v1233_v45 = vld [vmem:[#allocation2 + $0x82] sm:$0xf]  ;;  %v1234_v28 = vld [vmem:[#allocation2 + $0x9a] sm:$0xf] }
 0x228   :  { %v1210_v19 = vadd.f32 %v1194_v0, %v1161_v14  ;;  %v1211_v62 = vadd.f32 %v1195_v22, %v1162_v51  ;;  %v1212_v55 = vadd.f32 %v1196_v36, %v1163_v11  ;;  %v1213_v38 = vadd.f32 %v1197_v34, %v1164_v6  ;;  %v1235_v22 = vld [vmem:[#allocation2 + $0xa2] sm:$0xf]  ;;  %v1238_v36 = vld [vmem:[#allocation2 + $0xca] sm:$0xf] }
 0x229   :  { %v1214_v21 = vadd.f32 %v1198_v60, %v1165_v1  ;;  %v1215_v18 = vadd.f32 %v1199_v13, %v1166_v26  ;;  %v1216_v12 = vadd.f32 %v1200_v20, %v1167_v52  ;;  %v5870_v42 = vperm.slane %v5738_v23, 6  ;;  %v1236_v1 = vld [vmem:[#allocation2 + $0xaa] sm:$0xf]  ;;  %v1237_v26 = vld [vmem:[#allocation2 + $0xb2] sm:$0xf] }
 0x22a   :  { %v1217_v14 = vadd.f32 %v1201_v33, %v1168_v2  ;;  %v1218_v51 = vadd.f32 %v1202_v4, %v1169_v61  ;;  %v1219_v11 = vadd.f32 %v1203_v59, %v1170_v3  ;;  %v1220_v6 = vadd.f32 %v1204_v58, %v1171_v27  ;;  %v1239_v3 = vld [vmem:[#allocation2 + $0xd2] sm:$0xf]  ;;  %v1240_v27 = vld [vmem:[#allocation2 + $0xda] sm:$0xf]  ;;  %v1282_v35 = vld [vmem:[#allocation2 + $0x80] sm:$0xf] }
 0x22b   :  { %8010 = vst [vmem:[#allocation10_spill] sm:$0xff] %v5870_v42  ;;  %v1221_v53 = vadd.f32 %v1205_v25, %v1172_v30  ;;  %v1222_v15 = vadd.f32 %v1206_v5, %v1173_v41  ;;  %v1223_v24 = vadd.f32 %v1207_v37, %v1174_v47  ;;  %v1224_v0 = vadd.f32 %v1208_v32, %v1175_v17  ;;  %v1241_v30 = vld [vmem:[#allocation2 + $0xe2] sm:$0xf] }
 0x22c   :  { %v1225_v52 = vadd.f32 %v1209_v46, %v1176_v39  ;;  %v5873_v34 = vperm.slane %v5738_v23, 7  ;;  %v5876_v2 = vperm.slane %v5867_v63, 0  ;;  %v5879_v61 = vperm.slane %v5867_v63, 1  ;;  %v1276_v46 = vld [vmem:[#allocation2 + $0x40] sm:$0xf] }
 0x22d   :  { %v1243_v41 = vmul.f32 %v5870_v42, %v1226_v50  ;;  %v1244_v47 = vmul.f32 %v5870_v42, %v1227_v43  ;;  %v1245_v17 = vmul.f32 %v5870_v42, %v1228_v8  ;;  %v1246_v39 = vmul.f32 %v5870_v42, %v1229_v56 }
 0x22e   :  { %8011 = vst [vmem:[#allocation11_spill] sm:$0xff] %v5873_v34  ;;  %v1247_v23 = vmul.f32 %v5870_v42, %v1230_v44  ;;  %v1248_v60 = vmul.f32 %v5870_v42, %v1231_v40  ;;  %v1249_v13 = vmul.f32 %v5870_v42, %v1232_v57  ;;  %v1250_v20 = vmul.f32 %v5870_v42, %v1233_v45  ;;  %v1277_v44 = vld [vmem:[#allocation2 + $0x48] sm:$0xf]  ;;  %v1278_v40 = vld [vmem:[#allocation2 + $0x50] sm:$0xf] }
 0x22f   :  { %8012 = vst [vmem:[#allocation12_spill] sm:$0xff] %v5876_v2  ;;  %v1251_v33 = vmul.f32 %v5870_v42, %v1234_v28  ;;  %v1252_v4 = vmul.f32 %v5870_v42, %v1235_v22  ;;  %v1253_v59 = vmul.f32 %v5870_v42, %v1236_v1  ;;  %v1254_v58 = vmul.f32 %v5870_v42, %v1237_v26  ;;  %v1280_v57 = vld [vmem:[#allocation2 + $0x70] sm:$0xf]  ;;  %v1279_v26 = vld [vmem:[#allocation2 + $0x58] sm:$0xf] }
 0x230   :  { %8013 = vst [vmem:[#allocation13_spill] sm:$0xff] %v5879_v61  ;;  %v1255_v25 = vmul.f32 %v5870_v42, %v1238_v36  ;;  %v1256_v5 = vmul.f32 %v5870_v42, %v1239_v3  ;;  %v1257_v37 = vmul.f32 %v5870_v42, %v1240_v27  ;;  %v1258_v32 = vmul.f32 %v5870_v42, %v1241_v30  ;;  %v1281_v36 = vld [vmem:[#allocation2 + $0x78] sm:$0xf]  ;;  %v1283_v30 = vld [vmem:[#allocation2 + $0x88] sm:$0xf] }
 0x231   :  { %v1259_v50 = vadd.f32 %v1243_v41, %v1210_v19  ;;  %v1260_v43 = vadd.f32 %v1244_v47, %v1211_v62  ;;  %v1261_v8 = vadd.f32 %v1245_v17, %v1212_v55  ;;  %v1262_v56 = vadd.f32 %v1246_v39, %v1213_v38  ;;  %v1284_v42 = vld [vmem:[#allocation2 + $0xa0] sm:$0xf]  ;;  %v1285_v19 = vld [vmem:[#allocation2 + $0xa8] sm:$0xf]  ;;  %v1286_v47 = vld [vmem:[#allocation2 + $0xb0] sm:$0xf] }
 0x232   :  { %v1263_v45 = vadd.f32 %v1247_v23, %v1214_v21  ;;  %v1264_v28 = vadd.f32 %v1248_v60, %v1215_v18  ;;  %v1265_v22 = vadd.f32 %v1249_v13, %v1216_v12  ;;  %v1266_v1 = vadd.f32 %v1250_v20, %v1217_v14  ;;  %v1287_v17 = vld [vmem:[#allocation2 + $0xb8] sm:$0xf]  ;;  %v1288_v21 = vld [vmem:[#allocation2 + $0xd0] sm:$0xf]  ;;  %v1290_v12 = vld [vmem:[#allocation2 + $0xe0] sm:$0xf] }
 0x233   :  { %v1267_v3 = vadd.f32 %v1251_v33, %v1218_v51  ;;  %v1268_v29 = vadd.f32 %v1252_v4, %v1219_v11  ;;  %v1269_v27 = vadd.f32 %v1253_v59, %v1220_v6  ;;  %v1270_v9 = vadd.f32 %v1254_v58, %v1221_v53  ;;  %v1289_v18 = vld [vmem:[#allocation2 + $0xd8] sm:$0xf]  ;;  %v1291_v14 = vld [vmem:[#allocation2 + $0xe8] sm:$0xf] }
 0x234   :  { %v1271_v62 = vadd.f32 %v1255_v25, %v1222_v15  ;;  %v1272_v55 = vadd.f32 %v1256_v5, %v1223_v24  ;;  %v1273_v38 = vadd.f32 %v1257_v37, %v1224_v0  ;;  %v1274_v41 = vadd.f32 %v1258_v32, %v1225_v52  ;;  %v1326_v37 = vld [vmem:[#allocation2 + $0x49] sm:$0xf] }
 0x235   :  { %v1293_v39 = vmul.f32 %v5873_v34, %v1276_v46  ;;  %v1294_v51 = vmul.f32 %v5873_v34, %v1277_v44  ;;  %v1295_v11 = vmul.f32 %v5873_v34, %v1278_v40  ;;  %v1296_v6 = vmul.f32 %v5873_v34, %v1279_v26  ;;  %v1327_v26 = vld [vmem:[#allocation2 + $0x51] sm:$0xf] }
 0x236   :  { %v1297_v53 = vmul.f32 %v5873_v34, %v1280_v57  ;;  %v1298_v15 = vmul.f32 %v5873_v34, %v1281_v36  ;;  %v1299_v24 = vmul.f32 %v5873_v34, %v1282_v35  ;;  %v1300_v0 = vmul.f32 %v5873_v34, %v1283_v30  ;;  %v1325_v57 = vld [vmem:[#allocation2 + $0x41] sm:$0xf]  ;;  %v1328_v36 = vld [vmem:[#allocation2 + $0x59] sm:$0xf]  ;;  %v1334_v30 = vld [vmem:[#allocation2 + $0xa9] sm:$0xf] }
 0x237   :  { %v1301_v52 = vmul.f32 %v5873_v34, %v1284_v42  ;;  %v1302_v23 = vmul.f32 %v5873_v34, %v1285_v19  ;;  %v1303_v60 = vmul.f32 %v5873_v34, %v1286_v47  ;;  %v1304_v13 = vmul.f32 %v5873_v34, %v1287_v17  ;;  %v1330_v42 = vld [vmem:[#allocation2 + $0x79] sm:$0xf] }
 0x238   :  { %v1305_v20 = vmul.f32 %v5873_v34, %v1288_v21  ;;  %v1306_v33 = vmul.f32 %v5873_v34, %v1289_v18  ;;  %v1307_v4 = vmul.f32 %v5873_v34, %v1290_v12  ;;  %v1308_v59 = vmul.f32 %v5873_v34, %v1291_v14  ;;  %v1329_v18 = vld [vmem:[#allocation2 + $0x71] sm:$0xf]  ;;  %v1331_v12 = vld [vmem:[#allocation2 + $0x81] sm:$0xf] }
 0x239   :  { %v1309_v58 = vadd.f32 %v1293_v39, %v1259_v50  ;;  %v1310_v35 = vadd.f32 %v1294_v51, %v1260_v43  ;;  %v1311_v25 = vadd.f32 %v1295_v11, %v1261_v8  ;;  %v1312_v5 = vadd.f32 %v1296_v6, %v1262_v56  ;;  %v1332_v50 = vld [vmem:[#allocation2 + $0x89] sm:$0xf]  ;;  %v1338_v43 = vld [vmem:[#allocation2 + $0xd9] sm:$0xf]  ;;  %v1339_v51 = vld [vmem:[#allocation2 + $0xe1] sm:$0xf] }
 0x23a   :  { %v1313_v32 = vadd.f32 %v1297_v53, %v1263_v45  ;;  %v1314_v46 = vadd.f32 %v1298_v15, %v1264_v28  ;;  %v1315_v44 = vadd.f32 %v1299_v24, %v1265_v22  ;;  %v1316_v40 = vadd.f32 %v1300_v0, %v1266_v1  ;;  %v1333_v45 = vld [vmem:[#allocation2 + $0xa1] sm:$0xf]  ;;  %v1335_v28 = vld [vmem:[#allocation2 + $0xb1] sm:$0xf]  ;;  %v1336_v22 = vld [vmem:[#allocation2 + $0xb9] sm:$0xf] }
 0x23b   :  { %v1317_v19 = vadd.f32 %v1301_v52, %v1267_v3  ;;  %v1318_v47 = vadd.f32 %v1302_v23, %v1268_v29  ;;  %v1319_v17 = vadd.f32 %v1303_v60, %v1269_v27  ;;  %v1320_v21 = vadd.f32 %v1304_v13, %v1270_v9  ;;  %v1337_v1 = vld [vmem:[#allocation2 + $0xd1] sm:$0xf]  ;;  %v1340_v11 = vld [vmem:[#allocation2 + $0xe9] sm:$0xf] }
 0x23c   :  { %v1321_v8 = vadd.f32 %v1305_v20, %v1271_v62  ;;  %v1322_v56 = vadd.f32 %v1306_v33, %v1272_v55  ;;  %v1323_v14 = vadd.f32 %v1307_v4, %v1273_v38  ;;  %v1324_v39 = vadd.f32 %v1308_v59, %v1274_v41  ;;  %v1375_v59 = vld [vmem:[#allocation2 + $0x4a] sm:$0xf] }
 0x23d   :  { %v1342_v6 = vmul.f32 %v5876_v2, %v1325_v57  ;;  %v1343_v29 = vmul.f32 %v5876_v2, %v1326_v37  ;;  %v1344_v9 = vmul.f32 %v5876_v2, %v1327_v26  ;;  %v1345_v3 = vmul.f32 %v5876_v2, %v1328_v36  ;;  %v1379_v37 = vld [vmem:[#allocation2 + $0x7a] sm:$0xf] }
 0x23e   :  { %v1346_v27 = vmul.f32 %v5876_v2, %v1329_v18  ;;  %v1347_v62 = vmul.f32 %v5876_v2, %v1330_v42  ;;  %v1348_v55 = vmul.f32 %v5876_v2, %v1331_v12  ;;  %v1349_v38 = vmul.f32 %v5876_v2, %v1332_v50  ;;  %v1376_v18 = vld [vmem:[#allocation2 + $0x52] sm:$0xf]  ;;  %v1377_v12 = vld [vmem:[#allocation2 + $0x5a] sm:$0xf]  ;;  %v1383_v50 = vld [vmem:[#allocation2 + $0xaa] sm:$0xf] }
 0x23f   :  { %v1350_v41 = vmul.f32 %v5876_v2, %v1333_v45  ;;  %v1351_v53 = vmul.f32 %v5876_v2, %v1334_v30  ;;  %v1352_v15 = vmul.f32 %v5876_v2, %v1335_v28  ;;  %v1353_v24 = vmul.f32 %v5876_v2, %v1336_v22  ;;  %v1374_v30 = vld [vmem:[#allocation2 + $0x42] sm:$0xf] }
 0x240   :  { %v1354_v0 = vmul.f32 %v5876_v2, %v1337_v1  ;;  %v1355_v52 = vmul.f32 %v5876_v2, %v1338_v43  ;;  %v1356_v23 = vmul.f32 %v5876_v2, %v1339_v51  ;;  %v1357_v60 = vmul.f32 %v5876_v2, %v1340_v11  ;;  %v1378_v1 = vld [vmem:[#allocation2 + $0x72] sm:$0xf]  ;;  %v1380_v51 = vld [vmem:[#allocation2 + $0x82] sm:$0xf] }
 0x241   :  { %v1358_v13 = vadd.f32 %v1342_v6, %v1309_v58  ;;  %v1359_v20 = vadd.f32 %v1343_v29, %v1310_v35  ;;  %v1360_v33 = vadd.f32 %v1344_v9, %v1311_v25  ;;  %v1361_v4 = vadd.f32 %v1345_v3, %v1312_v5  ;;  %v1381_v58 = vld [vmem:[#allocation2 + $0x8a] sm:$0xf]  ;;  %v1387_v35 = vld [vmem:[#allocation2 + $0xda] sm:$0xf]  ;;  %v1388_v29 = vld [vmem:[#allocation2 + $0xe2] sm:$0xf] }
 0x242   :  { %v1362_v42 = vadd.f32 %v1346_v27, %v1313_v32  ;;  %v1363_v57 = vadd.f32 %v1347_v62, %v1314_v46  ;;  %v1364_v26 = vadd.f32 %v1348_v55, %v1315_v44  ;;  %v1365_v36 = vadd.f32 %v1349_v38, %v1316_v40  ;;  %v1382_v32 = vld [vmem:[#allocation2 + $0xa2] sm:$0xf]  ;;  %v1384_v46 = vld [vmem:[#allocation2 + $0xb2] sm:$0xf]  ;;  %v1385_v44 = vld [vmem:[#allocation2 + $0xba] sm:$0xf] }
 0x243   :  { %v1366_v45 = vadd.f32 %v1350_v41, %v1317_v19  ;;  %v1367_v43 = vadd.f32 %v1351_v53, %v1318_v47  ;;  %v1368_v28 = vadd.f32 %v1352_v15, %v1319_v17  ;;  %v1369_v22 = vadd.f32 %v1353_v24, %v1320_v21  ;;  %v1386_v40 = vld [vmem:[#allocation2 + $0xd2] sm:$0xf]  ;;  %v1389_v9 = vld [vmem:[#allocation2 + $0xea] sm:$0xf] }
 0x244   :  { %v1370_v25 = vadd.f32 %v1354_v0, %v1321_v8  ;;  %v1371_v5 = vadd.f32 %v1355_v52, %v1322_v56  ;;  %v1372_v11 = vadd.f32 %v1356_v23, %v1323_v14  ;;  %v1373_v6 = vadd.f32 %v1357_v60, %v1324_v39  ;;  %v1425_v60 = vld [vmem:[#allocation2 + $0x68] sm:$0xf] }
 0x245   :  { %v1391_v3 = vmul.f32 %v5879_v61, %v1374_v30  ;;  %v1392_v19 = vmul.f32 %v5879_v61, %v1375_v59  ;;  %v1393_v47 = vmul.f32 %v5879_v61, %v1376_v18  ;;  %v1394_v17 = vmul.f32 %v5879_v61, %v1377_v12  ;;  %v1427_v59 = vld [vmem:[#allocation2 + $0x78] sm:$0xf] }
 0x246   :  { %v1395_v21 = vmul.f32 %v5879_v61, %v1378_v1  ;;  %v1396_v8 = vmul.f32 %v5879_v61, %v1379_v37  ;;  %v1397_v56 = vmul.f32 %v5879_v61, %v1380_v51  ;;  %v1398_v14 = vmul.f32 %v5879_v61, %v1381_v58  ;;  %v1429_v12 = vld [vmem:[#allocation2 + $0x98] sm:$0xf] }
 0x247   :  { %v1399_v39 = vmul.f32 %v5879_v61, %v1382_v32  ;;  %v1400_v27 = vmul.f32 %v5879_v61, %v1383_v50  ;;  %v1401_v62 = vmul.f32 %v5879_v61, %v1384_v46  ;;  %v1402_v55 = vmul.f32 %v5879_v61, %v1385_v44  ;;  %v1431_v50 = vld [vmem:[#allocation2 + $0xa8] sm:$0xf]  ;;  %v1424_v46 = vld [vmem:[#allocation2 + $0x60] sm:$0xf]  ;;  %v1426_v44 = vld [vmem:[#allocation2 + $0x70] sm:$0xf] }
 0x248   :  { %v1403_v38 = vmul.f32 %v5879_v61, %v1386_v40  ;;  %v1404_v41 = vmul.f32 %v5879_v61, %v1387_v35  ;;  %v1405_v53 = vmul.f32 %v5879_v61, %v1388_v29  ;;  %v1406_v15 = vmul.f32 %v5879_v61, %v1389_v9  ;;  %v1434_v9 = vld [vmem:[#allocation2 + $0xd0] sm:$0xf]  ;;  %v1482_v61 = vld [vmem:[#allocation2 + $0xc9] sm:$0xf] }
 0x249   :  { %v1407_v24 = vadd.f32 %v1391_v3, %v1358_v13  ;;  %v1408_v0 = vadd.f32 %v1392_v19, %v1359_v20  ;;  %v1409_v52 = vadd.f32 %v1393_v47, %v1360_v33  ;;  %v1410_v23 = vadd.f32 %v1394_v17, %v1361_v4  ;;  %v1430_v13 = vld [vmem:[#allocation2 + $0xa0] sm:$0xf]  ;;  %v1433_v20 = vld [vmem:[#allocation2 + $0xc8] sm:$0xf]  ;;  %v1435_v33 = vld [vmem:[#allocation2 + $0xd8] sm:$0xf] }
 0x24a   :  { %v1411_v37 = vadd.f32 %v1395_v21, %v1362_v42  ;;  %v1412_v30 = vadd.f32 %v1396_v8, %v1363_v57  ;;  %v1413_v18 = vadd.f32 %v1397_v56, %v1364_v26  ;;  %v5946_v1 = vperm.slane %v5867_v63, 2  ;;  %v1428_v57 = vld [vmem:[#allocation2 + $0x90] sm:$0xf]  ;;  %v1432_v26 = vld [vmem:[#allocation2 + $0xc0] sm:$0xf] }
 0x24b   :  { %v1414_v51 = vadd.f32 %v1398_v14, %v1365_v36  ;;  %v1415_v58 = vadd.f32 %v1399_v39, %v1366_v45  ;;  %v1416_v35 = vadd.f32 %v1400_v27, %v1367_v43  ;;  %v1417_v32 = vadd.f32 %v1401_v62, %v1368_v28  ;;  %v1436_v19 = vld [vmem:[#allocation2 + $0xf0] sm:$0xf]  ;;  %v1437_v43 = vld [vmem:[#allocation2 + $0xf8] sm:$0xf]  ;;  %v1438_v28 = vld [vmem:[#allocation2 + $0x100] sm:$0xf] }
 0x24c   :  { %8014 = vst [vmem:[#allocation14_spill] sm:$0xff] %v5946_v1  ;;  %v1418_v4 = vadd.f32 %v1402_v55, %v1369_v22  ;;  %v1419_v40 = vadd.f32 %v1403_v38, %v1370_v25  ;;  %v1420_v29 = vadd.f32 %v1404_v41, %v1371_v5  ;;  %v1421_v42 = vadd.f32 %v1405_v53, %v1372_v11  ;;  %v1439_v22 = vld [vmem:[#allocation2 + $0x108] sm:$0xf] }
 0x24d   :  { %v1422_v3 = vadd.f32 %v1406_v15, %v1373_v6  ;;  %v5949_v47 = vperm.slane %v5867_v63, 3  ;;  %v5952_v36 = vperm.slane %v5867_v63, 4  ;;  %v5955_v45 = vperm.slane %v5867_v63, 5  ;;  %v1474_v15 = vld [vmem:[#allocation2 + $0x69] sm:$0xf] }
 0x24e   :  { %v1441_v25 = vmul.f32 %v5946_v1, %v1424_v46  ;;  %v1442_v5 = vmul.f32 %v5946_v1, %v1425_v60  ;;  %v1443_v11 = vmul.f32 %v5946_v1, %v1426_v44  ;;  %v1444_v6 = vmul.f32 %v5946_v1, %v1427_v59  ;;  %v1476_v46 = vld [vmem:[#allocation2 + $0x79] sm:$0xf] }
 0x24f   :  { %8015 = vst [vmem:[#allocation15_spill] sm:$0xff] %v5955_v45  ;;  %v1445_v17 = vmul.f32 %v5946_v1, %v1428_v57  ;;  %v1446_v21 = vmul.f32 %v5946_v1, %v1429_v12  ;;  %v1447_v8 = vmul.f32 %v5946_v1, %v1430_v13  ;;  %v1448_v56 = vmul.f32 %v5946_v1, %v1431_v50  ;;  %v1478_v44 = vld [vmem:[#allocation2 + $0x99] sm:$0xf]  ;;  %v1480_v13 = vld [vmem:[#allocation2 + $0xa9] sm:$0xf] }
 0x250   :  { %v1449_v14 = vmul.f32 %v5946_v1, %v1432_v26  ;;  %v1450_v39 = vmul.f32 %v5946_v1, %v1433_v20  ;;  %v1451_v27 = vmul.f32 %v5946_v1, %v1434_v9  ;;  %v1452_v62 = vmul.f32 %v5946_v1, %v1435_v33  ;;  %v1473_v9 = vld [vmem:[#allocation2 + $0x61] sm:$0xf] }
 0x251   :  { %v1453_v55 = vmul.f32 %v5946_v1, %v1436_v19  ;;  %v1454_v38 = vmul.f32 %v5946_v1, %v1437_v43  ;;  %v1455_v41 = vmul.f32 %v5946_v1, %v1438_v28  ;;  %v1456_v53 = vmul.f32 %v5946_v1, %v1439_v22  ;;  %v1475_v19 = vld [vmem:[#allocation2 + $0x71] sm:$0xf]  ;;  %v1479_v1 = vld [vmem:[#allocation2 + $0xa1] sm:$0xf] }
 0x252   :  { %v1457_v60 = vadd.f32 %v1441_v25, %v1407_v24  ;;  %v1458_v59 = vadd.f32 %v1442_v5, %v1408_v0  ;;  %v1459_v12 = vadd.f32 %v1443_v11, %v1409_v52  ;;  %v1460_v50 = vadd.f32 %v1444_v6, %v1410_v23  ;;  %v1477_v22 = vld [vmem:[#allocation2 + $0x91] sm:$0xf]  ;;  %v1484_v24 = vld [vmem:[#allocation2 + $0xd9] sm:$0xf]  ;;  %v1481_v5 = vld [vmem:[#allocation2 + $0xc1] sm:$0xf] }
 0x253   :  { %v1461_v20 = vadd.f32 %v1445_v17, %v1411_v37  ;;  %v1462_v57 = vadd.f32 %v1446_v21, %v1412_v30  ;;  %v1463_v26 = vadd.f32 %v1447_v8, %v1413_v18  ;;  %v1464_v33 = vadd.f32 %v1448_v56, %v1414_v51  ;;  %v1483_v11 = vld [vmem:[#allocation2 + $0xd1] sm:$0xf]  ;;  %v1486_v30 = vld [vmem:[#allocation2 + $0xf9] sm:$0xf]  ;;  %v1487_v18 = vld [vmem:[#allocation2 + $0x101] sm:$0xf] }
 0x254   :  { %v1465_v43 = vadd.f32 %v1449_v14, %v1415_v58  ;;  %v1466_v2 = vadd.f32 %v1450_v39, %v1416_v35  ;;  %v1467_v28 = vadd.f32 %v1451_v27, %v1417_v32  ;;  %v1468_v34 = vadd.f32 %v1452_v62, %v1418_v4  ;;  %v1485_v37 = vld [vmem:[#allocation2 + $0xf1] sm:$0xf]  ;;  %v1488_v51 = vld [vmem:[#allocation2 + $0x109] sm:$0xf] }
 0x255   :  { %v1469_v0 = vadd.f32 %v1453_v55, %v1419_v40  ;;  %v1470_v52 = vadd.f32 %v1454_v38, %v1420_v29  ;;  %v1471_v23 = vadd.f32 %v1455_v41, %v1421_v42  ;;  %v1472_v25 = vadd.f32 %v1456_v53, %v1422_v3  ;;  %v1523_v62 = vld [vmem:[#allocation2 + $0x6a] sm:$0xf]  ;;  %v1525_v53 = vld [vmem:[#allocation2 + $0x7a] sm:$0xf] }
 0x256   :  { %v1490_v6 = vmul.f32 %v5949_v47, %v1473_v9  ;;  %v1491_v58 = vmul.f32 %v5949_v47, %v1474_v15  ;;  %v1492_v35 = vmul.f32 %v5949_v47, %v1475_v19  ;;  %v1493_v32 = vmul.f32 %v5949_v47, %v1476_v46  ;;  %v1527_v15 = vld [vmem:[#allocation2 + $0x9a] sm:$0xf]  ;;  %v1522_v19 = vld [vmem:[#allocation2 + $0x62] sm:$0xf] }
 0x257   :  { %v1494_v4 = vmul.f32 %v5949_v47, %v1477_v22  ;;  %v1495_v40 = vmul.f32 %v5949_v47, %v1478_v44  ;;  %v1496_v29 = vmul.f32 %v5949_v47, %v1479_v1  ;;  %v1497_v42 = vmul.f32 %v5949_v47, %v1480_v13  ;;  %v1524_v22 = vld [vmem:[#allocation2 + $0x72] sm:$0xf] }
 0x258   :  { %v1498_v3 = vmul.f32 %v5949_v47, %v1481_v5  ;;  %v1499_v17 = vmul.f32 %v5949_v47, %v1482_v61  ;;  %v1500_v21 = vmul.f32 %v5949_v47, %v1483_v11  ;;  %v1501_v8 = vmul.f32 %v5949_v47, %v1484_v24  ;;  %v1529_v61 = vld [vmem:[#allocation2 + $0xaa] sm:$0xf] }
 0x259   :  { %v1502_v56 = vmul.f32 %v5949_v47, %v1485_v37  ;;  %v1503_v14 = vmul.f32 %v5949_v47, %v1486_v30  ;;  %v1504_v39 = vmul.f32 %v5949_v47, %v1487_v18  ;;  %v1505_v27 = vmul.f32 %v5949_v47, %v1488_v51  ;;  %v1531_v24 = vld [vmem:[#allocation2 + $0xca] sm:$0xf]  ;;  %v1526_v18 = vld [vmem:[#allocation2 + $0x92] sm:$0xf]  ;;  %v1528_v51 = vld [vmem:[#allocation2 + $0xa2] sm:$0xf] }
 0x25a   :  { %v1506_v1 = vadd.f32 %v1490_v6, %v1457_v60  ;;  %v1507_v55 = vadd.f32 %v1491_v58, %v1458_v59  ;;  %v1508_v38 = vadd.f32 %v1492_v35, %v1459_v12  ;;  %v1509_v41 = vadd.f32 %v1493_v32, %v1460_v50  ;;  %v1532_v60 = vld [vmem:[#allocation2 + $0xd2] sm:$0xf]  ;;  %v1530_v58 = vld [vmem:[#allocation2 + $0xc2] sm:$0xf]  ;;  %v1533_v35 = vld [vmem:[#allocation2 + $0xda] sm:$0xf] }
 0x25b   :  { %v1510_v46 = vadd.f32 %v1494_v4, %v1461_v20  ;;  %v1511_v44 = vadd.f32 %v1495_v40, %v1462_v57  ;;  %v1512_v13 = vadd.f32 %v1496_v29, %v1463_v26  ;;  %v1513_v9 = vadd.f32 %v1497_v42, %v1464_v33  ;;  %v1534_v20 = vld [vmem:[#allocation2 + $0xf2] sm:$0xf]  ;;  %v1535_v57 = vld [vmem:[#allocation2 + $0xfa] sm:$0xf]  ;;  %v1536_v26 = vld [vmem:[#allocation2 + $0x102] sm:$0xf] }
 0x25c   :  { %v1514_v5 = vadd.f32 %v1498_v3, %v1465_v43  ;;  %v1515_v11 = vadd.f32 %v1499_v17, %v1466_v2  ;;  %v1516_v37 = vadd.f32 %v1500_v21, %v1467_v28  ;;  %v1517_v30 = vadd.f32 %v1501_v8, %v1468_v34  ;;  %v1537_v33 = vld [vmem:[#allocation2 + $0x10a] sm:$0xf] }
 0x25d   :  { %v1518_v59 = vadd.f32 %v1502_v56, %v1469_v0  ;;  %v1519_v12 = vadd.f32 %v1503_v14, %v1470_v52  ;;  %v1520_v50 = vadd.f32 %v1504_v39, %v1471_v23  ;;  %v1521_v6 = vadd.f32 %v1505_v27, %v1472_v25  ;;  %v1572_v27 = vld [vmem:[#allocation2 + $0x68] sm:$0xf] }
 0x25e   :  { %v1539_v32 = vmul.f32 %v5952_v36, %v1522_v19  ;;  %v1540_v43 = vmul.f32 %v5952_v36, %v1523_v62  ;;  %v1541_v2 = vmul.f32 %v5952_v36, %v1524_v22  ;;  %v1542_v34 = vmul.f32 %v5952_v36, %v1525_v53  ;;  %v1574_v62 = vld [vmem:[#allocation2 + $0x78] sm:$0xf]  ;;  %v1573_v22 = vld [vmem:[#allocation2 + $0x70] sm:$0xf] }
 0x25f   :  { %v1543_v28 = vmul.f32 %v5952_v36, %v1526_v18  ;;  %v1544_v0 = vmul.f32 %v5952_v36, %v1527_v15  ;;  %v1545_v52 = vmul.f32 %v5952_v36, %v1528_v51  ;;  %v1546_v23 = vmul.f32 %v5952_v36, %v1529_v61  ;;  %v1576_v18 = vld [vmem:[#allocation2 + $0x98] sm:$0xf] }
 0x260   :  { %v1547_v25 = vmul.f32 %v5952_v36, %v1530_v58  ;;  %v1548_v4 = vmul.f32 %v5952_v36, %v1531_v24  ;;  %v1549_v40 = vmul.f32 %v5952_v36, %v1532_v60  ;;  %v1550_v29 = vmul.f32 %v5952_v36, %v1533_v35  ;;  %v1575_v24 = vld [vmem:[#allocation2 + $0x80] sm:$0xf] }
 0x261   :  { %v1551_v42 = vmul.f32 %v5952_v36, %v1534_v20  ;;  %v1552_v3 = vmul.f32 %v5952_v36, %v1535_v57  ;;  %v1553_v17 = vmul.f32 %v5952_v36, %v1536_v26  ;;  %v1554_v21 = vmul.f32 %v5952_v36, %v1537_v33  ;;  %v1577_v20 = vld [vmem:[#allocation2 + $0xa0] sm:$0xf]  ;;  %v1578_v57 = vld [vmem:[#allocation2 + $0xa8] sm:$0xf]  ;;  %v1584_v33 = vld [vmem:[#allocation2 + $0xf8] sm:$0xf] }
 0x262   :  { %v1555_v8 = vadd.f32 %v1539_v32, %v1506_v1  ;;  %v1556_v56 = vadd.f32 %v1540_v43, %v1507_v55  ;;  %v1557_v14 = vadd.f32 %v1541_v2, %v1508_v38  ;;  %v1558_v39 = vadd.f32 %v1542_v34, %v1509_v41  ;;  %v1580_v26 = vld [vmem:[#allocation2 + $0xc8] sm:$0xf]  ;;  %v1587_v32 = vld [vmem:[#allocation2 + $0x110] sm:$0xf] }
 0x263   :  { %v1559_v53 = vadd.f32 %v1543_v28, %v1510_v46  ;;  %v1560_v15 = vadd.f32 %v1544_v0, %v1511_v44  ;;  %v1561_v61 = vadd.f32 %v1545_v52, %v1512_v13  ;;  %v1562_v19 = vadd.f32 %v1546_v23, %v1513_v9  ;;  %v1579_v46 = vld [vmem:[#allocation2 + $0xb0] sm:$0xf]  ;;  %v1582_v13 = vld [vmem:[#allocation2 + $0xd8] sm:$0xf]  ;;  %v1583_v9 = vld [vmem:[#allocation2 + $0xe0] sm:$0xf] }
 0x264   :  { %v1563_v51 = vadd.f32 %v1547_v25, %v1514_v5  ;;  %v1564_v60 = vadd.f32 %v1548_v4, %v1515_v11  ;;  %v1565_v58 = vadd.f32 %v1549_v40, %v1516_v37  ;;  %v1566_v35 = vadd.f32 %v1550_v29, %v1517_v30  ;;  %v1581_v44 = vld [vmem:[#allocation2 + $0xd0] sm:$0xf]  ;;  %v1585_v5 = vld [vmem:[#allocation2 + $0x100] sm:$0xf]  ;;  %v1621_v23 = vld [vmem:[#allocation2 + $0x69] sm:$0xf] }
 0x265   :  { %v6005_v1 = vadd.f32 %v1551_v42, %v1518_v59  ;;  %v6007_v55 = vadd.f32 %v1552_v3, %v1519_v12  ;;  %v6009_v38 = vadd.f32 %v1553_v17, %v1520_v50  ;;  %v6011_v41 = vadd.f32 %v1554_v21, %v1521_v6  ;;  %v1586_v12 = vld [vmem:[#allocation2 + $0x108] sm:$0xf]  ;;  %v1622_v25 = vld [vmem:[#allocation2 + $0x71] sm:$0xf]  ;;  %v1623_v4 = vld [vmem:[#allocation2 + $0x79] sm:$0xf] }
 0x266   :  { %v1589_v11 = vmul.f32 %v5955_v45, %v1572_v27  ;;  %v1590_v37 = vmul.f32 %v5955_v45, %v1573_v22  ;;  %v1591_v30 = vmul.f32 %v5955_v45, %v1574_v62  ;;  %v1592_v59 = vmul.f32 %v5955_v45, %v1575_v24  ;;  %v6035_v22 = vld [vmem:[%s7930_s2 + $0x18] sm:$0x7] }
 0x267   :  { %v1593_v50 = vmul.f32 %v5955_v45, %v1576_v18  ;;  %v1594_v6 = vmul.f32 %v5955_v45, %v1577_v20  ;;  %v1595_v43 = vmul.f32 %v5955_v45, %v1578_v57  ;;  %v6021_v2 = vperm.slane %v5867_v63, 6 }
 0x268   :  { %v1596_v34 = vmul.f32 %v5955_v45, %v1579_v46  ;;  %v1597_v28 = vmul.f32 %v5955_v45, %v1580_v26  ;;  %v1598_v0 = vmul.f32 %v5955_v45, %v1581_v44  ;;  %v1599_v52 = vmul.f32 %v5955_v45, %v1582_v13  ;;  %v1670_v46 = vld [vmem:[#allocation2 + $0x6a] sm:$0xf]  ;;  %v1671_v44 = vld [vmem:[#allocation2 + $0x72] sm:$0xf]  ;;  %v1672_v13 = vld [vmem:[#allocation2 + $0x7a] sm:$0xf] }
 0x269   :  { %8016 = vst [vmem:[#allocation16_spill] sm:$0xff] %v6021_v2  ;;  %v1600_v40 = vmul.f32 %v5955_v45, %v1583_v9  ;;  %v1605_v29 = vadd.f32 %v1589_v11, %v1555_v8  ;;  %v1606_v42 = vadd.f32 %v1590_v37, %v1556_v56  ;;  %v1607_v3 = vadd.f32 %v1591_v30, %v1557_v14 }
 0x26a   :  { %v1601_v17 = vmul.f32 %v5955_v45, %v1584_v33  ;;  %v1602_v21 = vmul.f32 %v5955_v45, %v1585_v5  ;;  %v1603_v27 = vmul.f32 %v5955_v45, %v1586_v12  ;;  %v1604_v62 = vmul.f32 %v5955_v45, %v1587_v32  ;;  %v1624_v33 = vld [vmem:[#allocation2 + $0x81] sm:$0xf] }
 0x26b   :  { %v1638_v24 = vmul.f32 %v6021_v2, %v1621_v23  ;;  %v1639_v18 = vmul.f32 %v6021_v2, %v1622_v25  ;;  %v1640_v8 = vmul.f32 %v6021_v2, %v1623_v4  ;;  %v6041_v56 = vperm.slane %v5867_v63, 7  ;;  %v1673_v23 = vld [vmem:[#allocation2 + $0x82] sm:$0xf] }
 0x26c   :  { %v1608_v14 = vadd.f32 %v1592_v59, %v1558_v39  ;;  %v1609_v20 = vadd.f32 %v1593_v50, %v1559_v53  ;;  %v1610_v57 = vadd.f32 %v1594_v6, %v1560_v15  ;;  %v6043_v26 = vadd.f32 %v1595_v43, %v1561_v61  ;;  %v1625_v53 = vld [vmem:[#allocation2 + $0x99] sm:$0xf]  ;;  %v1626_v15 = vld [vmem:[#allocation2 + $0xa1] sm:$0xf]  ;;  %v1627_v61 = vld [vmem:[#allocation2 + $0xa9] sm:$0xf] }
 0x26d   :  { %8017 = vst [vmem:[#allocation17_spill] sm:$0xff] %v6041_v56  ;;  %v6045_v9 = vadd.f32 %v1596_v34, %v1562_v19  ;;  %v1654_v5 = vadd.f32 %v1638_v24, %v1605_v29  ;;  %v1655_v11 = vadd.f32 %v1639_v18, %v1606_v42  ;;  %v1656_v37 = vadd.f32 %v1640_v8, %v1607_v3  ;;  %v1720_v6 = vld [vmem:[#allocation2 + $0x70] sm:$0xf]  ;;  %v1721_v43 = vld [vmem:[#allocation2 + $0x78] sm:$0xf] }
 0x26e   :  { %v6047_v30 = vadd.f32 %v1597_v28, %v1563_v51  ;;  %v6049_v12 = vadd.f32 %v1598_v0, %v1564_v60  ;;  %v6051_v63 = vadd.f32 %v1599_v52, %v1565_v58  ;;  %v6053_v39 = vadd.f32 %v1600_v40, %v1566_v35  ;;  %v1722_v34 = vld [vmem:[#allocation2 + $0x80] sm:$0xf]  ;;  %v1628_v0 = vld [vmem:[#allocation2 + $0xb1] sm:$0xf]  ;;  %v1629_v52 = vld [vmem:[#allocation2 + $0xc9] sm:$0xf] }
 0x26f   :  { %v1687_v59 = vmul.f32 %v6041_v56, %v1670_v46  ;;  %v1688_v19 = vmul.f32 %v6041_v56, %v1671_v44  ;;  %v1689_v32 = vmul.f32 %v6041_v56, %v1672_v13  ;;  %v6059_v50 = vperm.slane %v6035_v22, 0  ;;  %v1674_v3 = vld [vmem:[#allocation2 + $0x9a] sm:$0xf]  ;;  %v1769_v46 = vld [vmem:[#allocation2 + $0x71] sm:$0xf] }
 0x270   :  { %v6062_v51 = vadd.f32 %v1601_v17, %v6005_v1  ;;  %v6065_v60 = vadd.f32 %v1602_v21, %v6007_v55  ;;  %v6068_v58 = vadd.f32 %v1603_v27, %v6009_v38  ;;  %v1641_v35 = vmul.f32 %v6021_v2, %v1624_v33  ;;  %v1675_v17 = vld [vmem:[#allocation2 + $0xa2] sm:$0xf]  ;;  %v1770_v44 = vld [vmem:[#allocation2 + $0x79] sm:$0xf]  ;;  %v1630_v33 = vld [vmem:[#allocation2 + $0xd1] sm:$0xf] }
 0x271   :  { %8018 = vst [vmem:[#allocation18_spill] sm:$0xff] %v6059_v50  ;;  %v6072_v28 = vadd.f32 %v1604_v62, %v6011_v41  ;;  %v1703_v25 = vadd.f32 %v1687_v59, %v1654_v5  ;;  %v1704_v1 = vadd.f32 %v1688_v19, %v1655_v11  ;;  %v1705_v4 = vadd.f32 %v1689_v32, %v1656_v37  ;;  %v1723_v41 = vld [vmem:[#allocation2 + $0x88] sm:$0xf]  ;;  %v1771_v13 = vld [vmem:[#allocation2 + $0x81] sm:$0xf] }
 0x272   :  { %v1642_v55 = vmul.f32 %v6021_v2, %v1625_v53  ;;  %v1643_v40 = vmul.f32 %v6021_v2, %v1626_v15  ;;  %v1657_v38 = vadd.f32 %v1641_v35, %v1608_v14  ;;  %v6077_v29 = vperm.slane %v6035_v22, 1  ;;  %v1631_v5 = vld [vmem:[#allocation2 + $0xd9] sm:$0xf]  ;;  %v1632_v11 = vld [vmem:[#allocation2 + $0xe1] sm:$0xf] }
 0x273   :  { %v1644_v42 = vmul.f32 %v6021_v2, %v1627_v61  ;;  %v1737_v21 = vmul.f32 %v6059_v50, %v1720_v6  ;;  %v1738_v27 = vmul.f32 %v6059_v50, %v1721_v43  ;;  %v1739_v62 = vmul.f32 %v6059_v50, %v1722_v34  ;;  %v1725_v35 = vld [vmem:[#allocation2 + $0xa8] sm:$0xf]  ;;  %v1724_v6 = vld [vmem:[#allocation2 + $0xa0] sm:$0xf] }
 0x274   :  { %8019 = vst [vmem:[#allocation19_spill] sm:$0xff] %v6077_v29  ;;  %v1645_v24 = vmul.f32 %v6021_v2, %v1628_v0  ;;  %v6085_v18 = vmul.f32 %v6021_v2, %v1629_v52  ;;  %v1658_v8 = vadd.f32 %v1642_v55, %v1609_v20  ;;  %v1690_v14 = vmul.f32 %v6041_v56, %v1673_v23  ;;  %v1772_v43 = vld [vmem:[#allocation2 + $0x89] sm:$0xf]  ;;  %v1818_v55 = vld [vmem:[#allocation2 + $0x72] sm:$0xf] }
 0x275   :  { %v1659_v37 = vadd.f32 %v1643_v40, %v1610_v57  ;;  %v1753_v53 = vadd.f32 %v1737_v21, %v1703_v25  ;;  %v1754_v15 = vadd.f32 %v1738_v27, %v1704_v1  ;;  %v1755_v61 = vadd.f32 %v1739_v62, %v1705_v4  ;;  %v1819_v40 = vld [vmem:[#allocation2 + $0x7a] sm:$0xf] }
 0x276   :  { %v1691_v59 = vmul.f32 %v6041_v56, %v1674_v3  ;;  %v1692_v19 = vmul.f32 %v6041_v56, %v1675_v17  ;;  %v1706_v32 = vadd.f32 %v1690_v14, %v1657_v38  ;;  %v1740_v20 = vmul.f32 %v6059_v50, %v1723_v41  ;;  %v1820_v38 = vld [vmem:[#allocation2 + $0x82] sm:$0xf]  ;;  %v1633_v3 = vld [vmem:[#allocation2 + $0xf9] sm:$0xf]  ;;  %v1676_v17 = vld [vmem:[#allocation2 + $0xaa] sm:$0xf] }
 0x277   :  { %v1786_v34 = vmul.f32 %v6077_v29, %v1769_v46  ;;  %v1787_v0 = vmul.f32 %v6077_v29, %v1770_v44  ;;  %v1788_v52 = vmul.f32 %v6077_v29, %v1771_v13  ;;  %v6095_v57 = vperm.slane %v6035_v22, 2  ;;  %v1634_v14 = vld [vmem:[#allocation2 + $0x101] sm:$0xf] }
 0x278   :  { %v1647_v23 = vmul.f32 %v6021_v2, %v1630_v33  ;;  %v1648_v25 = vmul.f32 %v6021_v2, %v1631_v5  ;;  %v1649_v1 = vmul.f32 %v6021_v2, %v1632_v11  ;;  %v1707_v4 = vadd.f32 %v1691_v59, %v1658_v8  ;;  %v1635_v33 = vld [vmem:[#allocation2 + $0x109] sm:$0xf]  ;;  %v1677_v5 = vld [vmem:[#allocation2 + $0xb2] sm:$0xf]  ;;  %v1773_v8 = vld [vmem:[#allocation2 + $0xa1] sm:$0xf] }
 0x279   :  { %8020 = vst [vmem:[#allocation20_spill] sm:$0xff] %v6095_v57  ;;  %v1708_v41 = vadd.f32 %v1692_v19, %v1659_v37  ;;  %v1802_v21 = vadd.f32 %v1786_v34, %v1753_v53  ;;  %v1803_v27 = vadd.f32 %v1787_v0, %v1754_v15  ;;  %v1804_v62 = vadd.f32 %v1788_v52, %v1755_v61  ;;  %v1774_v19 = vld [vmem:[#allocation2 + $0xa9] sm:$0xf] }
 0x27a   :  { %v1660_v22 = vadd.f32 %v1644_v42, %v6043_v26  ;;  %v1741_v46 = vmul.f32 %v6059_v50, %v1724_v6  ;;  %v1742_v44 = vmul.f32 %v6059_v50, %v1725_v35  ;;  %v1756_v13 = vadd.f32 %v1740_v20, %v1706_v32  ;;  %v1821_v32 = vld [vmem:[#allocation2 + $0x8a] sm:$0xf]  ;;  %v1636_v35 = vld [vmem:[#allocation2 + $0x111] sm:$0xf]  ;;  %v1727_v20 = vld [vmem:[#allocation2 + $0xb8] sm:$0xf] }
 0x27b   :  { %v1789_v11 = vmul.f32 %v6077_v29, %v1772_v43  ;;  %v1835_v59 = vmul.f32 %v6095_v57, %v1818_v55  ;;  %v1836_v37 = vmul.f32 %v6095_v57, %v1819_v40  ;;  %v1837_v53 = vmul.f32 %v6095_v57, %v1820_v38 }
 0x27c   :  { %v1650_v15 = vmul.f32 %v6021_v2, %v1633_v3  ;;  %v1661_v26 = vadd.f32 %v1645_v24, %v6045_v9  ;;  %v1693_v42 = vmul.f32 %v6041_v56, %v1676_v17  ;;  %v1757_v61 = vadd.f32 %v1741_v46, %v1707_v4  ;;  %v1726_v24 = vld [vmem:[#allocation2 + $0xb0] sm:$0xf]  ;;  %v1822_v17 = vld [vmem:[#allocation2 + $0xa2] sm:$0xf]  ;;  %v1823_v46 = vld [vmem:[#allocation2 + $0xaa] sm:$0xf] }
 0x27d   :  { %v1758_v6 = vadd.f32 %v1742_v44, %v1708_v41  ;;  %v6110_v34 = vadd.f32 %v1835_v59, %v1802_v21  ;;  %v6112_v43 = vadd.f32 %v1836_v37, %v1803_v27  ;;  %v6114_v0 = vadd.f32 %v1837_v53, %v1804_v62  ;;  %v1678_v37 = vld [vmem:[#allocation2 + $0xca] sm:$0xf]  ;;  %v1682_v53 = vld [vmem:[#allocation2 + $0xfa] sm:$0xf] }
 0x27e   :  { %v1651_v52 = vmul.f32 %v6021_v2, %v1634_v14  ;;  %v1652_v55 = vmul.f32 %v6021_v2, %v1635_v33  ;;  %v1694_v9 = vmul.f32 %v6041_v56, %v1677_v5  ;;  %v1790_v4 = vmul.f32 %v6077_v29, %v1773_v8  ;;  %v1776_v33 = vld [vmem:[#allocation2 + $0xb9] sm:$0xf] }
 0x27f   :  { %8021 = vst [vmem:[#allocation21_spill] sm:$0xff] %v6110_v34  ;;  %v1709_v40 = vadd.f32 %v1693_v42, %v1660_v22  ;;  %v1791_v38 = vmul.f32 %v6077_v29, %v1774_v19  ;;  %v1805_v3 = vadd.f32 %v1789_v11, %v1756_v13  ;;  %v1838_v41 = vmul.f32 %v6095_v57, %v1821_v32 }
 0x280   :  { %8022 = vst [vmem:[#allocation22_spill] sm:$0xff] %v6112_v43  ;;  %v1653_v21 = vmul.f32 %v6021_v2, %v1636_v35  ;;  %v1710_v27 = vadd.f32 %v1694_v9, %v1661_v26  ;;  %v1744_v62 = vmul.f32 %v6059_v50, %v1727_v20  ;;  %v1806_v14 = vadd.f32 %v1790_v4, %v1757_v61  ;;  %v1775_v26 = vld [vmem:[#allocation2 + $0xb1] sm:$0xf] }
 0x281   :  { %8023 = vst [vmem:[#allocation23_spill] sm:$0xff] %v6114_v0  ;;  %v1662_v22 = vadd.f32 %v6085_v18, %v6047_v30  ;;  %v1663_v44 = vadd.f32 %v1647_v23, %v6049_v12  ;;  %v1743_v13 = vmul.f32 %v6059_v50, %v1726_v24  ;;  %v1807_v5 = vadd.f32 %v1791_v38, %v1758_v6  ;;  %v1683_v12 = vld [vmem:[#allocation2 + $0x102] sm:$0xf]  ;;  %v1684_v18 = vld [vmem:[#allocation2 + $0x10a] sm:$0xf] }
 0x282   :  { %3187 = vst [vmem:[#allocation1] ss:$2 sm:$0xff] %v6110_v34  ;;  %v1664_v8 = vadd.f32 %v1648_v25, %v6051_v63  ;;  %v1665_v11 = vadd.f32 %v1649_v1, %v6053_v39  ;;  %v1666_v59 = vadd.f32 %v1650_v15, %v6062_v51  ;;  %v1839_v42 = vmul.f32 %v6095_v57, %v1822_v17  ;;  %v1685_v23 = vld [vmem:[#allocation2 + $0x112] sm:$0xf]  ;;  %v1680_v25 = vld [vmem:[#allocation2 + $0xda] sm:$0xf] }
 0x283   :  { %3189 = vst [vmem:[#allocation1 + $0x1] ss:$2 sm:$0xff] %v6112_v43  ;;  %v1667_v30 = vadd.f32 %v1651_v52, %v6065_v60  ;;  %v1759_v61 = vadd.f32 %v1743_v13, %v1709_v40  ;;  %v1840_v19 = vmul.f32 %v6095_v57, %v1823_v46  ;;  %v6137_v32 = vadd.f32 %v1838_v41, %v1805_v3  ;;  %v1679_v39 = vld [vmem:[#allocation2 + $0xd2] sm:$0xf]  ;;  %v1681_v51 = vld [vmem:[#allocation2 + $0xe2] sm:$0xf] }
 0x284   :  { %3191 = vst [vmem:[#allocation1 + $0x10] ss:$2 sm:$0xff] %v6114_v0  ;;  %v1668_v63 = vadd.f32 %v1652_v55, %v6068_v58  ;;  %v1760_v1 = vadd.f32 %v1744_v62, %v1710_v27  ;;  %v1793_v15 = vmul.f32 %v6077_v29, %v1776_v33  ;;  %v6141_v35 = vadd.f32 %v1839_v42, %v1806_v14  ;;  %v1825_v52 = vld [vmem:[#allocation2 + $0xba] sm:$0xf]  ;;  %v1824_v40 = vld [vmem:[#allocation2 + $0xb2] sm:$0xf] }
 0x285   :  { %8024 = vst [vmem:[#allocation24_spill] sm:$0xff] %v6137_v32  ;;  %v1669_v60 = vadd.f32 %v1653_v21, %v6072_v28  ;;  %v1695_v20 = vmul.f32 %v6041_v56, %v1678_v37  ;;  %v1792_v6 = vmul.f32 %v6077_v29, %v1775_v26  ;;  %v6146_v9 = vadd.f32 %v1840_v19, %v1807_v5  ;;  %v1728_v17 = vld [vmem:[#allocation2 + $0xd0] sm:$0xf]  ;;  %v1731_v41 = vld [vmem:[#allocation2 + $0xe8] sm:$0xf] }
 0x286   :  { %8025 = vst [vmem:[#allocation25_spill] sm:$0xff] %v6141_v35  ;;  %v1699_v24 = vmul.f32 %v6041_v56, %v1682_v53  ;;  %v1700_v58 = vmul.f32 %v6041_v56, %v1683_v12  ;;  %v1701_v55 = vmul.f32 %v6041_v56, %v1684_v18  ;;  %v1702_v4 = vmul.f32 %v6041_v56, %v1685_v23  ;;  %v1732_v62 = vld [vmem:[#allocation2 + $0x100] sm:$0xf]  ;;  %v1733_v14 = vld [vmem:[#allocation2 + $0x108] sm:$0xf] }
 0x287   :  { %8026 = vst [vmem:[#allocation26_spill] sm:$0xff] %v6146_v9  ;;  %v1696_v38 = vmul.f32 %v6041_v56, %v1679_v39  ;;  %v1697_v28 = vmul.f32 %v6041_v56, %v1680_v25  ;;  %v1698_v3 = vmul.f32 %v6041_v56, %v1681_v51  ;;  %v1808_v21 = vadd.f32 %v1792_v6, %v1759_v61  ;;  %v1734_v53 = vld [vmem:[#allocation2 + $0x110] sm:$0xf]  ;;  %v1735_v26 = vld [vmem:[#allocation2 + $0x118] sm:$0xf] }
 0x288   :  { %3193 = vst [vmem:[#allocation1 + $0x11] ss:$2 sm:$0xff] %v6137_v32  ;;  %v1711_v27 = vadd.f32 %v1695_v20, %v1662_v22  ;;  %v1809_v46 = vadd.f32 %v1793_v15, %v1760_v1  ;;  %v1842_v13 = vmul.f32 %v6095_v57, %v1825_v52  ;;  %v1841_v42 = vmul.f32 %v6095_v57, %v1824_v40  ;;  %v1729_v61 = vld [vmem:[#allocation2 + $0xd8] sm:$0xf]  ;;  %v1730_v19 = vld [vmem:[#allocation2 + $0xe0] sm:$0xf] }
 0x289   :  { %3195 = vst [vmem:[#allocation1 + $0x20] ss:$2 sm:$0xff] %v6141_v35  ;;  %v1712_v33 = vadd.f32 %v1696_v38, %v1663_v44  ;;  %v1713_v5 = vadd.f32 %v1697_v28, %v1664_v8  ;;  %v1714_v37 = vadd.f32 %v1698_v3, %v1665_v11  ;;  %v1715_v12 = vadd.f32 %v1699_v24, %v1666_v59  ;;  %v1777_v15 = vld [vmem:[#allocation2 + $0xd1] sm:$0xf]  ;;  %v1780_v20 = vld [vmem:[#allocation2 + $0xe9] sm:$0xf] }
 0x28a   :  { %3197 = vst [vmem:[#allocation1 + $0x21] ss:$2 sm:$0xff] %v6146_v9  ;;  %v1716_v18 = vadd.f32 %v1700_v58, %v1667_v30  ;;  %v1717_v23 = vadd.f32 %v1701_v55, %v1668_v63  ;;  %v1718_v22 = vadd.f32 %v1702_v4, %v1669_v60  ;;  %v1745_v39 = vmul.f32 %v6059_v50, %v1728_v17  ;;  %v1778_v60 = vld [vmem:[#allocation2 + $0xd9] sm:$0xf]  ;;  %v1781_v6 = vld [vmem:[#allocation2 + $0x101] sm:$0xf] }
 0x28b   :  { %v1748_v25 = vmul.f32 %v6059_v50, %v1731_v41  ;;  %v1749_v44 = vmul.f32 %v6059_v50, %v1732_v62  ;;  %v6163_v8 = vadd.f32 %v1841_v42, %v1808_v21  ;;  %v1750_v11 = vmul.f32 %v6059_v50, %v1733_v14  ;;  %v1782_v24 = vld [vmem:[#allocation2 + $0x109] sm:$0xf]  ;;  %v1783_v58 = vld [vmem:[#allocation2 + $0x111] sm:$0xf]  ;;  %v1784_v55 = vld [vmem:[#allocation2 + $0x119] sm:$0xf] }
 0x28c   :  { %v1751_v51 = vmul.f32 %v6059_v50, %v1734_v53  ;;  %v1752_v1 = vmul.f32 %v6059_v50, %v1735_v26  ;;  %v6168_v59 = vadd.f32 %v1842_v13, %v1809_v46  ;;  %v1746_v30 = vmul.f32 %v6059_v50, %v1729_v61  ;;  %v1868_v4 = vld [vmem:[#allocation2 + $0x120] sm:$0xf]  ;;  %v1869_v41 = vld [vmem:[#allocation2 + $0x128] sm:$0xf]  ;;  %v1870_v13 = vld [vmem:[#allocation2 + $0x130] sm:$0xf] }
 0x28d   :  { %8027 = vst [vmem:[#allocation27_spill] sm:$0xff] %v6163_v8  ;;  %v1747_v63 = vmul.f32 %v6059_v50, %v1730_v19  ;;  %v1761_v52 = vadd.f32 %v1745_v39, %v1711_v27  ;;  %v1764_v28 = vadd.f32 %v1748_v25, %v1714_v37  ;;  %v1765_v3 = vadd.f32 %v1749_v44, %v1715_v12  ;;  %v1779_v17 = vld [vmem:[#allocation2 + $0xe1] sm:$0xf]  ;;  %v1871_v53 = vld [vmem:[#allocation2 + $0x138] sm:$0xf] }
 0x28e   :  { %8028 = vst [vmem:[#allocation28_spill] sm:$0xff] %v6168_v59  ;;  %v1762_v40 = vadd.f32 %v1746_v30, %v1712_v33  ;;  %v1766_v21 = vadd.f32 %v1750_v11, %v1716_v18  ;;  %v1767_v62 = vadd.f32 %v1751_v51, %v1717_v23  ;;  %v1768_v14 = vadd.f32 %v1752_v1, %v1718_v22  ;;  %v1826_v18 = vld [vmem:[#allocation2 + $0xd2] sm:$0xf]  ;;  %v1829_v23 = vld [vmem:[#allocation2 + $0xea] sm:$0xf] }
 0x28f   :  { %v1763_v38 = vadd.f32 %v1747_v63, %v1713_v5  ;;  %3199 = vst [vmem:[#allocation1 + $0x30] ss:$2 sm:$0xff] %v6163_v8  ;;  %v1797_v46 = vmul.f32 %v6077_v29, %v1780_v20  ;;  %v1798_v27 = vmul.f32 %v6077_v29, %v1781_v6  ;;  %v1799_v33 = vmul.f32 %v6077_v29, %v1782_v24  ;;  %v1827_v22 = vld [vmem:[#allocation2 + $0xda] sm:$0xf]  ;;  %v1830_v61 = vld [vmem:[#allocation2 + $0x102] sm:$0xf] }
 0x290   :  { %3201 = vst [vmem:[#allocation1 + $0x31] ss:$2 sm:$0xff] %v6168_v59  ;;  %v1800_v5 = vmul.f32 %v6077_v29, %v1783_v58  ;;  %v1801_v37 = vmul.f32 %v6077_v29, %v1784_v55  ;;  %v1794_v26 = vmul.f32 %v6077_v29, %v1777_v15  ;;  %v1795_v42 = vmul.f32 %v6077_v29, %v1778_v60  ;;  %v1872_v19 = vld [vmem:[#allocation2 + $0x150] sm:$0xf]  ;;  %v1873_v39 = vld [vmem:[#allocation2 + $0x158] sm:$0xf] }
 0x291   :  { %v1796_v12 = vmul.f32 %v6077_v29, %v1779_v17  ;;  %v6183_v25 = vmul.f32 %v1868_v4, %v5556_v54  ;;  %v6186_v44 = vmul.f32 %v1869_v41, %v5556_v54  ;;  %v6189_v11 = vmul.f32 %v1870_v13, %v5556_v54  ;;  %v1831_v60 = vld [vmem:[#allocation2 + $0x10a] sm:$0xf]  ;;  %v1832_v20 = vld [vmem:[#allocation2 + $0x112] sm:$0xf]  ;;  %v1833_v6 = vld [vmem:[#allocation2 + $0x11a] sm:$0xf] }
 0x292   :  { %v6192_v51 = vmul.f32 %v1871_v53, %v5556_v54  ;;  %v1810_v1 = vadd.f32 %v1794_v26, %v1761_v52  ;;  %v1811_v30 = vadd.f32 %v1795_v42, %v1762_v40  ;;  %v1813_v15 = vadd.f32 %v1797_v46, %v1764_v28  ;;  %v1828_v17 = vld [vmem:[#allocation2 + $0xe2] sm:$0xf]  ;;  %v1875_v29 = vld [vmem:[#allocation2 + $0x168] sm:$0xf]  ;;  %v1878_v52 = vld [vmem:[#allocation2 + $0x190] sm:$0xf] }
 0x293   :  { %v1812_v63 = vadd.f32 %v1796_v12, %v1763_v38  ;;  %v1814_v24 = vadd.f32 %v1798_v27, %v1765_v3  ;;  %v1815_v58 = vadd.f32 %v1799_v33, %v1766_v21  ;;  %v1816_v55 = vadd.f32 %v1800_v5, %v1767_v62  ;;  %v1874_v41 = vld [vmem:[#allocation2 + $0x160] sm:$0xf]  ;;  %v1877_v8 = vld [vmem:[#allocation2 + $0x188] sm:$0xf]  ;;  %v1879_v27 = vld [vmem:[#allocation2 + $0x198] sm:$0xf] }
 0x294   :  { %v1817_v4 = vadd.f32 %v1801_v37, %v1768_v14  ;;  %v1846_v13 = vmul.f32 %v6095_v57, %v1829_v23  ;;  %v1847_v59 = vmul.f32 %v6095_v57, %v1830_v61  ;;  %v1876_v53 = vld [vmem:[#allocation2 + $0x180] sm:$0xf]  ;;  %v6197_v40 = vmul.f32 %v1872_v19, %v5556_v54  ;;  %v1880_v33 = vld [vmem:[#allocation2 + $0x1b0] sm:$0xf]  ;;  %v1917_v42 = vld [vmem:[#allocation2 + $0x129] sm:$0xf] }
 0x295   :  { %v6200_v38 = vmul.f32 %v1873_v39, %v5556_v54  ;;  %v1843_v28 = vmul.f32 %v6095_v57, %v1826_v18  ;;  %v1848_v3 = vmul.f32 %v6095_v57, %v1831_v60  ;;  %v1849_v21 = vmul.f32 %v6095_v57, %v1832_v20  ;;  %v1916_v26 = vld [vmem:[#allocation2 + $0x121] sm:$0xf]  ;;  %v1919_v12 = vld [vmem:[#allocation2 + $0x139] sm:$0xf]  ;;  %v1883_v19 = vld [vmem:[#allocation2 + $0x1c8] sm:$0xf] }
 0x296   :  { %v1850_v62 = vmul.f32 %v6095_v57, %v1833_v6  ;;  %v1844_v14 = vmul.f32 %v6095_v57, %v1827_v22  ;;  %v1845_v46 = vmul.f32 %v6095_v57, %v1828_v17  ;;  %v6209_v5 = vmul.f32 %v1874_v41, %v5556_v54  ;;  %v1881_v23 = vld [vmem:[#allocation2 + $0x1b8] sm:$0xf]  ;;  %v1882_v61 = vld [vmem:[#allocation2 + $0x1c0] sm:$0xf]  ;;  %v1918_v41 = vld [vmem:[#allocation2 + $0x131] sm:$0xf] }
 0x297   :  { %v6212_v37 = vmul.f32 %v1875_v29, %v5556_v54  ;;  %v6214_v18 = vadd.f32 %v1843_v28, %v1810_v1  ;;  %v1892_v22 = vmul.f32 %v1876_v53, %v5556_v54  ;;  %v1893_v39 = vmul.f32 %v1877_v8, %v5556_v54  ;;  %v1920_v1 = vld [vmem:[#allocation2 + $0x151] sm:$0xf]  ;;  %v1924_v28 = vld [vmem:[#allocation2 + $0x181] sm:$0xf]  ;;  %v1969_v34 = vld [vmem:[#allocation2 + $0x15a] sm:$0xf] }
 0x298   :  { %v1894_v60 = vmul.f32 %v1878_v52, %v5556_v54  ;;  %v6219_v20 = vadd.f32 %v1844_v14, %v1811_v30  ;;  %v6221_v6 = vadd.f32 %v1845_v46, %v1812_v63  ;;  %v6223_v29 = vadd.f32 %v1846_v13, %v1813_v15  ;;  %v1921_v52 = vld [vmem:[#allocation2 + $0x159] sm:$0xf]  ;;  %v1922_v30 = vld [vmem:[#allocation2 + $0x161] sm:$0xf]  ;;  %v1923_v14 = vld [vmem:[#allocation2 + $0x169] sm:$0xf] }
 0x299   :  { %8029 = vst [vmem:[#allocation29_spill] sm:$0xff] %v6214_v18  ;;  %v6225_v17 = vadd.f32 %v1847_v59, %v1814_v24  ;;  %v6227_v57 = vadd.f32 %v1848_v3, %v1815_v58  ;;  %v6229_v9 = vadd.f32 %v1849_v21, %v1816_v55  ;;  %v6231_v53 = vadd.f32 %v1850_v62, %v1817_v4  ;;  %v1928_v63 = vld [vmem:[#allocation2 + $0x1b1] sm:$0xf]  ;;  %v1925_v58 = vld [vmem:[#allocation2 + $0x189] sm:$0xf] }
 0x29a   :  { %8030 = vst [vmem:[#allocation30_spill] sm:$0xff] %v6219_v20  ;;  %v1895_v8 = vmul.f32 %v1879_v27, %v5556_v54  ;;  %v1896_v15 = vmul.f32 %v1880_v33, %v5556_v54  ;;  %v1897_v59 = vmul.f32 %v1881_v23, %v5556_v54  ;;  %v1898_v24 = vmul.f32 %v1882_v61, %v5556_v54  ;;  %v1926_v3 = vld [vmem:[#allocation2 + $0x191] sm:$0xf]  ;;  %v1927_v55 = vld [vmem:[#allocation2 + $0x199] sm:$0xf] }
 0x29b   :  { %8031 = vst [vmem:[#allocation31_spill] sm:$0xff] %v6221_v6  ;;  %v1899_v13 = vmul.f32 %v1883_v19, %v5556_v54  ;;  %v1929_v21 = vld [vmem:[#allocation2 + $0x1b9] sm:$0xf]  ;;  %v1930_v4 = vld [vmem:[#allocation2 + $0x1c1] sm:$0xf]  ;;  %v1932_v46 = vmul.f32 %v1916_v26, %v5559_v48  ;;  %v1933_v27 = vmul.f32 %v1917_v42, %v5559_v48  ;;  %v1934_v35 = vmul.f32 %v1918_v41, %v5559_v48 }
 0x29c   :  { %8032 = vst [vmem:[#allocation32_spill] sm:$0xff] %v6223_v29  ;;  %v1931_v62 = vld [vmem:[#allocation2 + $0x1c9] sm:$0xf]  ;;  %v1935_v33 = vmul.f32 %v1919_v12, %v5559_v48  ;;  %v1936_v23 = vmul.f32 %v1920_v1, %v5559_v48  ;;  %v1937_v61 = vmul.f32 %v1921_v52, %v5559_v48  ;;  %v1938_v54 = vmul.f32 %v1922_v30, %v5559_v48  ;;  %v1964_v43 = vld [vmem:[#allocation2 + $0x122] sm:$0xf] }
 0x29d   :  { %8033 = vst [vmem:[#allocation33_spill] sm:$0xff] %v6225_v17  ;;  %v1939_v19 = vmul.f32 %v1923_v14, %v5559_v48  ;;  %v1940_v32 = vmul.f32 %v1924_v28, %v5559_v48  ;;  %v1941_v0 = vmul.f32 %v1925_v58, %v5559_v48  ;;  %v1942_v26 = vmul.f32 %v1926_v3, %v5559_v48  ;;  %v1965_v3 = vld [vmem:[#allocation2 + $0x12a] sm:$0xf]  ;;  %v1966_v50 = vld [vmem:[#allocation2 + $0x132] sm:$0xf] }
 0x29e   :  { %8034 = vst [vmem:[#allocation34_spill] sm:$0xff] %v6227_v57  ;;  %v1943_v42 = vmul.f32 %v1927_v55, %v5559_v48  ;;  %v1944_v41 = vmul.f32 %v1928_v63, %v5559_v48  ;;  %v1945_v12 = vmul.f32 %v1929_v21, %v5559_v48  ;;  %v1946_v1 = vmul.f32 %v1930_v4, %v5559_v48  ;;  %v1967_v55 = vld [vmem:[#allocation2 + $0x13a] sm:$0xf] }
 0x29f   :  { %8035 = vst [vmem:[#allocation35_spill] sm:$0xff] %v6229_v9  ;;  %v1947_v52 = vmul.f32 %v1931_v62, %v5559_v48  ;;  %v1948_v30 = vadd.f32 %v1932_v46, %v6183_v25  ;;  %v1949_v14 = vadd.f32 %v1933_v27, %v6186_v44  ;;  %v1950_v28 = vadd.f32 %v1934_v35, %v6189_v11  ;;  %v1968_v62 = vld [vmem:[#allocation2 + $0x152] sm:$0xf]  ;;  %v1970_v25 = vld [vmem:[#allocation2 + $0x162] sm:$0xf] }
 0x2a0   :  { %8036 = vst [vmem:[#allocation36_spill] sm:$0xff] %v6231_v53  ;;  %v1951_v58 = vadd.f32 %v1935_v33, %v6192_v51  ;;  %v1952_v63 = vadd.f32 %v1936_v23, %v6197_v40  ;;  %v1953_v21 = vadd.f32 %v1937_v61, %v6200_v38  ;;  %v1954_v4 = vadd.f32 %v1938_v54, %v6209_v5  ;;  %v1971_v11 = vld [vmem:[#allocation2 + $0x16a] sm:$0xf]  ;;  %v1972_v51 = vld [vmem:[#allocation2 + $0x182] sm:$0xf] }
 0x2a1   :  { %v1955_v48 = vadd.f32 %v1939_v19, %v6212_v37  ;;  %v1956_v46 = vadd.f32 %v1940_v32, %v1892_v22  ;;  %v1957_v44 = vadd.f32 %v1941_v0, %v1893_v39  ;;  %v1958_v27 = vadd.f32 %v1942_v26, %v1894_v60  ;;  %v1973_v33 = vld [vmem:[#allocation2 + $0x18a] sm:$0xf]  ;;  %v1974_v23 = vld [vmem:[#allocation2 + $0x192] sm:$0xf]  ;;  %v1975_v38 = vld [vmem:[#allocation2 + $0x19a] sm:$0xf] }
 0x2a2   :  { %v1959_v35 = vadd.f32 %v1943_v42, %v1895_v8  ;;  %v1960_v56 = vadd.f32 %v1944_v41, %v1896_v15  ;;  %v1961_v2 = vadd.f32 %v1945_v12, %v1897_v59  ;;  %v1962_v45 = vadd.f32 %v1946_v1, %v1898_v24  ;;  %v1976_v61 = vld [vmem:[#allocation2 + $0x1b2] sm:$0xf]  ;;  %v1977_v5 = vld [vmem:[#allocation2 + $0x1ba] sm:$0xf]  ;;  %v1978_v54 = vld [vmem:[#allocation2 + $0x1c2] sm:$0xf] }
 0x2a3   :  { %v1963_v40 = vadd.f32 %v1947_v52, %v1899_v13  ;;  %v1979_v37 = vld [vmem:[#allocation2 + $0x1ca] sm:$0xf]  ;;  %v1980_v19 = vmul.f32 %v1964_v43, %v5569_v16  ;;  %v1981_v32 = vmul.f32 %v1965_v3, %v5569_v16  ;;  %v1982_v0 = vmul.f32 %v1966_v50, %v5569_v16 }
 0x2a4   :  { %v1983_v22 = vmul.f32 %v1967_v55, %v5569_v16  ;;  %v1984_v39 = vmul.f32 %v1968_v62, %v5569_v16  ;;  %v1985_v60 = vmul.f32 %v1969_v34, %v5569_v16  ;;  %v1986_v8 = vmul.f32 %v1970_v25, %v5569_v16  ;;  %v2013_v41 = vld [vmem:[#allocation2 + $0x128] sm:$0xf]  ;;  %v2014_v55 = vld [vmem:[#allocation2 + $0x130] sm:$0xf]  ;;  %v2015_v62 = vld [vmem:[#allocation2 + $0x138] sm:$0xf] }
 0x2a5   :  { %v1987_v15 = vmul.f32 %v1971_v11, %v5569_v16  ;;  %v1988_v59 = vmul.f32 %v1972_v51, %v5569_v16  ;;  %v1989_v24 = vmul.f32 %v1973_v33, %v5569_v16  ;;  %v1990_v43 = vmul.f32 %v1974_v23, %v5569_v16  ;;  %v2016_v25 = vld [vmem:[#allocation2 + $0x140] sm:$0xf]  ;;  %v2019_v53 = vld [vmem:[#allocation2 + $0x168] sm:$0xf] }
 0x2a6   :  { %v1991_v13 = vmul.f32 %v1975_v38, %v5569_v16  ;;  %v1992_v50 = vmul.f32 %v1976_v61, %v5569_v16  ;;  %v1993_v26 = vmul.f32 %v1977_v5, %v5569_v16  ;;  %v1994_v42 = vmul.f32 %v1978_v54, %v5569_v16  ;;  %v2017_v38 = vld [vmem:[#allocation2 + $0x158] sm:$0xf]  ;;  %v2018_v61 = vld [vmem:[#allocation2 + $0x160] sm:$0xf] }
 0x2a7   :  { %v1995_v34 = vmul.f32 %v1979_v37, %v5569_v16  ;;  %v1996_v12 = vadd.f32 %v1980_v19, %v1948_v30  ;;  %v1997_v1 = vadd.f32 %v1981_v32, %v1949_v14  ;;  %v1998_v52 = vadd.f32 %v1982_v0, %v1950_v28  ;;  %v2020_v16 = vld [vmem:[#allocation2 + $0x170] sm:$0xf]  ;;  %v2021_v37 = vld [vmem:[#allocation2 + $0x188] sm:$0xf]  ;;  %v2023_v32 = vld [vmem:[#allocation2 + $0x198] sm:$0xf] }
 0x2a8   :  { %v1999_v3 = vadd.f32 %v1983_v22, %v1951_v58  ;;  %v2000_v11 = vadd.f32 %v1984_v39, %v1952_v63  ;;  %v2001_v51 = vadd.f32 %v1985_v60, %v1953_v21  ;;  %v2002_v33 = vadd.f32 %v1986_v8, %v1954_v4  ;;  %v2022_v30 = vld [vmem:[#allocation2 + $0x190] sm:$0xf]  ;;  %v2024_v0 = vld [vmem:[#allocation2 + $0x1a0] sm:$0xf]  ;;  %v2025_v63 = vld [vmem:[#allocation2 + $0x1b8] sm:$0xf] }
 0x2a9   :  { %v2003_v23 = vadd.f32 %v1987_v15, %v1955_v48  ;;  %v2004_v5 = vadd.f32 %v1988_v59, %v1956_v46  ;;  %v2005_v9 = vadd.f32 %v1989_v24, %v1957_v44  ;;  %v2006_v54 = vadd.f32 %v1990_v43, %v1958_v27  ;;  %v2026_v21 = vld [vmem:[#allocation2 + $0x1c0] sm:$0xf]  ;;  %v2027_v4 = vld [vmem:[#allocation2 + $0x1c8] sm:$0xf]  ;;  %v2028_v48 = vld [vmem:[#allocation2 + $0x1d0] sm:$0xf] }
 0x2aa   :  { %v2007_v57 = vadd.f32 %v1991_v13, %v1959_v35  ;;  %v2008_v14 = vadd.f32 %v1992_v50, %v1960_v56  ;;  %v2009_v28 = vadd.f32 %v1993_v26, %v1961_v2  ;;  %v2010_v58 = vadd.f32 %v1994_v42, %v1962_v45  ;;  %v2061_v13 = vld [vmem:[#allocation2 + $0x129] sm:$0xf] }
 0x2ab   :  { %v2011_v19 = vadd.f32 %v1995_v34, %v1963_v40  ;;  %v2029_v22 = vmul.f32 %v2013_v41, %v5585_v7  ;;  %v2030_v46 = vmul.f32 %v2014_v55, %v5585_v7  ;;  %v2031_v44 = vmul.f32 %v2015_v62, %v5585_v7  ;;  %v2062_v34 = vld [vmem:[#allocation2 + $0x131] sm:$0xf]  ;;  %v2063_v41 = vld [vmem:[#allocation2 + $0x139] sm:$0xf]  ;;  %v2064_v55 = vld [vmem:[#allocation2 + $0x141] sm:$0xf] }
 0x2ac   :  { %v2032_v27 = vmul.f32 %v2016_v25, %v5585_v7  ;;  %v2033_v35 = vmul.f32 %v2017_v38, %v5585_v7  ;;  %v2034_v2 = vmul.f32 %v2018_v61, %v5585_v7  ;;  %v2035_v45 = vmul.f32 %v2019_v53, %v5585_v7 }
 0x2ad   :  { %v2036_v56 = vmul.f32 %v2020_v16, %v5585_v7  ;;  %v2037_v40 = vmul.f32 %v2021_v37, %v5585_v7  ;;  %v2038_v39 = vmul.f32 %v2022_v30, %v5585_v7  ;;  %v2039_v60 = vmul.f32 %v2023_v32, %v5585_v7  ;;  %v2065_v16 = vld [vmem:[#allocation2 + $0x159] sm:$0xf]  ;;  %v2066_v37 = vld [vmem:[#allocation2 + $0x161] sm:$0xf]  ;;  %v2067_v30 = vld [vmem:[#allocation2 + $0x169] sm:$0xf] }
 0x2ae   :  { %v2040_v8 = vmul.f32 %v2024_v0, %v5585_v7  ;;  %v2041_v15 = vmul.f32 %v2025_v63, %v5585_v7  ;;  %v2042_v59 = vmul.f32 %v2026_v21, %v5585_v7  ;;  %v2043_v24 = vmul.f32 %v2027_v4, %v5585_v7  ;;  %v2069_v4 = vld [vmem:[#allocation2 + $0x189] sm:$0xf] }
 0x2af   :  { %v2044_v43 = vmul.f32 %v2028_v48, %v5585_v7  ;;  %v2045_v53 = vadd.f32 %v2029_v22, %v1996_v12  ;;  %v2046_v50 = vadd.f32 %v2030_v46, %v1997_v1  ;;  %v2047_v26 = vadd.f32 %v2031_v44, %v1998_v52  ;;  %v2068_v7 = vld [vmem:[#allocation2 + $0x171] sm:$0xf]  ;;  %v2071_v22 = vld [vmem:[#allocation2 + $0x199] sm:$0xf]  ;;  %v2072_v46 = vld [vmem:[#allocation2 + $0x1a1] sm:$0xf] }
 0x2b0   :  { %v2048_v42 = vadd.f32 %v2032_v27, %v1999_v3  ;;  %v2049_v62 = vadd.f32 %v2033_v35, %v2000_v11  ;;  %v2050_v25 = vadd.f32 %v2034_v2, %v2001_v51  ;;  %v2051_v38 = vadd.f32 %v2035_v45, %v2002_v33  ;;  %v2070_v12 = vld [vmem:[#allocation2 + $0x191] sm:$0xf]  ;;  %v2073_v11 = vld [vmem:[#allocation2 + $0x1b9] sm:$0xf]  ;;  %v2074_v51 = vld [vmem:[#allocation2 + $0x1c1] sm:$0xf] }
 0x2b1   :  { %v2052_v61 = vadd.f32 %v2036_v56, %v2003_v23  ;;  %v2053_v32 = vadd.f32 %v2037_v40, %v2004_v5  ;;  %v2054_v0 = vadd.f32 %v2038_v39, %v2005_v9  ;;  %v2055_v63 = vadd.f32 %v2039_v60, %v2006_v54  ;;  %v2075_v33 = vld [vmem:[#allocation2 + $0x1c9] sm:$0xf]  ;;  %v2076_v23 = vld [vmem:[#allocation2 + $0x1d1] sm:$0xf] }
 0x2b2   :  { %v2056_v21 = vadd.f32 %v2040_v8, %v2007_v57  ;;  %v2057_v1 = vadd.f32 %v2041_v15, %v2008_v14  ;;  %v2058_v52 = vadd.f32 %v2042_v59, %v2009_v28  ;;  %v2059_v3 = vadd.f32 %v2043_v24, %v2010_v58  ;;  %v2109_v60 = vld [vmem:[#allocation2 + $0x12a] sm:$0xf] }
 0x2b3   :  { %v2060_v48 = vadd.f32 %v2044_v43, %v2011_v19  ;;  %v2077_v44 = vmul.f32 %v2061_v13, %v5597_v31  ;;  %v2078_v5 = vmul.f32 %v2062_v34, %v5597_v31  ;;  %v2079_v9 = vmul.f32 %v2063_v41, %v5597_v31  ;;  %v2110_v43 = vld [vmem:[#allocation2 + $0x132] sm:$0xf]  ;;  %v2111_v13 = vld [vmem:[#allocation2 + $0x13a] sm:$0xf]  ;;  %v2112_v34 = vld [vmem:[#allocation2 + $0x142] sm:$0xf] }
 0x2b4   :  { %v2080_v57 = vmul.f32 %v2064_v55, %v5597_v31  ;;  %v2081_v54 = vmul.f32 %v2065_v16, %v5597_v31  ;;  %v2082_v14 = vmul.f32 %v2066_v37, %v5597_v31  ;;  %v2083_v28 = vmul.f32 %v2067_v30, %v5597_v31  ;;  %v2113_v30 = vld [vmem:[#allocation2 + $0x15a] sm:$0xf] }
 0x2b5   :  { %v2084_v58 = vmul.f32 %v2068_v7, %v5597_v31  ;;  %v2085_v19 = vmul.f32 %v2069_v4, %v5597_v31  ;;  %v2086_v27 = vmul.f32 %v2070_v12, %v5597_v31  ;;  %v2087_v35 = vmul.f32 %v2071_v22, %v5597_v31  ;;  %v2114_v7 = vld [vmem:[#allocation2 + $0x162] sm:$0xf]  ;;  %v2115_v4 = vld [vmem:[#allocation2 + $0x16a] sm:$0xf] }
 0x2b6   :  { %v2088_v2 = vmul.f32 %v2072_v46, %v5597_v31  ;;  %v2089_v45 = vmul.f32 %v2073_v11, %v5597_v31  ;;  %v2090_v56 = vmul.f32 %v2074_v51, %v5597_v31  ;;  %v2091_v40 = vmul.f32 %v2075_v33, %v5597_v31  ;;  %v2117_v51 = vld [vmem:[#allocation2 + $0x18a] sm:$0xf] }
 0x2b7   :  { %v2092_v39 = vmul.f32 %v2076_v23, %v5597_v31  ;;  %v2093_v8 = vadd.f32 %v2077_v44, %v2045_v53  ;;  %v2094_v15 = vadd.f32 %v2078_v5, %v2046_v50  ;;  %v2095_v59 = vadd.f32 %v2079_v9, %v2047_v26  ;;  %v2116_v31 = vld [vmem:[#allocation2 + $0x172] sm:$0xf]  ;;  %v2119_v23 = vld [vmem:[#allocation2 + $0x19a] sm:$0xf]  ;;  %v2120_v44 = vld [vmem:[#allocation2 + $0x1a2] sm:$0xf] }
 0x2b8   :  { %v2096_v24 = vadd.f32 %v2080_v57, %v2048_v42  ;;  %v2097_v41 = vadd.f32 %v2081_v54, %v2049_v62  ;;  %v2098_v55 = vadd.f32 %v2082_v14, %v2050_v25  ;;  %v2099_v16 = vadd.f32 %v2083_v28, %v2051_v38  ;;  %v2118_v53 = vld [vmem:[#allocation2 + $0x192] sm:$0xf]  ;;  %v2121_v62 = vld [vmem:[#allocation2 + $0x1ba] sm:$0xf]  ;;  %v2122_v25 = vld [vmem:[#allocation2 + $0x1c2] sm:$0xf] }
 0x2b9   :  { %v2100_v37 = vadd.f32 %v2084_v58, %v2052_v61  ;;  %v2101_v12 = vadd.f32 %v2085_v19, %v2053_v32  ;;  %v2102_v22 = vadd.f32 %v2086_v27, %v2054_v0  ;;  %v2103_v46 = vadd.f32 %v2087_v35, %v2055_v63  ;;  %v2123_v38 = vld [vmem:[#allocation2 + $0x1ca] sm:$0xf]  ;;  %v2124_v61 = vld [vmem:[#allocation2 + $0x1d2] sm:$0xf] }
 0x2ba   :  { %v2104_v11 = vadd.f32 %v2088_v2, %v2056_v21  ;;  %v2105_v50 = vadd.f32 %v2089_v45, %v2057_v1  ;;  %v2106_v26 = vadd.f32 %v2090_v56, %v2058_v52  ;;  %v2107_v42 = vadd.f32 %v2091_v40, %v2059_v3  ;;  %v2158_v27 = vld [vmem:[#allocation2 + $0x130] sm:$0xf]  ;;  %v2159_v40 = vld [vmem:[#allocation2 + $0x138] sm:$0xf] }
 0x2bb   :  { %v2108_v33 = vadd.f32 %v2092_v39, %v2060_v48  ;;  %v2125_v5 = vmul.f32 %v2109_v60, %v5612_v49  ;;  %v2126_v32 = vmul.f32 %v2110_v43, %v5612_v49  ;;  %v2127_v0 = vmul.f32 %v2111_v13, %v5612_v49  ;;  %v2160_v39 = vld [vmem:[#allocation2 + $0x140] sm:$0xf]  ;;  %v2161_v60 = vld [vmem:[#allocation2 + $0x148] sm:$0xf] }
 0x2bc   :  { %v2128_v63 = vmul.f32 %v2112_v34, %v5612_v49  ;;  %v2129_v21 = vmul.f32 %v2113_v30, %v5612_v49  ;;  %v2130_v1 = vmul.f32 %v2114_v7, %v5612_v49  ;;  %v2131_v52 = vmul.f32 %v2115_v4, %v5612_v49  ;;  %v2162_v7 = vld [vmem:[#allocation2 + $0x160] sm:$0xf]  ;;  %v2163_v4 = vld [vmem:[#allocation2 + $0x168] sm:$0xf] }
 0x2bd   :  { %v2132_v3 = vmul.f32 %v2116_v31, %v5612_v49  ;;  %v2133_v48 = vmul.f32 %v2117_v51, %v5612_v49  ;;  %v2134_v9 = vmul.f32 %v2118_v53, %v5612_v49  ;;  %v2135_v57 = vmul.f32 %v2119_v23, %v5612_v49  ;;  %v2164_v31 = vld [vmem:[#allocation2 + $0x170] sm:$0xf] }
 0x2be   :  { %v2136_v54 = vmul.f32 %v2120_v44, %v5612_v49  ;;  %v2137_v14 = vmul.f32 %v2121_v62, %v5612_v49  ;;  %v2138_v28 = vmul.f32 %v2122_v25, %v5612_v49  ;;  %v2139_v58 = vmul.f32 %v2123_v38, %v5612_v49  ;;  %v2166_v62 = vld [vmem:[#allocation2 + $0x190] sm:$0xf]  ;;  %v2168_v38 = vld [vmem:[#allocation2 + $0x1a0] sm:$0xf] }
 0x2bf   :  { %v2140_v19 = vmul.f32 %v2124_v61, %v5612_v49  ;;  %v2141_v35 = vadd.f32 %v2125_v5, %v2093_v8  ;;  %v2142_v2 = vadd.f32 %v2126_v32, %v2094_v15  ;;  %v2143_v45 = vadd.f32 %v2127_v0, %v2095_v59  ;;  %v2165_v49 = vld [vmem:[#allocation2 + $0x178] sm:$0xf]  ;;  %v2169_v61 = vld [vmem:[#allocation2 + $0x1a8] sm:$0xf] }
 0x2c0   :  { %v2144_v56 = vadd.f32 %v2128_v63, %v2096_v24  ;;  %v2145_v43 = vadd.f32 %v2129_v21, %v2097_v41  ;;  %v2146_v13 = vadd.f32 %v2130_v1, %v2098_v55  ;;  %v2147_v34 = vadd.f32 %v2131_v52, %v2099_v16  ;;  %v2167_v8 = vld [vmem:[#allocation2 + $0x198] sm:$0xf]  ;;  %v2170_v41 = vld [vmem:[#allocation2 + $0x1c0] sm:$0xf]  ;;  %v2171_v55 = vld [vmem:[#allocation2 + $0x1c8] sm:$0xf] }
 0x2c1   :  { %v2148_v30 = vadd.f32 %v2132_v3, %v2100_v37  ;;  %v2149_v51 = vadd.f32 %v2133_v48, %v2101_v12  ;;  %v2150_v53 = vadd.f32 %v2134_v9, %v2102_v22  ;;  %v2151_v23 = vadd.f32 %v2135_v57, %v2103_v46  ;;  %v2172_v16 = vld [vmem:[#allocation2 + $0x1d0] sm:$0xf]  ;;  %v2173_v37 = vld [vmem:[#allocation2 + $0x1d8] sm:$0xf] }
 0x2c2   :  { %v2152_v44 = vadd.f32 %v2136_v54, %v2104_v11  ;;  %v2153_v15 = vadd.f32 %v2137_v14, %v2105_v50  ;;  %v2154_v59 = vadd.f32 %v2138_v28, %v2106_v26  ;;  %v2155_v24 = vadd.f32 %v2139_v58, %v2107_v42  ;;  %v2206_v48 = vld [vmem:[#allocation2 + $0x131] sm:$0xf]  ;;  %v2207_v28 = vld [vmem:[#allocation2 + $0x139] sm:$0xf]  ;;  %v2208_v58 = vld [vmem:[#allocation2 + $0x141] sm:$0xf] }
 0x2c3   :  { %v2156_v25 = vadd.f32 %v2140_v19, %v2108_v33  ;;  %v2174_v5 = vmul.f32 %v2158_v27, %v5703_v10  ;;  %v2175_v12 = vmul.f32 %v2159_v40, %v5703_v10  ;;  %v2176_v22 = vmul.f32 %v2160_v39, %v5703_v10  ;;  %v2209_v19 = vld [vmem:[#allocation2 + $0x149] sm:$0xf] }
 0x2c4   :  { %v2177_v46 = vmul.f32 %v2161_v60, %v5703_v10  ;;  %v2178_v11 = vmul.f32 %v2162_v7, %v5703_v10  ;;  %v2179_v50 = vmul.f32 %v2163_v4, %v5703_v10  ;;  %v2180_v26 = vmul.f32 %v2164_v31, %v5703_v10  ;;  %v2210_v7 = vld [vmem:[#allocation2 + $0x161] sm:$0xf]  ;;  %v2211_v4 = vld [vmem:[#allocation2 + $0x169] sm:$0xf]  ;;  %v2212_v31 = vld [vmem:[#allocation2 + $0x171] sm:$0xf] }
 0x2c5   :  { %v2181_v42 = vmul.f32 %v2165_v49, %v5703_v10  ;;  %v2182_v33 = vmul.f32 %v2166_v62, %v5703_v10  ;;  %v2183_v32 = vmul.f32 %v2167_v8, %v5703_v10  ;;  %v2184_v0 = vmul.f32 %v2168_v38, %v5703_v10 }
 0x2c6   :  { %v2185_v63 = vmul.f32 %v2169_v61, %v5703_v10  ;;  %v2186_v21 = vmul.f32 %v2170_v41, %v5703_v10  ;;  %v2187_v1 = vmul.f32 %v2171_v55, %v5703_v10  ;;  %v2188_v52 = vmul.f32 %v2172_v16, %v5703_v10  ;;  %v2214_v61 = vld [vmem:[#allocation2 + $0x191] sm:$0xf]  ;;  %v2216_v55 = vld [vmem:[#allocation2 + $0x1a1] sm:$0xf]  ;;  %v2217_v16 = vld [vmem:[#allocation2 + $0x1a9] sm:$0xf] }
 0x2c7   :  { %v2189_v3 = vmul.f32 %v2173_v37, %v5703_v10  ;;  %v2190_v9 = vadd.f32 %v2174_v5, %v2141_v35  ;;  %v2191_v57 = vadd.f32 %v2175_v12, %v2142_v2  ;;  %v2192_v54 = vadd.f32 %v2176_v22, %v2143_v45  ;;  %v2213_v10 = vld [vmem:[#allocation2 + $0x179] sm:$0xf]  ;;  %v8037_v37 = vld [vmem:[#allocation3_spill] sm:$0xff] }
 0x2c8   :  { %v2193_v14 = vadd.f32 %v2177_v46, %v2144_v56  ;;  %v2194_v27 = vadd.f32 %v2178_v11, %v2145_v43  ;;  %v2195_v40 = vadd.f32 %v2179_v50, %v2146_v13  ;;  %v2196_v39 = vadd.f32 %v2180_v26, %v2147_v34  ;;  %v2215_v35 = vld [vmem:[#allocation2 + $0x199] sm:$0xf]  ;;  %v2218_v43 = vld [vmem:[#allocation2 + $0x1c1] sm:$0xf]  ;;  %v2219_v13 = vld [vmem:[#allocation2 + $0x1c9] sm:$0xf] }
 0x2c9   :  { %v2197_v60 = vadd.f32 %v2181_v42, %v2148_v30  ;;  %v2198_v49 = vadd.f32 %v2182_v33, %v2149_v51  ;;  %v2199_v62 = vadd.f32 %v2183_v32, %v2150_v53  ;;  %v2200_v8 = vadd.f32 %v2184_v0, %v2151_v23  ;;  %v2220_v34 = vld [vmem:[#allocation2 + $0x1d1] sm:$0xf]  ;;  %v2221_v30 = vld [vmem:[#allocation2 + $0x1d9] sm:$0xf] }
 0x2ca   :  { %v2201_v38 = vadd.f32 %v2185_v63, %v2152_v44  ;;  %v2202_v2 = vadd.f32 %v2186_v21, %v2153_v15  ;;  %v2203_v45 = vadd.f32 %v2187_v1, %v2154_v59  ;;  %v2204_v56 = vadd.f32 %v2188_v52, %v2155_v24  ;;  %v2254_v33 = vld [vmem:[#allocation2 + $0x132] sm:$0xf]  ;;  %v2255_v1 = vld [vmem:[#allocation2 + $0x13a] sm:$0xf]  ;;  %v2256_v52 = vld [vmem:[#allocation2 + $0x142] sm:$0xf] }
 0x2cb   :  { %v2205_v41 = vadd.f32 %v2189_v3, %v2156_v25  ;;  %v2222_v5 = vmul.f32 %v2206_v48, %v8037_v37  ;;  %v2223_v51 = vmul.f32 %v2207_v28, %v8037_v37  ;;  %v2224_v53 = vmul.f32 %v2208_v58, %v8037_v37  ;;  %v2257_v3 = vld [vmem:[#allocation2 + $0x14a] sm:$0xf] }
 0x2cc   :  { %v2225_v23 = vmul.f32 %v2209_v19, %v8037_v37  ;;  %v2226_v44 = vmul.f32 %v2210_v7, %v8037_v37  ;;  %v2227_v15 = vmul.f32 %v2211_v4, %v8037_v37  ;;  %v2228_v59 = vmul.f32 %v2212_v31, %v8037_v37  ;;  %v2258_v7 = vld [vmem:[#allocation2 + $0x162] sm:$0xf]  ;;  %v2259_v4 = vld [vmem:[#allocation2 + $0x16a] sm:$0xf]  ;;  %v2260_v31 = vld [vmem:[#allocation2 + $0x172] sm:$0xf] }
 0x2cd   :  { %v2229_v24 = vmul.f32 %v2213_v10, %v8037_v37  ;;  %v2230_v25 = vmul.f32 %v2214_v61, %v8037_v37  ;;  %v2231_v12 = vmul.f32 %v2215_v35, %v8037_v37  ;;  %v2232_v22 = vmul.f32 %v2216_v55, %v8037_v37 }
 0x2ce   :  { %v2233_v46 = vmul.f32 %v2217_v16, %v8037_v37  ;;  %v2234_v11 = vmul.f32 %v2218_v43, %v8037_v37  ;;  %v2235_v50 = vmul.f32 %v2219_v13, %v8037_v37  ;;  %v2236_v26 = vmul.f32 %v2220_v34, %v8037_v37  ;;  %v2261_v16 = vld [vmem:[#allocation2 + $0x17a] sm:$0xf]  ;;  %v2262_v43 = vld [vmem:[#allocation2 + $0x192] sm:$0xf]  ;;  %v2264_v34 = vld [vmem:[#allocation2 + $0x1a2] sm:$0xf] }
 0x2cf   :  { %v2237_v42 = vmul.f32 %v2221_v30, %v8037_v37  ;;  %v2238_v32 = vadd.f32 %v2222_v5, %v2190_v9  ;;  %v2239_v0 = vadd.f32 %v2223_v51, %v2191_v57  ;;  %v2240_v63 = vadd.f32 %v2224_v53, %v2192_v54  ;;  %v2263_v9 = vld [vmem:[#allocation2 + $0x19a] sm:$0xf]  ;;  %v2265_v30 = vld [vmem:[#allocation2 + $0x1aa] sm:$0xf] }
 0x2d0   :  { %v2241_v21 = vadd.f32 %v2225_v23, %v2193_v14  ;;  %v2242_v48 = vadd.f32 %v2226_v44, %v2194_v27  ;;  %v2243_v28 = vadd.f32 %v2227_v15, %v2195_v40  ;;  %v2244_v58 = vadd.f32 %v2228_v59, %v2196_v39  ;;  %v2266_v27 = vld [vmem:[#allocation2 + $0x1c2] sm:$0xf]  ;;  %v2267_v40 = vld [vmem:[#allocation2 + $0x1ca] sm:$0xf]  ;;  %v2268_v39 = vld [vmem:[#allocation2 + $0x1d2] sm:$0xf] }
 0x2d1   :  { %v2245_v19 = vadd.f32 %v2229_v24, %v2197_v60  ;;  %v2246_v10 = vadd.f32 %v2230_v25, %v2198_v49  ;;  %v2247_v61 = vadd.f32 %v2231_v12, %v2199_v62  ;;  %v2248_v35 = vadd.f32 %v2232_v22, %v2200_v8  ;;  %v2269_v60 = vld [vmem:[#allocation2 + $0x1da] sm:$0xf]  ;;  %v8038_v37 = vld [vmem:[#allocation4_spill] sm:$0xff]  ;;  %v2303_v25 = vld [vmem:[#allocation2 + $0x150] sm:$0xf] }
 0x2d2   :  { %v2249_v55 = vadd.f32 %v2233_v46, %v2201_v38  ;;  %v2250_v57 = vadd.f32 %v2234_v11, %v2202_v2  ;;  %v2251_v54 = vadd.f32 %v2235_v50, %v2203_v45  ;;  %v2252_v14 = vadd.f32 %v2236_v26, %v2204_v56  ;;  %v2304_v50 = vld [vmem:[#allocation2 + $0x158] sm:$0xf]  ;;  %v2305_v26 = vld [vmem:[#allocation2 + $0x160] sm:$0xf] }
 0x2d3   :  { %v2253_v13 = vadd.f32 %v2237_v42, %v2205_v41  ;;  %v2270_v5 = vmul.f32 %v2254_v33, %v8038_v37  ;;  %v2271_v49 = vmul.f32 %v2255_v1, %v8038_v37  ;;  %v2272_v62 = vmul.f32 %v2256_v52, %v8038_v37  ;;  %v2306_v42 = vld [vmem:[#allocation2 + $0x168] sm:$0xf] }
 0x2d4   :  { %v2273_v8 = vmul.f32 %v2257_v3, %v8038_v37  ;;  %v2274_v38 = vmul.f32 %v2258_v7, %v8038_v37  ;;  %v2275_v2 = vmul.f32 %v2259_v4, %v8038_v37  ;;  %v2276_v45 = vmul.f32 %v2260_v31, %v8038_v37  ;;  %v2307_v7 = vld [vmem:[#allocation2 + $0x180] sm:$0xf]  ;;  %v2308_v4 = vld [vmem:[#allocation2 + $0x188] sm:$0xf]  ;;  %v2309_v31 = vld [vmem:[#allocation2 + $0x190] sm:$0xf] }
 0x2d5   :  { %v2277_v56 = vmul.f32 %v2261_v16, %v8038_v37  ;;  %v2278_v41 = vmul.f32 %v2262_v43, %v8038_v37  ;;  %v2279_v51 = vmul.f32 %v2263_v9, %v8038_v37  ;;  %v2280_v53 = vmul.f32 %v2264_v34, %v8038_v37 }
 0x2d6   :  { %v2281_v23 = vmul.f32 %v2265_v30, %v8038_v37  ;;  %v2282_v44 = vmul.f32 %v2266_v27, %v8038_v37  ;;  %v2283_v15 = vmul.f32 %v2267_v40, %v8038_v37  ;;  %v2284_v59 = vmul.f32 %v2268_v39, %v8038_v37  ;;  %v2310_v30 = vld [vmem:[#allocation2 + $0x198] sm:$0xf]  ;;  %v2311_v27 = vld [vmem:[#allocation2 + $0x1b0] sm:$0xf]  ;;  %v2313_v39 = vld [vmem:[#allocation2 + $0x1c0] sm:$0xf] }
 0x2d7   :  { %v2285_v24 = vmul.f32 %v2269_v60, %v8038_v37  ;;  %v2286_v12 = vadd.f32 %v2270_v5, %v2238_v32  ;;  %v2287_v22 = vadd.f32 %v2271_v49, %v2239_v0  ;;  %v2288_v46 = vadd.f32 %v2272_v62, %v2240_v63  ;;  %v2312_v32 = vld [vmem:[#allocation2 + $0x1b8] sm:$0xf]  ;;  %v2314_v60 = vld [vmem:[#allocation2 + $0x1c8] sm:$0xf]  ;;  %v8039_v37 = vld [vmem:[#allocation5_spill] sm:$0xff] }
 0x2d8   :  { %v2289_v11 = vadd.f32 %v2273_v8, %v2241_v21  ;;  %v2290_v33 = vadd.f32 %v2274_v38, %v2242_v48  ;;  %v2291_v1 = vadd.f32 %v2275_v2, %v2243_v28  ;;  %v2292_v52 = vadd.f32 %v2276_v45, %v2244_v58  ;;  %v2315_v48 = vld [vmem:[#allocation2 + $0x1e0] sm:$0xf]  ;;  %v2316_v28 = vld [vmem:[#allocation2 + $0x1e8] sm:$0xf]  ;;  %v2317_v58 = vld [vmem:[#allocation2 + $0x1f0] sm:$0xf] }
 0x2d9   :  { %v2293_v3 = vadd.f32 %v2277_v56, %v2245_v19  ;;  %v2294_v16 = vadd.f32 %v2278_v41, %v2246_v10  ;;  %v2295_v43 = vadd.f32 %v2279_v51, %v2247_v61  ;;  %v2296_v9 = vadd.f32 %v2280_v53, %v2248_v35  ;;  %v2318_v19 = vld [vmem:[#allocation2 + $0x1f8] sm:$0xf]  ;;  %v2351_v41 = vld [vmem:[#allocation2 + $0x151] sm:$0xf] }
 0x2da   :  { %v2297_v34 = vadd.f32 %v2281_v23, %v2249_v55  ;;  %v2298_v0 = vadd.f32 %v2282_v44, %v2250_v57  ;;  %v2299_v63 = vadd.f32 %v2283_v15, %v2251_v54  ;;  %v2300_v21 = vadd.f32 %v2284_v59, %v2252_v14  ;;  %v2352_v15 = vld [vmem:[#allocation2 + $0x159] sm:$0xf]  ;;  %v2354_v59 = vld [vmem:[#allocation2 + $0x169] sm:$0xf] }
 0x2db   :  { %v2301_v40 = vadd.f32 %v2285_v24, %v2253_v13  ;;  %v2319_v5 = vmul.f32 %v2303_v25, %v8039_v37  ;;  %v2320_v10 = vmul.f32 %v2304_v50, %v8039_v37  ;;  %v2321_v61 = vmul.f32 %v2305_v26, %v8039_v37  ;;  %v2356_v24 = vld [vmem:[#allocation2 + $0x189] sm:$0xf] }
 0x2dc   :  { %v2322_v35 = vmul.f32 %v2306_v42, %v8039_v37  ;;  %v2323_v55 = vmul.f32 %v2307_v7, %v8039_v37  ;;  %v2324_v57 = vmul.f32 %v2308_v4, %v8039_v37  ;;  %v2325_v54 = vmul.f32 %v2309_v31, %v8039_v37  ;;  %v2353_v7 = vld [vmem:[#allocation2 + $0x161] sm:$0xf]  ;;  %v2357_v31 = vld [vmem:[#allocation2 + $0x191] sm:$0xf] }
 0x2dd   :  { %v2326_v14 = vmul.f32 %v2310_v30, %v8039_v37  ;;  %v2327_v13 = vmul.f32 %v2311_v27, %v8039_v37  ;;  %v2328_v49 = vmul.f32 %v2312_v32, %v8039_v37  ;;  %v2329_v62 = vmul.f32 %v2313_v39, %v8039_v37  ;;  %v2355_v4 = vld [vmem:[#allocation2 + $0x181] sm:$0xf] }
 0x2de   :  { %v2330_v8 = vmul.f32 %v2314_v60, %v8039_v37  ;;  %v2331_v38 = vmul.f32 %v2315_v48, %v8039_v37  ;;  %v2332_v2 = vmul.f32 %v2316_v28, %v8039_v37  ;;  %v2333_v45 = vmul.f32 %v2317_v58, %v8039_v37  ;;  %v2358_v60 = vld [vmem:[#allocation2 + $0x199] sm:$0xf]  ;;  %v2359_v48 = vld [vmem:[#allocation2 + $0x1b1] sm:$0xf]  ;;  %v2361_v58 = vld [vmem:[#allocation2 + $0x1c1] sm:$0xf] }
 0x2df   :  { %v2334_v56 = vmul.f32 %v2318_v19, %v8039_v37  ;;  %v2335_v51 = vadd.f32 %v2319_v5, %v2286_v12  ;;  %v2336_v53 = vadd.f32 %v2320_v10, %v2287_v22  ;;  %v2337_v23 = vadd.f32 %v2321_v61, %v2288_v46  ;;  %v2360_v12 = vld [vmem:[#allocation2 + $0x1b9] sm:$0xf]  ;;  %v2362_v19 = vld [vmem:[#allocation2 + $0x1c9] sm:$0xf] }
 0x2e0   :  { %v2338_v44 = vadd.f32 %v2322_v35, %v2289_v11  ;;  %v2339_v25 = vadd.f32 %v2323_v55, %v2290_v33  ;;  %v2340_v50 = vadd.f32 %v2324_v57, %v2291_v1  ;;  %v2341_v26 = vadd.f32 %v2325_v54, %v2292_v52  ;;  %v2363_v33 = vld [vmem:[#allocation2 + $0x1e1] sm:$0xf]  ;;  %v2364_v1 = vld [vmem:[#allocation2 + $0x1e9] sm:$0xf]  ;;  %v2365_v52 = vld [vmem:[#allocation2 + $0x1f1] sm:$0xf] }
 0x2e1   :  { %v2342_v42 = vadd.f32 %v2326_v14, %v2293_v3  ;;  %v2343_v30 = vadd.f32 %v2327_v13, %v2294_v16  ;;  %v2344_v27 = vadd.f32 %v2328_v49, %v2295_v43  ;;  %v2345_v32 = vadd.f32 %v2329_v62, %v2296_v9  ;;  %v2366_v3 = vld [vmem:[#allocation2 + $0x1f9] sm:$0xf]  ;;  %v2399_v13 = vld [vmem:[#allocation2 + $0x152] sm:$0xf] }
 0x2e2   :  { %v2346_v39 = vadd.f32 %v2330_v8, %v2297_v34  ;;  %v2347_v22 = vadd.f32 %v2331_v38, %v2298_v0  ;;  %v2348_v46 = vadd.f32 %v2332_v2, %v2299_v63  ;;  %v2349_v11 = vadd.f32 %v2333_v45, %v2300_v21  ;;  %v8040_v37 = vld [vmem:[#allocation6_spill] sm:$0xff]  ;;  %v2402_v45 = vld [vmem:[#allocation2 + $0x16a] sm:$0xf] }
 0x2e3   :  { %v2350_v28 = vadd.f32 %v2334_v56, %v2301_v40  ;;  %v2367_v5 = vmul.f32 %v2351_v41, %v8040_v37  ;;  %v2368_v16 = vmul.f32 %v2352_v15, %v8040_v37  ;;  %v2369_v43 = vmul.f32 %v2353_v7, %v8040_v37  ;;  %v2400_v2 = vld [vmem:[#allocation2 + $0x15a] sm:$0xf]  ;;  %v2404_v56 = vld [vmem:[#allocation2 + $0x18a] sm:$0xf]  ;;  %v2401_v7 = vld [vmem:[#allocation2 + $0x162] sm:$0xf] }
 0x2e4   :  { %v2370_v9 = vmul.f32 %v2354_v59, %v8040_v37  ;;  %v2371_v34 = vmul.f32 %v2355_v4, %v8040_v37  ;;  %v2372_v0 = vmul.f32 %v2356_v24, %v8040_v37  ;;  %v2373_v63 = vmul.f32 %v2357_v31, %v8040_v37  ;;  %v2406_v4 = vld [vmem:[#allocation2 + $0x19a] sm:$0xf] }
 0x2e5   :  { %v2374_v21 = vmul.f32 %v2358_v60, %v8040_v37  ;;  %v2375_v40 = vmul.f32 %v2359_v48, %v8040_v37  ;;  %v2376_v10 = vmul.f32 %v2360_v12, %v8040_v37  ;;  %v2377_v61 = vmul.f32 %v2361_v58, %v8040_v37  ;;  %v2408_v31 = vld [vmem:[#allocation2 + $0x1ba] sm:$0xf] }
 0x2e6   :  { %v2378_v35 = vmul.f32 %v2362_v19, %v8040_v37  ;;  %v2379_v55 = vmul.f32 %v2363_v33, %v8040_v37  ;;  %v2380_v57 = vmul.f32 %v2364_v1, %v8040_v37  ;;  %v2381_v54 = vmul.f32 %v2365_v52, %v8040_v37  ;;  %v2403_v19 = vld [vmem:[#allocation2 + $0x182] sm:$0xf]  ;;  %v2405_v33 = vld [vmem:[#allocation2 + $0x192] sm:$0xf] }
 0x2e7   :  { %v2382_v14 = vmul.f32 %v2366_v3, %v8040_v37  ;;  %v2383_v49 = vadd.f32 %v2367_v5, %v2335_v51  ;;  %v2384_v62 = vadd.f32 %v2368_v16, %v2336_v53  ;;  %v2385_v8 = vadd.f32 %v2369_v43, %v2337_v23  ;;  %v2410_v51 = vld [vmem:[#allocation2 + $0x1ca] sm:$0xf]  ;;  %v2407_v52 = vld [vmem:[#allocation2 + $0x1b2] sm:$0xf]  ;;  %v2409_v3 = vld [vmem:[#allocation2 + $0x1c2] sm:$0xf] }
 0x2e8   :  { %v2386_v38 = vadd.f32 %v2370_v9, %v2338_v44  ;;  %v2387_v41 = vadd.f32 %v2371_v34, %v2339_v25  ;;  %v2388_v15 = vadd.f32 %v2372_v0, %v2340_v50  ;;  %v2389_v59 = vadd.f32 %v2373_v63, %v2341_v26  ;;  %v2411_v25 = vld [vmem:[#allocation2 + $0x1e2] sm:$0xf]  ;;  %v2412_v50 = vld [vmem:[#allocation2 + $0x1ea] sm:$0xf]  ;;  %v2413_v26 = vld [vmem:[#allocation2 + $0x1f2] sm:$0xf] }
 0x2e9   :  { %v2390_v24 = vadd.f32 %v2374_v21, %v2342_v42  ;;  %v2391_v60 = vadd.f32 %v2375_v40, %v2343_v30  ;;  %v2392_v48 = vadd.f32 %v2376_v10, %v2344_v27  ;;  %v2393_v12 = vadd.f32 %v2377_v61, %v2345_v32  ;;  %v2414_v42 = vld [vmem:[#allocation2 + $0x1fa] sm:$0xf]  ;;  %v8041_v37 = vld [vmem:[#allocation7_spill] sm:$0xff] }
 0x2ea   :  { %v2394_v58 = vadd.f32 %v2378_v35, %v2346_v39  ;;  %v2395_v53 = vadd.f32 %v2379_v55, %v2347_v22  ;;  %v2396_v23 = vadd.f32 %v2380_v57, %v2348_v46  ;;  %v2397_v44 = vadd.f32 %v2381_v54, %v2349_v11  ;;  %v2447_v40 = vld [vmem:[#allocation2 + $0x158] sm:$0xf]  ;;  %v2449_v57 = vld [vmem:[#allocation2 + $0x168] sm:$0xf] }
 0x2eb   :  { %v2398_v1 = vadd.f32 %v2382_v14, %v2350_v28  ;;  %v2415_v5 = vmul.f32 %v2399_v13, %v8041_v37  ;;  %v2416_v30 = vmul.f32 %v2400_v2, %v8041_v37  ;;  %v2417_v27 = vmul.f32 %v2401_v7, %v8041_v37  ;;  %v2451_v54 = vld [vmem:[#allocation2 + $0x188] sm:$0xf]  ;;  %v2453_v14 = vld [vmem:[#allocation2 + $0x198] sm:$0xf]  ;;  %v2448_v7 = vld [vmem:[#allocation2 + $0x160] sm:$0xf] }
 0x2ec   :  { %v2418_v32 = vmul.f32 %v2402_v45, %v8041_v37  ;;  %v2419_v39 = vmul.f32 %v2403_v19, %v8041_v37  ;;  %v2420_v22 = vmul.f32 %v2404_v56, %v8041_v37  ;;  %v2421_v46 = vmul.f32 %v2405_v33, %v8041_v37 }
 0x2ed   :  { %v2422_v11 = vmul.f32 %v2406_v4, %v8041_v37  ;;  %v2423_v28 = vmul.f32 %v2407_v52, %v8041_v37  ;;  %v2424_v16 = vmul.f32 %v2408_v31, %v8041_v37  ;;  %v2425_v43 = vmul.f32 %v2409_v3, %v8041_v37  ;;  %v2450_v4 = vld [vmem:[#allocation2 + $0x170] sm:$0xf]  ;;  %v2455_v31 = vld [vmem:[#allocation2 + $0x1b8] sm:$0xf] }
 0x2ee   :  { %v2426_v9 = vmul.f32 %v2410_v51, %v8041_v37  ;;  %v2427_v34 = vmul.f32 %v2411_v25, %v8041_v37  ;;  %v2428_v0 = vmul.f32 %v2412_v50, %v8041_v37  ;;  %v2429_v63 = vmul.f32 %v2413_v26, %v8041_v37  ;;  %v2452_v3 = vld [vmem:[#allocation2 + $0x190] sm:$0xf]  ;;  %v2454_v25 = vld [vmem:[#allocation2 + $0x1a0] sm:$0xf] }
 0x2ef   :  { %v2430_v21 = vmul.f32 %v2414_v42, %v8041_v37  ;;  %v2431_v10 = vadd.f32 %v2415_v5, %v2383_v49  ;;  %v2432_v61 = vadd.f32 %v2416_v30, %v2384_v62  ;;  %v2433_v35 = vadd.f32 %v2417_v27, %v2385_v8  ;;  %v2457_v49 = vld [vmem:[#allocation2 + $0x1c8] sm:$0xf]  ;;  %v2456_v26 = vld [vmem:[#allocation2 + $0x1c0] sm:$0xf]  ;;  %v2458_v42 = vld [vmem:[#allocation2 + $0x1d0] sm:$0xf] }
 0x2f0   :  { %v2434_v55 = vadd.f32 %v2418_v32, %v2386_v38  ;;  %v2435_v13 = vadd.f32 %v2419_v39, %v2387_v41  ;;  %v2436_v2 = vadd.f32 %v2420_v22, %v2388_v15  ;;  %v2437_v45 = vadd.f32 %v2421_v46, %v2389_v59  ;;  %v2459_v41 = vld [vmem:[#allocation2 + $0x1e8] sm:$0xf]  ;;  %v2460_v15 = vld [vmem:[#allocation2 + $0x1f0] sm:$0xf]  ;;  %v2461_v59 = vld [vmem:[#allocation2 + $0x1f8] sm:$0xf] }
 0x2f1   :  { %v2438_v56 = vadd.f32 %v2422_v11, %v2390_v24  ;;  %v2439_v19 = vadd.f32 %v2423_v28, %v2391_v60  ;;  %v2440_v33 = vadd.f32 %v2424_v16, %v2392_v48  ;;  %v2441_v51 = vadd.f32 %v2425_v43, %v2393_v12  ;;  %v2462_v24 = vld [vmem:[#allocation2 + $0x200] sm:$0xf]  ;;  %v8042_v37 = vld [vmem:[#allocation8_spill] sm:$0xff]  ;;  %v2495_v28 = vld [vmem:[#allocation2 + $0x159] sm:$0xf] }
 0x2f2   :  { %v2442_v52 = vadd.f32 %v2426_v9, %v2394_v58  ;;  %v2443_v62 = vadd.f32 %v2427_v34, %v2395_v53  ;;  %v2444_v8 = vadd.f32 %v2428_v0, %v2396_v23  ;;  %v2445_v38 = vadd.f32 %v2429_v63, %v2397_v44  ;;  %v2497_v0 = vld [vmem:[#allocation2 + $0x169] sm:$0xf] }
 0x2f3   :  { %v2446_v50 = vadd.f32 %v2430_v21, %v2398_v1  ;;  %v2463_v5 = vmul.f32 %v2447_v40, %v8042_v37  ;;  %v2464_v60 = vmul.f32 %v2448_v7, %v8042_v37  ;;  %v2465_v48 = vmul.f32 %v2449_v57, %v8042_v37  ;;  %v2499_v63 = vld [vmem:[#allocation2 + $0x189] sm:$0xf]  ;;  %v2501_v21 = vld [vmem:[#allocation2 + $0x199] sm:$0xf]  ;;  %v2496_v7 = vld [vmem:[#allocation2 + $0x161] sm:$0xf] }
 0x2f4   :  { %v2466_v12 = vmul.f32 %v2450_v4, %v8042_v37  ;;  %v2467_v58 = vmul.f32 %v2451_v54, %v8042_v37  ;;  %v2468_v53 = vmul.f32 %v2452_v3, %v8042_v37  ;;  %v2469_v23 = vmul.f32 %v2453_v14, %v8042_v37  ;;  %v2498_v4 = vld [vmem:[#allocation2 + $0x171] sm:$0xf] }
 0x2f5   :  { %v2470_v44 = vmul.f32 %v2454_v25, %v8042_v37  ;;  %v2471_v1 = vmul.f32 %v2455_v31, %v8042_v37  ;;  %v2472_v30 = vmul.f32 %v2456_v26, %v8042_v37  ;;  %v2473_v27 = vmul.f32 %v2457_v49, %v8042_v37  ;;  %v2503_v31 = vld [vmem:[#allocation2 + $0x1b9] sm:$0xf] }
 0x2f6   :  { %v2474_v32 = vmul.f32 %v2458_v42, %v8042_v37  ;;  %v2475_v39 = vmul.f32 %v2459_v41, %v8042_v37  ;;  %v2476_v22 = vmul.f32 %v2460_v15, %v8042_v37  ;;  %v2477_v46 = vmul.f32 %v2461_v59, %v8042_v37  ;;  %v2500_v42 = vld [vmem:[#allocation2 + $0x191] sm:$0xf]  ;;  %v2502_v41 = vld [vmem:[#allocation2 + $0x1a1] sm:$0xf] }
 0x2f7   :  { %v2478_v11 = vmul.f32 %v2462_v24, %v8042_v37  ;;  %v2479_v16 = vadd.f32 %v2463_v5, %v2431_v10  ;;  %v2480_v43 = vadd.f32 %v2464_v60, %v2432_v61  ;;  %v2481_v9 = vadd.f32 %v2465_v48, %v2433_v35  ;;  %v2505_v10 = vld [vmem:[#allocation2 + $0x1c9] sm:$0xf]  ;;  %v2504_v59 = vld [vmem:[#allocation2 + $0x1c1] sm:$0xf]  ;;  %v2506_v24 = vld [vmem:[#allocation2 + $0x1d1] sm:$0xf] }
 0x2f8   :  { %v2482_v34 = vadd.f32 %v2466_v12, %v2434_v55  ;;  %v2483_v40 = vadd.f32 %v2467_v58, %v2435_v13  ;;  %v2484_v57 = vadd.f32 %v2468_v53, %v2436_v2  ;;  %v2485_v54 = vadd.f32 %v2469_v23, %v2437_v45  ;;  %v2507_v13 = vld [vmem:[#allocation2 + $0x1e9] sm:$0xf]  ;;  %v2508_v2 = vld [vmem:[#allocation2 + $0x1f1] sm:$0xf]  ;;  %v2509_v45 = vld [vmem:[#allocation2 + $0x1f9] sm:$0xf] }
 0x2f9   :  { %v2486_v14 = vadd.f32 %v2470_v44, %v2438_v56  ;;  %v2487_v3 = vadd.f32 %v2471_v1, %v2439_v19  ;;  %v2488_v25 = vadd.f32 %v2472_v30, %v2440_v33  ;;  %v2489_v49 = vadd.f32 %v2473_v27, %v2441_v51  ;;  %v2510_v56 = vld [vmem:[#allocation2 + $0x201] sm:$0xf]  ;;  %v8043_v37 = vld [vmem:[#allocation9_spill] sm:$0xff]  ;;  %v2543_v1 = vld [vmem:[#allocation2 + $0x15a] sm:$0xf] }
 0x2fa   :  { %v2490_v26 = vadd.f32 %v2474_v32, %v2442_v52  ;;  %v2491_v61 = vadd.f32 %v2475_v39, %v2443_v62  ;;  %v2492_v35 = vadd.f32 %v2476_v22, %v2444_v8  ;;  %v2493_v55 = vadd.f32 %v2477_v46, %v2445_v38  ;;  %v2545_v22 = vld [vmem:[#allocation2 + $0x16a] sm:$0xf] }
 0x2fb   :  { %v2494_v15 = vadd.f32 %v2478_v11, %v2446_v50  ;;  %v2511_v5 = vmul.f32 %v2495_v28, %v8043_v37  ;;  %v2512_v19 = vmul.f32 %v2496_v7, %v8043_v37  ;;  %v2513_v33 = vmul.f32 %v2497_v0, %v8043_v37  ;;  %v2547_v46 = vld [vmem:[#allocation2 + $0x18a] sm:$0xf]  ;;  %v2549_v11 = vld [vmem:[#allocation2 + $0x19a] sm:$0xf]  ;;  %v2544_v7 = vld [vmem:[#allocation2 + $0x162] sm:$0xf] }
 0x2fc   :  { %v2514_v51 = vmul.f32 %v2498_v4, %v8043_v37  ;;  %v2515_v52 = vmul.f32 %v2499_v63, %v8043_v37  ;;  %v2516_v62 = vmul.f32 %v2500_v42, %v8043_v37  ;;  %v2517_v8 = vmul.f32 %v2501_v21, %v8043_v37  ;;  %v2546_v4 = vld [vmem:[#allocation2 + $0x172] sm:$0xf] }
 0x2fd   :  { %v2518_v38 = vmul.f32 %v2502_v41, %v8043_v37  ;;  %v2519_v50 = vmul.f32 %v2503_v31, %v8043_v37  ;;  %v2520_v60 = vmul.f32 %v2504_v59, %v8043_v37  ;;  %v2521_v48 = vmul.f32 %v2505_v10, %v8043_v37  ;;  %v2551_v31 = vld [vmem:[#allocation2 + $0x1ba] sm:$0xf] }
 0x2fe   :  { %v2522_v12 = vmul.f32 %v2506_v24, %v8043_v37  ;;  %v2523_v58 = vmul.f32 %v2507_v13, %v8043_v37  ;;  %v2524_v53 = vmul.f32 %v2508_v2, %v8043_v37  ;;  %v2525_v23 = vmul.f32 %v2509_v45, %v8043_v37  ;;  %v2548_v24 = vld [vmem:[#allocation2 + $0x192] sm:$0xf]  ;;  %v2550_v13 = vld [vmem:[#allocation2 + $0x1a2] sm:$0xf] }
 0x2ff   :  { %v2526_v44 = vmul.f32 %v2510_v56, %v8043_v37  ;;  %v2527_v30 = vadd.f32 %v2511_v5, %v2479_v16  ;;  %v2528_v27 = vadd.f32 %v2512_v19, %v2480_v43  ;;  %v2529_v32 = vadd.f32 %v2513_v33, %v2481_v9  ;;  %v2553_v16 = vld [vmem:[#allocation2 + $0x1ca] sm:$0xf]  ;;  %v2552_v45 = vld [vmem:[#allocation2 + $0x1c2] sm:$0xf]  ;;  %v2554_v56 = vld [vmem:[#allocation2 + $0x1d2] sm:$0xf] }
 0x300   :  { %v2530_v39 = vadd.f32 %v2514_v51, %v2482_v34  ;;  %v2531_v28 = vadd.f32 %v2515_v52, %v2483_v40  ;;  %v2532_v0 = vadd.f32 %v2516_v62, %v2484_v57  ;;  %v2533_v63 = vadd.f32 %v2517_v8, %v2485_v54  ;;  %v2555_v40 = vld [vmem:[#allocation2 + $0x1ea] sm:$0xf]  ;;  %v2556_v57 = vld [vmem:[#allocation2 + $0x1f2] sm:$0xf]  ;;  %v2557_v54 = vld [vmem:[#allocation2 + $0x1fa] sm:$0xf] }
 0x301   :  { %v2534_v21 = vadd.f32 %v2518_v38, %v2486_v14  ;;  %v2535_v42 = vadd.f32 %v2519_v50, %v2487_v3  ;;  %v2536_v41 = vadd.f32 %v2520_v60, %v2488_v25  ;;  %v2537_v10 = vadd.f32 %v2521_v48, %v2489_v49  ;;  %v2558_v14 = vld [vmem:[#allocation2 + $0x202] sm:$0xf]  ;;  %v8044_v37 = vld [vmem:[#allocation10_spill] sm:$0xff] }
 0x302   :  { %v2538_v59 = vadd.f32 %v2522_v12, %v2490_v26  ;;  %v2539_v43 = vadd.f32 %v2523_v58, %v2491_v61  ;;  %v2540_v9 = vadd.f32 %v2524_v53, %v2492_v35  ;;  %v2541_v34 = vadd.f32 %v2525_v23, %v2493_v55  ;;  %v2593_v58 = vld [vmem:[#allocation2 + $0x168] sm:$0xf]  ;;  %v2597_v53 = vld [vmem:[#allocation2 + $0x198] sm:$0xf] }
 0x303   :  { %v2542_v2 = vadd.f32 %v2526_v44, %v2494_v15  ;;  %v2559_v5 = vmul.f32 %v2543_v1, %v8044_v37  ;;  %v2560_v3 = vmul.f32 %v2544_v7, %v8044_v37  ;;  %v2561_v25 = vmul.f32 %v2545_v22, %v8044_v37  ;;  %v2595_v7 = vld [vmem:[#allocation2 + $0x178] sm:$0xf] }
 0x304   :  { %v2562_v49 = vmul.f32 %v2546_v4, %v8044_v37  ;;  %v2563_v26 = vmul.f32 %v2547_v46, %v8044_v37  ;;  %v2564_v61 = vmul.f32 %v2548_v24, %v8044_v37  ;;  %v2565_v35 = vmul.f32 %v2549_v11, %v8044_v37  ;;  %v2592_v46 = vld [vmem:[#allocation2 + $0x160] sm:$0xf]  ;;  %v2594_v11 = vld [vmem:[#allocation2 + $0x170] sm:$0xf]  ;;  %v2601_v4 = vld [vmem:[#allocation2 + $0x1c8] sm:$0xf] }
 0x305   :  { %v2566_v55 = vmul.f32 %v2550_v13, %v8044_v37  ;;  %v2567_v15 = vmul.f32 %v2551_v31, %v8044_v37  ;;  %v2568_v19 = vmul.f32 %v2552_v45, %v8044_v37  ;;  %v2569_v33 = vmul.f32 %v2553_v16, %v8044_v37  ;;  %v2596_v45 = vld [vmem:[#allocation2 + $0x190] sm:$0xf] }
 0x306   :  { %v2570_v51 = vmul.f32 %v2554_v56, %v8044_v37  ;;  %v2571_v52 = vmul.f32 %v2555_v40, %v8044_v37  ;;  %v2572_v62 = vmul.f32 %v2556_v57, %v8044_v37  ;;  %v2573_v8 = vmul.f32 %v2557_v54, %v8044_v37  ;;  %v2598_v56 = vld [vmem:[#allocation2 + $0x1a0] sm:$0xf] }
 0x307   :  { %v2574_v38 = vmul.f32 %v2558_v14, %v8044_v37  ;;  %v2575_v50 = vadd.f32 %v2559_v5, %v2527_v30  ;;  %v2576_v60 = vadd.f32 %v2560_v3, %v2528_v27  ;;  %v2577_v48 = vadd.f32 %v2561_v25, %v2529_v32  ;;  %v2599_v30 = vld [vmem:[#allocation2 + $0x1a8] sm:$0xf]  ;;  %v2605_v27 = vld [vmem:[#allocation2 + $0x1f8] sm:$0xf]  ;;  %v2606_v54 = vld [vmem:[#allocation2 + $0x200] sm:$0xf] }
 0x308   :  { %v2578_v12 = vadd.f32 %v2562_v49, %v2530_v39  ;;  %v2579_v23 = vadd.f32 %v2563_v26, %v2531_v28  ;;  %v2580_v44 = vadd.f32 %v2564_v61, %v2532_v0  ;;  %v2581_v1 = vadd.f32 %v2565_v35, %v2533_v63  ;;  %v2600_v28 = vld [vmem:[#allocation2 + $0x1c0] sm:$0xf]  ;;  %v2602_v0 = vld [vmem:[#allocation2 + $0x1d0] sm:$0xf]  ;;  %v2603_v63 = vld [vmem:[#allocation2 + $0x1d8] sm:$0xf] }
 0x309   :  { %v2582_v22 = vadd.f32 %v2566_v55, %v2534_v21  ;;  %v2583_v31 = vadd.f32 %v2567_v15, %v2535_v42  ;;  %v2584_v24 = vadd.f32 %v2568_v19, %v2536_v41  ;;  %v2585_v13 = vadd.f32 %v2569_v33, %v2537_v10  ;;  %v2604_v21 = vld [vmem:[#allocation2 + $0x1f0] sm:$0xf]  ;;  %v2607_v14 = vld [vmem:[#allocation2 + $0x208] sm:$0xf]  ;;  %v8045_v37 = vld [vmem:[#allocation11_spill] sm:$0xff] }
 0x30a   :  { %v2586_v16 = vadd.f32 %v2570_v51, %v2538_v59  ;;  %v2587_v32 = vadd.f32 %v2571_v52, %v2539_v43  ;;  %v2588_v39 = vadd.f32 %v2572_v62, %v2540_v9  ;;  %v2589_v40 = vadd.f32 %v2573_v8, %v2541_v34  ;;  %v2641_v52 = vld [vmem:[#allocation2 + $0x169] sm:$0xf]  ;;  %v2645_v62 = vld [vmem:[#allocation2 + $0x199] sm:$0xf] }
 0x30b   :  { %v2590_v57 = vadd.f32 %v2574_v38, %v2542_v2  ;;  %v2608_v5 = vmul.f32 %v2592_v46, %v8045_v37  ;;  %v2609_v42 = vmul.f32 %v2593_v58, %v8045_v37  ;;  %v2610_v41 = vmul.f32 %v2594_v11, %v8045_v37  ;;  %v2640_v46 = vld [vmem:[#allocation2 + $0x161] sm:$0xf]  ;;  %v2642_v11 = vld [vmem:[#allocation2 + $0x171] sm:$0xf] }
 0x30c   :  { %v2611_v10 = vmul.f32 %v2595_v7, %v8045_v37  ;;  %v2612_v59 = vmul.f32 %v2596_v45, %v8045_v37  ;;  %v2613_v43 = vmul.f32 %v2597_v53, %v8045_v37  ;;  %v2614_v9 = vmul.f32 %v2598_v56, %v8045_v37  ;;  %v2643_v7 = vld [vmem:[#allocation2 + $0x179] sm:$0xf] }
 0x30d   :  { %v2615_v34 = vmul.f32 %v2599_v30, %v8045_v37  ;;  %v2616_v2 = vmul.f32 %v2600_v28, %v8045_v37  ;;  %v2617_v3 = vmul.f32 %v2601_v4, %v8045_v37  ;;  %v2618_v25 = vmul.f32 %v2602_v0, %v8045_v37  ;;  %v2649_v4 = vld [vmem:[#allocation2 + $0x1c9] sm:$0xf]  ;;  %v2644_v28 = vld [vmem:[#allocation2 + $0x191] sm:$0xf]  ;;  %v2646_v0 = vld [vmem:[#allocation2 + $0x1a1] sm:$0xf] }
 0x30e   :  { %v2619_v49 = vmul.f32 %v2603_v63, %v8045_v37  ;;  %v2620_v26 = vmul.f32 %v2604_v21, %v8045_v37  ;;  %v2621_v61 = vmul.f32 %v2605_v27, %v8045_v37  ;;  %v2622_v35 = vmul.f32 %v2606_v54, %v8045_v37  ;;  %v2654_v54 = vld [vmem:[#allocation2 + $0x201] sm:$0xf] }
 0x30f   :  { %v2623_v55 = vmul.f32 %v2607_v14, %v8045_v37  ;;  %v2624_v15 = vadd.f32 %v2608_v5, %v2575_v50  ;;  %v2625_v19 = vadd.f32 %v2609_v42, %v2576_v60  ;;  %v2626_v33 = vadd.f32 %v2610_v41, %v2577_v48  ;;  %v2647_v50 = vld [vmem:[#allocation2 + $0x1a9] sm:$0xf]  ;;  %v2653_v60 = vld [vmem:[#allocation2 + $0x1f9] sm:$0xf] }
 0x310   :  { %v2627_v51 = vadd.f32 %v2611_v10, %v2578_v12  ;;  %v2628_v8 = vadd.f32 %v2612_v59, %v2579_v23  ;;  %v2629_v38 = vadd.f32 %v2613_v43, %v2580_v44  ;;  %v2630_v58 = vadd.f32 %v2614_v9, %v2581_v1  ;;  %v2648_v23 = vld [vmem:[#allocation2 + $0x1c1] sm:$0xf]  ;;  %v2650_v44 = vld [vmem:[#allocation2 + $0x1d1] sm:$0xf]  ;;  %v2651_v1 = vld [vmem:[#allocation2 + $0x1d9] sm:$0xf] }
 0x311   :  { %v2631_v53 = vadd.f32 %v2615_v34, %v2582_v22  ;;  %v2632_v45 = vadd.f32 %v2616_v2, %v2583_v31  ;;  %v2633_v56 = vadd.f32 %v2617_v3, %v2584_v24  ;;  %v2634_v30 = vadd.f32 %v2618_v25, %v2585_v13  ;;  %v2652_v22 = vld [vmem:[#allocation2 + $0x1f1] sm:$0xf]  ;;  %v2655_v14 = vld [vmem:[#allocation2 + $0x209] sm:$0xf] }
 0x312   :  { %v2635_v27 = vadd.f32 %v2619_v49, %v2586_v16  ;;  %v2636_v48 = vadd.f32 %v2620_v26, %v2587_v32  ;;  %v2637_v12 = vadd.f32 %v2621_v61, %v2588_v39  ;;  %v2638_v63 = vadd.f32 %v2622_v35, %v2589_v40  ;;  %v8046_v37 = vld [vmem:[#allocation12_spill] sm:$0xff]  ;;  %v2693_v61 = vld [vmem:[#allocation2 + $0x19a] sm:$0xf] }
 0x313   :  { %v2639_v21 = vadd.f32 %v2623_v55, %v2590_v57  ;;  %v2656_v5 = vmul.f32 %v2640_v46, %v8046_v37  ;;  %v2657_v31 = vmul.f32 %v2641_v52, %v8046_v37  ;;  %v2658_v24 = vmul.f32 %v2642_v11, %v8046_v37  ;;  %v2689_v26 = vld [vmem:[#allocation2 + $0x16a] sm:$0xf]  ;;  %v2688_v46 = vld [vmem:[#allocation2 + $0x162] sm:$0xf]  ;;  %v2690_v11 = vld [vmem:[#allocation2 + $0x172] sm:$0xf] }
 0x314   :  { %v2659_v13 = vmul.f32 %v2643_v7, %v8046_v37  ;;  %v2660_v16 = vmul.f32 %v2644_v28, %v8046_v37  ;;  %v2661_v32 = vmul.f32 %v2645_v62, %v8046_v37  ;;  %v2662_v39 = vmul.f32 %v2646_v0, %v8046_v37  ;;  %v2691_v7 = vld [vmem:[#allocation2 + $0x17a] sm:$0xf] }
 0x315   :  { %v2663_v40 = vmul.f32 %v2647_v50, %v8046_v37  ;;  %v2664_v57 = vmul.f32 %v2648_v23, %v8046_v37  ;;  %v2665_v42 = vmul.f32 %v2649_v4, %v8046_v37  ;;  %v2666_v41 = vmul.f32 %v2650_v44, %v8046_v37  ;;  %v2697_v4 = vld [vmem:[#allocation2 + $0x1ca] sm:$0xf]  ;;  %v2692_v23 = vld [vmem:[#allocation2 + $0x192] sm:$0xf]  ;;  %v2694_v44 = vld [vmem:[#allocation2 + $0x1a2] sm:$0xf] }
 0x316   :  { %v2667_v10 = vmul.f32 %v2651_v1, %v8046_v37  ;;  %v2668_v59 = vmul.f32 %v2652_v22, %v8046_v37  ;;  %v2669_v43 = vmul.f32 %v2653_v60, %v8046_v37  ;;  %v2670_v9 = vmul.f32 %v2654_v54, %v8046_v37  ;;  %v2702_v54 = vld [vmem:[#allocation2 + $0x202] sm:$0xf] }
 0x317   :  { %v2671_v34 = vmul.f32 %v2655_v14, %v8046_v37  ;;  %v2672_v2 = vadd.f32 %v2656_v5, %v2624_v15  ;;  %v2673_v3 = vadd.f32 %v2657_v31, %v2625_v19  ;;  %v2674_v25 = vadd.f32 %v2658_v24, %v2626_v33  ;;  %v2695_v15 = vld [vmem:[#allocation2 + $0x1aa] sm:$0xf]  ;;  %v2701_v19 = vld [vmem:[#allocation2 + $0x1fa] sm:$0xf]  ;;  %v8047_v37 = vld [vmem:[#allocation13_spill] sm:$0xff] }
 0x318   :  { %v2675_v49 = vadd.f32 %v2659_v13, %v2627_v51  ;;  %v2676_v35 = vadd.f32 %v2660_v16, %v2628_v8  ;;  %v2677_v55 = vadd.f32 %v2661_v32, %v2629_v38  ;;  %v2678_v52 = vadd.f32 %v2662_v39, %v2630_v58  ;;  %v2696_v8 = vld [vmem:[#allocation2 + $0x1c2] sm:$0xf]  ;;  %v2698_v38 = vld [vmem:[#allocation2 + $0x1d2] sm:$0xf]  ;;  %v2699_v58 = vld [vmem:[#allocation2 + $0x1da] sm:$0xf] }
 0x319   :  { %v2679_v62 = vadd.f32 %v2663_v40, %v2631_v53  ;;  %v2680_v28 = vadd.f32 %v2664_v57, %v2632_v45  ;;  %v2681_v0 = vadd.f32 %v2665_v42, %v2633_v56  ;;  %v2682_v50 = vadd.f32 %v2666_v41, %v2634_v30  ;;  %v2700_v53 = vld [vmem:[#allocation2 + $0x1f2] sm:$0xf]  ;;  %v2703_v14 = vld [vmem:[#allocation2 + $0x20a] sm:$0xf] }
 0x31a   :  { %v2683_v60 = vadd.f32 %v2667_v10, %v2635_v27  ;;  %v2684_v33 = vadd.f32 %v2668_v59, %v2636_v48  ;;  %v2685_v51 = vadd.f32 %v2669_v43, %v2637_v12  ;;  %v2686_v1 = vadd.f32 %v2670_v9, %v2638_v63  ;;  %v2738_v57 = vld [vmem:[#allocation2 + $0x188] sm:$0xf]  ;;  %v2740_v43 = vld [vmem:[#allocation2 + $0x198] sm:$0xf] }
 0x31b   :  { %v2687_v22 = vadd.f32 %v2671_v34, %v2639_v21  ;;  %v2704_v5 = vmul.f32 %v2688_v46, %v8047_v37  ;;  %v2705_v45 = vmul.f32 %v2689_v26, %v8047_v37  ;;  %v2706_v56 = vmul.f32 %v2690_v11, %v8047_v37  ;;  %v2742_v9 = vld [vmem:[#allocation2 + $0x1b8] sm:$0xf]  ;;  %v2744_v34 = vld [vmem:[#allocation2 + $0x1c8] sm:$0xf] }
 0x31c   :  { %v2707_v30 = vmul.f32 %v2691_v7, %v8047_v37  ;;  %v2708_v27 = vmul.f32 %v2692_v23, %v8047_v37  ;;  %v2709_v48 = vmul.f32 %v2693_v61, %v8047_v37  ;;  %v2710_v12 = vmul.f32 %v2694_v44, %v8047_v37  ;;  %v2737_v7 = vld [vmem:[#allocation2 + $0x180] sm:$0xf]  ;;  %v2746_v23 = vld [vmem:[#allocation2 + $0x1e8] sm:$0xf] }
 0x31d   :  { %v2711_v63 = vmul.f32 %v2695_v15, %v8047_v37  ;;  %v2712_v21 = vmul.f32 %v2696_v8, %v8047_v37  ;;  %v2713_v31 = vmul.f32 %v2697_v4, %v8047_v37  ;;  %v2714_v24 = vmul.f32 %v2698_v38, %v8047_v37  ;;  %v2739_v4 = vld [vmem:[#allocation2 + $0x190] sm:$0xf] }
 0x31e   :  { %v2715_v13 = vmul.f32 %v2699_v58, %v8047_v37  ;;  %v2716_v16 = vmul.f32 %v2700_v53, %v8047_v37  ;;  %v2717_v32 = vmul.f32 %v2701_v19, %v8047_v37  ;;  %v2718_v39 = vmul.f32 %v2702_v54, %v8047_v37  ;;  %v2741_v38 = vld [vmem:[#allocation2 + $0x1b0] sm:$0xf]  ;;  %v2743_v58 = vld [vmem:[#allocation2 + $0x1c0] sm:$0xf] }
 0x31f   :  { %v2719_v40 = vmul.f32 %v2703_v14, %v8047_v37  ;;  %v2720_v42 = vadd.f32 %v2704_v5, %v2672_v2  ;;  %v2721_v41 = vadd.f32 %v2705_v45, %v2673_v3  ;;  %v2722_v10 = vadd.f32 %v2706_v56, %v2674_v25  ;;  %v2748_v2 = vld [vmem:[#allocation2 + $0x1f8] sm:$0xf]  ;;  %v2745_v54 = vld [vmem:[#allocation2 + $0x1e0] sm:$0xf]  ;;  %v2747_v14 = vld [vmem:[#allocation2 + $0x1f0] sm:$0xf] }
 0x320   :  { %v2723_v59 = vadd.f32 %v2707_v30, %v2675_v49  ;;  %v2724_v26 = vadd.f32 %v2708_v27, %v2676_v35  ;;  %v2725_v61 = vadd.f32 %v2709_v48, %v2677_v55  ;;  %v2726_v46 = vadd.f32 %v2710_v12, %v2678_v52  ;;  %v2749_v35 = vld [vmem:[#allocation2 + $0x210] sm:$0xf]  ;;  %v2750_v55 = vld [vmem:[#allocation2 + $0x218] sm:$0xf]  ;;  %v2751_v52 = vld [vmem:[#allocation2 + $0x220] sm:$0xf] }
 0x321   :  { %v2727_v11 = vadd.f32 %v2711_v63, %v2679_v62  ;;  %v2728_v44 = vadd.f32 %v2712_v21, %v2680_v28  ;;  %v2729_v15 = vadd.f32 %v2713_v31, %v2681_v0  ;;  %v2730_v19 = vadd.f32 %v2714_v24, %v2682_v50  ;;  %v2752_v62 = vld [vmem:[#allocation2 + $0x228] sm:$0xf]  ;;  %v8048_v37 = vld [vmem:[#allocation14_spill] sm:$0xff] }
 0x322   :  { %v2731_v8 = vadd.f32 %v2715_v13, %v2683_v60  ;;  %v2732_v3 = vadd.f32 %v2716_v16, %v2684_v33  ;;  %v2733_v25 = vadd.f32 %v2717_v32, %v2685_v51  ;;  %v2734_v49 = vadd.f32 %v2718_v39, %v2686_v1  ;;  %v2786_v21 = vld [vmem:[#allocation2 + $0x189] sm:$0xf]  ;;  %v2788_v32 = vld [vmem:[#allocation2 + $0x199] sm:$0xf] }
 0x323   :  { %v2735_v53 = vadd.f32 %v2719_v40, %v2687_v22  ;;  %v2753_v5 = vmul.f32 %v2737_v7, %v8048_v37  ;;  %v2754_v28 = vmul.f32 %v2738_v57, %v8048_v37  ;;  %v2755_v0 = vmul.f32 %v2739_v4, %v8048_v37  ;;  %v2790_v39 = vld [vmem:[#allocation2 + $0x1b9] sm:$0xf]  ;;  %v2792_v40 = vld [vmem:[#allocation2 + $0x1c9] sm:$0xf]  ;;  %v2785_v7 = vld [vmem:[#allocation2 + $0x181] sm:$0xf] }
 0x324   :  { %v2756_v50 = vmul.f32 %v2740_v43, %v8048_v37  ;;  %v2757_v60 = vmul.f32 %v2741_v38, %v8048_v37  ;;  %v2758_v33 = vmul.f32 %v2742_v9, %v8048_v37  ;;  %v2759_v51 = vmul.f32 %v2743_v58, %v8048_v37  ;;  %v2787_v4 = vld [vmem:[#allocation2 + $0x191] sm:$0xf] }
 0x325   :  { %v2760_v1 = vmul.f32 %v2744_v34, %v8048_v37  ;;  %v2761_v22 = vmul.f32 %v2745_v54, %v8048_v37  ;;  %v2762_v45 = vmul.f32 %v2746_v23, %v8048_v37  ;;  %v2763_v56 = vmul.f32 %v2747_v14, %v8048_v37  ;;  %v2794_v23 = vld [vmem:[#allocation2 + $0x1e9] sm:$0xf]  ;;  %v2789_v14 = vld [vmem:[#allocation2 + $0x1b1] sm:$0xf] }
 0x326   :  { %v2764_v30 = vmul.f32 %v2748_v2, %v8048_v37  ;;  %v2765_v27 = vmul.f32 %v2749_v35, %v8048_v37  ;;  %v2766_v48 = vmul.f32 %v2750_v55, %v8048_v37  ;;  %v2767_v12 = vmul.f32 %v2751_v52, %v8048_v37  ;;  %v2791_v35 = vld [vmem:[#allocation2 + $0x1c1] sm:$0xf] }
 0x327   :  { %v2768_v63 = vmul.f32 %v2752_v62, %v8048_v37  ;;  %v2769_v31 = vadd.f32 %v2753_v5, %v2720_v42  ;;  %v2770_v24 = vadd.f32 %v2754_v28, %v2721_v41  ;;  %v2771_v13 = vadd.f32 %v2755_v0, %v2722_v10  ;;  %v2795_v42 = vld [vmem:[#allocation2 + $0x1f1] sm:$0xf]  ;;  %v2793_v52 = vld [vmem:[#allocation2 + $0x1e1] sm:$0xf]  ;;  %v2796_v62 = vld [vmem:[#allocation2 + $0x1f9] sm:$0xf] }
 0x328   :  { %v2772_v16 = vadd.f32 %v2756_v50, %v2723_v59  ;;  %v2773_v57 = vadd.f32 %v2757_v60, %v2724_v26  ;;  %v2774_v43 = vadd.f32 %v2758_v33, %v2725_v61  ;;  %v2775_v9 = vadd.f32 %v2759_v51, %v2726_v46  ;;  %v2797_v26 = vld [vmem:[#allocation2 + $0x211] sm:$0xf]  ;;  %v2798_v61 = vld [vmem:[#allocation2 + $0x219] sm:$0xf]  ;;  %v2799_v46 = vld [vmem:[#allocation2 + $0x221] sm:$0xf] }
 0x329   :  { %v2776_v34 = vadd.f32 %v2760_v1, %v2727_v11  ;;  %v2777_v38 = vadd.f32 %v2761_v22, %v2728_v44  ;;  %v2778_v58 = vadd.f32 %v2762_v45, %v2729_v15  ;;  %v2779_v2 = vadd.f32 %v2763_v56, %v2730_v19  ;;  %v2800_v11 = vld [vmem:[#allocation2 + $0x229] sm:$0xf]  ;;  %v2836_v22 = vld [vmem:[#allocation2 + $0x19a] sm:$0xf] }
 0x32a   :  { %v2780_v54 = vadd.f32 %v2764_v30, %v2731_v8  ;;  %v2781_v41 = vadd.f32 %v2765_v27, %v2732_v3  ;;  %v2782_v10 = vadd.f32 %v2766_v48, %v2733_v25  ;;  %v2783_v59 = vadd.f32 %v2767_v12, %v2734_v49  ;;  %v2834_v1 = vld [vmem:[#allocation2 + $0x18a] sm:$0xf]  ;;  %v2835_v48 = vld [vmem:[#allocation2 + $0x192] sm:$0xf]  ;;  %v2838_v12 = vld [vmem:[#allocation2 + $0x1ba] sm:$0xf] }
 0x32b   :  { %v2784_v55 = vadd.f32 %v2768_v63, %v2735_v53  ;;  %v2801_v37 = vmul.f32 %v2785_v7, %v5949_v47  ;;  %v2802_v44 = vmul.f32 %v2786_v21, %v5949_v47  ;;  %v2803_v15 = vmul.f32 %v2787_v4, %v5949_v47  ;;  %v2839_v63 = vld [vmem:[#allocation2 + $0x1c2] sm:$0xf]  ;;  %v2840_v21 = vld [vmem:[#allocation2 + $0x1ca] sm:$0xf] }
 0x32c   :  { %v2804_v19 = vmul.f32 %v2788_v32, %v5949_v47  ;;  %v2805_v8 = vmul.f32 %v2789_v14, %v5949_v47  ;;  %v2806_v3 = vmul.f32 %v2790_v39, %v5949_v47  ;;  %v2807_v25 = vmul.f32 %v2791_v35, %v5949_v47  ;;  %v2833_v4 = vld [vmem:[#allocation2 + $0x182] sm:$0xf]  ;;  %v2842_v35 = vld [vmem:[#allocation2 + $0x1ea] sm:$0xf] }
 0x32d   :  { %v2808_v49 = vmul.f32 %v2792_v40, %v5949_v47  ;;  %v2809_v53 = vmul.f32 %v2793_v52, %v5949_v47  ;;  %v2810_v5 = vmul.f32 %v2794_v23, %v5949_v47  ;;  %v2811_v28 = vmul.f32 %v2795_v42, %v5949_v47  ;;  %v2837_v23 = vld [vmem:[#allocation2 + $0x1b2] sm:$0xf]  ;;  %v2841_v14 = vld [vmem:[#allocation2 + $0x1e2] sm:$0xf] }
 0x32e   :  { %v2812_v0 = vmul.f32 %v2796_v62, %v5949_v47  ;;  %v2813_v50 = vmul.f32 %v2797_v26, %v5949_v47  ;;  %v2814_v60 = vmul.f32 %v2798_v61, %v5949_v47  ;;  %v2815_v33 = vmul.f32 %v2799_v46, %v5949_v47  ;;  %v2843_v42 = vld [vmem:[#allocation2 + $0x1f2] sm:$0xf]  ;;  %v2847_v26 = vld [vmem:[#allocation2 + $0x222] sm:$0xf]  ;;  %v2848_v61 = vld [vmem:[#allocation2 + $0x22a] sm:$0xf] }
 0x32f   :  { %v2816_v51 = vmul.f32 %v2800_v11, %v5949_v47  ;;  %v2817_v45 = vadd.f32 %v2801_v37, %v2769_v31  ;;  %v2818_v56 = vadd.f32 %v2802_v44, %v2770_v24  ;;  %v2819_v30 = vadd.f32 %v2803_v15, %v2771_v13  ;;  %v2844_v47 = vld [vmem:[#allocation2 + $0x1fa] sm:$0xf]  ;;  %v2845_v13 = vld [vmem:[#allocation2 + $0x212] sm:$0xf] }
 0x330   :  { %v2820_v27 = vadd.f32 %v2804_v19, %v2772_v16  ;;  %v2821_v32 = vadd.f32 %v2805_v8, %v2773_v57  ;;  %v2822_v39 = vadd.f32 %v2806_v3, %v2774_v43  ;;  %v2823_v40 = vadd.f32 %v2807_v25, %v2775_v9  ;;  %v2846_v16 = vld [vmem:[#allocation2 + $0x21a] sm:$0xf]  ;;  %v6552_v11 = vld.sshfl [vmem:[#allocation1 + $0x10] sm:$0xff pattern:$0x75316420] }
 0x331   :  { %v2824_v7 = vadd.f32 %v2808_v49, %v2776_v34  ;;  %v2825_v52 = vadd.f32 %v2809_v53, %v2777_v38  ;;  %v2826_v62 = vadd.f32 %v2810_v5, %v2778_v58  ;;  %v2827_v31 = vadd.f32 %v2811_v28, %v2779_v2  ;;  %v6550_v46 = vld.sshfl [vmem:[#allocation1] sm:$0xff pattern:$0x75316420]  ;;  %3208 = vst [vmem:[#allocation1 + $0x10] ss:$2 sm:$0xff] %v6221_v6 }
 0x332   :  { %v2828_v24 = vadd.f32 %v2812_v0, %v2780_v54  ;;  %v2829_v57 = vadd.f32 %v2813_v50, %v2781_v41  ;;  %v2830_v43 = vadd.f32 %v2814_v60, %v2782_v10  ;;  %v2831_v9 = vadd.f32 %v2815_v33, %v2783_v59  ;;  %3206 = vst [vmem:[#allocation1] ss:$2 sm:$0xff] %v6214_v18  ;;  %v6559_v54 = vld.sshfl [vmem:[#allocation1 + $0x20] sm:$0xff pattern:$0x75316420] }
 0x333   :  { %v2832_v34 = vadd.f32 %v2816_v51, %v2784_v55  ;;  %v2849_v37 = vmul.f32 %v2833_v4, %v5952_v36  ;;  %v2850_v38 = vmul.f32 %v2834_v1, %v5952_v36  ;;  %v2851_v58 = vmul.f32 %v2835_v48, %v5952_v36  ;;  %3207 = vst [vmem:[#allocation1 + $0x1] ss:$2 sm:$0xff] %v6219_v20  ;;  %v6571_v3 = vld.sshfl [vmem:[#allocation1 + $0x30] sm:$0xff pattern:$0x75316420] }
 0x334   :  { %v2852_v2 = vmul.f32 %v2836_v22, %v5952_v36  ;;  %v2853_v41 = vmul.f32 %v2837_v23, %v5952_v36  ;;  %v2854_v10 = vmul.f32 %v2838_v12, %v5952_v36  ;;  %v2855_v59 = vmul.f32 %v2839_v63, %v5952_v36  ;;  %8049 = vst [vmem:[#allocation3_spill] sm:$0xff] %v6571_v3  ;;  %v2882_v28 = vld [vmem:[#allocation2 + $0x188] sm:$0xf]  ;;  %v2884_v0 = vld [vmem:[#allocation2 + $0x198] sm:$0xf] }
 0x335   :  { %v2856_v55 = vmul.f32 %v2840_v21, %v5952_v36  ;;  %v2857_v44 = vmul.f32 %v2841_v14, %v5952_v36  ;;  %v2858_v15 = vmul.f32 %v2842_v35, %v5952_v36  ;;  %v2859_v19 = vmul.f32 %v2843_v42, %v5952_v36  ;;  %3209 = vst [vmem:[#allocation1 + $0x11] ss:$2 sm:$0xff] %v6223_v29  ;;  %v2883_v1 = vld [vmem:[#allocation2 + $0x190] sm:$0xf]  ;;  %v2886_v22 = vld [vmem:[#allocation2 + $0x1b8] sm:$0xf] }
 0x336   :  { %v2860_v8 = vmul.f32 %v2844_v47, %v5952_v36  ;;  %v2861_v25 = vmul.f32 %v2845_v13, %v5952_v36  ;;  %v2862_v49 = vmul.f32 %v2846_v16, %v5952_v36  ;;  %v2863_v53 = vmul.f32 %v2847_v26, %v5952_v36  ;;  %3210 = vst [vmem:[#allocation1 + $0x20] ss:$2 sm:$0xff] %v6225_v17  ;;  %v2888_v48 = vld [vmem:[#allocation2 + $0x1c8] sm:$0xf]  ;;  %v8050_v12 = vld [vmem:[#allocation34_spill] sm:$0xff]  ;;  %v8051_v42 = vld [vmem:[#allocation35_spill] sm:$0xff] }
 0x337   :  { %v2864_v5 = vmul.f32 %v2848_v61, %v5952_v36  ;;  %v2865_v50 = vadd.f32 %v2849_v37, %v2817_v45  ;;  %v2866_v60 = vadd.f32 %v2850_v38, %v2818_v56  ;;  %v2867_v33 = vadd.f32 %v2851_v58, %v2819_v30  ;;  %3211 = vst [vmem:[#allocation1 + $0x21] ss:$2 sm:$0xff] %v8050_v12  ;;  %v2885_v14 = vld [vmem:[#allocation2 + $0x1a0] sm:$0xf]  ;;  %v2890_v36 = vld [vmem:[#allocation2 + $0x1e8] sm:$0xf] }
 0x338   :  { %v2868_v51 = vadd.f32 %v2852_v2, %v2820_v27  ;;  %v2869_v63 = vadd.f32 %v2853_v41, %v2821_v32  ;;  %v2870_v21 = vadd.f32 %v2854_v10, %v2822_v39  ;;  %v2871_v4 = vadd.f32 %v2855_v59, %v2823_v40  ;;  %v2887_v35 = vld [vmem:[#allocation2 + $0x1c0] sm:$0xf]  ;;  %3212 = vst [vmem:[#allocation1 + $0x30] ss:$2 sm:$0xff] %v8051_v42  ;;  %v2889_v30 = vld [vmem:[#allocation2 + $0x1d0] sm:$0xf] }
 0x339   :  { %v2872_v23 = vadd.f32 %v2856_v55, %v2824_v7  ;;  %v2873_v47 = vadd.f32 %v2857_v44, %v2825_v52  ;;  %v2874_v13 = vadd.f32 %v2858_v15, %v2826_v62  ;;  %v2875_v45 = vadd.f32 %v2859_v19, %v2827_v31  ;;  %v2891_v27 = vld [vmem:[#allocation2 + $0x1f0] sm:$0xf]  ;;  %v8052_v16 = vld [vmem:[#allocation36_spill] sm:$0xff]  ;;  %v2892_v39 = vld [vmem:[#allocation2 + $0x1f8] sm:$0xf] }
 0x33a   :  { %v2876_v56 = vadd.f32 %v2860_v8, %v2828_v24  ;;  %3213 = vst [vmem:[#allocation1 + $0x31] ss:$2 sm:$0xff] %v8052_v16  ;;  %v2877_v26 = vadd.f32 %v2861_v25, %v2829_v57  ;;  %v2878_v61 = vadd.f32 %v2862_v49, %v2830_v43  ;;  %v2879_v37 = vadd.f32 %v2863_v53, %v2831_v9  ;;  %v2893_v40 = vld [vmem:[#allocation2 + $0x200] sm:$0xf]  ;;  %v2894_v7 = vld [vmem:[#allocation2 + $0x218] sm:$0xf] }
 0x33b   :  { %v2880_v32 = vadd.f32 %v2864_v5, %v2832_v34  ;;  %v2895_v38 = vld [vmem:[#allocation2 + $0x220] sm:$0xf]  ;;  %v2896_v58 = vld [vmem:[#allocation2 + $0x228] sm:$0xf]  ;;  %v2897_v2 = vld [vmem:[#allocation2 + $0x230] sm:$0xf] }
 0x33c   :  { %v8053_v41 = vld [vmem:[#allocation15_spill] sm:$0xff]  ;;  %v2930_v49 = vld [vmem:[#allocation2 + $0x189] sm:$0xf] }
 0x33d   :  { %v2898_v10 = vmul.f32 %v2882_v28, %v8053_v41  ;;  %v2899_v52 = vmul.f32 %v2883_v1, %v8053_v41  ;;  %v2900_v62 = vmul.f32 %v2884_v0, %v8053_v41  ;;  %v2901_v31 = vmul.f32 %v2885_v14, %v8053_v41  ;;  %v2932_v1 = vld [vmem:[#allocation2 + $0x199] sm:$0xf] }
 0x33e   :  { %v2902_v24 = vmul.f32 %v2886_v22, %v8053_v41  ;;  %v2903_v57 = vmul.f32 %v2887_v35, %v8053_v41  ;;  %v2904_v43 = vmul.f32 %v2888_v48, %v8053_v41  ;;  %v2905_v9 = vmul.f32 %v2889_v30, %v8053_v41  ;;  %v2934_v22 = vld [vmem:[#allocation2 + $0x1b9] sm:$0xf]  ;;  %v2936_v48 = vld [vmem:[#allocation2 + $0x1c9] sm:$0xf] }
 0x33f   :  { %v2906_v34 = vmul.f32 %v2890_v36, %v8053_v41  ;;  %v2907_v59 = vmul.f32 %v2891_v27, %v8053_v41  ;;  %v2908_v55 = vmul.f32 %v2892_v39, %v8053_v41  ;;  %v2909_v44 = vmul.f32 %v2893_v40, %v8053_v41  ;;  %v2931_v27 = vld [vmem:[#allocation2 + $0x191] sm:$0xf]  ;;  %v2933_v39 = vld [vmem:[#allocation2 + $0x1a1] sm:$0xf]  ;;  %v2938_v40 = vld [vmem:[#allocation2 + $0x1e9] sm:$0xf] }
 0x340   :  { %v2910_v15 = vmul.f32 %v2894_v7, %v8053_v41  ;;  %v2911_v19 = vmul.f32 %v2895_v38, %v8053_v41  ;;  %v2912_v8 = vmul.f32 %v2896_v58, %v8053_v41  ;;  %v2913_v25 = vmul.f32 %v2897_v2, %v8053_v41  ;;  %v2935_v2 = vld [vmem:[#allocation2 + $0x1c1] sm:$0xf]  ;;  %v2937_v41 = vld [vmem:[#allocation2 + $0x1d1] sm:$0xf] }
 0x341   :  { %v2914_v53 = vadd.f32 %v2898_v10, %v2865_v50  ;;  %v2915_v5 = vadd.f32 %v2899_v52, %v2866_v60  ;;  %v2916_v28 = vadd.f32 %v2900_v62, %v2867_v33  ;;  %v2917_v0 = vadd.f32 %v2901_v31, %v2868_v51  ;;  %v2939_v50 = vld [vmem:[#allocation2 + $0x1f1] sm:$0xf]  ;;  %v2940_v52 = vld [vmem:[#allocation2 + $0x1f9] sm:$0xf]  ;;  %v2941_v62 = vld [vmem:[#allocation2 + $0x201] sm:$0xf] }
 0x342   :  { %v2918_v14 = vadd.f32 %v2902_v24, %v2869_v63  ;;  %v2919_v35 = vadd.f32 %v2903_v57, %v2870_v21  ;;  %v2920_v36 = vadd.f32 %v2904_v43, %v2871_v4  ;;  %v2921_v30 = vadd.f32 %v2905_v9, %v2872_v23  ;;  %v2942_v63 = vld [vmem:[#allocation2 + $0x219] sm:$0xf]  ;;  %v2943_v21 = vld [vmem:[#allocation2 + $0x221] sm:$0xf]  ;;  %v2944_v4 = vld [vmem:[#allocation2 + $0x229] sm:$0xf] }
 0x343   :  { %v2922_v7 = vadd.f32 %v2906_v34, %v2873_v47  ;;  %v2923_v38 = vadd.f32 %v2907_v59, %v2874_v13  ;;  %v2924_v58 = vadd.f32 %v2908_v55, %v2875_v45  ;;  %v2925_v3 = vadd.f32 %v2909_v44, %v2876_v56  ;;  %v2945_v23 = vld [vmem:[#allocation2 + $0x231] sm:$0xf]  ;;  %v8054_v31 = vld [vmem:[#allocation16_spill] sm:$0xff] }
 0x344   :  { %v2926_v60 = vadd.f32 %v2910_v15, %v2877_v26  ;;  %v2927_v33 = vadd.f32 %v2911_v19, %v2878_v61  ;;  %v2928_v51 = vadd.f32 %v2912_v8, %v2879_v37  ;;  %v2929_v10 = vadd.f32 %v2913_v25, %v2880_v32  ;;  %v2978_v15 = vld [vmem:[#allocation2 + $0x18a] sm:$0xf] }
 0x345   :  { %v2946_v24 = vmul.f32 %v2930_v49, %v8054_v31  ;;  %v2947_v47 = vmul.f32 %v2931_v27, %v8054_v31  ;;  %v2948_v13 = vmul.f32 %v2932_v1, %v8054_v31  ;;  %v2949_v45 = vmul.f32 %v2933_v39, %v8054_v31  ;;  %v2980_v1 = vld [vmem:[#allocation2 + $0x19a] sm:$0xf] }
 0x346   :  { %v2950_v56 = vmul.f32 %v2934_v22, %v8054_v31  ;;  %v2951_v26 = vmul.f32 %v2935_v2, %v8054_v31  ;;  %v2952_v61 = vmul.f32 %v2936_v48, %v8054_v31  ;;  %v2953_v37 = vmul.f32 %v2937_v41, %v8054_v31  ;;  %v2982_v22 = vld [vmem:[#allocation2 + $0x1ba] sm:$0xf]  ;;  %v2984_v48 = vld [vmem:[#allocation2 + $0x1ca] sm:$0xf]  ;;  %v2979_v41 = vld [vmem:[#allocation2 + $0x192] sm:$0xf] }
 0x347   :  { %v2954_v32 = vmul.f32 %v2938_v40, %v8054_v31  ;;  %v2955_v57 = vmul.f32 %v2939_v50, %v8054_v31  ;;  %v2956_v43 = vmul.f32 %v2940_v52, %v8054_v31  ;;  %v2957_v9 = vmul.f32 %v2941_v62, %v8054_v31  ;;  %v2981_v50 = vld [vmem:[#allocation2 + $0x1a2] sm:$0xf]  ;;  %v2986_v52 = vld [vmem:[#allocation2 + $0x1ea] sm:$0xf] }
 0x348   :  { %v2958_v34 = vmul.f32 %v2942_v63, %v8054_v31  ;;  %v2959_v59 = vmul.f32 %v2943_v21, %v8054_v31  ;;  %v2960_v55 = vmul.f32 %v2944_v4, %v8054_v31  ;;  %v2961_v44 = vmul.f32 %v2945_v23, %v8054_v31  ;;  %v2983_v23 = vld [vmem:[#allocation2 + $0x1c2] sm:$0xf]  ;;  %v2985_v31 = vld [vmem:[#allocation2 + $0x1d2] sm:$0xf] }
 0x349   :  { %v2962_v19 = vadd.f32 %v2946_v24, %v2914_v53  ;;  %v2963_v8 = vadd.f32 %v2947_v47, %v2915_v5  ;;  %v2964_v25 = vadd.f32 %v2948_v13, %v2916_v28  ;;  %v2965_v49 = vadd.f32 %v2949_v45, %v2917_v0  ;;  %v2987_v53 = vld [vmem:[#allocation2 + $0x1f2] sm:$0xf]  ;;  %v2988_v47 = vld [vmem:[#allocation2 + $0x1fa] sm:$0xf]  ;;  %v2989_v13 = vld [vmem:[#allocation2 + $0x202] sm:$0xf] }
 0x34a   :  { %v2966_v27 = vadd.f32 %v2950_v56, %v2918_v14  ;;  %v2967_v39 = vadd.f32 %v2951_v26, %v2919_v35  ;;  %v2968_v40 = vadd.f32 %v2952_v61, %v2920_v36  ;;  %v2969_v2 = vadd.f32 %v2953_v37, %v2921_v30  ;;  %v2990_v14 = vld [vmem:[#allocation2 + $0x21a] sm:$0xf]  ;;  %v2991_v35 = vld [vmem:[#allocation2 + $0x222] sm:$0xf]  ;;  %v2992_v36 = vld [vmem:[#allocation2 + $0x22a] sm:$0xf] }
 0x34b   :  { %v2970_v62 = vadd.f32 %v2954_v32, %v2922_v7  ;;  %v2971_v63 = vadd.f32 %v2955_v57, %v2923_v38  ;;  %v2972_v21 = vadd.f32 %v2956_v43, %v2924_v58  ;;  %v2973_v4 = vadd.f32 %v2957_v9, %v2925_v3  ;;  %v2993_v30 = vld [vmem:[#allocation2 + $0x232] sm:$0xf] }
 0x34c   :  { %v2974_v5 = vadd.f32 %v2958_v34, %v2926_v60  ;;  %v2975_v28 = vadd.f32 %v2959_v59, %v2927_v33  ;;  %v2976_v0 = vadd.f32 %v2960_v55, %v2928_v51  ;;  %v2977_v24 = vadd.f32 %v2961_v44, %v2929_v10  ;;  %v8055_v45 = vld [vmem:[#allocation17_spill] sm:$0xff] }
 0x34d   :  { %v2994_v56 = vmul.f32 %v2978_v15, %v8055_v45  ;;  %v2995_v7 = vmul.f32 %v2979_v41, %v8055_v45  ;;  %v2996_v38 = vmul.f32 %v2980_v1, %v8055_v45  ;;  %v2997_v3 = vmul.f32 %v2981_v50, %v8055_v45  ;;  %v3027_v15 = vld [vmem:[#allocation2 + $0x190] sm:$0xf]  ;;  %v3028_v1 = vld [vmem:[#allocation2 + $0x198] sm:$0xf] }
 0x34e   :  { %v2998_v58 = vmul.f32 %v2982_v22, %v8055_v45  ;;  %v2999_v60 = vmul.f32 %v2983_v23, %v8055_v45  ;;  %v3000_v33 = vmul.f32 %v2984_v48, %v8055_v45  ;;  %v3001_v51 = vmul.f32 %v2985_v31, %v8055_v45  ;;  %v3031_v23 = vld [vmem:[#allocation2 + $0x1c0] sm:$0xf]  ;;  %v3032_v31 = vld [vmem:[#allocation2 + $0x1c8] sm:$0xf] }
 0x34f   :  { %v3002_v10 = vmul.f32 %v2986_v52, %v8055_v45  ;;  %v3003_v26 = vmul.f32 %v2987_v53, %v8055_v45  ;;  %v3004_v61 = vmul.f32 %v2988_v47, %v8055_v45  ;;  %v3005_v37 = vmul.f32 %v2989_v13, %v8055_v45  ;;  %v3029_v52 = vld [vmem:[#allocation2 + $0x1a0] sm:$0xf]  ;;  %v3035_v47 = vld [vmem:[#allocation2 + $0x1f0] sm:$0xf] }
 0x350   :  { %v3006_v32 = vmul.f32 %v2990_v14, %v8055_v45  ;;  %v3007_v57 = vmul.f32 %v2991_v35, %v8055_v45  ;;  %v3008_v43 = vmul.f32 %v2992_v36, %v8055_v45  ;;  %v3009_v9 = vmul.f32 %v2993_v30, %v8055_v45  ;;  %v3037_v13 = vld [vmem:[#allocation2 + $0x200] sm:$0xf]  ;;  %v3038_v36 = vld [vmem:[#allocation2 + $0x208] sm:$0xf]  ;;  %v8056_v30 = vld [vmem:[#allocation21_spill] sm:$0xff] }
 0x351   :  { %v3010_v34 = vadd.f32 %v2994_v56, %v2962_v19  ;;  %v6630_v59 = vadd.f32 %v2995_v7, %v2963_v8  ;;  %v6632_v55 = vadd.f32 %v2996_v38, %v2964_v25  ;;  %v6634_v44 = vadd.f32 %v2997_v3, %v2965_v49  ;;  %v3033_v19 = vld [vmem:[#allocation2 + $0x1d0] sm:$0xf]  ;;  %v3040_v45 = vld [vmem:[#allocation2 + $0x228] sm:$0xf]  ;;  %v8057_v56 = vld [vmem:[#allocation18_spill] sm:$0xff] }
 0x352   :  { %v6636_v22 = vadd.f32 %v2998_v58, %v2966_v27  ;;  %v6638_v48 = vadd.f32 %v2999_v60, %v2967_v39  ;;  %v6640_v41 = vadd.f32 %v3000_v33, %v2968_v40  ;;  %v6642_v50 = vadd.f32 %v3001_v51, %v2969_v2  ;;  %v3030_v27 = vld [vmem:[#allocation2 + $0x1a8] sm:$0xf]  ;;  %v3036_v39 = vld [vmem:[#allocation2 + $0x1f8] sm:$0xf] }
 0x353   :  { %v6644_v8 = vadd.f32 %v3002_v10, %v2970_v62  ;;  %v6646_v25 = vadd.f32 %v3003_v26, %v2971_v63  ;;  %v6648_v49 = vadd.f32 %v3004_v61, %v2972_v21  ;;  %v6650_v53 = vadd.f32 %v3005_v37, %v2973_v4  ;;  %v6652_v40 = vld.sshfl [vmem:[#allocation1] sm:$0xff pattern:$0x75316420]  ;;  %v3039_v63 = vld [vmem:[#allocation2 + $0x220] sm:$0xf] }
 0x354   :  { %v6654_v2 = vadd.f32 %v3006_v32, %v2974_v5  ;;  %v6656_v14 = vadd.f32 %v3007_v57, %v2975_v28  ;;  %v6658_v35 = vadd.f32 %v3008_v43, %v2976_v0  ;;  %v3034_v62 = vld [vmem:[#allocation2 + $0x1d8] sm:$0xf]  ;;  %v3247_v21 = vmul.f32 %v8056_v30, %v8056_v30  ;;  %v6666_v3 = vld.sshfl [vmem:[#allocation1 + $0x10] sm:$0xff pattern:$0x75316420] }
 0x355   :  { %v6662_v4 = vadd.f32 %v3009_v9, %v2977_v24  ;;  %v3043_v7 = vmul.f32 %v3027_v15, %v8057_v56  ;;  %v3044_v38 = vmul.f32 %v3028_v1, %v8057_v56  ;;  %v8058_v5 = vld [vmem:[#allocation22_spill] sm:$0xff]  ;;  %v3041_v0 = vld [vmem:[#allocation2 + $0x230] sm:$0xf]  ;;  %v3045_v60 = vmul.f32 %v3029_v52, %v8057_v56  ;;  %v8059_v24 = vld [vmem:[#allocation23_spill] sm:$0xff] }
 0x356   :  { %v3248_v28 = vmul.f32 %v8058_v5, %v8058_v5  ;;  %v3042_v58 = vld [vmem:[#allocation2 + $0x238] sm:$0xf]  ;;  %v3046_v33 = vmul.f32 %v3030_v27, %v8057_v56  ;;  %v3047_v51 = vmul.f32 %v3031_v23, %v8057_v56  ;;  %v3249_v10 = vmul.f32 %v8059_v24, %v8059_v24  ;;  %3279 = vst [vmem:[#allocation1] ss:$2 sm:$0xff] %v3247_v21  ;;  %v8060_v57 = vld [vmem:[#allocation24_spill] sm:$0xff]  ;;  %v8061_v52 = vld [vmem:[#allocation25_spill] sm:$0xff] }
 0x357   :  { %v3048_v26 = vmul.f32 %v3032_v31, %v8057_v56  ;;  %v3049_v61 = vmul.f32 %v3033_v19, %v8057_v56  ;;  %v3050_v37 = vmul.f32 %v3034_v62, %v8057_v56  ;;  %v6678_v32 = vld.sshfl [vmem:[#allocation1 + $0x20] sm:$0xff pattern:$0x75316420]  ;;  %v3250_v43 = vmul.f32 %v8060_v57, %v8060_v57  ;;  %v6690_v62 = vld.sshfl [vmem:[#allocation1 + $0x30] sm:$0xff pattern:$0x75316420] }
 0x358   :  { %3281 = vst [vmem:[#allocation1 + $0x1] ss:$2 sm:$0xff] %v3248_v28  ;;  %v3051_v9 = vmul.f32 %v3035_v47, %v8057_v56  ;;  %v3052_v15 = vmul.f32 %v3036_v39, %v8057_v56  ;;  %v3053_v1 = vmul.f32 %v3037_v13, %v8057_v56  ;;  %v3251_v23 = vmul.f32 %v8061_v52, %v8061_v52  ;;  %v8062_v21 = vld [vmem:[#allocation26_spill] sm:$0xff]  ;;  %v8063_v57 = vld [vmem:[#allocation27_spill] sm:$0xff]  ;;  %v3075_v30 = vld [vmem:[#allocation2 + $0x191] sm:$0xf] }
 0x359   :  { %3283 = vst [vmem:[#allocation1 + $0x10] ss:$2 sm:$0xff] %v3249_v10  ;;  %v3054_v31 = vmul.f32 %v3038_v36, %v8057_v56  ;;  %v3055_v19 = vmul.f32 %v3039_v63, %v8057_v56  ;;  %v3056_v27 = vmul.f32 %v3040_v45, %v8057_v56  ;;  %v3252_v28 = vmul.f32 %v8062_v21, %v8062_v21  ;;  %v3077_v21 = vld [vmem:[#allocation2 + $0x1a1] sm:$0xf] }
 0x35a   :  { %3285 = vst [vmem:[#allocation1 + $0x11] ss:$2 sm:$0xff] %v3250_v43  ;;  %v3057_v47 = vmul.f32 %v3041_v0, %v8057_v56  ;;  %v3058_v39 = vmul.f32 %v3042_v58, %v8057_v56  ;;  %v3059_v13 = vadd.f32 %v3043_v7, %v3010_v34  ;;  %v3253_v10 = vmul.f32 %v8063_v57, %v8063_v57  ;;  %v3076_v43 = vld [vmem:[#allocation2 + $0x199] sm:$0xf]  ;;  %v8064_v0 = vld [vmem:[#allocation28_spill] sm:$0xff] }
 0x35b   :  { %3287 = vst [vmem:[#allocation1 + $0x20] ss:$2 sm:$0xff] %v3251_v23  ;;  %v6699_v36 = vadd.f32 %v3044_v38, %v6630_v59  ;;  %v6702_v63 = vadd.f32 %v3045_v60, %v6632_v55  ;;  %v6705_v45 = vadd.f32 %v3046_v33, %v6634_v44  ;;  %v3254_v56 = vmul.f32 %v8064_v0, %v8064_v0  ;;  %v3079_v44 = vld [vmem:[#allocation2 + $0x1c1] sm:$0xf]  ;;  %v3080_v38 = vld [vmem:[#allocation2 + $0x1c9] sm:$0xf] }
 0x35c   :  { %3289 = vst [vmem:[#allocation1 + $0x21] ss:$2 sm:$0xff] %v3252_v28  ;;  %v6710_v34 = vadd.f32 %v3047_v51, %v6636_v22  ;;  %v6713_v7 = vadd.f32 %v3048_v26, %v6638_v48  ;;  %v6716_v59 = vadd.f32 %v3049_v61, %v6640_v41  ;;  %v6719_v55 = vadd.f32 %v3050_v37, %v6642_v50  ;;  %v3081_v58 = vld [vmem:[#allocation2 + $0x1d1] sm:$0xf]  ;;  %v3078_v48 = vld [vmem:[#allocation2 + $0x1a9] sm:$0xf] }
 0x35d   :  { %3291 = vst [vmem:[#allocation1 + $0x30] ss:$2 sm:$0xff] %v3253_v10  ;;  %v6722_v60 = vadd.f32 %v3051_v9, %v6644_v8  ;;  %v6725_v33 = vadd.f32 %v3052_v15, %v6646_v25  ;;  %v6728_v22 = vadd.f32 %v3053_v1, %v6648_v49  ;;  %v3083_v51 = vld [vmem:[#allocation2 + $0x1f1] sm:$0xf]  ;;  %v3255_v41 = vmul.f32 %v6214_v18, %v6214_v18  ;;  %v3084_v25 = vld [vmem:[#allocation2 + $0x1f9] sm:$0xf] }
 0x35e   :  { %3293 = vst [vmem:[#allocation1 + $0x31] ss:$2 sm:$0xff] %v3254_v56  ;;  %v6733_v50 = vadd.f32 %v3054_v31, %v6650_v53  ;;  %v6736_v26 = vadd.f32 %v3055_v19, %v6654_v2  ;;  %v6739_v8 = vadd.f32 %v3056_v27, %v6656_v14  ;;  %v3085_v61 = vld [vmem:[#allocation2 + $0x201] sm:$0xf]  ;;  %v3256_v49 = vmul.f32 %v6219_v20, %v6219_v20  ;;  %v3082_v53 = vld [vmem:[#allocation2 + $0x1d9] sm:$0xf] }
 0x35f   :  { %v6743_v37 = vld.sshfl [vmem:[#allocation1] sm:$0xff pattern:$0x75316420]  ;;  %v6746_v9 = vadd.f32 %v3057_v47, %v6658_v35  ;;  %v6749_v15 = vadd.f32 %v3058_v39, %v6662_v4  ;;  %v3086_v1 = vld [vmem:[#allocation2 + $0x209] sm:$0xf]  ;;  %v8065_v2 = vld [vmem:[#allocation19_spill] sm:$0xff]  ;;  %v3257_v14 = vmul.f32 %v6221_v6, %v6221_v6  ;;  %v3258_v4 = vmul.f32 %v6223_v29, %v6223_v29 }
 0x360   :  { %v3091_v23 = vmul.f32 %v3075_v30, %v8065_v2  ;;  %3298 = vst [vmem:[#allocation1] ss:$2 sm:$0xff] %v3255_v41  ;;  %v3087_v31 = vld [vmem:[#allocation2 + $0x221] sm:$0xf]  ;;  %v3092_v19 = vmul.f32 %v3076_v43, %v8065_v2  ;;  %v3093_v27 = vmul.f32 %v3077_v21, %v8065_v2  ;;  %v3094_v28 = vmul.f32 %v3078_v48, %v8065_v2  ;;  %v3124_v35 = vld [vmem:[#allocation2 + $0x19a] sm:$0xf] }
 0x361   :  { %v6759_v47 = vld.sshfl [vmem:[#allocation1 + $0x10] sm:$0xff pattern:$0x75316420]  ;;  %3299 = vst [vmem:[#allocation1 + $0x1] ss:$2 sm:$0xff] %v3256_v49  ;;  %v3095_v30 = vmul.f32 %v3079_v44, %v8065_v2  ;;  %v3096_v10 = vmul.f32 %v3080_v38, %v8065_v2  ;;  %v3097_v56 = vmul.f32 %v3081_v58, %v8065_v2  ;;  %v3259_v21 = vmul.f32 %v6225_v17, %v6225_v17 }
 0x362   :  { %v3088_v39 = vld [vmem:[#allocation2 + $0x229] sm:$0xf]  ;;  %v3123_v41 = vld [vmem:[#allocation2 + $0x192] sm:$0xf]  ;;  %3300 = vst [vmem:[#allocation1 + $0x10] ss:$2 sm:$0xff] %v3257_v14  ;;  %v3098_v6 = vmul.f32 %v3082_v53, %v8065_v2  ;;  %v3099_v29 = vmul.f32 %v3083_v51, %v8065_v2  ;;  %v3107_v20 = vadd.f32 %v3091_v23, %v3059_v13  ;;  %v3260_v49 = vmul.f32 %v8050_v12, %v8050_v12 }
 0x363   :  { %v3126_v43 = vld [vmem:[#allocation2 + $0x1aa] sm:$0xf]  ;;  %v3089_v48 = vld [vmem:[#allocation2 + $0x231] sm:$0xf]  ;;  %3301 = vst [vmem:[#allocation1 + $0x11] ss:$2 sm:$0xff] %v3258_v4  ;;  %v3100_v58 = vmul.f32 %v3084_v25, %v8065_v2  ;;  %v3101_v18 = vmul.f32 %v3085_v61, %v8065_v2  ;;  %v3108_v17 = vadd.f32 %v3092_v19, %v6699_v36  ;;  %v3261_v53 = vmul.f32 %v8051_v42, %v8051_v42 }
 0x364   :  { %v6770_v44 = vld.sshfl [vmem:[#allocation1 + $0x20] sm:$0xff pattern:$0x75316420]  ;;  %v3125_v14 = vld [vmem:[#allocation2 + $0x1a2] sm:$0xf]  ;;  %v3102_v13 = vmul.f32 %v3086_v1, %v8065_v2  ;;  %v3109_v51 = vadd.f32 %v3093_v27, %v6702_v63  ;;  %v8066_v23 = vld [vmem:[#allocation20_spill] sm:$0xff]  ;;  %v3262_v4 = vmul.f32 %v8052_v16, %v8052_v16  ;;  %v3103_v25 = vmul.f32 %v3087_v31, %v8065_v2 }
 0x365   :  { %v3090_v38 = vld [vmem:[#allocation2 + $0x239] sm:$0xf]  ;;  %3302 = vst [vmem:[#allocation1 + $0x20] ss:$2 sm:$0xff] %v3259_v21  ;;  %v3139_v12 = vmul.f32 %v3123_v41, %v8066_v23  ;;  %v3110_v36 = vadd.f32 %v3094_v28, %v6705_v45  ;;  %v3127_v61 = vld [vmem:[#allocation2 + $0x1c2] sm:$0xf]  ;;  %v3140_v19 = vmul.f32 %v3124_v35, %v8066_v23  ;;  %v3142_v21 = vmul.f32 %v3126_v43, %v8066_v23 }
 0x366   :  { %v6782_v0 = vld.sshfl [vmem:[#allocation1 + $0x30] sm:$0xff pattern:$0x75316420]  ;;  %3303 = vst [vmem:[#allocation1 + $0x21] ss:$2 sm:$0xff] %v3260_v49  ;;  %v3104_v63 = vmul.f32 %v3088_v39, %v8065_v2  ;;  %v3111_v1 = vadd.f32 %v3095_v30, %v6710_v34  ;;  %v3141_v16 = vmul.f32 %v3125_v14, %v8066_v23  ;;  %v3105_v31 = vmul.f32 %v3089_v48, %v8065_v2 }
 0x367   :  { %3304 = vst [vmem:[#allocation1 + $0x30] ss:$2 sm:$0xff] %v3261_v53  ;;  %v3128_v27 = vld [vmem:[#allocation2 + $0x1ca] sm:$0xf]  ;;  %v3130_v41 = vld [vmem:[#allocation2 + $0x1da] sm:$0xf]  ;;  %v6791_v42 = vadd.f32 %v3139_v12, %v3107_v20  ;;  %v6795_v45 = vmul.f32 %v3090_v38, %v8065_v2  ;;  %v3112_v28 = vadd.f32 %v3096_v10, %v6713_v7  ;;  %v6798_v43 = vadd.f32 %v3140_v19, %v3108_v17 }
 0x368   :  { %3305 = vst [vmem:[#allocation1 + $0x31] ss:$2 sm:$0xff] %v3262_v4  ;;  %v3129_v35 = vld [vmem:[#allocation2 + $0x1d2] sm:$0xf]  ;;  %v3113_v34 = vadd.f32 %v3097_v56, %v6716_v59  ;;  %v3132_v49 = vld [vmem:[#allocation2 + $0x1fa] sm:$0xf]  ;;  %v3143_v20 = vmul.f32 %v3127_v61, %v8066_v23  ;;  %v6804_v12 = vadd.f32 %v3141_v16, %v3109_v51  ;;  %v3114_v7 = vadd.f32 %v3098_v6, %v6719_v55 }
 0x369   :  { %v6800_v39 = vld.sshfl [vmem:[#allocation1] sm:$0xff pattern:$0x75316420]  ;;  %v3131_v30 = vld [vmem:[#allocation2 + $0x1f2] sm:$0xf]  ;;  %v3227_v48 = vsel %vm199_vm0, %v6552_v11, 0.0  ;;  %v3144_v17 = vmul.f32 %v3128_v27, %v8066_v23  ;;  %v3146_v10 = vmul.f32 %v3130_v41, %v8066_v23  ;;  %v6812_v38 = vadd.f32 %v3142_v21, %v3110_v36 }
 0x36a   :  { %3355 = vst [vmem:[#allocation1] ss:$2 sm:$0xff] %v6791_v42  ;;  %v3134_v2 = vld [vmem:[#allocation2 + $0x20a] sm:$0xf]  ;;  %v3135_v16 = vld [vmem:[#allocation2 + $0x222] sm:$0xf]  ;;  %v3145_v56 = vmul.f32 %v3129_v35, %v8066_v23  ;;  %v6818_v14 = vadd.f32 %v3143_v20, %v3111_v1  ;;  %v3115_v55 = vadd.f32 %v3099_v29, %v6722_v60  ;;  %v3116_v53 = vadd.f32 %v3100_v58, %v6725_v33 }
 0x36b   :  { %v6814_v59 = vld.sshfl [vmem:[#allocation1 + $0x10] sm:$0xff pattern:$0x75316420]  ;;  %3357 = vst [vmem:[#allocation1 + $0x1] ss:$2 sm:$0xff] %v6798_v43  ;;  %v3226_v11 = vsel %vm199_vm0, %v6550_v46, 0.0  ;;  %v6827_v51 = vadd.f32 %v3144_v17, %v3112_v28  ;;  %v3117_v61 = vadd.f32 %v3101_v18, %v6728_v22  ;;  %v3118_v46 = vadd.f32 %v3102_v13, %v6733_v50 }
 0x36c   :  { %v3229_v6 = vsel %vm199_vm0, %v6559_v54, 0.0  ;;  %3359 = vst [vmem:[#allocation1 + $0x10] ss:$2 sm:$0xff] %v6804_v12  ;;  %v3228_v4 = vadd.f32 %v3227_v48, %v3226_v11  ;;  %v3119_v19 = vadd.f32 %v3103_v25, %v6736_v26  ;;  %v3133_v54 = vld [vmem:[#allocation2 + $0x202] sm:$0xf]  ;;  %v6835_v1 = vadd.f32 %v3145_v56, %v3113_v34 }
 0x36d   :  { %v6829_v36 = vld.sshfl [vmem:[#allocation1 + $0x20] sm:$0xff pattern:$0x75316420]  ;;  %3361 = vst [vmem:[#allocation1 + $0x11] ss:$2 sm:$0xff] %v6812_v38  ;;  %v3147_v29 = vmul.f32 %v3131_v30, %v8066_v23  ;;  %v3148_v60 = vmul.f32 %v3132_v49, %v8066_v23  ;;  %v6840_v33 = vadd.f32 %v3146_v10, %v3114_v7  ;;  %v3150_v22 = vmul.f32 %v3134_v2, %v8066_v23  ;;  %v8067_v26 = vld [vmem:[#allocation3_spill] sm:$0xff] }
 0x36e   :  { %v3136_v21 = vld [vmem:[#allocation2 + $0x22a] sm:$0xf]  ;;  %3363 = vst [vmem:[#allocation1 + $0x20] ss:$2 sm:$0xff] %v6818_v14  ;;  %v3230_v58 = vadd.f32 %v3229_v6, %v3228_v4  ;;  %v3137_v18 = vld [vmem:[#allocation2 + $0x232] sm:$0xf]  ;;  %v3151_v50 = vmul.f32 %v3135_v16, %v8066_v23  ;;  %v3120_v41 = vadd.f32 %v3104_v63, %v6739_v8  ;;  %v3121_v28 = vadd.f32 %v3105_v31, %v6746_v9 }
 0x36f   :  { %v6842_v27 = vld.sshfl [vmem:[#allocation1 + $0x30] sm:$0xff pattern:$0x75316420]  ;;  %3365 = vst [vmem:[#allocation1 + $0x21] ss:$2 sm:$0xff] %v6827_v51  ;;  %v3231_v13 = vsel %vm199_vm0, %v8067_v26, 0.0  ;;  %v3149_v34 = vmul.f32 %v3133_v54, %v8066_v23  ;;  %v6855_v30 = vadd.f32 %v3147_v29, %v3115_v55  ;;  %v3152_v49 = vmul.f32 %v3136_v21, %v8066_v23 }
 0x370   :  { %v3319_v25 = vsel %vm199_vm0, %v6759_v47, 0.0  ;;  %3367 = vst [vmem:[#allocation1 + $0x30] ss:$2 sm:$0xff] %v6835_v1  ;;  %v3138_v35 = vld [vmem:[#allocation2 + $0x23a] sm:$0xf]  ;;  %v6859_v20 = vadd.f32 %v3148_v60, %v3116_v53  ;;  %v3318_v47 = vsel %vm199_vm0, %v6743_v37, 0.0  ;;  %v3153_v9 = vmul.f32 %v3137_v18, %v8066_v23 }
 0x371   :  { %3369 = vst [vmem:[#allocation1 + $0x31] ss:$2 sm:$0xff] %v6840_v33  ;;  %v3321_v48 = vsel %vm199_vm0, %v6770_v44, 0.0  ;;  %v6866_v63 = vadd.f32 %v3149_v34, %v3117_v61  ;;  %v3232_v31 = vadd.f32 %v3231_v13, %v3230_v58  ;;  %v3320_v7 = vadd.f32 %v3319_v25, %v3318_v47 }
 0x372   :  { %v3370_v8 = vld.sshfl [vmem:[#allocation1] sm:$0xff pattern:$0x75316420]  ;;  %v3122_v2 = vadd.f32 %v6795_v45, %v6749_v15  ;;  %v3154_v17 = vmul.f32 %v3138_v35, %v8066_v23  ;;  %v6872_v10 = vadd.f32 %v3150_v22, %v3118_v46  ;;  %v6874_v37 = vadd.f32 %v3151_v50, %v3119_v19 }
 0x373   :  { %3374 = vst [vmem:[#allocation1] ss:$2 sm:$0xff] %v6855_v30  ;;  %v3233_v44 = vsel %vm199_vm0, %v6652_v40, 0.0  ;;  %v3322_v56 = vadd.f32 %v3321_v48, %v3320_v7  ;;  %v3394_v11 = vsel %vm199_vm0, %v3370_v8, 0.0  ;;  %v6882_v15 = vadd.f32 %v3152_v49, %v3120_v41 }
 0x374   :  { %v3371_v16 = vld.sshfl [vmem:[#allocation1 + $0x10] sm:$0xff pattern:$0x75316420]  ;;  %3375 = vst [vmem:[#allocation1 + $0x1] ss:$2 sm:$0xff] %v6859_v20  ;;  %v3323_v23 = vsel %vm199_vm0, %v6782_v0, 0.0  ;;  %v6887_v53 = vadd.f32 %v3153_v9, %v3121_v28  ;;  %v3234_v4 = vadd.f32 %v3233_v44, %v3232_v31  ;;  %v6891_v61 = vadd.f32 %v3154_v17, %v3122_v2 }
 0x375   :  { %3376 = vst [vmem:[#allocation1 + $0x10] ss:$2 sm:$0xff] %v6866_v63  ;;  %v3395_v6 = vsel %vm199_vm0, %v3371_v16, 0.0  ;;  %v3324_v54 = vadd.f32 %v3323_v23, %v3322_v56  ;;  %v3235_v21 = vsel %vm199_vm0, %v6666_v3, 0.0  ;;  %v3415_v60 = vmul.f32 %v6791_v42, %v6791_v42 }
 0x376   :  { %v3372_v45 = vld.sshfl [vmem:[#allocation1 + $0x20] sm:$0xff pattern:$0x75316420]  ;;  %3377 = vst [vmem:[#allocation1 + $0x11] ss:$2 sm:$0xff] %v6872_v10  ;;  %v3396_v55 = vadd.f32 %v3395_v6, %v3394_v11  ;;  %v3236_v58 = vadd.f32 %v3235_v21, %v3234_v4  ;;  %v3416_v22 = vmul.f32 %v6798_v43, %v6798_v43  ;;  %v3237_v50 = vsel %vm199_vm0, %v6678_v32, 0.0 }
 0x377   :  { %3378 = vst [vmem:[#allocation1 + $0x20] ss:$2 sm:$0xff] %v6874_v37  ;;  %v3397_v40 = vsel %vm199_vm0, %v3372_v45, 0.0  ;;  %v3325_v26 = vsel %vm199_vm0, %v6800_v39, 0.0  ;;  %v3417_v3 = vmul.f32 %v6804_v12, %v6804_v12  ;;  %v3418_v35 = vmul.f32 %v6812_v38, %v6812_v38 }
 0x378   :  { %v3373_v46 = vld.sshfl [vmem:[#allocation1 + $0x30] sm:$0xff pattern:$0x75316420]  ;;  %3379 = vst [vmem:[#allocation1 + $0x21] ss:$2 sm:$0xff] %v6882_v15  ;;  %v3398_v19 = vadd.f32 %v3397_v40, %v3396_v55  ;;  %v3326_v25 = vadd.f32 %v3325_v26, %v3324_v54  ;;  %v3419_v32 = vmul.f32 %v6818_v14, %v6818_v14  ;;  %v3238_v39 = vadd.f32 %v3237_v50, %v3236_v58 }
 0x379   :  { %3380 = vst [vmem:[#allocation1 + $0x30] ss:$2 sm:$0xff] %v6887_v53  ;;  %v3399_v0 = vsel %vm199_vm0, %v3373_v46, 0.0  ;;  %v3420_v48 = vmul.f32 %v6827_v51, %v6827_v51  ;;  %v3239_v8 = vsel %vm199_vm0, %v6690_v62, 0.0  ;;  %v3327_v9 = vsel %vm199_vm0, %v6814_v59, 0.0 }
 0x37a   :  { %3381 = vst [vmem:[#allocation1 + $0x31] ss:$2 sm:$0xff] %v6891_v61  ;;  %v3400_v29 = vadd.f32 %v3399_v0, %v3398_v19  ;;  %v3421_v7 = vmul.f32 %v6835_v1, %v6835_v1  ;;  %v3328_v2 = vadd.f32 %v3327_v9, %v3326_v25  ;;  %v3422_v44 = vmul.f32 %v6840_v33, %v6840_v33 }
 0x37b   :  { %v3382_v18 = vld.sshfl [vmem:[#allocation1] sm:$0xff pattern:$0x75316420]  ;;  %v3329_v56 = vsel %vm199_vm0, %v6829_v36, 0.0  ;;  %v3240_v59 = vadd.f32 %v3239_v8, %v3238_v39  ;;  %v3423_v6 = vmul.f32 %v6855_v30, %v6855_v30  ;;  %v3424_v23 = vmul.f32 %v6859_v20, %v6859_v20 }
 0x37c   :  { %v3401_v13 = vsel %vm199_vm0, %v3382_v18, 0.0  ;;  %3447 = vst [vmem:[#allocation1] ss:$2 sm:$0xff] %v3415_v60  ;;  %v3330_v55 = vadd.f32 %v3329_v56, %v3328_v2  ;;  %v3425_v40 = vmul.f32 %v6866_v63, %v6866_v63  ;;  %v3331_v36 = vsel %vm199_vm0, %v6842_v27, 0.0 }
 0x37d   :  { %v3383_v41 = vld.sshfl [vmem:[#allocation1 + $0x10] sm:$0xff pattern:$0x75316420]  ;;  %v3402_v28 = vadd.f32 %v3401_v13, %v3400_v29  ;;  %3449 = vst [vmem:[#allocation1 + $0x1] ss:$2 sm:$0xff] %v3416_v22  ;;  %v3426_v46 = vmul.f32 %v6872_v10, %v6872_v10  ;;  %v3241_v54 = vrot.slane %v3240_v59, 4  ;;  %v3427_v0 = vmul.f32 %v6874_v37, %v6874_v37 }
 0x37e   :  { %v3403_v34 = vsel %vm199_vm0, %v3383_v41, 0.0  ;;  %3451 = vst [vmem:[#allocation1 + $0x10] ss:$2 sm:$0xff] %v3417_v3  ;;  %v3428_v60 = vmul.f32 %v6882_v15, %v6882_v15  ;;  %v3332_v18 = vadd.f32 %v3331_v36, %v3330_v55  ;;  %v3429_v50 = vmul.f32 %v6887_v53, %v6887_v53 }
 0x37f   :  { %v3384_v49 = vld.sshfl [vmem:[#allocation1 + $0x20] sm:$0xff pattern:$0x75316420]  ;;  %v3404_v47 = vadd.f32 %v3403_v34, %v3402_v28  ;;  %3453 = vst [vmem:[#allocation1 + $0x11] ss:$2 sm:$0xff] %v3418_v35  ;;  %v3430_v13 = vmul.f32 %v6891_v61, %v6891_v61  ;;  %v3242_v41 = vadd.f32 %v3241_v54, %v3240_v59 }
 0x380   :  { %v3405_v31 = vsel %vm199_vm0, %v3384_v49, 0.0  ;;  %3455 = vst [vmem:[#allocation1 + $0x20] ss:$2 sm:$0xff] %v3419_v32  ;;  %v3333_v34 = vrot.slane %v3332_v18, 4 }
 0x381   :  { %v3385_v17 = vld.sshfl [vmem:[#allocation1 + $0x30] sm:$0xff pattern:$0x75316420]  ;;  %v3406_v16 = vadd.f32 %v3405_v31, %v3404_v47  ;;  %3457 = vst [vmem:[#allocation1 + $0x21] ss:$2 sm:$0xff] %v3420_v48  ;;  %v3243_v47 = vrot.slane %v3242_v41, 2 }
 0x382   :  { %v3407_v62 = vsel %vm199_vm0, %v3385_v17, 0.0  ;;  %3459 = vst [vmem:[#allocation1 + $0x30] ss:$2 sm:$0xff] %v3421_v7  ;;  %v3334_v31 = vadd.f32 %v3333_v34, %v3332_v18 }
 0x383   :  { %v3408_v11 = vadd.f32 %v3407_v62, %v3406_v16  ;;  %3461 = vst [vmem:[#allocation1 + $0x31] ss:$2 sm:$0xff] %v3422_v44  ;;  %v3244_v44 = vadd.f32 %v3243_v47, %v3242_v41 }
 0x384   :  { %v3462_v45 = vld.sshfl [vmem:[#allocation1] sm:$0xff pattern:$0x75316420] }
 0x385   :  { %v3409_v4 = vrot.slane %v3408_v11, 4  ;;  %3466 = vst [vmem:[#allocation1] ss:$2 sm:$0xff] %v3423_v6  ;;  %v3486_v21 = vsel %vm199_vm0, %v3462_v45, 0.0  ;;  %v3245_v45 = vrot.slane %v3244_v44, 1 }
 0x386   :  { %v3463_v19 = vld.sshfl [vmem:[#allocation1 + $0x10] sm:$0xff pattern:$0x75316420]  ;;  %3467 = vst [vmem:[#allocation1 + $0x1] ss:$2 sm:$0xff] %v3424_v23 }
 0x387   :  { %3468 = vst [vmem:[#allocation1 + $0x10] ss:$2 sm:$0xff] %v3425_v40  ;;  %v3487_v29 = vsel %vm199_vm0, %v3463_v19, 0.0  ;;  %v3410_v22 = vadd.f32 %v3409_v4, %v3408_v11  ;;  %v3335_v11 = vrot.slane %v3334_v31, 2 }
 0x388   :  { %v3464_v58 = vld.sshfl [vmem:[#allocation1 + $0x20] sm:$0xff pattern:$0x75316420]  ;;  %3469 = vst [vmem:[#allocation1 + $0x11] ss:$2 sm:$0xff] %v3426_v46  ;;  %v3488_v27 = vadd.f32 %v3487_v29, %v3486_v21  ;;  %v3246_v46 = vadd.f32 %v3245_v45, %v3244_v44  ;;  %v8069_v45 = vld [vmem:[#allocation28_spill] sm:$0xff] }
 0x389   :  { %3470 = vst [vmem:[#allocation1 + $0x20] ss:$2 sm:$0xff] %v3427_v0  ;;  %v3489_v26 = vsel %vm199_vm0, %v3464_v58, 0.0  ;;  %v3411_v32 = vrot.slane %v3410_v22, 2  ;;  %v3336_v4 = vadd.f32 %v3335_v11, %v3334_v31 }
 0x38a   :  { %v3465_v3 = vld.sshfl [vmem:[#allocation1 + $0x30] sm:$0xff pattern:$0x75316420]  ;;  %3471 = vst [vmem:[#allocation1 + $0x21] ss:$2 sm:$0xff] %v3428_v60  ;;  %v3490_v25 = vadd.f32 %v3489_v26, %v3488_v27 }
 0x38b   :  { %3472 = vst [vmem:[#allocation1 + $0x30] ss:$2 sm:$0xff] %v3429_v50  ;;  %v3491_v28 = vsel %vm199_vm0, %v3465_v3, 0.0  ;;  %v3412_v7 = vadd.f32 %v3411_v32, %v3410_v22  ;;  %v3337_v54 = vrot.slane %v3336_v4, 1  ;;  %v3514_v32 = vld [vmem:[%s7931_s6] sm:$0x1] }
 0x38c   :  { %3473 = vst [vmem:[#allocation1 + $0x31] ss:$2 sm:$0xff] %v3430_v13  ;;  %v3492_v35 = vadd.f32 %v3491_v28, %v3490_v25 }
 0x38d   :  { %v3474_v39 = vld.sshfl [vmem:[#allocation1] sm:$0xff pattern:$0x75316420]  ;;  %v3413_v6 = vrot.slane %v3412_v7, 1  ;;  %v3338_v60 = vadd.f32 %v3337_v54, %v3336_v4 }
 0x38e   :  { %v3493_v49 = vsel %vm199_vm0, %v3474_v39, 0.0 }
 0x38f   :  { %v3475_v48 = vld.sshfl [vmem:[#allocation1 + $0x10] sm:$0xff pattern:$0x75316420]  ;;  %v3494_v8 = vadd.f32 %v3493_v49, %v3492_v35  ;;  %v3414_v40 = vadd.f32 %v3413_v6, %v3412_v7 }
 0x390   :  { %v3495_v9 = vsel %vm199_vm0, %v3475_v48, 0.0  ;;  %v3527_v48 = vld [vmem:[%s7932_s7] sm:$0x1] }
 0x391   :  { %v3476_v2 = vld.sshfl [vmem:[#allocation1 + $0x20] sm:$0xff pattern:$0x75316420]  ;;  %v3496_v17 = vadd.f32 %v3495_v9, %v3494_v8  ;;  %v3507_v21 = vadd.f32 %v3414_v40, %v3246_v46 }
 0x392   :  { %v3497_v16 = vsel %vm199_vm0, %v3476_v2, 0.0 }
 0x393   :  { %v3477_v56 = vld.sshfl [vmem:[#allocation1 + $0x30] sm:$0xff pattern:$0x75316420]  ;;  %v3498_v62 = vadd.f32 %v3497_v16, %v3496_v17  ;;  %v3509_v27 = vmul.f32 0.0078125, %v3507_v21  ;;  %v8070_v21 = vld [vmem:[#allocation33_spill] sm:$0xff] }
 0x394   :  { %v3499_v59 = vsel %vm199_vm0, %v3477_v56, 0.0 }
 0x395   :  { %v3500_v23 = vadd.f32 %v3499_v59, %v3498_v62  ;;  %v3511_v50 = vmul.f32 %v3509_v27, %v3509_v27 }
 0x397   :  { %v3501_v55 = vrot.slane %v3500_v23, 4 }
 0x399   :  { %v3502_v36 = vadd.f32 %v3501_v55, %v3500_v23  ;;  %v8068_v23 = vld [vmem:[#allocation26_spill] sm:$0xff] }
 0x39b   :  { %v3503_v19 = vrot.slane %v3502_v36, 2 }
 0x39d   :  { %v3504_v0 = vadd.f32 %v3503_v19, %v3502_v36 }
 0x39f   :  { %v3505_v29 = vrot.slane %v3504_v0, 1 }
 0x3a1   :  { %v3506_v58 = vadd.f32 %v3505_v29, %v3504_v0 }
 0x3a3   :  { %v3508_v18 = vadd.f32 %v3506_v58, %v3338_v60  ;;  %v8072_v58 = vld [vmem:[#allocation34_spill] sm:$0xff] }
 0x3a5   :  { %v3510_v22 = vmul.f32 0.0078125, %v3508_v18  ;;  %v8073_v18 = vld [vmem:[#allocation24_spill] sm:$0xff] }
 0x3a7   :  { %v3512_v26 = vsub.f32 %v3510_v22, %v3511_v50  ;;  %v8074_v50 = vld [vmem:[#allocation35_spill] sm:$0xff] }
 0x3a9   :  { %v3513_v13 = vmax.f32 %v3512_v26, 0.0 }
 0x3ab   :  { %v3515_v3 = vadd.f32 1e-05, %v3513_v13 }
 0x3ad   :  { %4975 = vrsqrt.f32 %v3515_v3  ;;  %vm3522_vm7 = vweird.f32 %v3515_v3 }
 0x3b3   :  { %v4976_v25 = vpop.eup %4975 }
 0x3b4   :  { %v3517_v41 = vmul.f32 %v4976_v25, %v3515_v3  ;;  %vm3523_vm6 = vweird.f32 %v4976_v25 }
 0x3b5   :  { %vm3524_vm8 = vmor %vm3522_vm7, %vm3523_vm6 }
 0x3b6   :  { %v3518_v28 = vmul.f32 %v4976_v25, %v3517_v41 }
 0x3b8   :  { %v3519_v35 = vmul.f32 0.5, %v3518_v28 }
 0x3ba   :  { %v3520_v34 = vsub.f32 1.5, %v3519_v35 }
 0x3bc   :  { %v3521_v39 = vmul.f32 %v4976_v25, %v3520_v34 }
 0x3be   :  { %v3525_v49 = vsel %vm3524_vm8, %v4976_v25, %v3521_v39  ;;  %v8075_v25 = vld [vmem:[#allocation36_spill] sm:$0xff] }
 0x3bf   :  { %v3526_v47 = vmul.f32 %v3525_v49, %v3514_v32 }
 0x3c1   :  { %v3528_v8 = vmul.f32 %v3526_v47, %v3509_v27  ;;  %v6961_v9 = vperm.slane %v3526_v47, 0 }
 0x3c3   :  { %v3529_v31 = vsub.f32 %v3527_v48, %v3528_v8  ;;  %v6964_v7 = vrot.slane %v6961_v9, 4  ;;  %v3537_v2 = vmul.f32 %v6961_v9, %v8059_v24  ;;  %v3539_v6 = vmul.f32 %v6961_v9, %v8061_v52  ;;  %v8076_v8 = vld [vmem:[#allocation29_spill] sm:$0xff] }
 0x3c4   :  { %v3547_v29 = vmul.f32 %v6961_v9, %v8070_v21  ;;  %v3549_v26 = vmul.f32 %v6961_v9, %v8074_v50 }
 0x3c5   :  { %v6968_v17 = vperm.slane %v3529_v31, 0  ;;  %v3536_v16 = vmul.f32 %v6964_v7, %v8058_v5  ;;  %v3540_v24 = vmul.f32 %v6964_v7, %v8068_v23  ;;  %v3541_v5 = vmul.f32 %v6961_v9, %v8063_v57  ;;  %v8071_v57 = vld [vmem:[#allocation21_spill] sm:$0xff] }
 0x3c6   :  { %v3542_v55 = vmul.f32 %v6964_v7, %v8069_v45  ;;  %v3535_v60 = vmul.f32 %v6961_v9, %v8071_v57  ;;  %v3548_v27 = vmul.f32 %v6964_v7, %v8072_v58  ;;  %v3538_v22 = vmul.f32 %v6964_v7, %v8073_v18 }
 0x3c7   :  { %v6973_v44 = vrot.slane %v6968_v17, 4  ;;  %v3558_v56 = vadd.f32 %v6968_v17, %v3537_v2  ;;  %v3560_v4 = vadd.f32 %v6968_v17, %v3539_v6  ;;  %v3562_v36 = vadd.f32 %v6968_v17, %v3541_v5 }
 0x3c8   :  { %v3568_v13 = vadd.f32 %v6968_v17, %v3547_v29  ;;  %v3556_v3 = vadd.f32 %v6968_v17, %v3535_v60  ;;  %v3550_v41 = vmul.f32 %v6964_v7, %v8075_v25  ;;  %v3570_v35 = vadd.f32 %v6968_v17, %v3549_v26 }
 0x3c9   :  { %v3557_v62 = vadd.f32 %v6973_v44, %v3536_v16  ;;  %v3574_v59 = vmax.f32 %v3558_v56, 0.0  ;;  %v3561_v40 = vadd.f32 %v6973_v44, %v3540_v24  ;;  %v3563_v46 = vadd.f32 %v6973_v44, %v3542_v55  ;;  %v8077_v16 = vld [vmem:[#allocation30_spill] sm:$0xff] }
 0x3ca   :  { %v3576_v19 = vmax.f32 %v3560_v4, 0.0  ;;  %v3578_v54 = vmax.f32 %v3562_v36, 0.0  ;;  %v3569_v28 = vadd.f32 %v6973_v44, %v3548_v27  ;;  %v3559_v34 = vadd.f32 %v6973_v44, %v3538_v22  ;;  %v8078_v36 = vld [vmem:[#allocation31_spill] sm:$0xff] }
 0x3cb   :  { %v3573_v11 = vmax.f32 %v3557_v62, 0.0  ;;  %3680 = vst [vmem:[#allocation1 + $0x10] ss:$2 sm:$0xff] %v3574_v59  ;;  %v3577_v52 = vmax.f32 %v3561_v40, 0.0  ;;  %v3579_v0 = vmax.f32 %v3563_v46, 0.0  ;;  %v3571_v32 = vadd.f32 %v6973_v44, %v3550_v41 }
 0x3cc   :  { %3684 = vst [vmem:[#allocation1 + $0x20] ss:$2 sm:$0xff] %v3576_v19  ;;  %v3572_v39 = vmax.f32 %v3556_v3, 0.0  ;;  %v3584_v49 = vmax.f32 %v3568_v13, 0.0  ;;  %v3585_v47 = vmax.f32 %v3569_v28, 0.0  ;;  %v3543_v31 = vmul.f32 %v6961_v9, %v8076_v8 }
 0x3cd   :  { %3678 = vst [vmem:[#allocation1 + $0x1] ss:$2 sm:$0xff] %v3573_v11  ;;  %v3586_v2 = vmax.f32 %v3570_v35, 0.0  ;;  %v3544_v56 = vmul.f32 %v6964_v7, %v8077_v16  ;;  %v3575_v62 = vmax.f32 %v3559_v34, 0.0  ;;  %v3587_v59 = vmax.f32 %v3571_v32, 0.0 }
 0x3ce   :  { %3686 = vst [vmem:[#allocation1 + $0x21] ss:$2 sm:$0xff] %v3577_v52  ;;  %v3592_v11 = vmul.f32 %v6961_v9, %v6818_v14  ;;  %v3564_v23 = vadd.f32 %v6968_v17, %v3543_v31  ;;  %v3593_v24 = vmul.f32 %v6964_v7, %v6827_v51  ;;  %v3594_v45 = vmul.f32 %v6961_v9, %v6835_v1  ;;  %v8079_v52 = vld [vmem:[#allocation32_spill] sm:$0xff] }
 0x3cf   :  { %3688 = vst [vmem:[#allocation1 + $0x30] ss:$2 sm:$0xff] %v3578_v54  ;;  %v3565_v5 = vadd.f32 %v6973_v44, %v3544_v56  ;;  %v3595_v14 = vmul.f32 %v6964_v7, %v6840_v33  ;;  %v3545_v51 = vmul.f32 %v6961_v9, %v8078_v36  ;;  %v3546_v1 = vmul.f32 %v6964_v7, %v8079_v52 }
 0x3d0   :  { %3690 = vst [vmem:[#allocation1 + $0x31] ss:$2 sm:$0xff] %v3579_v0  ;;  %v3608_v55 = vadd.f32 %v3592_v11, %v6968_v17  ;;  %v3609_v4 = vadd.f32 %v3593_v24, %v6973_v44  ;;  %v3610_v40 = vadd.f32 %v3594_v45, %v6968_v17  ;;  %v3580_v46 = vmax.f32 %v3564_v23, 0.0 }
 0x3d1   :  { %3676 = vst [vmem:[#allocation1] ss:$2 sm:$0xff] %v3572_v39  ;;  %v3611_v19 = vadd.f32 %v3595_v14, %v6973_v44  ;;  %v3581_v54 = vmax.f32 %v3565_v5, 0.0  ;;  %v3566_v33 = vadd.f32 %v6968_v17, %v3545_v51  ;;  %v3567_v60 = vadd.f32 %v6973_v44, %v3546_v1 }
 0x3d2   :  { %3682 = vst [vmem:[#allocation1 + $0x11] ss:$2 sm:$0xff] %v3575_v62  ;;  %v3624_v21 = vmax.f32 %v3608_v55, 0.0  ;;  %v3625_v29 = vmax.f32 %v3609_v4, 0.0  ;;  %v3588_v58 = vmul.f32 %v6961_v9, %v6791_v42  ;;  %v3589_v27 = vmul.f32 %v6964_v7, %v6798_v43 }
 0x3d3   :  { %v3626_v18 = vmax.f32 %v3610_v40, 0.0  ;;  %v3601_v22 = vmul.f32 %v6964_v7, %v6882_v15  ;;  %v3627_v50 = vmax.f32 %v3611_v19, 0.0  ;;  %v3582_v41 = vmax.f32 %v3566_v33, 0.0 }
 0x3d4   :  { %v3604_v13 = vadd.f32 %v3588_v58, %v6968_v17  ;;  %v3605_v3 = vadd.f32 %v3589_v27, %v6973_v44  ;;  %v3600_v43 = vmul.f32 %v6961_v9, %v6874_v37  ;;  %v3602_v28 = vmul.f32 %v6961_v9, %v6887_v53  ;;  %v3636_v58 = vld [vmem:[%s7933_s3] sm:$0xff]  ;;  %v3637_v27 = vld [vmem:[%s7933_s3 + $0x8] sm:$0xff] }
 0x3d5   :  { %v7007_v48 = vld.sshfl [vmem:[#allocation1 + $0x20] sm:$0xff pattern:$0x75316420]  ;;  %v3617_v15 = vadd.f32 %v3601_v22, %v6973_v44  ;;  %v3583_v35 = vmax.f32 %v3567_v60, 0.0  ;;  %v3603_v34 = vmul.f32 %v6964_v7, %v6891_v61  ;;  %v3598_v40 = vmul.f32 %v6961_v9, %v6866_v63 }
 0x3d6   :  { %3699 = vst [vmem:[#allocation1 + $0x20] ss:$2 sm:$0xff] %v3584_v49  ;;  %v3616_v39 = vadd.f32 %v3600_v43, %v6968_v17  ;;  %v3590_v49 = vmul.f32 %v6961_v9, %v6804_v12  ;;  %v3618_v37 = vadd.f32 %v3602_v28, %v6968_v17  ;;  %v3620_v53 = vmax.f32 %v3604_v13, 0.0  ;;  %v3642_v43 = vld [vmem:[%s7933_s3 + $0x30] sm:$0xff]  ;;  %v3643_v28 = vld [vmem:[%s7933_s3 + $0x38] sm:$0xff] }
 0x3d7   :  { %v7015_v6 = vld.sshfl [vmem:[#allocation1 + $0x30] sm:$0xff pattern:$0x75316420]  ;;  %3700 = vst [vmem:[#allocation1 + $0x21] ss:$2 sm:$0xff] %v3585_v47  ;;  %v3591_v47 = vmul.f32 %v6964_v7, %v6812_v38  ;;  %v3619_v8 = vadd.f32 %v3603_v34, %v6973_v44  ;;  %v3621_v61 = vmax.f32 %v3605_v3, 0.0  ;;  %v3597_v12 = vmul.f32 %v6964_v7, %v6859_v20 }
 0x3d8   :  { %3701 = vst [vmem:[#allocation1 + $0x30] ss:$2 sm:$0xff] %v3586_v2  ;;  %v7033_v0 = vld.sshfl [vmem:[#allocation1] sm:$0xff pattern:$0x75316420]  ;;  %v3606_v2 = vadd.f32 %v3590_v49, %v6968_v17  ;;  %v3633_v16 = vmax.f32 %v3617_v15, 0.0  ;;  %v3596_v38 = vmul.f32 %v6961_v9, %v6855_v30  ;;  %v3599_v30 = vmul.f32 %v6964_v7, %v6872_v10 }
 0x3d9   :  { %3702 = vst [vmem:[#allocation1 + $0x31] ss:$2 sm:$0xff] %v3587_v59  ;;  %v7045_v42 = vld.sshfl [vmem:[#allocation1 + $0x10] sm:$0xff pattern:$0x75316420]  ;;  %v3607_v56 = vadd.f32 %v3591_v47, %v6973_v44  ;;  %v3632_v59 = vmax.f32 %v3616_v39, 0.0  ;;  %v3613_v23 = vadd.f32 %v3597_v12, %v6973_v44  ;;  %v3614_v52 = vadd.f32 %v3598_v40, %v6968_v17 }
 0x3da   :  { %3695 = vst [vmem:[#allocation1] ss:$2 sm:$0xff] %v3580_v46  ;;  %v3634_v11 = vmax.f32 %v3618_v37, 0.0  ;;  %v3635_v24 = vmax.f32 %v3619_v8, 0.0  ;;  %v3622_v45 = vmax.f32 %v3606_v2, 0.0  ;;  %v3612_v20 = vadd.f32 %v3596_v38, %v6968_v17  ;;  %v3645_v39 = vld [vmem:[%s7933_s3 + $0x48] sm:$0xff] }
 0x3db   :  { %3696 = vst [vmem:[#allocation1 + $0x1] ss:$2 sm:$0xff] %v3581_v54  ;;  %v3623_v55 = vmax.f32 %v3607_v56, 0.0  ;;  %v3629_v36 = vmax.f32 %v3613_v23, 0.0  ;;  %v3615_v1 = vadd.f32 %v3599_v30, %v6973_v44  ;;  %v3716_v63 = vpack.c.bf16 %v7015_v6, %v7007_v48  ;;  %v3646_v37 = vld [vmem:[%s7933_s3 + $0x50] sm:$0xff]  ;;  %v3648_v8 = vld [vmem:[%s7933_s3 + $0x60] sm:$0xff] }
 0x3dc   :  { %3697 = vst [vmem:[#allocation1 + $0x10] ss:$2 sm:$0xff] %v3582_v41  ;;  %v3628_v19 = vmax.f32 %v3612_v20, 0.0  ;;  %v3715_v44 = vpack.c.bf16 %v7045_v42, %v7033_v0  ;;  %v3641_v0 = vld [vmem:[%s7933_s3 + $0x28] sm:$0xff]  ;;  %v3638_v41 = vld [vmem:[%s7933_s3 + $0x10] sm:$0xff]  ;;  %v3639_v42 = vld [vmem:[%s7933_s3 + $0x18] sm:$0xff]  ;;  %v3655_v34 = vpack.c.bf16 %v3643_v28, %v3642_v43 }
 0x3dd   :  { %3698 = vst [vmem:[#allocation1 + $0x11] ss:$2 sm:$0xff] %v3583_v35  ;;  %v3631_v10 = vmax.f32 %v3615_v1, 0.0  ;;  %v3747_v17 = vsel %vm199_vm0, %v3716_v63, 0  ;;  %v3653_v35 = vpack.c.bf16 %v3639_v42, %v3638_v41  ;;  %v3650_v12 = vld [vmem:[%s7933_s3 + $0x70] sm:$0xff]  ;;  %v3651_v56 = vld [vmem:[%s7933_s3 + $0x78] sm:$0xff] }
 0x3de   :  { %v3705_v57 = vld.sshfl [vmem:[#allocation1 + $0x20] sm:$0xff pattern:$0x75316420]  ;;  %v3744_v6 = vsel %vm199_vm0, %v3715_v44, 0 }
 0x3df   :  { %3828 = vst [vmem:[#allocation1 + $0x20] ss:$2 sm:$0xff] %v3624_v21  ;;  %v3630_v21 = vmax.f32 %v3614_v52, 0.0 }
 0x3e0   :  { %v3706_v26 = vld.sshfl [vmem:[#allocation1 + $0x30] sm:$0xff pattern:$0x75316420]  ;;  %3830 = vst [vmem:[#allocation1 + $0x21] ss:$2 sm:$0xff] %v3625_v29 }
 0x3e1   :  { %v3718_v25 = vpack.c.bf16 %v3706_v26, %v3705_v57  ;;  %3832 = vst [vmem:[#allocation1 + $0x30] ss:$2 sm:$0xff] %v3626_v18  ;;  %v3640_v18 = vld [vmem:[%s7933_s3 + $0x20] sm:$0xff] }
 0x3e2   :  { %3834 = vst [vmem:[#allocation1 + $0x31] ss:$2 sm:$0xff] %v3627_v50  ;;  %v3703_v31 = vld.sshfl [vmem:[#allocation1] sm:$0xff pattern:$0x75316420]  ;;  %v3652_v50 = vpack.c.bf16 %v3637_v27, %v3636_v58  ;;  %v3654_v26 = vpack.c.bf16 %v3641_v0, %v3640_v18 }
 0x3e3   :  { %v3753_v32 = vsel %vm199_vm0, %v3718_v25, 0  ;;  %3820 = vst [vmem:[#allocation1] ss:$2 sm:$0xff] %v3620_v53  ;;  %v3647_v53 = vld [vmem:[%s7933_s3 + $0x58] sm:$0xff] }
 0x3e4   :  { %3759 = vmatpush.bf16.xpose.msrb.mxu0 %v3753_v32  ;;  %4938 = vmatpush.bf16.xpose.msra.mxu2 %v3753_v32  ;;  %3822 = vst [vmem:[#allocation1 + $0x1] ss:$2 sm:$0xff] %v3621_v61  ;;  %v3704_v14 = vld.sshfl [vmem:[#allocation1 + $0x10] sm:$0xff pattern:$0x75316420]  ;;  %v3644_v32 = vld [vmem:[%s7933_s3 + $0x40] sm:$0xff]  ;;  %v3657_v47 = vpack.c.bf16 %v3647_v53, %v3646_v37 }
 0x3e5   :  { %v3717_v4 = vpack.c.bf16 %v3704_v14, %v3703_v31  ;;  %3824 = vst [vmem:[#allocation1 + $0x10] ss:$2 sm:$0xff] %v3622_v45  ;;  %v3656_v49 = vpack.c.bf16 %v3645_v39, %v3644_v32  ;;  %v3649_v61 = vld [vmem:[%s7933_s3 + $0x68] sm:$0xff] }
 0x3e6   :  { %3826 = vst [vmem:[#allocation1 + $0x11] ss:$2 sm:$0xff] %v3623_v55  ;;  %v3658_v31 = vpack.c.bf16 %v3649_v61, %v3648_v8 }
 0x3e7   :  { %v7066_v62 = vld.sshfl [vmem:[#allocation1 + $0x20] sm:$0xff pattern:$0x75316420]  ;;  %v3750_v51 = vsel %vm199_vm0, %v3717_v4, 0 }
 0x3e8   :  { %3844 = vst [vmem:[#allocation1 + $0x21] ss:$2 sm:$0xff] %v3633_v16 }
 0x3e9   :  { %v3838_v5 = vld.sshfl [vmem:[#allocation1 + $0x30] sm:$0xff pattern:$0x75316420]  ;;  %3843 = vst [vmem:[#allocation1 + $0x20] ss:$2 sm:$0xff] %v3632_v59 }
 0x3ea   :  { %3845 = vst [vmem:[#allocation1 + $0x30] ss:$2 sm:$0xff] %v3634_v11  ;;  %v3860_v13 = vpack.c.bf16 %v3838_v5, %v7066_v62  ;;  %v3659_v62 = vpack.c.bf16 %v3651_v56, %v3650_v12 }
 0x3eb   :  { %3846 = vst [vmem:[#allocation1 + $0x31] ss:$2 sm:$0xff] %v3635_v24  ;;  %v3835_v46 = vld.sshfl [vmem:[#allocation1] sm:$0xff pattern:$0x75316420] }
 0x3ec   :  { %3760 = vmatpush.bf16.xpose.msrb.mxu0 %v3750_v51  ;;  %3840 = vst [vmem:[#allocation1 + $0x1] ss:$2 sm:$0xff] %v3629_v36  ;;  %4939 = vmatpush.bf16.xpose.msra.mxu2 %v3750_v51  ;;  %v3867_v3 = vsel %vm199_vm0, %v3860_v13, 0 }
 0x3ed   :  { %3839 = vst [vmem:[#allocation1] ss:$2 sm:$0xff] %v3628_v19  ;;  %v3836_v7 = vld.sshfl [vmem:[#allocation1 + $0x10] sm:$0xff pattern:$0x75316420] }
 0x3ee   :  { %3841 = vst [vmem:[#allocation1 + $0x10] ss:$2 sm:$0xff] %v3630_v21  ;;  %v3859_v25 = vpack.c.bf16 %v3836_v7, %v3835_v46 }
 0x3ef   :  { %3842 = vst [vmem:[#allocation1 + $0x11] ss:$2 sm:$0xff] %v3631_v10 }
 0x3f0   :  { %v3849_v54 = vld.sshfl [vmem:[#allocation1 + $0x20] sm:$0xff pattern:$0x75316420]  ;;  %v3864_v15 = vsel %vm199_vm0, %v3859_v25, 0 }
 0x3f2   :  { %v3850_v9 = vld.sshfl [vmem:[#allocation1 + $0x30] sm:$0xff pattern:$0x75316420] }
 0x3f3   :  { %v3862_v33 = vpack.c.bf16 %v3850_v9, %v3849_v54 }
 0x3f4   :  { %3761 = vmatpush.bf16.xpose.msrb.mxu0 %v3747_v17  ;;  %4940 = vmatpush.bf16.xpose.msra.mxu2 %v3747_v17  ;;  %v3847_v57 = vld.sshfl [vmem:[#allocation1] sm:$0xff pattern:$0x75316420] }
 0x3f5   :  { %v3873_v29 = vsel %vm199_vm0, %v3862_v33, 0 }
 0x3f6   :  { %3879 = vmatpush.bf16.xpose.msrb.mxu1 %v3873_v29  ;;  %4942 = vmatpush.bf16.xpose.msra.mxu3 %v3873_v29  ;;  %v3848_v48 = vld.sshfl [vmem:[#allocation1 + $0x10] sm:$0xff pattern:$0x75316420] }
 0x3f7   :  { %v3861_v60 = vpack.c.bf16 %v3848_v48, %v3847_v57 }
 0x3f9   :  { %v3870_v22 = vsel %vm199_vm0, %v3861_v60, 0 }
 0x3fc   :  { %3762 = vmatpush.bf16.xpose.msrb.mxu0 %v3744_v6  ;;  %4941 = vmatpush.bf16.xpose.msra.mxu2 %v3744_v6 }
 0x3fe   :  { %3880 = vmatpush.bf16.xpose.msrb.mxu1 %v3870_v22  ;;  %4943 = vmatpush.bf16.xpose.msra.mxu3 %v3870_v22 }
 0x403   :  { %4890 = vmatmul.msk.bf16.vlgmr.msrb.gmra.mxu0 %vm199_vm0, %v3652_v50  ;;  %4892 = vmatmul.msk.bf16.vlgmr.msra.gmra.mxu2 %vm199_vm0, %v3654_v26 }
 0x406   :  { %3881 = vmatpush.bf16.xpose.msrb.mxu1 %v3867_v3  ;;  %4944 = vmatpush.bf16.xpose.msra.mxu3 %v3867_v3 }
 0x40e   :  { %3882 = vmatpush.bf16.xpose.msrb.mxu1 %v3864_v15  ;;  %4945 = vmatpush.bf16.xpose.msra.mxu3 %v3864_v15 }
 0x413   :  { %4891 = vmatmul.msk.bf16.gmra.mxu0 %vm199_vm0, %v3653_v35  ;;  %4893 = vmatmul.msk.bf16.gmra.mxu2 %vm199_vm0, %v3655_v34 }
 0x415   :  { %4898 = vmatmul.msk.bf16.vlgmr.msrb.gmra.mxu1 %vm199_vm0, %v3652_v50  ;;  %4900 = vmatmul.msk.bf16.vlgmr.msra.gmra.mxu3 %vm199_vm0, %v3654_v26 }
 0x423   :  { %4894 = vmatmul.msk.bf16.gmra.mxu2 %vm199_vm0, %v3656_v49 }
 0x425   :  { %4899 = vmatmul.msk.bf16.gmra.mxu1 %vm199_vm0, %v3653_v35  ;;  %4901 = vmatmul.msk.bf16.gmra.mxu3 %vm199_vm0, %v3655_v34 }
 0x433   :  { %4895 = vmatmul.msk.bf16.gmra.mxu2 %vm199_vm0, %v3657_v47 }
 0x435   :  { %4902 = vmatmul.msk.bf16.gmra.mxu3 %vm199_vm0, %v3656_v49 }
 0x443   :  { %4896 = vmatmul.msk.bf16.gmra.mxu2 %vm199_vm0, %v3658_v31 }
 0x445   :  { %4903 = vmatmul.msk.bf16.gmra.mxu3 %vm199_vm0, %v3657_v47 }
 0x453   :  { %4897 = vmatmul.msk.bf16.gmra.mxu2 %vm199_vm0, %v3659_v62 }
 0x455   :  { %4904 = vmatmul.msk.bf16.gmra.mxu3 %vm199_vm0, %v3658_v31 }
 0x465   :  { %4905 = vmatmul.msk.bf16.gmra.mxu3 %vm199_vm0, %v3659_v62 }
 0x480   :  { %v7146_v2 = vpop.f32.mrf.mxu0 }
 0x481   :  { %v3925_v16 = vsel %vm3924_vm9, %v7146_v2, 0.0  ;;  %v3973_v59 = vmul.f32 %v7146_v2, %v7146_v2 }
 0x482   :  { %3926 = vadd.xlane.f32.xlu1 %v3925_v16 }
 0x483   :  { %v3989_v23 = vsel %vm3924_vm9, %v3973_v59, 0.0 }
 0x486   :  { %v7160_v11 = vpop.f32.mrf.mxu2 }
 0x487   :  { %v3937_v20 = vsel %vm3924_vm9, %v7160_v11, 0.0  ;;  %v3977_v36 = vmul.f32 %v7160_v11, %v7160_v11 }
 0x488   :  { %v7162_v38 = vpop.f32.mrf.mxu0 }
 0x489   :  { %v3974_v24 = vmul.f32 %v7162_v38, %v7162_v38  ;;  %v3928_v4 = vsel %vm3924_vm9, %v7162_v38, 0.0  ;;  %v4001_v51 = vsel %vm3924_vm9, %v3977_v36, 0.0 }
 0x48a   :  { %3990 = vadd.xlane.f32.xlu1 %v3989_v23 }
 0x48b   :  { %v3992_v5 = vsel %vm3924_vm9, %v3974_v24, 0.0 }
 0x48c   :  { %3993 = vadd.xlane.f32.xlu2 %v3992_v5 }
 0x48e   :  { %v7168_v45 = vpop.f32.mrf.mxu2 }
 0x48f   :  { %v3940_v55 = vsel %vm3924_vm9, %v7168_v45, 0.0  ;;  %v3978_v30 = vmul.f32 %v7168_v45, %v7168_v45 }
 0x490   :  { %v7174_v14 = vpop.f32.mrf.mxu0 }
 0x491   :  { %v3931_v40 = vsel %vm3924_vm9, %v7174_v14, 0.0  ;;  %v4004_v46 = vsel %vm3924_vm9, %v3978_v30, 0.0  ;;  %v3975_v19 = vmul.f32 %v7174_v14, %v7174_v14 }
 0x492   :  { %3938 = vadd.xlane.f32.xlu1 %v3937_v20  ;;  %v7188_v52 = vpop.f32.mrf.mxu1 }
 0x493   :  { %v3995_v1 = vsel %vm3924_vm9, %v3975_v19, 0.0  ;;  %v4037_v54 = vsel %vm3924_vm9, %v7188_v52, 0.0  ;;  %v4085_v21 = vmul.f32 %v7188_v52, %v7188_v52 }
 0x494   :  { %3941 = vadd.xlane.f32.xlu2 %v3940_v55 }
 0x495   :  { %v4101_v33 = vsel %vm3924_vm9, %v4085_v21, 0.0 }
 0x496   :  { %v7193_v63 = vpop.f32.mrf.mxu2 }
 0x497   :  { %v3943_v9 = vsel %vm3924_vm9, %v7193_v63, 0.0  ;;  %v3979_v10 = vmul.f32 %v7193_v63, %v7193_v63 }
 0x498   :  { %v7203_v29 = vpop.f32.mrf.mxu3  ;;  %v7209_v57 = vpop.f32.mrf.mxu0 }
 0x499   :  { %v4007_v7 = vsel %vm3924_vm9, %v3979_v10, 0.0  ;;  %v4049_v17 = vsel %vm3924_vm9, %v7203_v29, 0.0  ;;  %v3934_v6 = vsel %vm3924_vm9, %v7209_v57, 0.0  ;;  %v4089_v58 = vmul.f32 %v7203_v29, %v7203_v29 }
 0x49a   :  { %3929 = vadd.xlane.f32.xlu1 %v3928_v4  ;;  %v7207_v44 = vpop.f32.mrf.mxu1  ;;  %v3976_v22 = vmul.f32 %v7209_v57, %v7209_v57 }
 0x49b   :  { %v4040_v48 = vsel %vm3924_vm9, %v7207_v44, 0.0  ;;  %v4086_v60 = vmul.f32 %v7207_v44, %v7207_v44  ;;  %v4113_v18 = vsel %vm3924_vm9, %v4089_v58, 0.0 }
 0x49c   :  { %3932 = vadd.xlane.f32.xlu2 %v3931_v40  ;;  %v3998_v26 = vsel %vm3924_vm9, %v3976_v22, 0.0 }
 0x49d   :  { %v4104_v27 = vsel %vm3924_vm9, %v4086_v60, 0.0 }
 0x49e   :  { %v7228_v13 = vpop.f32.mrf.mxu2 }
 0x49f   :  { %v3946_v42 = vsel %vm3924_vm9, %v7228_v13, 0.0  ;;  %v3980_v15 = vmul.f32 %v7228_v13, %v7228_v13 }
 0x4a0   :  { %v7221_v0 = vpop.f32.mrf.mxu3 }
 0x4a1   :  { %v4052_v50 = vsel %vm3924_vm9, %v7221_v0, 0.0  ;;  %v4090_v3 = vmul.f32 %v7221_v0, %v7221_v0  ;;  %v4010_v35 = vsel %vm3924_vm9, %v3980_v15, 0.0 }
 0x4a2   :  { %4002 = vadd.xlane.f32.xlu1 %v4001_v51  ;;  %v7246_v32 = vpop.f32.mrf.mxu1 }
 0x4a3   :  { %v4116_v25 = vsel %vm3924_vm9, %v4090_v3, 0.0  ;;  %v4043_v37 = vsel %vm3924_vm9, %v7246_v32, 0.0  ;;  %v4087_v61 = vmul.f32 %v7246_v32, %v7246_v32 }
 0x4a4   :  { %4005 = vadd.xlane.f32.xlu2 %v4004_v46 }
 0x4a5   :  { %v4107_v12 = vsel %vm3924_vm9, %v4087_v61, 0.0 }
 0x4a6   :  { %v7237_v43 = vpop.f32.mrf.mxu2 }
 0x4a7   :  { %v3949_v28 = vsel %vm3924_vm9, %v7237_v43, 0.0  ;;  %v3981_v34 = vmul.f32 %v7237_v43, %v7237_v43 }
 0x4a8   :  { %v7233_v41 = vpop.f32.mrf.mxu3 }
 0x4a9   :  { %v4013_v49 = vsel %vm3924_vm9, %v3981_v34, 0.0  ;;  %v4055_v24 = vsel %vm3924_vm9, %v7233_v41, 0.0  ;;  %v4091_v4 = vmul.f32 %v7233_v41, %v7233_v41 }
 0x4aa   :  { %3996 = vadd.xlane.f32.xlu1 %v3995_v1  ;;  %v7257_v8 = vpop.f32.mrf.mxu1 }
 0x4ab   :  { %v4046_v31 = vsel %vm3924_vm9, %v7257_v8, 0.0  ;;  %v4088_v56 = vmul.f32 %v7257_v8, %v7257_v8  ;;  %v4119_v30 = vsel %vm3924_vm9, %v4091_v4, 0.0 }
 0x4ac   :  { %4038 = vadd.xlane.f32.xlu2 %v4037_v54 }
 0x4ad   :  { %v4110_v23 = vsel %vm3924_vm9, %v4088_v56, 0.0 }
 0x4ae   :  { %v7253_v53 = vpop.f32.mrf.mxu2 }
 0x4af   :  { %v3952_v21 = vsel %vm3924_vm9, %v7253_v53, 0.0 }
 0x4b0   :  { %v7248_v39 = vpop.f32.mrf.mxu3 }
 0x4b1   :  { %v4058_v36 = vsel %vm3924_vm9, %v7248_v39, 0.0  ;;  %v4092_v46 = vmul.f32 %v7248_v39, %v7248_v39 }
 0x4b2   :  { %3944 = vadd.xlane.f32.xlu1 %v3943_v9 }
 0x4b3   :  { %v4122_v54 = vsel %vm3924_vm9, %v4092_v46, 0.0 }
 0x4b4   :  { %4102 = vadd.xlane.f32.xlu2 %v4101_v33 }
 0x4b6   :  { %v7263_v16 = vpop.f32.mrf.mxu2 }
 0x4b7   :  { %v3983_v60 = vmul.f32 %v7263_v16, %v7263_v16 }
 0x4b8   :  { %v7255_v47 = vpop.f32.mrf.mxu3 }
 0x4b9   :  { %v4019_v22 = vsel %vm3924_vm9, %v3983_v60, 0.0  ;;  %v4093_v15 = vmul.f32 %v7255_v47, %v7255_v47 }
 0x4ba   :  { %4008 = vadd.xlane.f32.xlu1 %v4007_v7  ;;  %v3955_v7 = vsel %vm3924_vm9, %v7263_v16, 0.0 }
 0x4bb   :  { %v4125_v61 = vsel %vm3924_vm9, %v4093_v15, 0.0 }
 0x4bc   :  { %4050 = vadd.xlane.f32.xlu2 %v4049_v17  ;;  %v3982_v17 = vmul.f32 %v7253_v53, %v7253_v53 }
 0x4be   :  { %v7273_v5 = vpop.f32.mrf.mxu2 }
 0x4bf   :  { %v3958_v46 = vsel %vm3924_vm9, %v7273_v5, 0.0 }
 0x4c0   :  { %v7268_v59 = vpop.f32.mrf.mxu3 }
 0x4c1   :  { %v4064_v34 = vsel %vm3924_vm9, %v7268_v59, 0.0 }
 0x4c2   :  { %4041 = vadd.xlane.f32.xlu1 %v4040_v48 }
 0x4c4   :  { %3935 = vadd.xlane.f32.xlu2 %v3934_v6  ;;  %v4016_v6 = vsel %vm3924_vm9, %v3982_v17, 0.0 }
 0x4c6   :  { %v7286_v19 = vpop.f32.mrf.mxu2 }
 0x4c8   :  { %v7279_v40 = vpop.f32.mrf.mxu3 }
 0x4ca   :  { %4105 = vadd.xlane.f32.xlu1 %v4104_v27 }
 0x4cc   :  { %4114 = vadd.xlane.f32.xlu2 %v4113_v18 }
 0x4ce   :  { %v7301_v48 = vpop.f32.mrf.mxu2 }
 0x4cf   :  { %8080 = vst [vmem:[#allocation4_spill] sm:$0xff] %v7301_v48 }
 0x4d0   :  { %v7291_v9 = vpop.f32.mrf.mxu3 }
 0x4d2   :  { %4053 = vadd.xlane.f32.xlu1 %v4052_v50  ;;  %v4061_v50 = vsel %vm3924_vm9, %v7255_v47, 0.0 }
 0x4d4   :  { %3999 = vadd.xlane.f32.xlu2 %v3998_v26 }
 0x4d6   :  { %v7315_v26 = vpop.f32.mrf.mxu2 }
 0x4d7   :  { %8081 = vst [vmem:[#allocation5_spill] sm:$0xff] %v7315_v26 }
 0x4d8   :  { %v7306_v58 = vpop.f32.mrf.mxu3 }
 0x4da   :  { %4117 = vadd.xlane.f32.xlu1 %v4116_v25  ;;  %v3987_v25 = vmul.f32 %v7315_v26, %v7315_v26 }
 0x4dc   :  { %3947 = vadd.xlane.f32.xlu2 %v3946_v42 }
 0x4e0   :  { %v7321_v42 = vpop.f32.mrf.mxu3 }
 0x4e1   :  { %8082 = vst [vmem:[#allocation6_spill] sm:$0xff] %v7321_v42 }
 0x4e2   :  { %3950 = vadd.xlane.f32.xlu1 %v3949_v28 }
 0x4e4   :  { %4011 = vadd.xlane.f32.xlu2 %v4010_v35  ;;  %v4031_v35 = vsel %vm3924_vm9, %v3987_v25, 0.0  ;;  %v3985_v25 = vmul.f32 %v7286_v19, %v7286_v19 }
 0x4e5   :  { %4032 = vadd.xlane.f32.xlu0 %v4031_v35  ;;  %v5010_v35 = vmov 0  }
 0x4e6   :  { %4970 = vset.pattern.permute.xlu0 %v5010_v35  ;;  %4971 = vset.pattern.permute.xlu1 %v5010_v35 }
 0x4e7   :  { %4972 = vset.pattern.permute.xlu2 %v5010_v35 }
 0x4ea   :  { %4014 = vadd.xlane.f32.xlu1 %v4013_v49  ;;  %v4098_v49 = vmul.f32 %v7321_v42, %v7321_v42 }
 0x4ec   :  { %4044 = vadd.xlane.f32.xlu2 %v4043_v37  ;;  %v4140_v56 = vsel %vm3924_vm9, %v4098_v49, 0.0  ;;  %v4025_v49 = vsel %vm3924_vm9, %v3985_v25, 0.0 }
 0x4ed   :  { %4141 = vadd.xlane.f32.xlu0 %v4140_v56 }
 0x4f2   :  { %4047 = vadd.xlane.f32.xlu1 %v4046_v31 }
 0x4f4   :  { %4108 = vadd.xlane.f32.xlu2 %v4107_v12  ;;  %v4094_v12 = vmul.f32 %v7268_v59, %v7268_v59 }
 0x4f5   :  { %v3927_v62 = vpop.xlane.xlu1 %3926 }
 0x4fa   :  { %4111 = vadd.xlane.f32.xlu1 %v4110_v23 }
 0x4fc   :  { %4056 = vadd.xlane.f32.xlu2 %v4055_v24 }
 0x4fd   :  { %v3991_v20 = vpop.xlane.xlu1 %3990 }
 0x4ff   :  { %v7275_v55 = vpop.xlane.xlu2 %3993 }
 0x502   :  { %4059 = vadd.xlane.f32.xlu1 %v4058_v36  ;;  %v4128_v36 = vsel %vm3924_vm9, %v4094_v12, 0.0 }
 0x504   :  { %4120 = vadd.xlane.f32.xlu2 %v4119_v30 }
 0x505   :  { %v3939_v51 = vpop.xlane.xlu1 %3938 }
 0x507   :  { %v7288_v1 = vpop.xlane.xlu2 %3941 }
 0x50a   :  { %4123 = vadd.xlane.f32.xlu1 %v4122_v54 }
 0x50c   :  { %3953 = vadd.xlane.f32.xlu2 %v3952_v21 }
 0x50d   :  { %v3930_v33 = vpop.xlane.xlu1 %3929 }
 0x50f   :  { %v7295_v10 = vpop.xlane.xlu2 %3932 }
 0x512   :  { %3956 = vadd.xlane.f32.xlu1 %v3955_v7 }
 0x514   :  { %4017 = vadd.xlane.f32.xlu2 %v4016_v6  ;;  %v3984_v6 = vmul.f32 %v7273_v5, %v7273_v5 }
 0x515   :  { %v7308_v27 = vpop.xlane.xlu1 %4002 }
 0x517   :  { %v7310_v18 = vpop.xlane.xlu2 %4005 }
 0x51a   :  { %4020 = vadd.xlane.f32.xlu1 %v4019_v22 }
 0x51c   :  { %4062 = vadd.xlane.f32.xlu2 %v4061_v50  ;;  %v4022_v50 = vsel %vm3924_vm9, %v3984_v6, 0.0  ;;  %v4261_v6 = vld [vmem:[%s7934_s8] sm:$0xff] }
 0x51d   :  { %v7317_v3 = vpop.xlane.xlu1 %3996 }
 0x51f   :  { %v4039_v28 = vpop.xlane.xlu2 %4038 }
 0x520   :  { %v4149_v37 = vadd.f32 %v4039_v28, %v3927_v62 }
 0x522   :  { %4065 = vadd.xlane.f32.xlu1 %v4064_v34  ;;  %v7336_v23 = vmul.f32 0.0078125, %v4149_v37 }
 0x524   :  { %4126 = vadd.xlane.f32.xlu2 %v4125_v61  ;;  %v4213_v62 = vmul.f32 %v7336_v23, %v7336_v23  ;;  %v4067_v61 = vsel %vm3924_vm9, %v7279_v40, 0.0 }
 0x525   :  { %v7331_v31 = vpop.xlane.xlu1 %3944 }
 0x527   :  { %v4103_v24 = vpop.xlane.xlu2 %4102 }
 0x528   :  { %v4165_v4 = vadd.f32 %v4103_v24, %v3991_v20  ;;  %v3961_v20 = vsel %vm3924_vm9, %v7286_v19, 0.0 }
 0x52a   :  { %v4197_v30 = vmul.f32 0.0078125, %v4165_v4  ;;  %4129 = vadd.xlane.f32.xlu1 %v4128_v36 }
 0x52c   :  { %v4229_v54 = vsub.f32 %v4197_v30, %v4213_v62  ;;  %3959 = vadd.xlane.f32.xlu2 %v3958_v46  ;;  %v4095_v30 = vmul.f32 %v7279_v40, %v7279_v40 }
 0x52d   :  { %v7343_v21 = vpop.xlane.xlu1 %4008 }
 0x52e   :  { %v4245_v7 = vmax.f32 %v4229_v54, 0.0 }
 0x52f   :  { %v4051_v17 = vpop.xlane.xlu2 %4050 }
 0x530   :  { %v4277_v60 = vadd.f32 1e-05, %v4245_v7  ;;  %v4153_v22 = vadd.f32 %v4051_v17, %v3939_v51 }
 0x532   :  { %4977 = vrsqrt.f32 %v4277_v60  ;;  %3962 = vadd.xlane.f32.xlu1 %v3961_v20  ;;  %v7359_v4 = vmul.f32 0.0078125, %v4153_v22  ;;  %v4070_v20 = vsel %vm3924_vm9, %v7291_v9, 0.0  ;;  %vm4299_vm11 = vweird.f32 %v4277_v60 }
 0x534   :  { %4023 = vadd.xlane.f32.xlu2 %v4022_v50  ;;  %v4217_v22 = vmul.f32 %v7359_v4, %v7359_v4 }
 0x535   :  { %v4042_v28 = vpop.xlane.xlu1 %4041 }
 0x536   :  { %v4150_v15 = vadd.f32 %v4042_v28, %v3930_v33  ;;  %v4131_v28 = vsel %vm3924_vm9, %v4095_v30, 0.0 }
 0x537   :  { %v7352_v34 = vpop.xlane.xlu2 %3935 }
 0x538   :  { %v4978_v37 = vpop.eup %4977  ;;  %v7357_v56 = vmul.f32 0.0078125, %v4150_v15 }
 0x539   :  { %v4294_v51 = vmul.f32 %v4978_v37, %v4277_v60  ;;  %vm4300_vm10 = vweird.f32 %v4978_v37 }
 0x53a   :  { %4026 = vadd.xlane.f32.xlu1 %v4025_v49  ;;  %v4214_v54 = vmul.f32 %v7357_v56, %v7357_v56  ;;  %vm4301_vm12 = vmor %vm4299_vm11, %vm4300_vm10 }
 0x53b   :  { %v4295_v12 = vmul.f32 %v4978_v37, %v4294_v51 }
 0x53c   :  { %4068 = vadd.xlane.f32.xlu2 %v4067_v61  ;;  %v4096_v61 = vmul.f32 %v7291_v9, %v7291_v9 }
 0x53d   :  { %v4296_v24 = vmul.f32 0.5, %v4295_v12  ;;  %v4106_v33 = vpop.xlane.xlu1 %4105 }
 0x53e   :  { %v4166_v36 = vadd.f32 %v4106_v33, %v7275_v55 }
 0x53f   :  { %v4115_v62 = vpop.xlane.xlu2 %4114  ;;  %v4297_v46 = vsub.f32 1.5, %v4296_v24 }
 0x540   :  { %v4198_v7 = vmul.f32 0.0078125, %v4166_v36  ;;  %v4169_v17 = vadd.f32 %v4115_v62, %v7308_v27  ;;  %v4134_v62 = vsel %vm3924_vm9, %v4096_v61, 0.0 }
 0x541   :  { %v4298_v55 = vmul.f32 %v4978_v37, %v4297_v46 }
 0x542   :  { %v4230_v50 = vsub.f32 %v4198_v7, %v4214_v54  ;;  %v4201_v25 = vmul.f32 0.0078125, %v4169_v17  ;;  %4071 = vadd.xlane.f32.xlu1 %v4070_v20 }
 0x543   :  { %v4302_v15 = vsel %vm4301_vm12, %v4978_v37, %v4298_v55  ;;  %v3964_v37 = vsel %vm3924_vm9, %v7301_v48, 0.0  ;;  %v3986_v55 = vmul.f32 %v7301_v48, %v7301_v48 }
 0x544   :  { %v4246_v27 = vmax.f32 %v4230_v50, 0.0  ;;  %v4233_v35 = vsub.f32 %v4201_v25, %v4217_v22  ;;  %4132 = vadd.xlane.f32.xlu2 %v4131_v28  ;;  %v4453_v49 = vmul.f32 %v4302_v15, %v4261_v6 }
 0x545   :  { %v4054_v51 = vpop.xlane.xlu1 %4053 }
 0x546   :  { %v4278_v12 = vadd.f32 1e-05, %v4246_v27  ;;  %v4249_v60 = vmax.f32 %v4233_v35, 0.0  ;;  %4519 = vperm.xlu0 %4970, %v4453_v49   ;;  %v4154_v36 = vadd.f32 %v4054_v51, %v7288_v1  ;;  %v7386_v46 = vmul.f32 %v4453_v49, %v7336_v23 }
 0x547   :  { %v7377_v24 = vpop.xlane.xlu2 %3999  ;;  %v3967_v1 = vsel %vm3924_vm9, %v7315_v26, 0.0 }
 0x548   :  { %4979 = vrsqrt.f32 %v4278_v12  ;;  %v4281_v33 = vadd.f32 1e-05, %v4249_v60  ;;  %v7383_v30 = vmul.f32 0.0078125, %v4154_v36  ;;  %v4076_v36 = vsel %vm3924_vm9, %v7321_v42, 0.0 }
 0x549   :  { %vm4309_vm15 = vweird.f32 %v4278_v12 }
 0x54a   :  { %4981 = vrsqrt.f32 %v4281_v33  ;;  %4135 = vadd.xlane.f32.xlu1 %v4134_v62  ;;  %v4218_v50 = vmul.f32 %v7383_v30, %v7383_v30  ;;  %vm4339_vm1 = vweird.f32 %v4281_v33 }
 0x54c   :  { %3965 = vadd.xlane.f32.xlu2 %v3964_v37  ;;  %v7404_v37 = vpop.f32.mrf.mxu2 }
 0x54d   :  { %v4118_v54 = vpop.xlane.xlu1 %4117 }
 0x54e   :  { %v4980_v7 = vpop.eup %4979  ;;  %v4170_v17 = vadd.f32 %v4118_v54, %v7310_v18  ;;  %v4028_v18 = vsel %vm3924_vm9, %v3986_v55, 0.0  ;;  %v4073_v54 = vsel %vm3924_vm9, %v7306_v58, 0.0 }
 0x54f   :  { %v4304_v20 = vmul.f32 %v4980_v7, %v4278_v12  ;;  %v7389_v6 = vpop.xlane.xlu2 %3947  ;;  %vm4310_vm13 = vweird.f32 %v4980_v7 }
 0x550   :  { %v4982_v22 = vpop.eup %4981  ;;  %v4202_v25 = vmul.f32 0.0078125, %v4170_v17  ;;  %vm4311_vm0 = vmor %vm4309_vm15, %vm4310_vm13 }
 0x551   :  { %v4334_v23 = vmul.f32 %v4982_v22, %v4281_v33  ;;  %v4305_v15 = vmul.f32 %v4980_v7, %v4304_v20  ;;  %vm4340_vm14 = vweird.f32 %v4982_v22 }
 0x552   :  { %v4234_v28 = vsub.f32 %v4202_v25, %v4218_v50  ;;  %3968 = vadd.xlane.f32.xlu1 %v3967_v1  ;;  %v3988_v1 = vmul.f32 %v7404_v37, %v7404_v37  ;;  %vm4341_vm2 = vmor %vm4339_vm1, %vm4340_vm14 }
 0x553   :  { %v4335_v35 = vmul.f32 %v4982_v22, %v4334_v23  ;;  %v4306_v61 = vmul.f32 0.5, %v4305_v15  ;;  %v4097_v23 = vmul.f32 %v7306_v58, %v7306_v58 }
 0x554   :  { %v4250_v27 = vmax.f32 %v4234_v28, 0.0  ;;  %4029 = vadd.xlane.f32.xlu2 %v4028_v18  ;;  %v4262_v18 = vld [vmem:[%s7934_s8 + $0x8] sm:$0xff] }
 0x555   :  { %v7398_v49 = vpop.xlane.xlu1 %3950  ;;  %v4336_v62 = vmul.f32 0.5, %v4335_v35  ;;  %v4307_v17 = vsub.f32 1.5, %v4306_v61  ;;  %v4137_v26 = vsel %vm3924_vm9, %v4097_v23, 0.0 }
 0x556   :  { %v4282_v51 = vadd.f32 1e-05, %v4250_v27  ;;  %v7417_v27 = vpop.f32.mrf.mxu3 }
 0x557   :  { %v7400_v60 = vpop.xlane.xlu2 %4011  ;;  %v4337_v55 = vsub.f32 1.5, %v4336_v62  ;;  %v4308_v50 = vmul.f32 %v4980_v7, %v4307_v17  ;;  %v4034_v62 = vsel %vm3924_vm9, %v3988_v1, 0.0  ;;  %v4099_v33 = vmul.f32 %v7417_v27, %v7417_v27 }
 0x558   :  { %4983 = vrsqrt.f32 %v4282_v51  ;;  %vm4349_vm4 = vweird.f32 %v4282_v51 }
 0x559   :  { %v4338_v35 = vmul.f32 %v4982_v22, %v4337_v55  ;;  %v4312_v61 = vsel %vm4311_vm0, %v4980_v7, %v4308_v50 }
 0x55a   :  { %4077 = vadd.xlane.f32.xlu1 %v4076_v36  ;;  %v7423_v12 = vmul.f32 %v4312_v61, %v4262_v18  ;;  %v4474_v61 = vld [vmem:[%s7935_s9 + $0x28] sm:$0xff] }
 0x55b   :  { %v4342_v42 = vsel %vm4341_vm2, %v4982_v22, %v4338_v35  ;;  %v3970_v35 = vsel %vm3924_vm9, %v7404_v37, 0.0 }
 0x55c   :  { %4074 = vadd.xlane.f32.xlu2 %v4073_v54  ;;  %v4265_v54 = vld [vmem:[%s7934_s8 + $0x20] sm:$0xff]  ;;  %v7433_v1 = vmul.f32 %v7423_v12, %v7357_v56 }
 0x55d   :  { %v7408_v20 = vpop.xlane.xlu1 %4014  ;;  %v7429_v7 = vmul.f32 %v4342_v42, %v4265_v54  ;;  %v4266_v42 = vld [vmem:[%s7934_s8 + $0x28] sm:$0xff] }
 0x55e   :  { %v4984_v25 = vpop.eup %4983 }
 0x55f   :  { %v4344_v28 = vmul.f32 %v4984_v25, %v4282_v51  ;;  %v4045_v15 = vpop.xlane.xlu2 %4044  ;;  %vm4350_vm3 = vweird.f32 %v4984_v25 }
 0x560   :  { %v4151_v17 = vadd.f32 %v4045_v15, %v7295_v10  ;;  %v7437_v10 = vmul.f32 %v7429_v7, %v7359_v4  ;;  %vm4351_vm5 = vmor %vm4349_vm4, %vm4350_vm3 }
 0x561   :  { %v4345_v36 = vmul.f32 %v4984_v25, %v4344_v28  ;;  %v4143_v28 = vsel %vm3924_vm9, %v4099_v33, 0.0 }
 0x562   :  { %4035 = vadd.xlane.f32.xlu1 %v4034_v62  ;;  %v7439_v23 = vmul.f32 0.0078125, %v4151_v17  ;;  %v7461_v17 = vpop.f32.mrf.mxu3 }
 0x563   :  { %v4346_v48 = vmul.f32 0.5, %v4345_v36 }
 0x564   :  { %4138 = vadd.xlane.f32.xlu2 %v4137_v26  ;;  %v4215_v4 = vmul.f32 %v7439_v23, %v7439_v23 }
 0x565   :  { %v4347_v55 = vsub.f32 1.5, %v4346_v48  ;;  %v4048_v50 = vpop.xlane.xlu1 %4047 }
 0x566   :  { %v4152_v48 = vadd.f32 %v4048_v50, %v7352_v34 }
 0x567   :  { %v4109_v22 = vpop.xlane.xlu2 %4108  ;;  %v4348_v56 = vmul.f32 %v4984_v25, %v4347_v55 }
 0x568   :  { %v4167_v26 = vadd.f32 %v4109_v22, %v7317_v3  ;;  %v7456_v36 = vmul.f32 0.0078125, %v4152_v48 }
 0x569   :  { %v4352_v15 = vsel %vm4351_vm5, %v4984_v25, %v4348_v56 }
 0x56a   :  { %v4199_v18 = vmul.f32 0.0078125, %v4167_v26  ;;  %4144 = vadd.xlane.f32.xlu1 %v4143_v28  ;;  %v7449_v51 = vmul.f32 %v4352_v15, %v4266_v42  ;;  %v4216_v50 = vmul.f32 %v7456_v36, %v7456_v36  ;;  %v4082_v42 = vsel %vm3924_vm9, %v7461_v17, 0.0 }
 0x56c   :  { %v4231_v34 = vsub.f32 %v4199_v18, %v4215_v4  ;;  %3971 = vadd.xlane.f32.xlu2 %v3970_v35  ;;  %v4490_v3 = vmul.f32 %v7449_v51, %v7383_v30  ;;  %v4100_v18 = vmul.f32 %v7461_v17, %v7461_v17 }
 0x56d   :  { %v4112_v25 = vpop.xlane.xlu1 %4111 }
 0x56e   :  { %v4247_v62 = vmax.f32 %v4231_v34, 0.0  ;;  %v4168_v54 = vadd.f32 %v4112_v25, %v7377_v24  ;;  %v4506_v33 = vsub.f32 %v4474_v61, %v4490_v3  ;;  %v4079_v24 = vsel %vm3924_vm9, %v7417_v27, 0.0 }
 0x56f   :  { %v4057_v55 = vpop.xlane.xlu2 %4056 }
 0x570   :  { %v4279_v22 = vadd.f32 1e-05, %v4247_v62  ;;  %v4200_v28 = vmul.f32 0.0078125, %v4168_v54  ;;  %4640 = vperm.xlu0 %4970, %v4506_v33   ;;  %v4155_v30 = vadd.f32 %v4057_v55, %v7331_v31  ;;  %v4146_v33 = vsel %vm3924_vm9, %v4100_v18, 0.0 }
 0x572   :  { %4985 = vrsqrt.f32 %v4279_v22  ;;  %v4232_v56 = vsub.f32 %v4200_v28, %v4216_v50  ;;  %4083 = vadd.xlane.f32.xlu1 %v4082_v42  ;;  %v7470_v4 = vmul.f32 0.0078125, %v4155_v30  ;;  %vm4319_vm7 = vweird.f32 %v4279_v22 }
 0x574   :  { %v4248_v48 = vmax.f32 %v4232_v56, 0.0  ;;  %4080 = vadd.xlane.f32.xlu2 %v4079_v24  ;;  %v4219_v31 = vmul.f32 %v7470_v4, %v7470_v4 }
 0x575   :  { %v4060_v26 = vpop.xlane.xlu1 %4059 }
 0x576   :  { %v4280_v15 = vadd.f32 1e-05, %v4248_v48  ;;  %v4156_v54 = vadd.f32 %v4060_v26, %v7389_v6  ;;  %v4263_v26 = vld [vmem:[%s7934_s8 + $0x10] sm:$0xff] }
 0x577   :  { %v4121_v35 = vpop.xlane.xlu2 %4120 }
 0x578   :  { %v4986_v61 = vpop.eup %4985  ;;  %4987 = vrsqrt.f32 %v4280_v15  ;;  %v4171_v34 = vadd.f32 %v4121_v35, %v7343_v21  ;;  %v7480_v48 = vmul.f32 0.0078125, %v4156_v54  ;;  %vm4329_vm11 = vweird.f32 %v4280_v15 }
 0x579   :  { %v4314_v3 = vmul.f32 %v4986_v61, %v4279_v22  ;;  %vm4320_vm6 = vweird.f32 %v4986_v61  ;;  %v4471_v22 = vld [vmem:[%s7935_s9 + $0x10] sm:$0xff] }
 0x57a   :  { %v4203_v25 = vmul.f32 0.0078125, %v4171_v34  ;;  %vm4321_vm8 = vmor %vm4319_vm7, %vm4320_vm6 }
 0x57b   :  { %v4315_v62 = vmul.f32 %v4986_v61, %v4314_v3 }
 0x57c   :  { %v4235_v55 = vsub.f32 %v4203_v25, %v4219_v31  ;;  %4147 = vadd.xlane.f32.xlu2 %v4146_v33 }
 0x57d   :  { %v4316_v50 = vmul.f32 0.5, %v4315_v62  ;;  %v4124_v28 = vpop.xlane.xlu1 %4123 }
 0x57e   :  { %v4988_v42 = vpop.eup %4987  ;;  %v4251_v56 = vmax.f32 %v4235_v55, 0.0  ;;  %v4172_v30 = vadd.f32 %v4124_v28, %v7400_v60  ;;  %v4220_v60 = vmul.f32 %v7480_v48, %v7480_v48 }
 0x57f   :  { %v4317_v24 = vsub.f32 1.5, %v4316_v50  ;;  %v4324_v21 = vmul.f32 %v4988_v42, %v4280_v15  ;;  %v3954_v35 = vpop.xlane.xlu2 %3953  ;;  %v4469_v50 = vld [vmem:[%s7935_s9] sm:$0xff]  ;;  %vm4330_vm10 = vweird.f32 %v4988_v42 }
 0x580   :  { %v4283_v34 = vadd.f32 1e-05, %v4251_v56  ;;  %v4204_v6 = vmul.f32 0.0078125, %v4172_v30  ;;  %vm4331_vm12 = vmor %vm4329_vm11, %vm4330_vm10 }
 0x581   :  { %v4325_v3 = vmul.f32 %v4988_v42, %v4324_v21  ;;  %v4318_v18 = vmul.f32 %v4986_v61, %v4317_v24 }
 0x582   :  { %4989 = vrsqrt.f32 %v4283_v34  ;;  %v4236_v54 = vsub.f32 %v4204_v6, %v4220_v60  ;;  %vm4359_vm14 = vweird.f32 %v4283_v34 }
 0x583   :  { %v4322_v31 = vsel %vm4321_vm8, %v4986_v61, %v4318_v18  ;;  %v4326_v62 = vmul.f32 0.5, %v4325_v3  ;;  %v4501_v3 = vsub.f32 %v4469_v50, %v7386_v46  ;;  %v4264_v46 = vld [vmem:[%s7934_s8 + $0x18] sm:$0xff] }
 0x584   :  { %v7487_v25 = vmul.f32 %v4322_v31, %v4263_v26  ;;  %v4252_v21 = vmax.f32 %v4236_v54, 0.0 }
 0x585   :  { %v7489_v33 = vpop.xlane.xlu1 %3956  ;;  %v4327_v30 = vsub.f32 1.5, %v4326_v62  ;;  %v4473_v62 = vld [vmem:[%s7935_s9 + $0x20] sm:$0xff] }
 0x586   :  { %v4487_v55 = vmul.f32 %v7487_v25, %v7439_v23  ;;  %v7500_v18 = vadd.f32 1e-05, %v4252_v21 }
 0x587   :  { %v4018_v28 = vpop.xlane.xlu2 %4017  ;;  %v4328_v60 = vmul.f32 %v4988_v42, %v4327_v30  ;;  %v4505_v30 = vsub.f32 %v4473_v62, %v7437_v10 }
 0x588   :  { %v4990_v56 = vpop.eup %4989  ;;  %v4503_v61 = vsub.f32 %v4471_v22, %v4487_v55  ;;  %4991 = vrsqrt.f32 %v7500_v18  ;;  %v4267_v55 = vld [vmem:[%s7934_s8 + $0x30] sm:$0xff]  ;;  %vm4369_vm1 = vweird.f32 %v7500_v18 }
 0x589   :  { %v4354_v24 = vmul.f32 %v4990_v56, %v4283_v34  ;;  %vm4360_vm13 = vweird.f32 %v4990_v56  ;;  %v4332_v22 = vsel %vm4331_vm12, %v4988_v42, %v4328_v60 }
 0x58a   :  { %4625 = vperm.xlu0 %4970, %v4503_v61   ;;  %v7510_v15 = vmul.f32 %v4332_v22, %v4264_v46  ;;  %vm4361_vm15 = vmor %vm4359_vm14, %vm4360_vm13 }
 0x58b   :  { %v4355_v6 = vmul.f32 %v4990_v56, %v4354_v24  ;;  %4615 = vperm.xlu1 %4971, %v4501_v3  }
 0x58c   :  { %v4488_v24 = vmul.f32 %v7510_v15, %v7456_v36 }
 0x58d   :  { %v4356_v26 = vmul.f32 0.5, %v4355_v6  ;;  %v7502_v23 = vpop.xlane.xlu1 %4020 }
 0x58f   :  { %v4063_v31 = vpop.xlane.xlu2 %4062  ;;  %v4357_v54 = vsub.f32 1.5, %v4356_v26  ;;  %v4992_v26 = vpop.eup %4991 }
 0x590   :  { %v4157_v61 = vadd.f32 %v4063_v31, %v7398_v49  ;;  %v4470_v49 = vld [vmem:[%s7935_s9 + $0x8] sm:$0xff]  ;;  %v4364_v36 = vmul.f32 %v4992_v26, %v7500_v18  ;;  %vm4370_vm0 = vweird.f32 %v4992_v26 }
 0x591   :  { %v4358_v50 = vmul.f32 %v4990_v56, %v4357_v54  ;;  %v4502_v31 = vsub.f32 %v4470_v49, %v7433_v1  ;;  %vm4371_vm2 = vmor %vm4369_vm1, %vm4370_vm0 }
 0x592   :  { %v7521_v6 = vmul.f32 0.0078125, %v4157_v61 }
 0x593   :  { %4539 = vperm.xlu1 %4971, %v7429_v7   ;;  %v4362_v42 = vsel %vm4361_vm15, %v4990_v56, %v4358_v50  ;;  %v4475_v50 = vld [vmem:[%s7935_s9 + $0x30] sm:$0xff] }
 0x594   :  { %4635 = vperm.xlu2 %4972, %v4505_v30   ;;  %v4459_v21 = vmul.f32 %v4362_v42, %v4267_v55  ;;  %v4221_v7 = vmul.f32 %v7521_v6, %v7521_v6 }
 0x595   :  { %v4066_v3 = vpop.xlane.xlu1 %4065 }
 0x596   :  { %4549 = vperm.xlu0 %4970, %v4459_v21   ;;  %v4158_v10 = vadd.f32 %v4066_v3, %v3954_v35  ;;  %v4491_v22 = vmul.f32 %v4459_v21, %v7470_v4  ;;  %v4365_v35 = vmul.f32 %v4992_v26, %v4364_v36  ;;  %v4472_v21 = vld [vmem:[%s7935_s9 + $0x18] sm:$0xff] }
 0x597   :  { %v4127_v60 = vpop.xlane.xlu2 %4126 }
 0x598   :  { %v4173_v34 = vadd.f32 %v4127_v60, %v7408_v20  ;;  %v7532_v62 = vmul.f32 0.0078125, %v4158_v10  ;;  %v4507_v42 = vsub.f32 %v4475_v50, %v4491_v22  ;;  %v4366_v3 = vmul.f32 0.5, %v4365_v35  ;;  %v4268_v35 = vld [vmem:[%s7934_s8 + $0x38] sm:$0xff] }
 0x59a   :  { %v4205_v56 = vmul.f32 0.0078125, %v4173_v34  ;;  %v4222_v1 = vmul.f32 %v7532_v62, %v7532_v62  ;;  %v4367_v10 = vsub.f32 1.5, %v4366_v3 }
 0x59b   :  { %4524 = vperm.xlu1 %4971, %v7423_v12  }
 0x59c   :  { %v4237_v54 = vsub.f32 %v4205_v56, %v4221_v7  ;;  %4620 = vperm.xlu2 %4972, %v4502_v31   ;;  %v4504_v56 = vsub.f32 %v4472_v21, %v4488_v24  ;;  %v4368_v31 = vmul.f32 %v4992_v26, %v4367_v10 }
 0x59d   :  { %v4130_v46 = vpop.xlane.xlu1 %4129 }
 0x59e   :  { %v4253_v55 = vmax.f32 %v4237_v54, 0.0  ;;  %v4174_v20 = vadd.f32 %v4130_v46, %v4018_v28 }
 0x59f   :  { %v3960_v61 = vpop.xlane.xlu2 %3959 }
 0x5a0   :  { %v4285_v30 = vadd.f32 1e-05, %v4253_v55  ;;  %v4206_v12 = vmul.f32 0.0078125, %v4174_v20  ;;  %v4372_v55 = vsel %vm4371_vm2, %v4992_v26, %v4368_v31 }
 0x5a2   :  { %4993 = vrsqrt.f32 %v4285_v30  ;;  %v4238_v60 = vsub.f32 %v4206_v12, %v4222_v1  ;;  %vm4379_vm4 = vweird.f32 %v4285_v30  ;;  %v4460_v12 = vmul.f32 %v4372_v55, %v4268_v35 }
 0x5a3   :  { %4645 = vperm.xlu1 %4971, %v4507_v42  }
 0x5a4   :  { %v4254_v49 = vmax.f32 %v4238_v60, 0.0  ;;  %4544 = vperm.xlu2 %4972, %v7449_v51  }
 0x5a5   :  { %v7541_v4 = vpop.xlane.xlu1 %3962 }
 0x5a6   :  { %v4286_v28 = vadd.f32 1e-05, %v4254_v49 }
 0x5a7   :  { %v4024_v34 = vpop.xlane.xlu2 %4023 }
 0x5a8   :  { %v4994_v36 = vpop.eup %4993  ;;  %4995 = vrsqrt.f32 %v4286_v28  ;;  %vm4389_vm7 = vweird.f32 %v4286_v28 }
 0x5a9   :  { %v4374_v7 = vmul.f32 %v4994_v36, %v4285_v30  ;;  %vm4380_vm3 = vweird.f32 %v4994_v36  ;;  %v4477_v30 = vld [vmem:[%s7935_s9 + $0x40] sm:$0xff] }
 0x5aa   :  { %vm4381_vm5 = vmor %vm4379_vm4, %vm4380_vm3 }
 0x5ab   :  { %v4375_v54 = vmul.f32 %v4994_v36, %v4374_v7  ;;  %4630 = vperm.xlu1 %4971, %v4504_v56   ;;  %v4492_v56 = vmul.f32 %v4460_v12, %v7480_v48 }
 0x5ac   :  { %4529 = vperm.xlu2 %4972, %v7487_v25   ;;  %v4269_v25 = vld [vmem:[%s7934_s8 + $0x40] sm:$0xff] }
 0x5ad   :  { %v4376_v51 = vmul.f32 0.5, %v4375_v54  ;;  %v7548_v46 = vpop.xlane.xlu1 %4026 }
 0x5ae   :  { %v4996_v22 = vpop.eup %4995 }
 0x5af   :  { %v4377_v20 = vsub.f32 1.5, %v4376_v51  ;;  %v4384_v24 = vmul.f32 %v4996_v22, %v4286_v28  ;;  %v4069_v50 = vpop.xlane.xlu2 %4068  ;;  %vm4390_vm6 = vweird.f32 %v4996_v22 }
 0x5b0   :  { %v4159_v42 = vadd.f32 %v4069_v50, %v7489_v33  ;;  %vm4391_vm8 = vmor %vm4389_vm7, %vm4390_vm6 }
 0x5b1   :  { %v4385_v1 = vmul.f32 %v4996_v22, %v4384_v24  ;;  %v4378_v18 = vmul.f32 %v4994_v36, %v4377_v20  ;;  %v4478_v24 = vld [vmem:[%s7935_s9 + $0x48] sm:$0xff] }
 0x5b2   :  { %v7561_v10 = vmul.f32 0.0078125, %v4159_v42 }
 0x5b3   :  { %v4386_v3 = vmul.f32 0.5, %v4385_v1  ;;  %4554 = vperm.xlu1 %4971, %v4460_v12   ;;  %v4382_v60 = vsel %vm4381_vm5, %v4994_v36, %v4378_v18  ;;  %v4270_v36 = vld [vmem:[%s7934_s8 + $0x48] sm:$0xff] }
 0x5b4   :  { %4534 = vperm.xlu2 %4972, %v7510_v15   ;;  %v4461_v26 = vmul.f32 %v4382_v60, %v4269_v25  ;;  %v4476_v15 = vld [vmem:[%s7935_s9 + $0x38] sm:$0xff]  ;;  %v4223_v48 = vmul.f32 %v7561_v10, %v7561_v10 }
 0x5b5   :  { %v4387_v49 = vsub.f32 1.5, %v4386_v3  ;;  %v4072_v21 = vpop.xlane.xlu1 %4071  ;;  %v4508_v28 = vsub.f32 %v4476_v15, %v4492_v56 }
 0x5b6   :  { %v4493_v7 = vmul.f32 %v4461_v26, %v7521_v6  ;;  %v4160_v54 = vadd.f32 %v4072_v21, %v3960_v61  ;;  %v7582_v21 = vpop.xlane.xlu0 %4032 }
 0x5b7   :  { %v4133_v33 = vpop.xlane.xlu2 %4132  ;;  %v4388_v31 = vmul.f32 %v4996_v22, %v4387_v49 }
 0x5b8   :  { %v4175_v51 = vadd.f32 %v4133_v33, %v7502_v23  ;;  %v4509_v35 = vsub.f32 %v4477_v30, %v4493_v7  ;;  %v7577_v50 = vmul.f32 0.0078125, %v4160_v54 }
 0x5b9   :  { %v4392_v55 = vsel %vm4391_vm8, %v4996_v22, %v4388_v31 }
 0x5ba   :  { %v4207_v6 = vmul.f32 0.0078125, %v4175_v51  ;;  %4655 = vperm.xlu0 %4970, %v4509_v35   ;;  %v4462_v20 = vmul.f32 %v4392_v55, %v4270_v36  ;;  %v4224_v42 = vmul.f32 %v7577_v50, %v7577_v50 }
 0x5bc   :  { %v4239_v1 = vsub.f32 %v4207_v6, %v4223_v48  ;;  %4650 = vperm.xlu2 %4972, %v4508_v28   ;;  %v4494_v61 = vmul.f32 %v4462_v20, %v7532_v62 }
 0x5bd   :  { %v4136_v23 = vpop.xlane.xlu1 %4135 }
 0x5be   :  { %v4255_v12 = vmax.f32 %v4239_v1, 0.0  ;;  %v4176_v22 = vadd.f32 %v4136_v23, %v4024_v34  ;;  %v4510_v25 = vsub.f32 %v4478_v24, %v4494_v61  ;;  %v4142_v36 = vpop.xlane.xlu0 %4141  ;;  %v4271_v24 = vld [vmem:[%s7934_s8 + $0x50] sm:$0xff] }
 0x5bf   :  { %v3966_v18 = vpop.xlane.xlu2 %3965 }
 0x5c0   :  { %v4287_v3 = vadd.f32 1e-05, %v4255_v12  ;;  %v4208_v60 = vmul.f32 0.0078125, %v4176_v22  ;;  %4660 = vperm.xlu1 %4971, %v4510_v25  }
 0x5c2   :  { %4997 = vrsqrt.f32 %v4287_v3  ;;  %v4240_v49 = vsub.f32 %v4208_v60, %v4224_v42  ;;  %4564 = vperm.xlu0 %4970, %v4462_v20   ;;  %vm4399_vm11 = vweird.f32 %v4287_v3 }
 0x5c4   :  { %v4256_v30 = vmax.f32 %v4240_v49, 0.0  ;;  %4559 = vperm.xlu2 %4972, %v4461_v26   ;;  %v4479_v49 = vld [vmem:[%s7935_s9 + $0x50] sm:$0xff] }
 0x5c5   :  { %v7584_v7 = vpop.xlane.xlu1 %3968 }
 0x5c6   :  { %v4288_v62 = vadd.f32 1e-05, %v4256_v30 }
 0x5c7   :  { %v4030_v56 = vpop.xlane.xlu2 %4029 }
 0x5c8   :  { %v4998_v34 = vpop.eup %4997  ;;  %4999 = vrsqrt.f32 %v4288_v62  ;;  %v4178_v35 = vadd.f32 %v4142_v36, %v4030_v56  ;;  %vm4409_vm14 = vweird.f32 %v4288_v62 }
 0x5c9   :  { %v4394_v33 = vmul.f32 %v4998_v34, %v4287_v3  ;;  %vm4400_vm10 = vweird.f32 %v4998_v34 }
 0x5ca   :  { %v4210_v61 = vmul.f32 0.0078125, %v4178_v35  ;;  %vm4401_vm12 = vmor %vm4399_vm11, %vm4400_vm10 }
 0x5cb   :  { %v4395_v15 = vmul.f32 %v4998_v34, %v4394_v33 }
 0x5cd   :  { %v4396_v31 = vmul.f32 0.5, %v4395_v15  ;;  %v4078_v54 = vpop.xlane.xlu1 %4077 }
 0x5ce   :  { %v5000_v51 = vpop.eup %4999  ;;  %v4162_v55 = vadd.f32 %v4078_v54, %v3966_v18 }
 0x5cf   :  { %v4404_v48 = vmul.f32 %v5000_v51, %v4288_v62  ;;  %v4075_v6 = vpop.xlane.xlu2 %4074  ;;  %v4397_v28 = vsub.f32 1.5, %v4396_v31  ;;  %vm4410_vm13 = vweird.f32 %v5000_v51 }
 0x5d0   :  { %v7586_v20 = vmul.f32 0.0078125, %v4162_v55  ;;  %v4161_v12 = vadd.f32 %v4075_v6, %v7541_v4  ;;  %v4272_v4 = vld [vmem:[%s7934_s8 + $0x58] sm:$0xff]  ;;  %vm4411_vm15 = vmor %vm4409_vm14, %vm4410_vm13 }
 0x5d1   :  { %v4405_v26 = vmul.f32 %v5000_v51, %v4404_v48  ;;  %v4398_v1 = vmul.f32 %v4998_v34, %v4397_v28 }
 0x5d2   :  { %v4226_v23 = vmul.f32 %v7586_v20, %v7586_v20  ;;  %v7597_v56 = vmul.f32 0.0078125, %v4161_v12 }
 0x5d3   :  { %v4406_v22 = vmul.f32 0.5, %v4405_v26  ;;  %v4402_v25 = vsel %vm4401_vm12, %v4998_v34, %v4398_v1 }
 0x5d4   :  { %v4242_v18 = vsub.f32 %v4210_v61, %v4226_v23  ;;  %v4463_v42 = vmul.f32 %v4402_v25, %v4271_v24  ;;  %v4225_v35 = vmul.f32 %v7597_v56, %v7597_v56 }
 0x5d5   :  { %v4407_v60 = vsub.f32 1.5, %v4406_v22  ;;  %v4036_v30 = vpop.xlane.xlu1 %4035 }
 0x5d6   :  { %4569 = vperm.xlu1 %4971, %v4463_v42   ;;  %v4495_v3 = vmul.f32 %v4463_v42, %v7561_v10  ;;  %v4258_v15 = vmax.f32 %v4242_v18, 0.0  ;;  %v4480_v10 = vld [vmem:[%s7935_s9 + $0x58] sm:$0xff] }
 0x5d7   :  { %v4139_v33 = vpop.xlane.xlu2 %4138  ;;  %v4408_v34 = vmul.f32 %v5000_v51, %v4407_v60 }
 0x5d8   :  { %v4177_v36 = vadd.f32 %v4139_v33, %v7548_v46  ;;  %v4511_v31 = vsub.f32 %v4479_v49, %v4495_v3  ;;  %v7609_v62 = vadd.f32 1e-05, %v4258_v15 }
 0x5d9   :  { %v4412_v54 = vsel %vm4411_vm15, %v5000_v51, %v4408_v34 }
 0x5da   :  { %v4209_v55 = vmul.f32 0.0078125, %v4177_v36  ;;  %4665 = vperm.xlu2 %4972, %v4511_v31   ;;  %v4464_v48 = vmul.f32 %v4412_v54, %v4272_v4  ;;  %5001 = vrsqrt.f32 %v7609_v62  ;;  %vm4429_vm4 = vweird.f32 %v7609_v62 }
 0x5dc   :  { %v4241_v6 = vsub.f32 %v4209_v55, %v4225_v35  ;;  %v4496_v28 = vmul.f32 %v4464_v48, %v7577_v50 }
 0x5dd   :  { %v4145_v46 = vpop.xlane.xlu1 %4144 }
 0x5de   :  { %v4257_v26 = vmax.f32 %v4241_v6, 0.0  ;;  %v4512_v24 = vsub.f32 %v4480_v10, %v4496_v28  ;;  %v4179_v22 = vadd.f32 %v4145_v46, %v7582_v21 }
 0x5df   :  { %v3972_v1 = vpop.xlane.xlu2 %3971 }
 0x5e0   :  { %v4289_v51 = vadd.f32 1e-05, %v4257_v26  ;;  %4670 = vperm.xlu0 %4970, %v4512_v24   ;;  %v7613_v61 = vpop.eup %5001  ;;  %v4211_v33 = vmul.f32 0.0078125, %v4179_v22 }
 0x5e1   :  { %v4424_v50 = vmul.f32 %v7613_v61, %v7609_v62  ;;  %vm4430_vm3 = vweird.f32 %v7613_v61  ;;  %v4906_v62 = vld [vmem:[%s7926_s0 + $0x80] sm:$0xff] }
 0x5e2   :  { %5003 = vrsqrt.f32 %v4289_v51  ;;  %4574 = vperm.xlu2 %4972, %v4464_v48   ;;  %v4273_v48 = vld [vmem:[%s7934_s8 + $0x60] sm:$0xff]  ;;  %vm4419_vm1 = vweird.f32 %v4289_v51  ;;  %vm4431_vm5 = vmor %vm4429_vm4, %vm4430_vm3 }
 0x5e3   :  { %v4425_v34 = vmul.f32 %v7613_v61, %v4424_v50 }
 0x5e5   :  { %v4084_v18 = vpop.xlane.xlu1 %4083  ;;  %v4426_v55 = vmul.f32 0.5, %v4425_v34 }
 0x5e6   :  { %v4164_v49 = vadd.f32 %v4084_v18, %v3972_v1  ;;  %v4520_v18 = vpop.permute.xlu0 %4519 }
 0x5e7   :  { %v4081_v23 = vpop.xlane.xlu2 %4080 }
 0x5e8   :  { %v5004_v12 = vpop.eup %5003  ;;  %v4163_v25 = vadd.f32 %v4081_v23, %v7584_v7  ;;  %v7624_v21 = vmul.f32 0.0078125, %v4164_v49  ;;  %v4427_v23 = vsub.f32 1.5, %v4426_v55 }
 0x5e9   :  { %v4414_v42 = vmul.f32 %v5004_v12, %v4289_v51  ;;  %vm4420_vm0 = vweird.f32 %v5004_v12 }
 0x5ea   :  { %v7619_v60 = vmul.f32 0.0078125, %v4163_v25  ;;  %v4228_v28 = vmul.f32 %v7624_v21, %v7624_v21  ;;  %vm4421_vm2 = vmor %vm4419_vm1, %vm4420_vm0  ;;  %v4428_v49 = vmul.f32 %v7613_v61, %v4427_v23 }
 0x5eb   :  { %v4415_v3 = vmul.f32 %v5004_v12, %v4414_v42 }
 0x5ec   :  { %v4227_v4 = vmul.f32 %v7619_v60, %v7619_v60  ;;  %v4432_v34 = vsel %vm4431_vm5, %v7613_v61, %v4428_v49 }
 0x5ed   :  { %v4416_v15 = vmul.f32 0.5, %v4415_v3 }
 0x5ee   :  { %v4243_v36 = vsub.f32 %v4211_v33, %v4227_v4  ;;  %v4597_v33 = vmul.f32 %v4520_v18, %v7146_v2  ;;  %v4274_v4 = vld [vmem:[%s7934_s8 + $0x68] sm:$0xff] }
 0x5ef   :  { %v4148_v7 = vpop.xlane.xlu2 %4147  ;;  %v4417_v31 = vsub.f32 1.5, %v4416_v15  ;;  %v4466_v55 = vmul.f32 %v4432_v34, %v4274_v4 }
 0x5f0   :  { %v4259_v54 = vmax.f32 %v4243_v36, 0.0  ;;  %v4180_v35 = vadd.f32 %v4148_v7, %v4036_v30  ;;  %v4481_v30 = vld [vmem:[%s7935_s9 + $0x60] sm:$0xff] }
 0x5f1   :  { %v4418_v10 = vmul.f32 %v5004_v12, %v4417_v31  ;;  %v4709_v36 = vld [vmem:[%s7926_s0] sm:$0xff] }
 0x5f2   :  { %v4291_v6 = vadd.f32 1e-05, %v4259_v54  ;;  %v4212_v26 = vmul.f32 0.0078125, %v4180_v35 }
 0x5f3   :  { %v4422_v24 = vsel %vm4421_vm2, %v5004_v12, %v4418_v10 }
 0x5f4   :  { %5005 = vrsqrt.f32 %v4291_v6  ;;  %v4244_v46 = vsub.f32 %v4212_v26, %v4228_v28  ;;  %v4465_v1 = vmul.f32 %v4422_v24, %v4273_v48  ;;  %v4641_v48 = vpop.permute.xlu0 %4640  ;;  %vm4439_vm7 = vweird.f32 %v4291_v6 }
 0x5f6   :  { %v4260_v22 = vmax.f32 %v4244_v46, 0.0  ;;  %4579 = vperm.xlu0 %4970, %v4465_v1   ;;  %v4497_v25 = vmul.f32 %v4465_v1, %v7597_v56  ;;  %v4773_v56 = vmul.f32 %v4520_v18, %v7188_v52  ;;  %v4275_v1 = vld [vmem:[%s7934_s8 + $0x70] sm:$0xff] }
 0x5f7   :  { %v4636_v51 = vpop.permute.xlu2 %4635 }
 0x5f8   :  { %v7635_v50 = vadd.f32 1e-05, %v4260_v22  ;;  %v4513_v42 = vsub.f32 %v4481_v30, %v4497_v25 }
 0x5fa   :  { %v5006_v12 = vpop.eup %5005  ;;  %5007 = vrsqrt.f32 %v7635_v50  ;;  %4675 = vperm.xlu1 %4971, %v4513_v42   ;;  %vm4449_vm11 = vweird.f32 %v7635_v50 }
 0x5fb   :  { %v4434_v3 = vmul.f32 %v5006_v12, %v4291_v6  ;;  %vm4440_vm6 = vweird.f32 %v5006_v12 }
 0x5fc   :  { %vm4441_vm8 = vmor %vm4439_vm7, %vm4440_vm6  ;;  %v4626_v4 = vpop.permute.xlu0 %4625 }
 0x5fd   :  { %v4435_v15 = vmul.f32 %v5006_v12, %v4434_v3  ;;  %v4616_v7 = vpop.permute.xlu1 %4615  ;;  %v4713_v3 = vld [vmem:[%s7926_s0 + $0x20] sm:$0xff] }
 0x5fe   :  { %v4693_v2 = vadd.f32 %v4616_v7, %v4597_v33  ;;  %v4789_v31 = vadd.f32 %v4773_v56, %v4616_v7 }
 0x5ff   :  { %v4436_v52 = vmul.f32 0.5, %v4435_v15  ;;  %v7653_v54 = vpop.permute.xlu2 %4620 }
 0x600   :  { %v5008_v35 = vpop.eup %5007  ;;  %v4725_v10 = vadd.f32 %v4709_v36, %v4693_v2  ;;  %v4821_v61 = vadd.f32 %v4906_v62, %v4789_v31  ;;  %v4276_v62 = vld [vmem:[%s7934_s8 + $0x78] sm:$0xff] }
 0x601   :  { %v4437_v28 = vsub.f32 1.5, %v4436_v52  ;;  %v4444_v26 = vmul.f32 %v5008_v35, %v7635_v50  ;;  %vm4450_vm10 = vweird.f32 %v5008_v35  ;;  %v4498_v52 = vmul.f32 %v4466_v55, %v7586_v20  ;;  %v4482_v50 = vld [vmem:[%s7935_s9 + $0x68] sm:$0xff] }
 0x602   :  { %v4741_v24 = vmax.f32 %v4725_v10, 0.0  ;;  %v4837_v46 = vmax.f32 %v4821_v61, 0.0  ;;  %4584 = vperm.xlu1 %4971, %v4466_v55   ;;  %vm4451_vm12 = vmor %vm4449_vm11, %vm4450_vm10  ;;  %v4484_v55 = vld [vmem:[%s7935_s9 + $0x78] sm:$0xff] }
 0x603   :  { %v4438_v23 = vmul.f32 %v5006_v12, %v4437_v28  ;;  %v4445_v30 = vmul.f32 %v5008_v35, %v4444_v26 }
 0x604   :  { %4757 = vst.msk [vmem:[%s7936_s10] sm:$0xff] %vm3924_vm9, %v4741_v24 }
 0x605   :  { %v4442_v22 = vsel %vm4441_vm8, %v5006_v12, %v4438_v23  ;;  %v4446_v25 = vmul.f32 0.5, %v4445_v30  ;;  %4922 = vst.msk [vmem:[%s7936_s10 + $0x80] sm:$0xff] %vm3924_vm9, %v4837_v46  ;;  %v4540_v18 = vpop.permute.xlu1 %4539  ;;  %v4910_v12 = vld [vmem:[%s7926_s0 + $0xa0] sm:$0xff] }
 0x606   :  { %v4467_v42 = vmul.f32 %v4442_v22, %v4275_v1  ;;  %v4601_v49 = vmul.f32 %v4540_v18, %v7160_v11  ;;  %v4777_v6 = vmul.f32 %v4540_v18, %v7203_v29  ;;  %v4714_v11 = vld [vmem:[%s7926_s0 + $0x28] sm:$0xff]  ;;  %v4514_v18 = vsub.f32 %v4482_v50, %v4498_v52 }
 0x607   :  { %v4545_v33 = vpop.permute.xlu2 %4544  ;;  %v4447_v56 = vsub.f32 1.5, %v4446_v25 }
 0x608   :  { %v4697_v34 = vadd.f32 %v4636_v51, %v4601_v49  ;;  %v4793_v15 = vadd.f32 %v4777_v6, %v4636_v51  ;;  %v4602_v36 = vmul.f32 %v4545_v33, %v7168_v45  ;;  %4589 = vperm.xlu2 %4972, %v4467_v42   ;;  %v4778_v29 = vmul.f32 %v4545_v33, %v7221_v0  ;;  %v4911_v45 = vld [vmem:[%s7926_s0 + $0xa8] sm:$0xff] }
 0x609   :  { %v4448_v7 = vmul.f32 %v5008_v35, %v4447_v56  ;;  %v4499_v30 = vmul.f32 %v4467_v42, %v7619_v60  ;;  %v4550_v60 = vpop.permute.xlu0 %4549 }
 0x60a   :  { %v4729_v2 = vadd.f32 %v4713_v3, %v4697_v34  ;;  %v4825_v31 = vadd.f32 %v4910_v12, %v4793_v15  ;;  %v4698_v51 = vadd.f32 %v4641_v48, %v4602_v36  ;;  %v4794_v10 = vadd.f32 %v4778_v29, %v4641_v48  ;;  %v4483_v3 = vld [vmem:[%s7935_s9 + $0x70] sm:$0xff] }
 0x60b   :  { %v4452_v0 = vsel %vm4451_vm12, %v5008_v35, %v4448_v7  ;;  %v4711_v12 = vld [vmem:[%s7926_s0 + $0x10] sm:$0xff]  ;;  %v4603_v15 = vmul.f32 %v4550_v60, %v7193_v63  ;;  %v4779_v36 = vmul.f32 %v4550_v60, %v7233_v41 }
 0x60c   :  { %v4745_v61 = vmax.f32 %v4729_v2, 0.0  ;;  %v4841_v28 = vmax.f32 %v4825_v31, 0.0  ;;  %v4730_v26 = vadd.f32 %v4714_v11, %v4698_v51  ;;  %v4468_v24 = vmul.f32 %v4452_v0, %v4276_v62  ;;  %v4715_v31 = vld [vmem:[%s7926_s0 + $0x30] sm:$0xff] }
 0x60d   :  { %v4826_v46 = vadd.f32 %v4911_v45, %v4794_v10  ;;  %v4525_v1 = vpop.permute.xlu1 %4524  ;;  %v4515_v11 = vsub.f32 %v4483_v3, %v4499_v30  ;;  %v4912_v45 = vld [vmem:[%s7926_s0 + $0xb0] sm:$0xff] }
 0x60e   :  { %4761 = vst.msk [vmem:[%s7936_s10 + $0x20] sm:$0xff] %vm3924_vm9, %v4745_v61  ;;  %v4746_v23 = vmax.f32 %v4730_v26, 0.0  ;;  %v4598_v20 = vmul.f32 %v4525_v1, %v7162_v38  ;;  %v4774_v35 = vmul.f32 %v4525_v1, %v7207_v44  ;;  %4594 = vperm.xlu0 %4970, %v4468_v24   ;;  %v4500_v48 = vmul.f32 %v4468_v24, %v7624_v21  ;;  %v4710_v38 = vld [vmem:[%s7926_s0 + $0x8] sm:$0xff]  ;;  %v4909_v1 = vld [vmem:[%s7926_s0 + $0x98] sm:$0xff] }
 0x60f   :  { %4926 = vst.msk [vmem:[%s7936_s10 + $0xa0] sm:$0xff] %vm3924_vm9, %v4841_v28  ;;  %v4842_v22 = vmax.f32 %v4826_v46, 0.0  ;;  %v4907_v44 = vld [vmem:[%s7926_s0 + $0x88] sm:$0xff]  ;;  %v4530_v25 = vpop.permute.xlu2 %4529  ;;  %v4712_v46 = vld [vmem:[%s7926_s0 + $0x18] sm:$0xff] }
 0x610   :  { %4762 = vst.msk [vmem:[%s7936_s10 + $0x28] sm:$0xff] %vm3924_vm9, %v4746_v23  ;;  %v4694_v21 = vadd.f32 %v7653_v54, %v4598_v20  ;;  %v4790_v42 = vadd.f32 %v4774_v35, %v7653_v54  ;;  %v4599_v49 = vmul.f32 %v4530_v25, %v7174_v14  ;;  %v4775_v6 = vmul.f32 %v4530_v25, %v7246_v32  ;;  %v4908_v54 = vld [vmem:[%s7926_s0 + $0x90] sm:$0xff]  ;;  %v4716_v25 = vld [vmem:[%s7926_s0 + $0x38] sm:$0xff] }
 0x611   :  { %4927 = vst.msk [vmem:[%s7936_s10 + $0xa8] sm:$0xff] %vm3924_vm9, %v4842_v22  ;;  %4680 = vperm.xlu2 %4972, %v4514_v18   ;;  %v4516_v14 = vsub.f32 %v4484_v55, %v4500_v48  ;;  %v4913_v18 = vld [vmem:[%s7926_s0 + $0xb8] sm:$0xff] }
 0x612   :  { %v4726_v32 = vadd.f32 %v4710_v38, %v4694_v21  ;;  %v4822_v33 = vadd.f32 %v4907_v44, %v4790_v42  ;;  %v4695_v56 = vadd.f32 %v4626_v4, %v4599_v49  ;;  %v4791_v34 = vadd.f32 %v4775_v6, %v4626_v4 }
 0x613   :  { %4690 = vperm.xlu1 %4971, %v4516_v14   ;;  %v4914_v14 = vld [vmem:[%s7926_s0 + $0xc0] sm:$0xff] }
 0x614   :  { %v4742_v29 = vmax.f32 %v4726_v32, 0.0  ;;  %v4838_v62 = vmax.f32 %v4822_v33, 0.0  ;;  %v4727_v7 = vadd.f32 %v4711_v12, %v4695_v56  ;;  %v4823_v2 = vadd.f32 %v4908_v54, %v4791_v34 }
 0x615   :  { %v4646_v51 = vpop.permute.xlu1 %4645 }
 0x616   :  { %4758 = vst.msk [vmem:[%s7936_s10 + $0x8] sm:$0xff] %vm3924_vm9, %v4742_v29  ;;  %v4743_v63 = vmax.f32 %v4727_v7, 0.0  ;;  %v4839_v41 = vmax.f32 %v4823_v2, 0.0  ;;  %v4699_v4 = vadd.f32 %v4646_v51, %v4603_v15  ;;  %v4795_v52 = vadd.f32 %v4779_v36, %v4646_v51  ;;  %4685 = vperm.xlu0 %4970, %v4515_v11   ;;  %v4718_v7 = vld [vmem:[%s7926_s0 + $0x48] sm:$0xff] }
 0x617   :  { %4923 = vst.msk [vmem:[%s7936_s10 + $0x88] sm:$0xff] %vm3924_vm9, %v4838_v62  ;;  %v4535_v10 = vpop.permute.xlu2 %4534  ;;  %v4915_v2 = vld [vmem:[%s7926_s0 + $0xc8] sm:$0xff] }
 0x618   :  { %4759 = vst.msk [vmem:[%s7936_s10 + $0x10] sm:$0xff] %vm3924_vm9, %v4743_v63  ;;  %v4731_v0 = vadd.f32 %v4715_v31, %v4699_v4  ;;  %v4827_v61 = vadd.f32 %v4912_v45, %v4795_v52  ;;  %v4600_v24 = vmul.f32 %v4535_v10, %v7209_v57  ;;  %v4776_v50 = vmul.f32 %v4535_v10, %v7257_v8 }
 0x619   :  { %4924 = vst.msk [vmem:[%s7936_s10 + $0x90] sm:$0xff] %vm3924_vm9, %v4839_v41 }
 0x61a   :  { %v4747_v28 = vmax.f32 %v4731_v0, 0.0  ;;  %v4843_v26 = vmax.f32 %v4827_v61, 0.0  ;;  %v4719_v0 = vld [vmem:[%s7926_s0 + $0x50] sm:$0xff] }
 0x61b   :  { %v4916_v61 = vld [vmem:[%s7926_s0 + $0xd0] sm:$0xff] }
 0x61c   :  { %4763 = vst.msk [vmem:[%s7936_s10 + $0x30] sm:$0xff] %vm3924_vm9, %v4747_v28 }
 0x61d   :  { %4928 = vst.msk [vmem:[%s7936_s10 + $0xb0] sm:$0xff] %vm3924_vm9, %v4843_v26  ;;  %v4631_v23 = vpop.permute.xlu1 %4630 }
 0x61e   :  { %v4696_v20 = vadd.f32 %v4631_v23, %v4600_v24  ;;  %v4792_v35 = vadd.f32 %v4776_v50, %v4631_v23 }
 0x61f   :  { %v4651_v55 = vpop.permute.xlu2 %4650 }
 0x620   :  { %v4728_v57 = vadd.f32 %v4712_v46, %v4696_v20  ;;  %v4824_v48 = vadd.f32 %v4909_v1, %v4792_v35 }
 0x622   :  { %v4744_v8 = vmax.f32 %v4728_v57, 0.0  ;;  %v4840_v30 = vmax.f32 %v4824_v48, 0.0 }
 0x624   :  { %4760 = vst.msk [vmem:[%s7936_s10 + $0x18] sm:$0xff] %vm3924_vm9, %v4744_v8 }
 0x625   :  { %4925 = vst.msk [vmem:[%s7936_s10 + $0x98] sm:$0xff] %vm3924_vm9, %v4840_v30  ;;  %v4555_v22 = vpop.permute.xlu1 %4554 }
 0x626   :  { %v4604_v38 = vmul.f32 %v4555_v22, %v7228_v13  ;;  %v4780_v44 = vmul.f32 %v4555_v22, %v7248_v39  ;;  %v4717_v39 = vld [vmem:[%s7926_s0 + $0x40] sm:$0xff] }
 0x627   :  { %v4560_v42 = vpop.permute.xlu2 %4559 }
 0x628   :  { %v4700_v60 = vadd.f32 %v4651_v55, %v4604_v38  ;;  %v4796_v21 = vadd.f32 %v4780_v44, %v4651_v55  ;;  %v4605_v3 = vmul.f32 %v4560_v42, %v7237_v43  ;;  %v4781_v12 = vmul.f32 %v4560_v42, %v7255_v47 }
 0x62a   :  { %v4732_v49 = vadd.f32 %v4716_v25, %v4700_v60  ;;  %v4828_v6 = vadd.f32 %v4913_v18, %v4796_v21  ;;  %v4721_v18 = vld [vmem:[%s7926_s0 + $0x60] sm:$0xff] }
 0x62b   :  { %v4918_v60 = vld [vmem:[%s7926_s0 + $0xe0] sm:$0xff] }
 0x62c   :  { %v4748_v13 = vmax.f32 %v4732_v49, 0.0  ;;  %v4844_v54 = vmax.f32 %v4828_v6, 0.0  ;;  %v4656_v32 = vpop.permute.xlu0 %4655 }
 0x62d   :  { %v4701_v33 = vadd.f32 %v4656_v32, %v4605_v3  ;;  %v4797_v56 = vadd.f32 %v4781_v12, %v4656_v32 }
 0x62e   :  { %4764 = vst.msk [vmem:[%s7936_s10 + $0x38] sm:$0xff] %vm3924_vm9, %v4748_v13 }
 0x62f   :  { %4929 = vst.msk [vmem:[%s7936_s10 + $0xb8] sm:$0xff] %vm3924_vm9, %v4844_v54  ;;  %v4733_v43 = vadd.f32 %v4717_v39, %v4701_v33  ;;  %v4829_v47 = vadd.f32 %v4914_v14, %v4797_v56  ;;  %v8084_v39 = vld [vmem:[#allocation6_spill] sm:$0xff]  ;;  %v4722_v33 = vld [vmem:[%s7926_s0 + $0x68] sm:$0xff] }
 0x630   :  { %v4919_v56 = vld [vmem:[%s7926_s0 + $0xe8] sm:$0xff] }
 0x631   :  { %v4749_v34 = vmax.f32 %v4733_v43, 0.0  ;;  %v4845_v15 = vmax.f32 %v4829_v47, 0.0 }
 0x632   :  { %v4661_v62 = vpop.permute.xlu1 %4660 }
 0x633   :  { %4765 = vst.msk [vmem:[%s7936_s10 + $0x40] sm:$0xff] %vm3924_vm9, %v4749_v34 }
 0x634   :  { %4930 = vst.msk [vmem:[%s7936_s10 + $0xc0] sm:$0xff] %vm3924_vm9, %v4845_v15  ;;  %v4565_v36 = vpop.permute.xlu0 %4564 }
 0x635   :  { %v4606_v11 = vmul.f32 %v4565_v36, %v7253_v53  ;;  %v4782_v29 = vmul.f32 %v4565_v36, %v7268_v59  ;;  %v4666_v53 = vpop.permute.xlu2 %4665 }
 0x637   :  { %v4702_v31 = vadd.f32 %v4661_v62, %v4606_v11  ;;  %v4798_v45 = vadd.f32 %v4782_v29, %v4661_v62 }
 0x639   :  { %v4734_v51 = vadd.f32 %v4718_v7, %v4702_v31  ;;  %v4830_v63 = vadd.f32 %v4915_v2, %v4798_v45  ;;  %v4724_v2 = vld [vmem:[%s7926_s0 + $0x78] sm:$0xff] }
 0x63a   :  { %v4921_v31 = vld [vmem:[%s7926_s0 + $0xf8] sm:$0xff] }
 0x63b   :  { %v4750_v41 = vmax.f32 %v4734_v51, 0.0  ;;  %v4846_v4 = vmax.f32 %v4830_v63, 0.0 }
 0x63d   :  { %4766 = vst.msk [vmem:[%s7936_s10 + $0x48] sm:$0xff] %vm3924_vm9, %v4750_v41  ;;  %v4575_v46 = vpop.permute.xlu2 %4574  ;;  %v8085_v41 = vld [vmem:[#allocation5_spill] sm:$0xff] }
 0x63e   :  { %4931 = vst.msk [vmem:[%s7936_s10 + $0xc8] sm:$0xff] %vm3924_vm9, %v4846_v4  ;;  %v4608_v20 = vmul.f32 %v4575_v46, %v7273_v5  ;;  %v4917_v5 = vld [vmem:[%s7926_s0 + $0xd8] sm:$0xff] }
 0x648   :  { %v4570_v59 = vpop.permute.xlu1 %4569 }
 0x649   :  { %v4607_v52 = vmul.f32 %v4570_v59, %v7263_v16  ;;  %v4783_v10 = vmul.f32 %v4570_v59, %v7279_v40  ;;  %v4784_v16 = vmul.f32 %v4575_v46, %v7291_v9  ;;  %v4720_v40 = vld [vmem:[%s7926_s0 + $0x58] sm:$0xff] }
 0x64b   :  { %v4703_v28 = vadd.f32 %v4666_v53, %v4607_v52  ;;  %v4799_v26 = vadd.f32 %v4783_v10, %v4666_v53 }
 0x64d   :  { %v4735_v24 = vadd.f32 %v4719_v0, %v4703_v28  ;;  %v4831_v50 = vadd.f32 %v4916_v61, %v4799_v26 }
 0x64f   :  { %v4751_v1 = vmax.f32 %v4735_v24, 0.0  ;;  %v4847_v23 = vmax.f32 %v4831_v50, 0.0 }
 0x651   :  { %4767 = vst.msk [vmem:[%s7936_s10 + $0x50] sm:$0xff] %vm3924_vm9, %v4751_v1 }
 0x652   :  { %4932 = vst.msk [vmem:[%s7936_s10 + $0xd0] sm:$0xff] %vm3924_vm9, %v4847_v23  ;;  %v4671_v35 = vpop.permute.xlu0 %4670 }
 0x653   :  { %v4704_v9 = vadd.f32 %v4671_v35, %v4608_v20  ;;  %v4800_v55 = vadd.f32 %v4784_v16, %v4671_v35 }
 0x655   :  { %v4736_v57 = vadd.f32 %v4720_v40, %v4704_v9  ;;  %v4832_v48 = vadd.f32 %v4917_v5, %v4800_v55 }
 0x657   :  { %v4752_v8 = vmax.f32 %v4736_v57, 0.0  ;;  %v4848_v30 = vmax.f32 %v4832_v48, 0.0 }
 0x659   :  { %4768 = vst.msk [vmem:[%s7936_s10 + $0x58] sm:$0xff] %vm3924_vm9, %v4752_v8 }
 0x65a   :  { %4933 = vst.msk [vmem:[%s7936_s10 + $0xd8] sm:$0xff] %vm3924_vm9, %v4848_v30 }
 0x662   :  { %v4590_v25 = vpop.permute.xlu2 %4589 }
 0x663   :  { %v4611_v4 = vmul.f32 %v4590_v25, %v8085_v41  ;;  %v4787_v53 = vmul.f32 %v4590_v25, %v7417_v27 }
 0x668   :  { %v4580_v22 = vpop.permute.xlu0 %4579 }
 0x669   :  { %v4609_v38 = vmul.f32 %v4580_v22, %v7286_v19  ;;  %v4785_v44 = vmul.f32 %v4580_v22, %v7306_v58  ;;  %v8083_v58 = vld [vmem:[#allocation4_spill] sm:$0xff] }
 0x66b   :  { %v4681_v32 = vpop.permute.xlu2 %4680 }
 0x66c   :  { %v4676_v21 = vpop.permute.xlu1 %4675 }
 0x66d   :  { %v4705_v42 = vadd.f32 %v4676_v21, %v4609_v38  ;;  %v4801_v49 = vadd.f32 %v4785_v44, %v4676_v21 }
 0x66f   :  { %v4737_v6 = vadd.f32 %v4721_v18, %v4705_v42  ;;  %v4833_v3 = vadd.f32 %v4918_v60, %v4801_v49 }
 0x671   :  { %v4753_v12 = vmax.f32 %v4737_v6, 0.0  ;;  %v4849_v13 = vmax.f32 %v4833_v3, 0.0 }
 0x673   :  { %4769 = vst.msk [vmem:[%s7936_s10 + $0x60] sm:$0xff] %vm3924_vm9, %v4753_v12 }
 0x674   :  { %4934 = vst.msk [vmem:[%s7936_s10 + $0xe0] sm:$0xff] %vm3924_vm9, %v4849_v13  ;;  %v4585_v19 = vpop.permute.xlu1 %4584 }
 0x675   :  { %v4610_v54 = vmul.f32 %v4585_v19, %v8083_v58  ;;  %v4786_v14 = vmul.f32 %v4585_v19, %v8084_v39 }
 0x677   :  { %v4706_v43 = vadd.f32 %v4681_v32, %v4610_v54  ;;  %v4802_v47 = vadd.f32 %v4786_v14, %v4681_v32 }
 0x679   :  { %v4738_v34 = vadd.f32 %v4722_v33, %v4706_v43  ;;  %v4834_v15 = vadd.f32 %v4919_v56, %v4802_v47 }
 0x67b   :  { %v4754_v36 = vmax.f32 %v4738_v34, 0.0  ;;  %v4850_v11 = vmax.f32 %v4834_v15, 0.0 }
 0x67d   :  { %4770 = vst.msk [vmem:[%s7936_s10 + $0x68] sm:$0xff] %vm3924_vm9, %v4754_v36 }
 0x67e   :  { %4935 = vst.msk [vmem:[%s7936_s10 + $0xe8] sm:$0xff] %vm3924_vm9, %v4850_v11 }
 0x680   :  { %v4595_v29 = vpop.permute.xlu0 %4594 }
 0x681   :  { %v4612_v62 = vmul.f32 %v4595_v29, %v7404_v37  ;;  %v4788_v7 = vmul.f32 %v4595_v29, %v7461_v17  ;;  %v4723_v37 = vld [vmem:[%s7926_s0 + $0x70] sm:$0xff] }
 0x682   :  { %v4920_v17 = vld [vmem:[%s7926_s0 + $0xf0] sm:$0xff] }
 0x685   :  { %v4691_v45 = vpop.permute.xlu1 %4690 }
 0x686   :  { %v4708_v51 = vadd.f32 %v4691_v45, %v4612_v62  ;;  %v4804_v63 = vadd.f32 %v4788_v7, %v4691_v45 }
 0x688   :  { %v4740_v59 = vadd.f32 %v4724_v2, %v4708_v51  ;;  %v4836_v52 = vadd.f32 %v4921_v31, %v4804_v63  ;;  %v4686_v10 = vpop.permute.xlu0 %4685 }
 0x689   :  { %v4707_v0 = vadd.f32 %v4686_v10, %v4611_v4  ;;  %v4803_v61 = vadd.f32 %v4787_v53, %v4686_v10 }
 0x68a   :  { %v4756_v28 = vmax.f32 %v4740_v59, 0.0  ;;  %v4852_v26 = vmax.f32 %v4836_v52, 0.0 }
 0x68b   :  { %v4739_v24 = vadd.f32 %v4723_v37, %v4707_v0  ;;  %v4835_v50 = vadd.f32 %v4920_v17, %v4803_v61 }
 0x68c   :  { %4772 = vst.msk [vmem:[%s7936_s10 + $0x78] sm:$0xff] %vm3924_vm9, %v4756_v28 }
 0x68d   :  { %4937 = vst.msk [vmem:[%s7936_s10 + $0xf8] sm:$0xff] %vm3924_vm9, %v4852_v26  ;;  %v4755_v27 = vmax.f32 %v4739_v24, 0.0  ;;  %v4851_v46 = vmax.f32 %v4835_v50, 0.0 }
 0x68f   :  { %4771 = vst.msk [vmem:[%s7936_s10 + $0x70] sm:$0xff] %vm3924_vm9, %v4755_v27 }
 0x690   :  { %4936 = vst.msk [vmem:[%s7936_s10 + $0xf0] sm:$0xff] %vm3924_vm9, %v4851_v46 }

</bundles_post_ra>
